<compile_context>
chip_gen: v5e
topology: v5e:2x2
jax: 0.10.0
libtpu: 0.0.40
codegen_flags: <defaults>
</compile_context>

<pallas_src>
import numpy as np
import jax
import jax.numpy as jnp
from jax.experimental import pallas as pl
from jax.experimental.pallas import tpu as pltpu

NUM_NODES = 9            # keypoint labels 1..9 -> 9-node ring graph
IN_CH = 8                # x, y, conf, label, dist_next, angle_next, dist_prev, angle_prev
HIDDEN = 512
OUT_CH = 4
OUT_PAD = 128            # lane-dense padded output width
IMG_W, IMG_H = 640, 480


# ----------------------------------------------------------------------------
# Pallas kernel: GraphGCN forward (3x GCNConv + ReLU, then Linear), eval mode.
# GCNConv(x, ring_edge_index) == A_hat @ x @ W + b with A_hat = (A + I)/3 for the
# fixed bidirectional 9-cycle (uniform degree 3); the 1/3 is folded into W, and
# (A + I) @ H is computed with rolls + per-graph boundary selects.
# ----------------------------------------------------------------------------
def gcn_kernel(x_ref, w1_ref, b1_ref, w2_ref, b2_ref, w3_ref, b3_ref,
               wfc_ref, bfc_ref, out_ref):
    m = x_ref.shape[0]                                        # M_STEP (static)
    node = jax.lax.broadcasted_iota(jnp.int32, (m, 1), 0) % NUM_NODES
    is_first = node == 0
    is_last = node == NUM_NODES - 1

    def ring_prop(h):
        # (A + I) @ h for contiguous 9-node rings; ordered for low live-range.
        prev_h = jnp.where(is_first,
                           pltpu.roll(h, m - (NUM_NODES - 1), axis=0),  # h[r+8]
                           pltpu.roll(h, 1, axis=0))                    # h[r-1]
        acc = h + prev_h
        next_h = jnp.where(is_last,
                           pltpu.roll(h, NUM_NODES - 1, axis=0),        # h[r-8]
                           pltpu.roll(h, m - 1, axis=0))                # h[r+1]
        return acc + next_h

    # GCNConv1 + ReLU: apply (A+I) to the 8-wide input (cheap), then matmul.
    x = ring_prop(x_ref[...])                                 # (M, 8) f32
    h = jnp.dot(x, w1_ref[...], preferred_element_type=jnp.float32)
    h = jnp.maximum(h + b1_ref[...], 0.0)
    # GCNConv2 + ReLU  (bf16 weights, f32 accumulate)
    h = jnp.dot(h.astype(jnp.bfloat16), w2_ref[...],
                preferred_element_type=jnp.float32)
    h = jnp.maximum(ring_prop(h) + b2_ref[...], 0.0)
    # GCNConv3 + ReLU
    h = jnp.dot(h.astype(jnp.bfloat16), w3_ref[...],
                preferred_element_type=jnp.float32)
    h = jnp.maximum(ring_prop(h) + b3_ref[...], 0.0)
    # Final Linear(512 -> 4), bf16 single-pass MXU, lane-padded to 128 columns.
    out = jnp.dot(h.astype(jnp.bfloat16), wfc_ref[...],
                  preferred_element_type=jnp.float32) + bfc_ref[...]
    out_ref[...] = out.astype(out_ref.dtype)


def graph_gcn_forward(node_feats_flat, kparams, gb):
    """node_feats_flat: (B_pad*9, 8) f32 with B_pad a multiple of gb.
    Returns (B_pad*9, OUT_PAD) bf16 (caller slices [:, :OUT_CH] and upcasts)."""
    m_total = node_feats_flat.shape[0]
    m_step = gb * NUM_NODES
    assert m_total % m_step == 0 and m_step % 16 == 0
    w1, b1, w2, b2, w3, b3, wfc, bfc = kparams

    def const_spec(shape):
        nd = len(shape)
        return pl.BlockSpec(shape, lambda i, _nd=nd: (0,) * _nd)

    return pl.pallas_call(
        gcn_kernel,
        out_shape=jax.ShapeDtypeStruct((m_total, OUT_PAD), jnp.bfloat16),
        grid_spec=pltpu.PrefetchScalarGridSpec(
            num_scalar_prefetch=0,
            grid=(m_total // m_step,),
            in_specs=[
                pl.BlockSpec((m_step, IN_CH), lambda i: (i, 0)),
                const_spec((IN_CH, HIDDEN)), const_spec((1, HIDDEN)),
                const_spec((HIDDEN, HIDDEN)), const_spec((1, HIDDEN)),
                const_spec((HIDDEN, HIDDEN)), const_spec((1, HIDDEN)),
                const_spec((HIDDEN, OUT_PAD)), const_spec((1, OUT_PAD)),
            ],
            out_specs=pl.BlockSpec((m_step, OUT_PAD), lambda i: (i, 0)),
        ),
        compiler_params=pltpu.CompilerParams(
            dimension_semantics=("parallel",),
            vmem_limit_bytes=48 * 1024 * 1024),
    )(node_feats_flat, w1, b1, w2, b2, w3, b3, wfc, bfc)


# ----------------------------------------------------------------------------
# Host-side glue (mirrors the PyTorch pipeline semantics exactly)
# ----------------------------------------------------------------------------
def _round_up(x, m):
    return ((x + m - 1) // m) * m


def _default_gb_max():
    """Graphs per grid step: generation-aware so the per-step footprint stays
    inside the default scoped VMEM limit (v5e 16 MiB; v6e/v7x 32 MiB)."""
    try:
        kind = jax.devices()[0].device_kind.lower()
    except Exception:
        kind = ""
    return 64 if "v5" in kind else 128


def fill_missing_keypoints(keypoints, image_width, image_height):
    """keypoints: list of [x, y, conf, label]; returns (9, 4) np.float32."""
    keypoints_dict = {int(kp[3]): list(kp) for kp in keypoints}
    labels = [int(kp[3]) for kp in keypoints]
    missing = sorted(set(range(1, 10)) - set(labels))
    complete = []
    for i in range(1, 10):
        if i in keypoints_dict:
            complete.append(list(keypoints_dict[i]))
        else:
            prev_label = i - 1 if i > 1 else 9
            next_label = i + 1 if i < 9 else 1
            prev_kp = keypoints_dict.get(
                prev_label, [image_width / 2, image_height / 2, 0, prev_label])
            next_kp = keypoints_dict.get(
                next_label, [image_width / 2, image_height / 2, 0, next_label])
            if next_label in missing:
                next_kp = [image_width / 2, image_height / 2, 0, next_label]
            complete.append([(prev_kp[0] + next_kp[0]) / 2,
                             (prev_kp[1] + next_kp[1]) / 2, 0.0, float(i)])
    return np.asarray(complete, np.float32)


def normalize_keypoints_batch(kps):
    """kps: (B, 9, 4) NumPy; normalizes x, y on a copy."""
    kps = np.array(kps, np.float32, copy=True)
    kps[..., 0] = (kps[..., 0] - IMG_W / 2) / (IMG_W / 2)
    kps[..., 1] = (kps[..., 1] - IMG_H / 2) / (IMG_H / 2)
    return kps


def keypoints_to_node_features_batch(kps):
    """kps: (B, 9, 4) jnp [x, y, conf, label] -> (B, 9, 8) node features (batched)."""
    xy = kps[..., :2]
    nxt = jnp.roll(xy, -1, axis=1)
    prv = jnp.roll(xy, 1, axis=1)
    dn = nxt - xy
    dp = prv - xy
    dist_next = jnp.sqrt(jnp.sum(dn * dn, axis=-1, keepdims=True))
    angle_next = jnp.arctan2(dn[..., 1:2], dn[..., 0:1])
    dist_prev = jnp.sqrt(jnp.sum(dp * dp, axis=-1, keepdims=True))
    angle_prev = jnp.arctan2(dp[..., 1:2], dp[..., 0:1])
    return jnp.concatenate(
        [kps, dist_next, angle_next, dist_prev, angle_prev], axis=-1
    ).astype(jnp.float32)


def init_gcn_params(key):
    ks = jax.random.split(key, 4)

    def glorot(k, shape):
        lim = np.sqrt(6.0 / (shape[0] + shape[1]))
        return jax.random.uniform(k, shape, jnp.float32, -lim, lim)

    w1 = glorot(ks[0], (IN_CH, HIDDEN));   b1 = jnp.zeros((1, HIDDEN), jnp.float32)
    w2 = glorot(ks[1], (HIDDEN, HIDDEN));  b2 = jnp.zeros((1, HIDDEN), jnp.float32)
    w3 = glorot(ks[2], (HIDDEN, HIDDEN));  b3 = jnp.zeros((1, HIDDEN), jnp.float32)
    wfc = glorot(ks[3], (HIDDEN, OUT_CH)); bfc = jnp.zeros((1, OUT_CH), jnp.float32)
    return (w1, b1, w2, b2, w3, b3, wfc, bfc)


def prepare_gcn_params(params):
    """Fold the 1/3 A_hat normalization into the conv weights, cast w2/w3/wfc to
    bf16 (single-pass MXU), and lane-pad the final Linear to 128 output columns."""
    w1, b1, w2, b2, w3, b3, wfc, bfc = params
    s = jnp.float32(1.0 / 3.0)
    w1k = (w1 * s).astype(jnp.float32)
    w2k = (w2 * s).astype(jnp.bfloat16)
    w3k = (w3 * s).astype(jnp.bfloat16)
    wfck = (jnp.zeros((HIDDEN, OUT_PAD), jnp.float32)
            .at[:, :OUT_CH].set(wfc).astype(jnp.bfloat16))
    bfck = jnp.zeros((1, OUT_PAD), jnp.float32).at[:, :OUT_CH].set(bfc)
    return (w1k, b1, w2k, b2, w3k, b3, wfck, bfck)


def keypoint_pipeline_forward(imgs, detections_per_image, kparams, gb_max=None):
    """Mirrors KeypointPipeline.forward: per-image detections -> fill -> normalize
    -> ring-graph node features (batched) -> GraphGCN (Pallas) -> (B, 9, 4) f32."""
    del imgs  # consumed only by the (replaced) detector; see TODO in __main__.
    filled = np.stack([fill_missing_keypoints(d, IMG_W, IMG_H)
                       for d in detections_per_image])             # (B, 9, 4) NumPy
    normed = normalize_keypoints_batch(filled)                     # (B, 9, 4) NumPy
    feats = keypoints_to_node_features_batch(jnp.asarray(normed))  # (B, 9, 8) batched
    b = feats.shape[0]
    if gb_max is None:
        gb_max = _default_gb_max()
    gb = min(gb_max, _round_up(b, 16))            # multiple of 16, clamped for tiny B
    b_pad = _round_up(b, gb)
    flat = feats.reshape(b * NUM_NODES, IN_CH)
    if b_pad != b:
        flat = jnp.pad(flat, ((0, (b_pad - b) * NUM_NODES), (0, 0)))
    out = graph_gcn_forward(flat, kparams, gb)                     # (b_pad*9, 128) bf16
    return (out[: b * NUM_NODES, :OUT_CH]
            .astype(jnp.float32).reshape(b, NUM_NODES, OUT_CH))


# ----------------------------------------------------------------------------
# Pure-JAX reference (dense A_hat) used only for a runtime correctness check.
# It matches the kernel's numerics (1/3 folded into weights, bf16 mid/FC weights);
# the original fp32 torch model would differ only by bf16 rounding (<~1%).
# ----------------------------------------------------------------------------
def ring_adjacency_plus_identity():
    a = np.zeros((NUM_NODES, NUM_NODES), np.float32)
    for i in range(NUM_NODES):
        a[i, i] = 1.0
        a[i, (i + 1) % NUM_NODES] = 1.0
        a[(i + 1) % NUM_NODES, i] = 1.0
    return a


def gcn_reference(node_feats, kparams):
    w1, b1, w2, b2, w3, b3, wfc, bfc = kparams
    a = jnp.asarray(ring_adjacency_plus_identity())  # A + I; 1/3 already in weights

    def dot32(x, w):
        return jnp.dot(x, w, preferred_element_type=jnp.float32,
                       precision=jax.lax.Precision.HIGHEST)

    def one(x):
        h = jnp.maximum(dot32(dot32(a, x), w1) + b1, 0.0)
        h = jnp.maximum(dot32(a, dot32(h.astype(jnp.bfloat16), w2)) + b2, 0.0)
        h = jnp.maximum(dot32(a, dot32(h.astype(jnp.bfloat16), w3)) + b3, 0.0)
        return dot32(h.astype(jnp.bfloat16), wfc) + bfc

    return jax.vmap(one)(node_feats)[..., :OUT_CH]


if __name__ == "__main__":
    key = jax.random.PRNGKey(0)
    k_img, k_kp, k_par = jax.random.split(key, 3)

    B = 2
    imgs = jax.random.normal(k_img, (B, 3, 32, 32), jnp.float32)  # NCHW, small

    # TODO(synk): the Keypoint R-CNN backbone (torch.load(weights_path)) and its
    # score-threshold / NMS / per-label-argmax post-processing have no clean
    # Pallas equivalent; per-image detections are synthesized deterministically.
    scale = jnp.asarray([IMG_W, IMG_H], jnp.float32)
    det_xy = np.asarray(
        jax.random.uniform(k_kp, (B, NUM_NODES, 2), jnp.float32) * scale)
    present_labels = [{1, 2, 3, 5, 6, 8, 9},          # image 0: labels 4, 7 missing
                      {1, 2, 3, 4, 5, 6, 7, 8, 9}]    # image 1: all present
    detections = []
    for b in range(B):
        dets = []
        for lbl in sorted(present_labels[b]):
            dets.append([float(det_xy[b, lbl - 1, 0]),
                         float(det_xy[b, lbl - 1, 1]),
                         0.9, float(lbl)])
        detections.append(dets)

    params = init_gcn_params(k_par)
    kparams = prepare_gcn_params(params)

    preds = keypoint_pipeline_forward(imgs, detections, kparams)
    preds = jax.block_until_ready(preds)
    assert preds.shape == (B, NUM_NODES, OUT_CH) and preds.dtype == jnp.float32
    assert bool(jnp.all(jnp.isfinite(preds)))

    # Runtime check of the roll-based A_hat kernel against a dense-adjacency reference.
    filled = np.stack([fill_missing_keypoints(d, IMG_W, IMG_H) for d in detections])
    feats = keypoints_to_node_features_batch(
        jnp.asarray(normalize_keypoints_batch(filled)))
    ref = jax.block_until_ready(gcn_reference(feats, kparams))
    err = float(jnp.max(jnp.abs(preds - ref)) / (jnp.max(jnp.abs(ref)) + 1e-6))
    assert err < 1e-2, f"kernel vs reference mismatch: rel-to-max err {err}"

    print("KERNEL_OK")
</pallas_src>

<mosaic_0001>
module attributes {stable_mosaic.version = 11 : i64} {
  func.func @gcn_kernel(%arg0: i32, %arg1: memref<144x8xf32, #tpu.memory_space<vmem>>, %arg2: memref<8x512xf32, #tpu.memory_space<vmem>>, %arg3: memref<1x512xf32, #tpu.memory_space<vmem>>, %arg4: memref<512x512xbf16, #tpu.memory_space<vmem>>, %arg5: memref<1x512xf32, #tpu.memory_space<vmem>>, %arg6: memref<512x512xbf16, #tpu.memory_space<vmem>>, %arg7: memref<1x512xf32, #tpu.memory_space<vmem>>, %arg8: memref<512x128xbf16, #tpu.memory_space<vmem>>, %arg9: memref<1x128xf32, #tpu.memory_space<vmem>>, %arg10: memref<144x128xbf16, #tpu.memory_space<vmem>>) attributes {dimension_semantics = [#tpu.dimension_semantics<parallel>], iteration_bounds = array<i64: 1>, scalar_prefetch = 0 : i64, scratch_operands = 0 : i64, tpu.core_type = #tpu.core_type<tc>, window_params = [{transform_indices = @transform_0, window_bounds = array<i64: 144, 8>}, {pipeline_mode = #tpu.pipeline_mode<synchronous>, transform_indices = @transform_1, window_bounds = array<i64: 8, 512>}, {pipeline_mode = #tpu.pipeline_mode<synchronous>, transform_indices = @transform_2, window_bounds = array<i64: 1, 512>}, {pipeline_mode = #tpu.pipeline_mode<synchronous>, transform_indices = @transform_3, window_bounds = array<i64: 512, 512>}, {pipeline_mode = #tpu.pipeline_mode<synchronous>, transform_indices = @transform_4, window_bounds = array<i64: 1, 512>}, {pipeline_mode = #tpu.pipeline_mode<synchronous>, transform_indices = @transform_5, window_bounds = array<i64: 512, 512>}, {pipeline_mode = #tpu.pipeline_mode<synchronous>, transform_indices = @transform_6, window_bounds = array<i64: 1, 512>}, {pipeline_mode = #tpu.pipeline_mode<synchronous>, transform_indices = @transform_7, window_bounds = array<i64: 512, 128>}, {pipeline_mode = #tpu.pipeline_mode<synchronous>, transform_indices = @transform_8, window_bounds = array<i64: 1, 128>}, {transform_indices = @transform_9, window_bounds = array<i64: 144, 128>}]} {
    %0 = tpu.iota {dimensions = array<i32: 0>} : vector<144x1xi32>
    %c9_i32 = arith.constant 9 : i32
    %c0_i32 = arith.constant 0 : i32
    %1 = arith.cmpi eq, %c9_i32, %c0_i32 : i32
    %c1_i32 = arith.constant 1 : i32
    %2 = arith.select %1, %c1_i32, %c9_i32 : i32
    %3 = vector.broadcast %2 : i32 to vector<144x1xi32>
    %4 = arith.remsi %0, %3 : vector<144x1xi32>
    %c0_i32_0 = arith.constant 0 : i32
    %5 = vector.broadcast %c0_i32_0 : i32 to vector<144x1xi32>
    %6 = arith.cmpi ne, %4, %5 : vector<144x1xi32>
    %c0_i32_1 = arith.constant 0 : i32
    %7 = vector.broadcast %c0_i32_1 : i32 to vector<144x1xi32>
    %8 = arith.cmpi slt, %4, %7 : vector<144x1xi32>
    %c0_i32_2 = arith.constant 0 : i32
    %9 = arith.cmpi slt, %2, %c0_i32_2 : i32
    %10 = vector.broadcast %9 : i1 to vector<144x1xi1>
    %11 = vector.broadcast %10 : vector<144x1xi1> to vector<144x1xi1>
    %12 = arith.xori %8, %11 : vector<144x1xi1>
    %13 = arith.andi %12, %6 : vector<144x1xi1>
    %14 = vector.broadcast %2 : i32 to vector<144x1xi32>
    %15 = arith.addi %4, %14 : vector<144x1xi32>
    %16 = arith.select %13, %15, %4 : vector<144x1xi1>, vector<144x1xi32>
    %c0_i32_3 = arith.constant 0 : i32
    %17 = vector.broadcast %c0_i32_3 : i32 to vector<144x1xi32>
    %18 = arith.cmpi eq, %16, %17 : vector<144x1xi32>
    %c8_i32 = arith.constant 8 : i32
    %19 = vector.broadcast %c8_i32 : i32 to vector<144x1xi32>
    %20 = arith.cmpi eq, %16, %19 : vector<144x1xi32>
    %c0 = arith.constant 0 : index
    %c0_4 = arith.constant 0 : index
    %21 = vector.load %arg1[%c0, %c0_4] : memref<144x8xf32, #tpu.memory_space<vmem>>, vector<144x8xf32>
    %c136_i32 = arith.constant 136 : i32
    %22 = tpu.dynamic_rotate %21 by %c136_i32 dim 0 : vector<144x8xf32>, i32 -> vector<144x8xf32>
    %c1_i32_5 = arith.constant 1 : i32
    %23 = tpu.dynamic_rotate %21 by %c1_i32_5 dim 0 : vector<144x8xf32>, i32 -> vector<144x8xf32>
    %24 = vector.shape_cast %18 : vector<144x1xi1> to vector<144x1xi1>
    %25 = vector.broadcast %24 : vector<144x1xi1> to vector<144x8xi1>
    %26 = arith.select %25, %22, %23 : vector<144x8xi1>, vector<144x8xf32>
    %27 = arith.addf %21, %26 : vector<144x8xf32>
    %c8_i32_6 = arith.constant 8 : i32
    %28 = tpu.dynamic_rotate %21 by %c8_i32_6 dim 0 : vector<144x8xf32>, i32 -> vector<144x8xf32>
    %c143_i32 = arith.constant 143 : i32
    %29 = tpu.dynamic_rotate %21 by %c143_i32 dim 0 : vector<144x8xf32>, i32 -> vector<144x8xf32>
    %30 = vector.shape_cast %20 : vector<144x1xi1> to vector<144x1xi1>
    %31 = vector.broadcast %30 : vector<144x1xi1> to vector<144x8xi1>
    %32 = arith.select %31, %28, %29 : vector<144x8xi1>, vector<144x8xf32>
    %33 = arith.addf %27, %32 : vector<144x8xf32>
    %c0_7 = arith.constant 0 : index
    %c0_8 = arith.constant 0 : index
    %34 = vector.load %arg2[%c0_7, %c0_8] : memref<8x512xf32, #tpu.memory_space<vmem>>, vector<8x512xf32>
    %cst = arith.constant dense<0.000000e+00> : vector<144x512xf32>
    %35 = tpu.matmul %33, %34, %cst {dimension_numbers = #tpu.dot_dimension_numbers<[1], [0], [0], [1], [0, 0, 1, 1], [], []>} : vector<144x8xf32>, vector<8x512xf32>, vector<144x512xf32> -> vector<144x512xf32>
    %c0_9 = arith.constant 0 : index
    %c0_10 = arith.constant 0 : index
    %36 = vector.load %arg3[%c0_9, %c0_10] : memref<1x512xf32, #tpu.memory_space<vmem>>, vector<1x512xf32>
    %37 = vector.broadcast %36 : vector<1x512xf32> to vector<144x512xf32>
    %38 = arith.addf %35, %37 : vector<144x512xf32>
    %cst_11 = arith.constant 0.000000e+00 : f32
    %39 = vector.broadcast %cst_11 : f32 to vector<144x512xf32>
    %40 = arith.maximumf %38, %39 : vector<144x512xf32>
    %41 = arith.truncf %40 : vector<144x512xf32> to vector<144x512xbf16>
    %c0_12 = arith.constant 0 : index
    %c0_13 = arith.constant 0 : index
    %42 = vector.load %arg4[%c0_12, %c0_13] : memref<512x512xbf16, #tpu.memory_space<vmem>>, vector<512x512xbf16>
    %cst_14 = arith.constant dense<0.000000e+00> : vector<144x512xf32>
    %43 = tpu.matmul %41, %42, %cst_14 {dimension_numbers = #tpu.dot_dimension_numbers<[1], [0], [0], [1], [0, 0, 1, 1], [], []>} : vector<144x512xbf16>, vector<512x512xbf16>, vector<144x512xf32> -> vector<144x512xf32>
    %c136_i32_15 = arith.constant 136 : i32
    %44 = tpu.dynamic_rotate %43 by %c136_i32_15 dim 0 : vector<144x512xf32>, i32 -> vector<144x512xf32>
    %c1_i32_16 = arith.constant 1 : i32
    %45 = tpu.dynamic_rotate %43 by %c1_i32_16 dim 0 : vector<144x512xf32>, i32 -> vector<144x512xf32>
    %46 = vector.shape_cast %18 : vector<144x1xi1> to vector<144x1xi1>
    %47 = vector.broadcast %46 : vector<144x1xi1> to vector<144x512xi1>
    %48 = arith.select %47, %44, %45 : vector<144x512xi1>, vector<144x512xf32>
    %49 = arith.addf %43, %48 : vector<144x512xf32>
    %c8_i32_17 = arith.constant 8 : i32
    %50 = tpu.dynamic_rotate %43 by %c8_i32_17 dim 0 : vector<144x512xf32>, i32 -> vector<144x512xf32>
    %c143_i32_18 = arith.constant 143 : i32
    %51 = tpu.dynamic_rotate %43 by %c143_i32_18 dim 0 : vector<144x512xf32>, i32 -> vector<144x512xf32>
    %52 = vector.shape_cast %20 : vector<144x1xi1> to vector<144x1xi1>
    %53 = vector.broadcast %52 : vector<144x1xi1> to vector<144x512xi1>
    %54 = arith.select %53, %50, %51 : vector<144x512xi1>, vector<144x512xf32>
    %55 = arith.addf %49, %54 : vector<144x512xf32>
    %c0_19 = arith.constant 0 : index
    %c0_20 = arith.constant 0 : index
    %56 = vector.load %arg5[%c0_19, %c0_20] : memref<1x512xf32, #tpu.memory_space<vmem>>, vector<1x512xf32>
    %57 = vector.broadcast %56 : vector<1x512xf32> to vector<144x512xf32>
    %58 = arith.addf %55, %57 : vector<144x512xf32>
    %cst_21 = arith.constant 0.000000e+00 : f32
    %59 = vector.broadcast %cst_21 : f32 to vector<144x512xf32>
    %60 = arith.maximumf %58, %59 : vector<144x512xf32>
    %61 = arith.truncf %60 : vector<144x512xf32> to vector<144x512xbf16>
    %c0_22 = arith.constant 0 : index
    %c0_23 = arith.constant 0 : index
    %62 = vector.load %arg6[%c0_22, %c0_23] : memref<512x512xbf16, #tpu.memory_space<vmem>>, vector<512x512xbf16>
    %cst_24 = arith.constant dense<0.000000e+00> : vector<144x512xf32>
    %63 = tpu.matmul %61, %62, %cst_24 {dimension_numbers = #tpu.dot_dimension_numbers<[1], [0], [0], [1], [0, 0, 1, 1], [], []>} : vector<144x512xbf16>, vector<512x512xbf16>, vector<144x512xf32> -> vector<144x512xf32>
    %c136_i32_25 = arith.constant 136 : i32
    %64 = tpu.dynamic_rotate %63 by %c136_i32_25 dim 0 : vector<144x512xf32>, i32 -> vector<144x512xf32>
    %c1_i32_26 = arith.constant 1 : i32
    %65 = tpu.dynamic_rotate %63 by %c1_i32_26 dim 0 : vector<144x512xf32>, i32 -> vector<144x512xf32>
    %66 = vector.shape_cast %18 : vector<144x1xi1> to vector<144x1xi1>
    %67 = vector.broadcast %66 : vector<144x1xi1> to vector<144x512xi1>
    %68 = arith.select %67, %64, %65 : vector<144x512xi1>, vector<144x512xf32>
    %69 = arith.addf %63, %68 : vector<144x512xf32>
    %c8_i32_27 = arith.constant 8 : i32
    %70 = tpu.dynamic_rotate %63 by %c8_i32_27 dim 0 : vector<144x512xf32>, i32 -> vector<144x512xf32>
    %c143_i32_28 = arith.constant 143 : i32
    %71 = tpu.dynamic_rotate %63 by %c143_i32_28 dim 0 : vector<144x512xf32>, i32 -> vector<144x512xf32>
    %72 = vector.shape_cast %20 : vector<144x1xi1> to vector<144x1xi1>
    %73 = vector.broadcast %72 : vector<144x1xi1> to vector<144x512xi1>
    %74 = arith.select %73, %70, %71 : vector<144x512xi1>, vector<144x512xf32>
    %75 = arith.addf %69, %74 : vector<144x512xf32>
    %c0_29 = arith.constant 0 : index
    %c0_30 = arith.constant 0 : index
    %76 = vector.load %arg7[%c0_29, %c0_30] : memref<1x512xf32, #tpu.memory_space<vmem>>, vector<1x512xf32>
    %77 = vector.broadcast %76 : vector<1x512xf32> to vector<144x512xf32>
    %78 = arith.addf %75, %77 : vector<144x512xf32>
    %cst_31 = arith.constant 0.000000e+00 : f32
    %79 = vector.broadcast %cst_31 : f32 to vector<144x512xf32>
    %80 = arith.maximumf %78, %79 : vector<144x512xf32>
    %81 = arith.truncf %80 : vector<144x512xf32> to vector<144x512xbf16>
    %c0_32 = arith.constant 0 : index
    %c0_33 = arith.constant 0 : index
    %82 = vector.load %arg8[%c0_32, %c0_33] : memref<512x128xbf16, #tpu.memory_space<vmem>>, vector<512x128xbf16>
    %cst_34 = arith.constant dense<0.000000e+00> : vector<144x128xf32>
    %83 = tpu.matmul %81, %82, %cst_34 {dimension_numbers = #tpu.dot_dimension_numbers<[1], [0], [0], [1], [0, 0, 1, 1], [], []>} : vector<144x512xbf16>, vector<512x128xbf16>, vector<144x128xf32> -> vector<144x128xf32>
    %c0_35 = arith.constant 0 : index
    %c0_36 = arith.constant 0 : index
    %84 = vector.load %arg9[%c0_35, %c0_36] : memref<1x128xf32, #tpu.memory_space<vmem>>, vector<1x128xf32>
    %85 = vector.broadcast %84 : vector<1x128xf32> to vector<144x128xf32>
    %86 = arith.addf %83, %85 : vector<144x128xf32>
    %87 = arith.truncf %86 : vector<144x128xf32> to vector<144x128xbf16>
    %c0_37 = arith.constant 0 : index
    %c0_38 = arith.constant 0 : index
    %88 = vector.load %arg10[%c0_37, %c0_38] : memref<144x128xbf16, #tpu.memory_space<vmem>>, vector<144x128xbf16>
    tpu.vector_store %arg10[%c0_37, %c0_38], %87 {strides = array<i32>} : memref<144x128xbf16, #tpu.memory_space<vmem>>, vector<144x128xbf16>,
    return
  }
  func.func @transform_0(%arg0: i32) -> (i32, i32) {
    %c0_i32 = arith.constant 0 : i32
    %c0_i32_0 = arith.constant 0 : i32
    return %arg0, %c0_i32 : i32, i32
  }
  func.func @transform_1(%arg0: i32) -> (i32, i32) {
    %c0_i32 = arith.constant 0 : i32
    %c0_i32_0 = arith.constant 0 : i32
    %c0_i32_1 = arith.constant 0 : i32
    return %c0_i32, %c0_i32_0 : i32, i32
  }
  func.func @transform_2(%arg0: i32) -> (i32, i32) {
    %c0_i32 = arith.constant 0 : i32
    %c0_i32_0 = arith.constant 0 : i32
    %c0_i32_1 = arith.constant 0 : i32
    return %c0_i32, %c0_i32_0 : i32, i32
  }
  func.func @transform_3(%arg0: i32) -> (i32, i32) {
    %c0_i32 = arith.constant 0 : i32
    %c0_i32_0 = arith.constant 0 : i32
    %c0_i32_1 = arith.constant 0 : i32
    return %c0_i32, %c0_i32_0 : i32, i32
  }
  func.func @transform_4(%arg0: i32) -> (i32, i32) {
    %c0_i32 = arith.constant 0 : i32
    %c0_i32_0 = arith.constant 0 : i32
    %c0_i32_1 = arith.constant 0 : i32
    return %c0_i32, %c0_i32_0 : i32, i32
  }
  func.func @transform_5(%arg0: i32) -> (i32, i32) {
    %c0_i32 = arith.constant 0 : i32
    %c0_i32_0 = arith.constant 0 : i32
    %c0_i32_1 = arith.constant 0 : i32
    return %c0_i32, %c0_i32_0 : i32, i32
  }
  func.func @transform_6(%arg0: i32) -> (i32, i32) {
    %c0_i32 = arith.constant 0 : i32
    %c0_i32_0 = arith.constant 0 : i32
    %c0_i32_1 = arith.constant 0 : i32
    return %c0_i32, %c0_i32_0 : i32, i32
  }
  func.func @transform_7(%arg0: i32) -> (i32, i32) {
    %c0_i32 = arith.constant 0 : i32
    %c0_i32_0 = arith.constant 0 : i32
    %c0_i32_1 = arith.constant 0 : i32
    return %c0_i32, %c0_i32_0 : i32, i32
  }
  func.func @transform_8(%arg0: i32) -> (i32, i32) {
    %c0_i32 = arith.constant 0 : i32
    %c0_i32_0 = arith.constant 0 : i32
    %c0_i32_1 = arith.constant 0 : i32
    return %c0_i32, %c0_i32_0 : i32, i32
  }
  func.func @transform_9(%arg0: i32) -> (i32, i32) {
    %c0_i32 = arith.constant 0 : i32
    %c0_i32_0 = arith.constant 0 : i32
    return %arg0, %c0_i32 : i32, i32
  }
}

</mosaic_0001>

<bundles_post_ra>
// kernel: tpu_custom_call.1
= control target key start
LH: loop header
LB: loop body
LE: loop exit
PB: predicated region body
PF: predicated region fallthrough
CT: control target
= control target key end

     0   :  { %14 = vsyncpa [#allocation3], 0  ;;  %s12342_s0 = inlined_call_operand.vmem [shape: f32[144,8], index: 0, kind: input, shape index: {}]   ;;  %s12343_s1 = inlined_call_operand.vmem [shape: f32[8,512], index: 1, kind: input, shape index: {}]   ;;  %s12344_s2 = inlined_call_operand.vmem [shape: f32[1,512], index: 2, kind: input, shape index: {}]   ;;  %s12345_s3 = inlined_call_operand.hbm [shape: bf16[512,512], index: 3, kind: input, shape index: {}]   ;;  %s12346_s4 = inlined_call_operand.vmem [shape: f32[1,512], index: 4, kind: input, shape index: {}]   ;;  %s12347_s5 = inlined_call_operand.hbm [shape: bf16[512,512], index: 5, kind: input, shape index: {}]   ;;  %s12348_s6 = inlined_call_operand.vmem [shape: f32[1,512], index: 6, kind: input, shape index: {}]   ;;  %s12349_s7 = inlined_call_operand.hbm [shape: bf16[512,128], index: 7, kind: input, shape index: {}]   ;;  %s12350_s8 = inlined_call_operand.vmem [shape: f32[1,128], index: 8, kind: input, shape index: {}]   ;;  %s12351_s9 = inlined_call_operand.hbm [shape: bf16[144,128], index: 9, kind: output, shape index: {}]  }
   0x1   :  { %15 = vsyncpa [#allocation6], 0 }
   0x2   :  { %16 = vsyncpa [#allocation4], 0  ;;  %s42_s11 = sshll.u32 %s12347_s5, 4  ;;  %s8453_s12 = smov [#allocation5]   ;;  %s43_s11 = int_to_ptr.hbm [resolvable:$true] %s42_s11 }
   0x3   :  { %s44_s13 = sshll.u32 %s8453_s12, 4  ;;  %s27_s16 = sshll.u32 %s12345_s3, 4  ;;  %s45_s13 = int_to_ptr.vmem [resolvable:$true] %s44_s13  ;;  %s28_s16 = int_to_ptr.hbm [resolvable:$true] %s27_s16 }
   0x4   :  { %s8454_s17 = smov 256   ;;  %s8455_s18 = smov 16  }
   0x5   :  { %50 = dma.hbm_to_vmem [thread:$0]  %s43_s11, 16384, %s45_s13, [#allocation6], %s8454_s17, %s8454_s17, %s8455_s18  }
   0x6   :  { %s8456_s19 = smov [#allocation2]   ;;  %s57_s23 = sshll.u32 %s12349_s7, 4  ;;  %s58_s23 = int_to_ptr.hbm [resolvable:$true] %s57_s23 }
   0x7   :  { %s29_s20 = sshll.u32 %s8456_s19, 4  ;;  %s8457_s5 = smov [#allocation7]   ;;  %s30_s20 = int_to_ptr.vmem [resolvable:$true] %s29_s20 }
   0x8   :  { %35 = dma.hbm_to_vmem [thread:$0]  %s28_s16, 16384, %s30_s20, [#allocation3], %s8454_s17, %s8454_s17, %s8455_s18  }
   0x9   :  { %s59_s24 = sshll.u32 %s8457_s5, 4  ;;  %s8458_s25 = smov 64   ;;  %s60_s24 = int_to_ptr.vmem [resolvable:$true] %s59_s24 }
   0xa   :  { %s8459_s26 = smov 4  }
   0xb   :  { %65 = dma.hbm_to_vmem [thread:$0]  %s58_s23, 4096, %s60_s24, [#allocation6], %s8458_s25, %s8458_s25, %s8459_s26  }
   0xc   :  { %8447 = dma.done.wait [#allocation3], 16384  }
   0xd   :  { %8448 = vsyncadd [#allocation3], 4294950912 }
   0xe   :  { %8449 = dma.done.wait [#allocation6], 20480  }
   0xf   :  { %8450 = vsyncadd [#allocation6], 4294946816  ;;  %v80_v0 = vlaneseq  ;;  %v983_v11 = vld [vmem:[%s12343_s1] sm:$0xff]  ;;  %v984_v12 = vld [vmem:[%s12343_s1 + $0x8] sm:$0xff]  ;;  %v8460_v33 = vmov 0   ;;  %vm997_vm8 = vcmask 64512  }
  0x10   :  { %v985_v13 = vld [vmem:[%s12343_s1 + $0x10] sm:$0xff]  ;;  %1067 = vmatpush.msra.mxu0 %v983_v11  ;;  %1138 = vmatpush.msra.mxu1 %v984_v12  ;;  %v986_v17 = vld [vmem:[%s12343_s1 + $0x18] sm:$0xff]  ;;  %v8562_v21 = vld [vmem:[%s12342_s0] sm:$0xff]  ;;  %s6758_s16 = sshll.u32 %s12351_s9, 4  ;;  %s6759_s16 = int_to_ptr.hbm [resolvable:$true] %s6758_s16 }
  0x11   :  { %v8524_v1 = vshrl.u32 %v80_v0, 7  ;;  %1209 = vmatpush.msra.mxu2 %v985_v13  ;;  %1280 = vmatpush.msra.mxu3 %v986_v17  ;;  %v8569_v24 = vld [vmem:[%s12342_s0 + $0x8] sm:$0xff]  ;;  %v765_v26 = vrot.slane %v8562_v21, 7  ;;  %v7214_v27 = vld [vmem:[#allocation2 + $0x2e0] sm:$0xf]  ;;  %v874_v30 = vrot.slane %v8562_v21, 1 }
  0x12   :  { %v8574_v25 = vld [vmem:[%s12342_s0 + $0x88] sm:$0xff]  ;;  %v8090_v31 = vld [vmem:[#allocation2 + $0x2ec] sm:$0xf0]  ;;  %v7342_v32 = vld [vmem:[#allocation2 + $0x3e0] sm:$0xf]  ;;  %v875_v35 = vrot.slane %v8569_v24, 1 }
  0x13   :  { %v102_v2 = vand.u32 65535, %v8524_v1  ;;  %v103_v3 = vshrl.u32 %v8524_v1, 16  ;;  %vm783_vm0 = vcmp.lt.s32.totalorder %v8524_v1, 1  ;;  %vm892_vm1 = vcmp.lt.s32.totalorder %v8524_v1, 7  ;;  %v8122_v37 = vld [vmem:[#allocation2 + $0x3ec] sm:$0xf0] }
  0x14   :  { %v8531_v4 = vadd.s32 8, %v8524_v1  ;;  %v8534_v5 = vadd.s32 16, %v8524_v1  ;;  %v8537_v6 = vadd.s32 24, %v8524_v1  ;;  %v8542_v10 = vadd.s32 32, %v8524_v1  ;;  %v6958_v38 = vld [vmem:[#allocation2 + $0xe0] sm:$0xf] }
  0x15   :  { %v105_v7 = vmul.u32 14564, %v102_v2  ;;  %v106_v8 = vmul.u32 58254, %v102_v2  ;;  %v8539_v9 = vmul.u32 14564, %v103_v3  ;;  %v108_v14 = vmul.u32 58254, %v103_v3  ;;  %v8026_v40 = vld [vmem:[#allocation2 + $0xec] sm:$0xf0] }
  0x16   :  { %v131_v15 = vand.u32 65535, %v8531_v4  ;;  %v132_v16 = vshrl.u32 %v8531_v4, 16  ;;  %v160_v22 = vand.u32 65535, %v8534_v5  ;;  %v782_v29 = vrot.slane %v8574_v25, 7  ;;  %v7086_v41 = vld [vmem:[#allocation2 + $0x1e0] sm:$0xf] }
  0x17   :  { %v109_v18 = vshll.u32 %v106_v8, 16  ;;  %v110_v19 = vshrl.u32 %v106_v8, 16  ;;  %v111_v20 = vshll.u32 %v8539_v9, 16  ;;  %v112_v23 = vshrl.u32 %v8539_v9, 16  ;;  %v8058_v42 = vld [vmem:[#allocation2 + $0x1ec] sm:$0xf0] }
  0x18   :  { %v7215_v36 = vor.u32 %v8090_v31, %v7214_v27  ;;  %v7343_v44 = vor.u32 %v8122_v37, %v7342_v32  ;;  %v6959_v45 = vor.u32 %v8026_v40, %v6958_v38  ;;  %v7087_v46 = vor.u32 %v8058_v42, %v7086_v41  ;;  %v8585_v51 = vld [vmem:[%s12342_s0 + $0x10] sm:$0xff]  ;;  %v7326_v31 = vld [vmem:[#allocation2 + $0x3c0] sm:$0xf] }
  0x19   :  { %vm113_vm2 = vc.u32 %v105_v7, %v109_v18  ;;  %v115_v28 = vadd.s32 %v109_v18, %v105_v7  ;;  %v134_v48 = vmul.u32 14564, %v131_v15  ;;  %v135_v49 = vmul.u32 58254, %v131_v15  ;;  %v7198_v15 = vld [vmem:[#allocation2 + $0x2c0] sm:$0xf]  ;;  %v8118_v32 = vld [vmem:[#allocation2 + $0x3cc] sm:$0xf0] }
  0x1a   :  { %v114_v34 = vsel %vm113_vm2, 1, %v8460_v33  ;;  %2320 = vmatpush.bf16.msrb.mxu2 %v7215_v36  ;;  %v136_v50 = vmul.u32 14564, %v132_v16  ;;  %v8593_v52 = vsel %vm783_vm0, %v782_v29, %v765_v26  ;;  %v8601_v53 = vsel %vm892_vm1, %v874_v30, %v875_v35  ;;  %2374 = vmatpush.bf16.msrb.mxu3 %v7343_v44 }
  0x1b   :  { %v116_v39 = vadd.s32 %v114_v34, %v108_v14  ;;  %vm117_vm3 = vc.u32 %v115_v28, %v111_v20  ;;  %2212 = vmatpush.bf16.msrb.mxu0 %v6959_v45  ;;  %v137_v54 = vmul.u32 58254, %v132_v16  ;;  %v161_v55 = vshrl.u32 %v8534_v5, 16  ;;  %2266 = vmatpush.bf16.msrb.mxu1 %v7087_v46  ;;  %v8086_v16 = vld [vmem:[#allocation2 + $0x2cc] sm:$0xf0]  ;;  %v8611_v20 = vld [vmem:[%s12342_s0 + $0x18] sm:$0xff] }
  0x1c   :  { %v118_v43 = vsel %vm117_vm3, 1, %v8460_v33  ;;  %v138_v57 = vshll.u32 %v135_v49, 16  ;;  %v140_v58 = vshll.u32 %v136_v50, 16  ;;  %v766_v59 = vrot.slane %v8569_v24, 7 }
  0x1d   :  { %v120_v47 = vadd.s32 %v118_v43, %v116_v39  ;;  %v139_v60 = vshrl.u32 %v135_v49, 16  ;;  %v876_v61 = vrot.slane %v8585_v51, 1  ;;  %v163_v62 = vmul.u32 14564, %v160_v22 }
  0x1e   :  { %v164_v63 = vmul.u32 58254, %v160_v22  ;;  %vm142_vm4 = vc.u32 %v134_v48, %v138_v57  ;;  %v144_v2 = vadd.s32 %v138_v57, %v134_v48  ;;  %v165_v3 = vmul.u32 14564, %v161_v55 }
  0x1f   :  { %v121_v56 = vadd.s32 %v120_v47, %v110_v19  ;;  %v141_v7 = vshrl.u32 %v136_v50, 16  ;;  %v143_v8 = vsel %vm142_vm4, 1, %v8460_v33  ;;  %v166_v9 = vmul.u32 58254, %v161_v55 }
  0x20   :  { %v167_v11 = vshll.u32 %v164_v63, 16  ;;  %v145_v13 = vadd.s32 %v143_v8, %v137_v54  ;;  %vm146_vm5 = vc.u32 %v144_v2, %v140_v58  ;;  %v169_v14 = vshll.u32 %v165_v3, 16 }
  0x21   :  { %v122_v0 = vadd.s32 %v121_v56, %v112_v23  ;;  %v147_v17 = vsel %vm146_vm5, 1, %v8460_v33  ;;  %v168_v18 = vshrl.u32 %v164_v63, 16  ;;  %v8617_v27 = vsel %vm783_vm0, %v765_v26, %v766_v59 }
  0x22   :  { %vm171_vm6 = vc.u32 %v163_v62, %v167_v11  ;;  %v173_v19 = vadd.s32 %v167_v11, %v163_v62  ;;  %v149_v23 = vadd.s32 %v147_v17, %v145_v13  ;;  %v170_v34 = vshrl.u32 %v165_v3, 16 }
  0x23   :  { %v123_v12 = vshrl.u32 %v122_v0, 3  ;;  %v172_v28 = vsel %vm171_vm6, 1, %v8460_v33  ;;  %v7199_v37 = vor.u32 %v8086_v16, %v7198_v15  ;;  %v767_v41 = vrot.slane %v8585_v51, 7 }
  0x24   :  { %v174_v36 = vadd.s32 %v172_v28, %v166_v9  ;;  %vm175_vm7 = vc.u32 %v173_v19, %v169_v14  ;;  %v150_v39 = vadd.s32 %v149_v23, %v139_v60  ;;  %v877_v26 = vrot.slane %v8611_v20, 1  ;;  %v8022_v14 = vld [vmem:[#allocation2 + $0xcc] sm:$0xf0]  ;;  %v8676_v19 = vld [vmem:[%s12342_s0 + $0x20] sm:$0xff] }
  0x25   :  { %v124_v22 = vmul.u32 9, %v123_v12  ;;  %v176_v40 = vsel %vm175_vm7, 1, %v8460_v33  ;;  %2321 = vmatpush.bf16.msrb.mxu2 %v7199_v37  ;;  %v7327_v43 = vor.u32 %v8118_v32, %v7326_v31  ;;  %v189_v44 = vand.u32 65535, %v8537_v6  ;;  %v7070_v31 = vld [vmem:[#allocation2 + $0x1c0] sm:$0xf] }
  0x26   :  { %v178_v42 = vadd.s32 %v176_v40, %v174_v36  ;;  %v151_v46 = vadd.s32 %v150_v39, %v141_v7  ;;  %v908_v47 = vsel %vm892_vm1, %v875_v35, %v876_v61  ;;  %v190_v49 = vshrl.u32 %v8537_v6, 16 }
  0x27   :  { %v125_v38 = vsub.s32 %v8524_v1, %v124_v22  ;;  %2375 = vmatpush.bf16.msrb.mxu3 %v7327_v43  ;;  %v8632_v50 = vmul.u32 58254, %v189_v44  ;;  %v8640_v56 = vsel %vm783_vm0, %v766_v59, %v767_v41  ;;  %v192_v57 = vmul.u32 14564, %v189_v44 }
  0x28   :  { %v179_v48 = vadd.s32 %v178_v42, %v168_v18  ;;  %v152_v55 = vshrl.u32 %v151_v46, 3  ;;  %v8644_v58 = vmul.u32 14564, %v190_v49  ;;  %v8660_v63 = vsel %vm892_vm1, %v876_v61, %v877_v26  ;;  %v6942_v61 = vld [vmem:[#allocation2 + $0xc0] sm:$0xf] }
  0x29   :  { %vm621_vm9 = vcmp.ne.s32.totalorder %v125_v38, 0  ;;  %vm639_vm10 = vcmp.lt.s32.totalorder %v125_v38, 0  ;;  %v675_v45 = vadd.s32 9, %v125_v38  ;;  %v195_v3 = vmul.u32 58254, %v190_v49 }
  0x2a   :  { %vm657_vm11 = vmand %vm639_vm10, %vm621_vm9  ;;  %v180_v35 = vadd.s32 %v179_v48, %v170_v34  ;;  %v153_v59 = vmul.u32 9, %v152_v55  ;;  %v197_v8 = vshrl.u32 %v8632_v50, 16  ;;  %v768_v9 = vrot.slane %v8611_v20, 7  ;;  %v7182_v55 = vld [vmem:[#allocation2 + $0x2a0] sm:$0xf] }
  0x2b   :  { %v8634_v54 = vsel %vm657_vm11, %v675_v45, %v125_v38  ;;  %v199_v17 = vshrl.u32 %v8644_v58, 16  ;;  %v6943_v28 = vor.u32 %v8022_v14, %v6942_v61  ;;  %v218_v32 = vand.u32 65535, %v8542_v10 }
  0x2c   :  { %12558 = vst [vmem:[#allocation12_spill] sm:$0xff] %v8634_v54  ;;  %vm12352_vm12 = vcmp.eq.s32.totalorder %v8634_v54, 0  ;;  %vm12353_vm13 = vcmp.eq.s32.totalorder %v8634_v54, 8  ;;  %v181_v2 = vshrl.u32 %v180_v35, 3  ;;  %v154_v7 = vsub.s32 %v8531_v4, %v153_v59 }
  0x2d   :  { %v838_v60 = vsel %vm12352_vm12, %v8569_v24, %v8593_v52  ;;  %v947_v62 = vsel %vm12353_vm13, %v8574_v25, %v8601_v53  ;;  %v196_v52 = vshll.u32 %v8632_v50, 16  ;;  %v198_v53 = vshll.u32 %v8644_v58, 16  ;;  %2213 = vmatpush.bf16.msrb.mxu0 %v6943_v28  ;;  %v7310_v28 = vld [vmem:[#allocation2 + $0x3a0] sm:$0xf]  ;;  %v7328_v25 = vld [vmem:[#allocation2 + $0x3d0] sm:$0xf0] }
  0x2e   :  { %v856_v0 = vadd.f32 %v838_v60, %v8562_v21  ;;  %v182_v12 = vmul.u32 9, %v181_v2  ;;  %vm622_vm15 = vcmp.ne.s32.totalorder %v154_v7, 0  ;;  %vm640_vm2 = vcmp.lt.s32.totalorder %v154_v7, 0 }
  0x2f   :  { %vm200_vm14 = vc.u32 %v192_v57, %v196_v52  ;;  %v202_v13 = vadd.s32 %v196_v52, %v192_v57  ;;  %v676_v15 = vadd.s32 9, %v154_v7  ;;  %vm658_vm3 = vmand %vm640_vm2, %vm622_vm15  ;;  %v878_v40 = vrot.slane %v8676_v19, 1  ;;  %v8082_v57 = vld [vmem:[#allocation2 + $0x2ac] sm:$0xf0] }
  0x30   :  { %v965_v11 = vadd.f32 %v947_v62, %v856_v0  ;;  %v201_v16 = vsel %vm200_vm14, 1, %v8460_v33  ;;  %v183_v4 = vsub.s32 %v8534_v5, %v182_v12  ;;  %v8054_v5 = vld [vmem:[#allocation2 + $0x1cc] sm:$0xf0]  ;;  %v219_v43 = vshrl.u32 %v8542_v10, 16 }
  0x31   :  { %v203_v18 = vadd.s32 %v201_v16, %v195_v3  ;;  %vm204_vm4 = vc.u32 %v202_v13, %v198_v53  ;;  %v8680_v22 = vsel %vm658_vm3, %v676_v15, %v154_v7  ;;  %v7071_v42 = vor.u32 %v8054_v5, %v7070_v31 }
  0x32   :  { %6772 = vmatmul.msk.f32.vlgmr.msra.gmra.mxu0 %vm997_vm8, %v965_v11  ;;  %6790 = vmatmul.msk.f32.vlgmr.msra.gmra.mxu1 %vm997_vm8, %v965_v11  ;;  %12559 = vst [vmem:[#allocation13_spill] sm:$0xff] %v8680_v22  ;;  %v205_v23 = vsel %vm204_vm4, 1, %v8460_v33  ;;  %vm712_vm5 = vcmp.eq.s32.totalorder %v8680_v22, 0  ;;  %vm730_vm6 = vcmp.eq.s32.totalorder %v8680_v22, 8  ;;  %vm623_vm7 = vcmp.ne.s32.totalorder %v183_v4, 0 }
  0x33   :  { %6808 = vmatmul.msk.f32.vlgmr.msra.gmra.mxu2 %vm997_vm8, %v965_v11  ;;  %6826 = vmatmul.msk.f32.vlgmr.msra.gmra.mxu3 %vm997_vm8, %v965_v11  ;;  %vm641_vm9 = vcmp.lt.s32.totalorder %v183_v4, 0  ;;  %v839_v34 = vsel %vm712_vm5, %v8585_v51, %v8617_v27  ;;  %v948_v36 = vsel %vm730_vm6, %v8562_v21, %v908_v47  ;;  %v677_v37 = vadd.s32 9, %v183_v4  ;;  %v8348_v21 = vld [vmem:[%s12342_s0] sm:$0xff] }
  0x34   :  { %vm659_vm10 = vmand %vm641_vm9, %vm623_vm7  ;;  %v207_v38 = vadd.s32 %v205_v23, %v203_v18  ;;  %v857_v39 = vadd.f32 %v839_v34, %v8569_v24  ;;  %v221_v46 = vmul.u32 14564, %v218_v32  ;;  %v222_v27 = vmul.u32 58254, %v218_v32  ;;  %2267 = vmatpush.bf16.msrb.mxu1 %v7071_v42  ;;  %v8114_v34 = vld [vmem:[#allocation2 + $0x3ac] sm:$0xf0] }
  0x35   :  { %v8696_v44 = vsel %vm659_vm10, %v677_v37, %v183_v4  ;;  %v223_v47 = vmul.u32 14564, %v219_v43  ;;  %v224_v58 = vmul.u32 58254, %v219_v43  ;;  %v798_v0 = vsel %vm783_vm0, %v767_v41, %v768_v9  ;;  %v8018_v42 = vld [vmem:[#allocation2 + $0xac] sm:$0xf0]  ;;  %v7054_v43 = vld [vmem:[#allocation2 + $0x1a0] sm:$0xf] }
  0x36   :  { %12560 = vst [vmem:[#allocation14_spill] sm:$0xff] %v8696_v44  ;;  %v208_v45 = vadd.s32 %v207_v38, %v197_v8  ;;  %v966_v48 = vadd.f32 %v948_v36, %v857_v39  ;;  %vm713_vm11 = vcmp.eq.s32.totalorder %v8696_v44, 0  ;;  %vm731_vm14 = vcmp.eq.s32.totalorder %v8696_v44, 8  ;;  %v6926_v39 = vld [vmem:[#allocation2 + $0xa0] sm:$0xf] }
  0x37   :  { %v840_v49 = vsel %vm713_vm11, %v8611_v20, %v8640_v56  ;;  %v225_v60 = vshll.u32 %v222_v27, 16  ;;  %v227_v62 = vshll.u32 %v223_v47, 16  ;;  %v949_v56 = vsel %vm731_vm14, %v8569_v24, %v8660_v63  ;;  %v8729_v63 = vld [vmem:[%s12342_s0 + $0x28] sm:$0xff] }
  0x38   :  { %v209_v50 = vadd.s32 %v208_v45, %v199_v17  ;;  %v858_v35 = vadd.f32 %v840_v49, %v8585_v51  ;;  %v906_v2 = vsel %vm892_vm1, %v877_v26, %v878_v40  ;;  %v7183_v52 = vor.u32 %v8082_v57, %v7182_v55  ;;  %v8778_v57 = vld [vmem:[%s12342_s0 + $0x30] sm:$0xff] }
  0x39   :  { %vm229_vm15 = vc.u32 %v221_v46, %v225_v60  ;;  %v231_v3 = vadd.s32 %v225_v60, %v221_v46  ;;  %v769_v41 = vrot.slane %v8676_v19, 7  ;;  %v8733_v8 = vadd.s32 40, %v8524_v1 }
  0x3a   :  { %6773 = vmatmul.msk.f32.gmra.mxu0 %vm997_vm8, %v966_v48  ;;  %6791 = vmatmul.msk.f32.gmra.mxu1 %vm997_vm8, %v966_v48  ;;  %v210_v59 = vshrl.u32 %v209_v50, 3  ;;  %v230_v24 = vsel %vm229_vm15, 1, %v8460_v33  ;;  %v967_v53 = vadd.f32 %v949_v56, %v858_v35  ;;  %v226_v11 = vshrl.u32 %v222_v27, 16  ;;  %v8050_v27 = vld [vmem:[#allocation2 + $0x1ac] sm:$0xf0] }
  0x3b   :  { %6809 = vmatmul.msk.f32.gmra.mxu2 %vm997_vm8, %v966_v48  ;;  %6827 = vmatmul.msk.f32.gmra.mxu3 %vm997_vm8, %v966_v48  ;;  %v232_v12 = vadd.s32 %v230_v24, %v224_v58  ;;  %vm233_vm2 = vc.u32 %v231_v3, %v227_v62  ;;  %v247_v61 = vand.u32 65535, %v8733_v8  ;;  %v248_v14 = vshrl.u32 %v8733_v8, 16 }
  0x3c   :  { %v211_v7 = vmul.u32 9, %v210_v59  ;;  %2322 = vmatpush.bf16.msrb.mxu2 %v7183_v52  ;;  %v234_v13 = vsel %vm233_vm2, 1, %v8460_v33  ;;  %v228_v15 = vshrl.u32 %v223_v47, 16  ;;  %v879_v4 = vrot.slane %v8729_v63, 1 }
  0x3d   :  { %v236_v16 = vadd.s32 %v234_v13, %v232_v12  ;;  %v8741_v17 = vadd.s32 48, %v8524_v1  ;;  %v250_v23 = vmul.u32 14564, %v247_v61  ;;  %v251_v31 = vmul.u32 58254, %v247_v61  ;;  %v8792_v12 = vld [vmem:[%s12342_s0 + $0x38] sm:$0xff] }
  0x3e   :  { %v212_v26 = vsub.s32 %v8537_v6, %v211_v7  ;;  %v8745_v5 = vmul.u32 14564, %v248_v14  ;;  %v253_v32 = vmul.u32 58254, %v248_v14  ;;  %v8757_v37 = vsel %vm783_vm0, %v768_v9, %v769_v41 }
  0x3f   :  { %v237_v6 = vadd.s32 %v236_v16, %v226_v11  ;;  %v7311_v38 = vor.u32 %v8114_v34, %v7310_v28  ;;  %v254_v46 = vshll.u32 %v251_v31, 16  ;;  %v905_v47 = vsel %vm892_vm1, %v878_v40, %v879_v4 }
  0x40   :  { %vm624_vm3 = vcmp.ne.s32.totalorder %v212_v26, 0  ;;  %vm642_vm4 = vcmp.lt.s32.totalorder %v212_v26, 0  ;;  %v678_v18 = vadd.s32 9, %v212_v26  ;;  %v256_v49 = vshll.u32 %v8745_v5, 16 }
  0x41   :  { %vm660_vm7 = vmand %vm642_vm4, %vm624_vm3  ;;  %v238_v45 = vadd.s32 %v237_v6, %v228_v15  ;;  %2376 = vmatpush.bf16.msrb.mxu3 %v7311_v38  ;;  %vm258_vm15 = vc.u32 %v250_v23, %v254_v46  ;;  %v260_v58 = vadd.s32 %v254_v46, %v250_v23  ;;  %v6927_v60 = vor.u32 %v8018_v42, %v6926_v39 }
  0x42   :  { %6774 = vmatmul.msk.f32.gmra.mxu0 %vm997_vm8, %v967_v53  ;;  %6792 = vmatmul.msk.f32.gmra.mxu1 %vm997_vm8, %v967_v53  ;;  %v8749_v36 = vsel %vm660_vm7, %v678_v18, %v212_v26  ;;  %v259_v35 = vsel %vm258_vm15, 1, %v8460_v33  ;;  %v7055_v62 = vor.u32 %v8050_v27, %v7054_v43  ;;  %v880_v3 = vrot.slane %v8778_v57, 1 }
  0x43   :  { %6810 = vmatmul.msk.f32.gmra.mxu2 %vm997_vm8, %v967_v53  ;;  %6828 = vmatmul.msk.f32.gmra.mxu3 %vm997_vm8, %v967_v53  ;;  %12561 = vst [vmem:[#allocation15_spill] sm:$0xff] %v8749_v36  ;;  %vm714_vm9 = vcmp.eq.s32.totalorder %v8749_v36, 0  ;;  %vm732_vm10 = vcmp.eq.s32.totalorder %v8749_v36, 8  ;;  %v239_v55 = vshrl.u32 %v238_v45, 3  ;;  %v261_v59 = vadd.s32 %v259_v35, %v253_v32  ;;  %v7166_v35 = vld [vmem:[#allocation2 + $0x280] sm:$0xf] }
  0x44   :  { %v841_v48 = vsel %vm714_vm9, %v8676_v19, %v798_v0  ;;  %v950_v9 = vsel %vm732_vm10, %v8585_v51, %v906_v2  ;;  %v770_v51 = vrot.slane %v8729_v63, 7  ;;  %v276_v0 = vand.u32 65535, %v8741_v17  ;;  %2214 = vmatpush.bf16.msrb.mxu0 %v6927_v60  ;;  %2268 = vmatpush.bf16.msrb.mxu1 %v7055_v62 }
  0x45   :  { %v859_v50 = vadd.f32 %v841_v48, %v8611_v20  ;;  %v240_v56 = vmul.u32 9, %v239_v55  ;;  %v255_v2 = vshrl.u32 %v251_v31, 16  ;;  %vm262_vm2 = vc.u32 %v260_v58, %v256_v49 }
  0x46   :  { %v277_v52 = vshrl.u32 %v8741_v17, 16  ;;  %v263_v24 = vsel %vm262_vm2, 1, %v8460_v33  ;;  %v279_v53 = vmul.u32 14564, %v276_v0  ;;  %v280_v11 = vmul.u32 58254, %v276_v0 }
  0x47   :  { %v968_v40 = vadd.f32 %v950_v9, %v859_v50  ;;  %v241_v7 = vsub.s32 %v8542_v10, %v240_v56  ;;  %v257_v26 = vshrl.u32 %v8745_v5, 16  ;;  %v265_v13 = vadd.s32 %v263_v24, %v261_v59  ;;  %v7294_v56 = vld [vmem:[#allocation2 + $0x380] sm:$0xf]  ;;  %v8110_v59 = vld [vmem:[#allocation2 + $0x38c] sm:$0xf0] }
  0x48   :  { %v281_v61 = vmul.u32 14564, %v277_v52  ;;  %v282_v14 = vmul.u32 58254, %v277_v52  ;;  %v283_v15 = vshll.u32 %v280_v11, 16  ;;  %v771_v23 = vrot.slane %v8778_v57, 7 }
  0x49   :  { %vm625_vm3 = vcmp.ne.s32.totalorder %v241_v7, 0  ;;  %vm643_vm4 = vcmp.lt.s32.totalorder %v241_v7, 0  ;;  %v679_v10 = vadd.s32 9, %v241_v7  ;;  %v266_v16 = vadd.s32 %v265_v13, %v255_v2 }
  0x4a   :  { %6775 = vmatmul.msk.f32.gmra.mxu0 %vm997_vm8, %v968_v40  ;;  %6793 = vmatmul.msk.f32.gmra.mxu1 %vm997_vm8, %v968_v40  ;;  %vm661_vm7 = vmand %vm643_vm4, %vm625_vm3  ;;  %v285_v18 = vshll.u32 %v281_v61, 16  ;;  %v881_v28 = vrot.slane %v8792_v12, 1  ;;  %v284_v31 = vshrl.u32 %v280_v11, 16  ;;  %vm287_vm15 = vc.u32 %v279_v53, %v283_v15  ;;  %v8014_v11 = vld [vmem:[#allocation2 + $0x8c] sm:$0xf0] }
  0x4b   :  { %6811 = vmatmul.msk.f32.gmra.mxu2 %vm997_vm8, %v968_v40  ;;  %6829 = vmatmul.msk.f32.gmra.mxu3 %vm997_vm8, %v968_v40  ;;  %v8799_v6 = vsel %vm661_vm7, %v679_v10, %v241_v7  ;;  %v289_v32 = vadd.s32 %v283_v15, %v279_v53  ;;  %v267_v5 = vadd.s32 %v266_v16, %v257_v26  ;;  %v288_v34 = vsel %vm287_vm15, 1, %v8460_v33  ;;  %v8078_v40 = vld [vmem:[#allocation2 + $0x28c] sm:$0xf0]  ;;  %v6910_v53 = vld [vmem:[#allocation2 + $0x80] sm:$0xf] }
  0x4c   :  { %12562 = vst [vmem:[#allocation16_spill] sm:$0xff] %v8799_v6  ;;  %vm12369_vm2 = vcmp.eq.s32.totalorder %v8799_v6, 0  ;;  %vm12362_vm12 = vcmp.eq.s32.totalorder %v8799_v6, 8  ;;  %v290_v42 = vadd.s32 %v288_v34, %v282_v14  ;;  %v8814_v27 = vadd.s32 56, %v8524_v1 }
  0x4d   :  { %v842_v38 = vsel %vm12369_vm2, %v8729_v63, %v8757_v37  ;;  %v951_v39 = vsel %vm12362_vm12, %v8611_v20, %v905_v47  ;;  %vm291_vm3 = vc.u32 %v289_v32, %v285_v18  ;;  %v268_v45 = vshrl.u32 %v267_v5, 3  ;;  %v8046_v32 = vld [vmem:[#allocation2 + $0x18c] sm:$0xf0] }
  0x4e   :  { %v860_v43 = vadd.f32 %v842_v38, %v8676_v19  ;;  %v292_v46 = vsel %vm291_vm3, 1, %v8460_v33  ;;  %v796_v37 = vsel %vm783_vm0, %v769_v41, %v770_v51  ;;  %v286_v48 = vshrl.u32 %v281_v61, 16 }
  0x4f   :  { %v294_v9 = vadd.s32 %v292_v46, %v290_v42  ;;  %v772_v20 = vrot.slane %v8792_v12, 7  ;;  %v269_v49 = vmul.u32 9, %v268_v45  ;;  %v305_v50 = vand.u32 65535, %v8814_v27 }
  0x50   :  { %v969_v47 = vadd.f32 %v951_v39, %v860_v43  ;;  %v306_v55 = vshrl.u32 %v8814_v27, 16  ;;  %v904_v58 = vsel %vm892_vm1, %v879_v4, %v880_v3  ;;  %v8835_v41 = vsel %vm783_vm0, %v770_v51, %v771_v23 }
  0x51   :  { %v295_v60 = vadd.s32 %v294_v9, %v284_v31  ;;  %v8841_v62 = vsel %vm892_vm1, %v880_v3, %v881_v28  ;;  %v270_v4 = vsub.s32 %v8733_v8, %v269_v49  ;;  %v308_v0 = vmul.u32 14564, %v305_v50  ;;  %v7038_v31 = vld [vmem:[#allocation2 + $0x180] sm:$0xf] }
  0x52   :  { %6776 = vmatmul.msk.f32.gmra.mxu0 %vm997_vm8, %v969_v47  ;;  %6794 = vmatmul.msk.f32.gmra.mxu1 %vm997_vm8, %v969_v47  ;;  %v309_v2 = vmul.u32 58254, %v305_v50  ;;  %v8846_v52 = vmul.u32 14564, %v306_v55  ;;  %v311_v3 = vmul.u32 58254, %v306_v55  ;;  %v7167_v7 = vor.u32 %v8078_v40, %v7166_v35 }
  0x53   :  { %6812 = vmatmul.msk.f32.gmra.mxu2 %vm997_vm8, %v969_v47  ;;  %6830 = vmatmul.msk.f32.gmra.mxu3 %vm997_vm8, %v969_v47  ;;  %v296_v51 = vadd.s32 %v295_v60, %v286_v48  ;;  %v7295_v24 = vor.u32 %v8110_v59, %v7294_v56  ;;  %vm626_vm4 = vcmp.ne.s32.totalorder %v270_v4, 0  ;;  %vm644_vm7 = vcmp.lt.s32.totalorder %v270_v4, 0 }
  0x54   :  { %v680_v26 = vadd.s32 9, %v270_v4  ;;  %v312_v13 = vshll.u32 %v309_v2, 16  ;;  %vm662_vm15 = vmand %vm644_vm7, %vm626_vm4  ;;  %v313_v61 = vshrl.u32 %v309_v2, 16  ;;  %v314_v14 = vshll.u32 %v8846_v52, 16  ;;  %2323 = vmatpush.bf16.msrb.mxu2 %v7167_v7 }
  0x55   :  { %v297_v8 = vshrl.u32 %v296_v51, 3  ;;  %2377 = vmatpush.bf16.msrb.mxu3 %v7295_v24  ;;  %v8852_v10 = vadd.s32 64, %v8524_v1  ;;  %v6911_v18 = vor.u32 %v8014_v11, %v6910_v53  ;;  %v7039_v48 = vor.u32 %v8046_v32, %v7038_v31 }
  0x56   :  { %v8854_v15 = vsel %vm662_vm15, %v680_v26, %v270_v4  ;;  %vm316_vm3 = vc.u32 %v308_v0, %v312_v13  ;;  %v318_v16 = vadd.s32 %v312_v13, %v308_v0  ;;  %v315_v9 = vshrl.u32 %v8846_v52, 16 }
  0x57   :  { %12563 = vst [vmem:[#allocation17_spill] sm:$0xff] %v8854_v15  ;;  %vm12361_vm13 = vcmp.eq.s32.totalorder %v8854_v15, 0  ;;  %vm12354_vm4 = vcmp.eq.s32.totalorder %v8854_v15, 8  ;;  %v298_v5 = vmul.u32 9, %v297_v8  ;;  %v317_v34 = vsel %vm316_vm3, 1, %v8460_v33  ;;  %2215 = vmatpush.bf16.msrb.mxu0 %v6911_v18  ;;  %2269 = vmatpush.bf16.msrb.mxu1 %v7039_v48 }
  0x58   :  { %v843_v38 = vsel %vm12361_vm13, %v8778_v57, %v796_v37  ;;  %v952_v39 = vsel %vm12354_vm4, %v8676_v19, %v904_v58  ;;  %v319_v42 = vadd.s32 %v317_v34, %v311_v3  ;;  %vm320_vm7 = vc.u32 %v318_v16, %v314_v14  ;;  %v8899_v3 = vld [vmem:[%s12342_s0 + $0x48] sm:$0xff]  ;;  %v7150_v34 = vld [vmem:[#allocation2 + $0x260] sm:$0xf] }
  0x59   :  { %v861_v43 = vadd.f32 %v843_v38, %v8729_v63  ;;  %v299_v45 = vsub.s32 %v8741_v17, %v298_v5  ;;  %v321_v46 = vsel %vm320_vm7, 1, %v8460_v33  ;;  %v334_v49 = vand.u32 65535, %v8852_v10  ;;  %v8874_v17 = vld [vmem:[%s12342_s0 + $0x40] sm:$0xff] }
  0x5a   :  { %v323_v47 = vadd.s32 %v321_v46, %v319_v42  ;;  %v335_v37 = vshrl.u32 %v8852_v10, 16  ;;  %v882_v52 = vrot.slane %v8874_v17, 1  ;;  %v773_v53 = vrot.slane %v8874_v17, 7 }
  0x5b   :  { %v970_v50 = vadd.f32 %v952_v39, %v861_v43  ;;  %vm627_vm15 = vcmp.ne.s32.totalorder %v299_v45, 0  ;;  %vm645_vm3 = vcmp.lt.s32.totalorder %v299_v45, 0  ;;  %v681_v19 = vadd.s32 9, %v299_v45 }
  0x5c   :  { %vm663_vm4 = vmand %vm645_vm3, %vm627_vm15  ;;  %v324_v55 = vadd.s32 %v323_v47, %v313_v61  ;;  %v337_v35 = vmul.u32 14564, %v334_v49  ;;  %v338_v58 = vmul.u32 58254, %v334_v49  ;;  %v8876_v60 = vmul.u32 14564, %v335_v37 }
  0x5d   :  { %6777 = vmatmul.msk.f32.gmra.mxu0 %vm997_vm8, %v970_v50  ;;  %6795 = vmatmul.msk.f32.gmra.mxu1 %vm997_vm8, %v970_v50  ;;  %v8880_v40 = vsel %vm663_vm4, %v681_v19, %v299_v45  ;;  %v340_v56 = vmul.u32 58254, %v335_v37  ;;  %v8911_v11 = vadd.s32 72, %v8524_v1  ;;  %v883_v61 = vrot.slane %v8899_v3, 1  ;;  %v8074_v45 = vld [vmem:[#allocation2 + $0x26c] sm:$0xf0] }
  0x5e   :  { %12564 = vst [vmem:[#allocation18_spill] sm:$0xff] %v8880_v40  ;;  %6813 = vmatmul.msk.f32.gmra.mxu2 %vm997_vm8, %v970_v50  ;;  %6831 = vmatmul.msk.f32.gmra.mxu3 %vm997_vm8, %v970_v50  ;;  %vm12356_vm7 = vcmp.eq.s32.totalorder %v8880_v40, 0  ;;  %vm12355_vm15 = vcmp.eq.s32.totalorder %v8880_v40, 8  ;;  %v325_v59 = vadd.s32 %v324_v55, %v315_v9  ;;  %v341_v4 = vshll.u32 %v338_v58, 16  ;;  %v7278_v37 = vld [vmem:[#allocation2 + $0x360] sm:$0xf] }
  0x5f   :  { %v844_v0 = vsel %vm12356_vm7, %v8792_v12, %v8835_v41  ;;  %v953_v2 = vsel %vm12355_vm15, %v8729_v63, %v8841_v62  ;;  %v343_v51 = vshll.u32 %v8876_v60, 16  ;;  %v794_v41 = vsel %vm783_vm0, %v771_v23, %v772_v20  ;;  %v8106_v50 = vld [vmem:[#allocation2 + $0x36c] sm:$0xf0] }
  0x60   :  { %v862_v7 = vadd.f32 %v844_v0, %v8778_v57  ;;  %v326_v24 = vshrl.u32 %v325_v59, 3  ;;  %vm345_vm4 = vc.u32 %v337_v35, %v341_v4  ;;  %v347_v62 = vadd.s32 %v341_v4, %v337_v35  ;;  %v8042_v4 = vld [vmem:[#allocation2 + $0x16c] sm:$0xf0] }
  0x61   :  { %v346_v63 = vsel %vm345_vm4, 1, %v8460_v33  ;;  %v342_v14 = vshrl.u32 %v338_v58, 16  ;;  %v363_v16 = vand.u32 65535, %v8911_v11  ;;  %v364_v23 = vshrl.u32 %v8911_v11, 16 }
  0x62   :  { %v971_v26 = vadd.f32 %v953_v2, %v862_v7  ;;  %v327_v13 = vmul.u32 9, %v326_v24  ;;  %v348_v8 = vadd.s32 %v346_v63, %v340_v56  ;;  %vm349_vm3 = vc.u32 %v347_v62, %v343_v51  ;;  %v8010_v56 = vld [vmem:[#allocation2 + $0x6c] sm:$0xf0] }
  0x63   :  { %v344_v31 = vshrl.u32 %v8876_v60, 16  ;;  %v350_v32 = vsel %vm349_vm3, 1, %v8460_v33  ;;  %v774_v5 = vrot.slane %v8899_v3, 7  ;;  %v366_v39 = vmul.u32 14564, %v363_v16  ;;  %v6894_v60 = vld [vmem:[#allocation2 + $0x60] sm:$0xf] }
  0x64   :  { %v328_v18 = vsub.s32 %v8814_v27, %v327_v13  ;;  %v352_v38 = vadd.s32 %v350_v32, %v348_v8  ;;  %v367_v42 = vmul.u32 58254, %v363_v16  ;;  %v8922_v43 = vmul.u32 14564, %v364_v23 }
  0x65   :  { %6778 = vmatmul.msk.f32.gmra.mxu0 %vm997_vm8, %v971_v26  ;;  %6796 = vmatmul.msk.f32.gmra.mxu1 %vm997_vm8, %v971_v26  ;;  %v8927_v46 = vadd.s32 80, %v8524_v1  ;;  %v902_v48 = vsel %vm892_vm1, %v881_v28, %v882_v52  ;;  %v369_v47 = vmul.u32 58254, %v364_v23  ;;  %v7151_v58 = vor.u32 %v8074_v45, %v7150_v34  ;;  %v7022_v28 = vld [vmem:[#allocation2 + $0x160] sm:$0xf] }
  0x66   :  { %6814 = vmatmul.msk.f32.gmra.mxu2 %vm997_vm8, %v971_v26  ;;  %6832 = vmatmul.msk.f32.gmra.mxu3 %vm997_vm8, %v971_v26  ;;  %vm628_vm4 = vcmp.ne.s32.totalorder %v328_v18, 0  ;;  %vm646_vm15 = vcmp.lt.s32.totalorder %v328_v18, 0  ;;  %v682_v27 = vadd.s32 9, %v328_v18  ;;  %v353_v9 = vadd.s32 %v352_v38, %v342_v14 }
  0x67   :  { %vm664_vm3 = vmand %vm646_vm15, %vm628_vm4  ;;  %v370_v49 = vshll.u32 %v367_v42, 16  ;;  %v371_v55 = vshrl.u32 %v367_v42, 16  ;;  %v372_v35 = vshll.u32 %v8922_v43, 16  ;;  %2324 = vmatpush.bf16.msrb.mxu2 %v7151_v58  ;;  %v7279_v26 = vor.u32 %v8106_v50, %v7278_v37 }
  0x68   :  { %v8935_v19 = vsel %vm664_vm3, %v682_v27, %v328_v18  ;;  %v354_v59 = vadd.s32 %v353_v9, %v344_v31  ;;  %v6895_v13 = vor.u32 %v8010_v56, %v6894_v60  ;;  %v7023_v8 = vor.u32 %v8042_v4, %v7022_v28 }
  0x69   :  { %12565 = vst [vmem:[#allocation19_spill] sm:$0xff] %v8935_v19  ;;  %vm12358_vm15 = vcmp.eq.s32.totalorder %v8935_v19, 0  ;;  %vm12357_vm4 = vcmp.eq.s32.totalorder %v8935_v19, 8  ;;  %vm374_vm7 = vc.u32 %v366_v39, %v370_v49  ;;  %v376_v7 = vadd.s32 %v370_v49, %v366_v39  ;;  %2378 = vmatpush.bf16.msrb.mxu3 %v7279_v26 }
  0x6a   :  { %v845_v0 = vsel %vm12358_vm15, %v8874_v17, %v794_v41  ;;  %v954_v2 = vsel %vm12357_vm4, %v8778_v57, %v902_v48  ;;  %v375_v51 = vsel %vm374_vm7, 1, %v8460_v33  ;;  %v355_v63 = vshrl.u32 %v354_v59, 3  ;;  %v8953_v57 = vld [vmem:[%s12342_s0 + $0x50] sm:$0xff]  ;;  %2216 = vmatpush.bf16.msrb.mxu0 %v6895_v13  ;;  %2270 = vmatpush.bf16.msrb.mxu1 %v7023_v8 }
  0x6b   :  { %v863_v24 = vadd.f32 %v845_v0, %v8792_v12  ;;  %v377_v62 = vadd.s32 %v375_v51, %v369_v47  ;;  %vm378_vm3 = vc.u32 %v376_v7, %v372_v35  ;;  %v392_v14 = vand.u32 65535, %v8927_v46 }
  0x6c   :  { %v356_v41 = vmul.u32 9, %v355_v63  ;;  %v379_v23 = vsel %vm378_vm3, 1, %v8460_v33  ;;  %v393_v18 = vshrl.u32 %v8927_v46, 16  ;;  %v373_v31 = vshrl.u32 %v8922_v43, 16 }
  0x6d   :  { %v972_v16 = vadd.f32 %v954_v2, %v863_v24  ;;  %v381_v32 = vadd.s32 %v379_v23, %v377_v62  ;;  %v395_v34 = vmul.u32 14564, %v392_v14  ;;  %v396_v38 = vmul.u32 58254, %v392_v14 }
  0x6e   :  { %v357_v39 = vsub.s32 %v8852_v10, %v356_v41  ;;  %v793_v42 = vsel %vm783_vm0, %v772_v20, %v773_v53  ;;  %v901_v43 = vsel %vm892_vm1, %v882_v52, %v883_v61  ;;  %v397_v45 = vmul.u32 14564, %v393_v18 }
  0x6f   :  { %6779 = vmatmul.msk.f32.gmra.mxu0 %vm997_vm8, %v972_v16  ;;  %6797 = vmatmul.msk.f32.gmra.mxu1 %vm997_vm8, %v972_v16  ;;  %v382_v10 = vadd.s32 %v381_v32, %v371_v55  ;;  %v884_v27 = vrot.slane %v8953_v57, 1  ;;  %v398_v48 = vmul.u32 58254, %v393_v18  ;;  %v399_v9 = vshll.u32 %v396_v38, 16 }
  0x70   :  { %6815 = vmatmul.msk.f32.gmra.mxu2 %vm997_vm8, %v972_v16  ;;  %6833 = vmatmul.msk.f32.gmra.mxu3 %vm997_vm8, %v972_v16  ;;  %vm629_vm7 = vcmp.ne.s32.totalorder %v357_v39, 0  ;;  %vm647_vm3 = vcmp.lt.s32.totalorder %v357_v39, 0  ;;  %v683_v20 = vadd.s32 9, %v357_v39  ;;  %v401_v47 = vshll.u32 %v397_v45, 16 }
  0x71   :  { %vm665_vm4 = vmand %vm647_vm3, %vm629_vm7  ;;  %v383_v49 = vadd.s32 %v382_v10, %v373_v31  ;;  %v792_v52 = vsel %vm783_vm0, %v773_v53, %v774_v5  ;;  %vm403_vm15 = vc.u32 %v395_v34, %v399_v9  ;;  %v405_v37 = vadd.s32 %v399_v9, %v395_v34  ;;  %v8070_v31 = vld [vmem:[#allocation2 + $0x24c] sm:$0xf0] }
  0x72   :  { %v8981_v50 = vsel %vm665_vm4, %v683_v20, %v357_v39  ;;  %v400_v55 = vshrl.u32 %v396_v38, 16  ;;  %v404_v35 = vsel %vm403_vm15, 1, %v8460_v33  ;;  %v8985_v58 = vadd.s32 88, %v8524_v1  ;;  %v8102_v9 = vld [vmem:[#allocation2 + $0x34c] sm:$0xf0] }
  0x73   :  { %12566 = vst [vmem:[#allocation20_spill] sm:$0xff] %v8981_v50  ;;  %vm12360_vm7 = vcmp.eq.s32.totalorder %v8981_v50, 0  ;;  %vm12359_vm3 = vcmp.eq.s32.totalorder %v8981_v50, 8  ;;  %v384_v60 = vshrl.u32 %v383_v49, 3  ;;  %v406_v56 = vadd.s32 %v404_v35, %v398_v48  ;;  %v7262_v48 = vld [vmem:[#allocation2 + $0x340] sm:$0xf] }
  0x74   :  { %v846_v53 = vsel %vm12360_vm7, %v8899_v3, %v793_v42  ;;  %v955_v59 = vsel %vm12359_vm3, %v8792_v12, %v901_v43  ;;  %vm407_vm4 = vc.u32 %v405_v37, %v401_v47  ;;  %v421_v28 = vand.u32 65535, %v8985_v58  ;;  %v9003_v12 = vld [vmem:[%s12342_s0 + $0x58] sm:$0xff]  ;;  %v9035_v35 = vld [vmem:[%s12342_s0 + $0x60] sm:$0xff] }
  0x75   :  { %v864_v4 = vadd.f32 %v846_v53, %v8874_v17  ;;  %v385_v0 = vmul.u32 9, %v384_v60  ;;  %v408_v2 = vsel %vm407_vm4, 1, %v8460_v33  ;;  %v422_v51 = vshrl.u32 %v8985_v58, 16 }
  0x76   :  { %v402_v7 = vshrl.u32 %v397_v45, 16  ;;  %v410_v24 = vadd.s32 %v408_v2, %v406_v56  ;;  %v424_v63 = vmul.u32 14564, %v421_v28  ;;  %v425_v62 = vmul.u32 58254, %v421_v28 }
  0x77   :  { %v973_v26 = vadd.f32 %v955_v59, %v864_v4  ;;  %v386_v13 = vsub.s32 %v8911_v11, %v385_v0  ;;  %v775_v8 = vrot.slane %v8953_v57, 7  ;;  %v9006_v14 = vmul.u32 14564, %v422_v51  ;;  %v7134_v11 = vld [vmem:[#allocation2 + $0x240] sm:$0xf] }
  0x78   :  { %v900_v16 = vsel %vm892_vm1, %v883_v61, %v884_v27  ;;  %v411_v41 = vadd.s32 %v410_v24, %v400_v55  ;;  %v427_v23 = vmul.u32 58254, %v422_v51  ;;  %v428_v18 = vshll.u32 %v425_v62, 16 }
  0x79   :  { %6780 = vmatmul.msk.f32.gmra.mxu0 %vm997_vm8, %v973_v26  ;;  %6798 = vmatmul.msk.f32.gmra.mxu1 %vm997_vm8, %v973_v26  ;;  %vm630_vm15 = vcmp.ne.s32.totalorder %v386_v13, 0  ;;  %vm648_vm4 = vcmp.lt.s32.totalorder %v386_v13, 0  ;;  %v684_v32 = vadd.s32 9, %v386_v13  ;;  %v430_v34 = vshll.u32 %v9006_v14, 16 }
  0x7a   :  { %6816 = vmatmul.msk.f32.gmra.mxu2 %vm997_vm8, %v973_v26  ;;  %6834 = vmatmul.msk.f32.gmra.mxu3 %vm997_vm8, %v973_v26  ;;  %vm666_vm3 = vmand %vm648_vm4, %vm630_vm15  ;;  %v412_v61 = vadd.s32 %v411_v41, %v402_v7  ;;  %v885_v38 = vrot.slane %v9003_v12, 1  ;;  %vm432_vm7 = vc.u32 %v424_v63, %v428_v18  ;;  %v434_v39 = vadd.s32 %v428_v18, %v424_v63  ;;  %v8006_v41 = vld [vmem:[#allocation2 + $0x4c] sm:$0xf0] }
  0x7b   :  { %v9020_v42 = vsel %vm666_vm3, %v684_v32, %v386_v13  ;;  %v433_v43 = vsel %vm432_vm7, 1, %v8460_v33  ;;  %v776_v45 = vrot.slane %v9003_v12, 7  ;;  %v7135_v10 = vor.u32 %v8070_v31, %v7134_v11  ;;  %v7006_v32 = vld [vmem:[#allocation2 + $0x140] sm:$0xf] }
  0x7c   :  { %12567 = vst [vmem:[#allocation21_spill] sm:$0xff] %v9020_v42  ;;  %vm12368_vm13 = vcmp.eq.s32.totalorder %v9020_v42, 0  ;;  %vm12365_vm12 = vcmp.eq.s32.totalorder %v9020_v42, 8  ;;  %v413_v20 = vshrl.u32 %v412_v61, 3  ;;  %v435_v47 = vadd.s32 %v433_v43, %v427_v23 }
  0x7d   :  { %v847_v49 = vsel %vm12368_vm13, %v8953_v57, %v792_v52  ;;  %v956_v37 = vsel %vm12365_vm12, %v8874_v17, %v900_v16  ;;  %v429_v55 = vshrl.u32 %v425_v62, 16  ;;  %vm436_vm7 = vc.u32 %v434_v39, %v430_v34  ;;  %2325 = vmatpush.bf16.msrb.mxu2 %v7135_v10  ;;  %v8038_v39 = vld [vmem:[#allocation2 + $0x14c] sm:$0xf0] }
  0x7e   :  { %v865_v60 = vadd.f32 %v847_v49, %v8899_v3  ;;  %v414_v56 = vmul.u32 9, %v413_v20  ;;  %v437_v53 = vsel %vm436_vm7, 1, %v8460_v33  ;;  %v7263_v59 = vor.u32 %v8102_v9, %v7262_v48 }
  0x7f   :  { %v791_v52 = vsel %vm783_vm0, %v774_v5, %v775_v8  ;;  %v431_v17 = vshrl.u32 %v9006_v14, 16  ;;  %v439_v28 = vadd.s32 %v437_v53, %v435_v47  ;;  %v9045_v4 = vadd.s32 96, %v8524_v1 }
  0x80   :  { %v974_v0 = vadd.f32 %v956_v37, %v865_v60  ;;  %v415_v2 = vsub.s32 %v8927_v46, %v414_v56  ;;  %v899_v51 = vsel %vm892_vm1, %v884_v27, %v885_v38  ;;  %v886_v7 = vrot.slane %v9035_v35, 1  ;;  %2379 = vmatpush.bf16.msrb.mxu3 %v7263_v59  ;;  %v6878_v27 = vld [vmem:[#allocation2 + $0x40] sm:$0xf] }
  0x81   :  { %v440_v24 = vadd.s32 %v439_v28, %v429_v55  ;;  %v9057_v5 = vsel %vm783_vm0, %v775_v8, %v776_v45  ;;  %v450_v63 = vand.u32 65535, %v9045_v4  ;;  %v451_v62 = vshrl.u32 %v9045_v4, 16 }
  0x82   :  { %6781 = vmatmul.msk.f32.gmra.mxu0 %vm997_vm8, %v974_v0  ;;  %6799 = vmatmul.msk.f32.gmra.mxu1 %vm997_vm8, %v974_v0  ;;  %vm631_vm3 = vcmp.ne.s32.totalorder %v415_v2, 0  ;;  %vm649_vm15 = vcmp.lt.s32.totalorder %v415_v2, 0  ;;  %v685_v46 = vadd.s32 9, %v415_v2  ;;  %v9064_v26 = vadd.s32 104, %v8524_v1 }
  0x83   :  { %6817 = vmatmul.msk.f32.gmra.mxu2 %vm997_vm8, %v974_v0  ;;  %6835 = vmatmul.msk.f32.gmra.mxu3 %vm997_vm8, %v974_v0  ;;  %vm667_vm4 = vmand %vm649_vm15, %vm631_vm3  ;;  %v441_v13 = vadd.s32 %v440_v24, %v431_v17  ;;  %v453_v8 = vmul.u32 14564, %v450_v63  ;;  %v454_v14 = vmul.u32 58254, %v450_v63  ;;  %v9068_v16 = vmul.u32 14564, %v451_v62 }
  0x84   :  { %v9070_v23 = vsel %vm667_vm4, %v685_v46, %v415_v2  ;;  %v898_v18 = vsel %vm892_vm1, %v885_v38, %v886_v7  ;;  %v456_v11 = vmul.u32 58254, %v451_v62  ;;  %v6879_v31 = vor.u32 %v8006_v41, %v6878_v27  ;;  %v7118_v41 = vld [vmem:[#allocation2 + $0x220] sm:$0xf] }
  0x85   :  { %12568 = vst [vmem:[#allocation22_spill] sm:$0xff] %v9070_v23  ;;  %vm12364_vm7 = vcmp.eq.s32.totalorder %v9070_v23, 0  ;;  %vm12363_vm3 = vcmp.eq.s32.totalorder %v9070_v23, 8  ;;  %v442_v34 = vshrl.u32 %v441_v13, 3  ;;  %v457_v61 = vshll.u32 %v454_v14, 16 }
  0x86   :  { %v848_v43 = vsel %vm12364_vm7, %v9003_v12, %v791_v52  ;;  %v957_v10 = vsel %vm12363_vm3, %v8899_v3, %v899_v51  ;;  %v459_v38 = vshll.u32 %v9068_v16, 16  ;;  %2217 = vmatpush.bf16.msrb.mxu0 %v6879_v31  ;;  %v479_v48 = vand.u32 65535, %v9064_v26  ;;  %v9094_v52 = vld [vmem:[%s12342_s0 + $0x68] sm:$0xff] }
  0x87   :  { %v866_v9 = vadd.f32 %v848_v43, %v8953_v57  ;;  %v443_v20 = vmul.u32 9, %v442_v34  ;;  %vm461_vm15 = vc.u32 %v453_v8, %v457_v61  ;;  %v777_v47 = vrot.slane %v9035_v35, 7 }
  0x88   :  { %v462_v49 = vsel %vm461_vm15, 1, %v8460_v33  ;;  %v463_v37 = vadd.s32 %v457_v61, %v453_v8  ;;  %v7007_v55 = vor.u32 %v8038_v39, %v7006_v32  ;;  %v480_v60 = vshrl.u32 %v9064_v26, 16 }
  0x89   :  { %v975_v56 = vadd.f32 %v957_v10, %v866_v9  ;;  %v444_v3 = vsub.s32 %v8985_v58, %v443_v20  ;;  %v458_v53 = vshrl.u32 %v454_v14, 16  ;;  %v464_v59 = vadd.s32 %v462_v49, %v456_v11 }
  0x8a   :  { %vm465_vm4 = vc.u32 %v463_v37, %v459_v38  ;;  %2271 = vmatpush.bf16.msrb.mxu1 %v7007_v55  ;;  %v482_v17 = vmul.u32 14564, %v479_v48  ;;  %v483_v28 = vmul.u32 58254, %v479_v48  ;;  %v9096_v0 = vmul.u32 14564, %v480_v60 }
  0x8b   :  { %6782 = vmatmul.msk.f32.gmra.mxu0 %vm997_vm8, %v975_v56  ;;  %6800 = vmatmul.msk.f32.gmra.mxu1 %vm997_vm8, %v975_v56  ;;  %vm632_vm15 = vcmp.ne.s32.totalorder %v444_v3, 0  ;;  %vm650_vm3 = vcmp.lt.s32.totalorder %v444_v3, 0  ;;  %v686_v58 = vadd.s32 9, %v444_v3  ;;  %v466_v2 = vsel %vm465_vm4, 1, %v8460_v33 }
  0x8c   :  { %6818 = vmatmul.msk.f32.gmra.mxu2 %vm997_vm8, %v975_v56  ;;  %6836 = vmatmul.msk.f32.gmra.mxu3 %vm997_vm8, %v975_v56  ;;  %vm668_vm7 = vmand %vm650_vm3, %vm632_vm15  ;;  %v460_v51 = vshrl.u32 %v9068_v16, 16  ;;  %v468_v24 = vadd.s32 %v466_v2, %v464_v59  ;;  %v485_v63 = vmul.u32 58254, %v480_v60  ;;  %v486_v62 = vshll.u32 %v483_v28, 16  ;;  %v8066_v16 = vld [vmem:[#allocation2 + $0x22c] sm:$0xf0] }
  0x8d   :  { %v9104_v46 = vsel %vm668_vm7, %v686_v58, %v444_v3  ;;  %v887_v27 = vrot.slane %v9094_v52, 1  ;;  %v488_v13 = vshll.u32 %v9096_v0, 16  ;;  %v9109_v8 = vadd.s32 112, %v8524_v1 }
  0x8e   :  { %12569 = vst [vmem:[#allocation23_spill] sm:$0xff] %v9104_v46  ;;  %vm12367_vm4 = vcmp.eq.s32.totalorder %v9104_v46, 0  ;;  %vm12366_vm12 = vcmp.eq.s32.totalorder %v9104_v46, 8  ;;  %v469_v14 = vadd.s32 %v468_v24, %v458_v53  ;;  %vm490_vm3 = vc.u32 %v482_v17, %v486_v62 }
  0x8f   :  { %v849_v11 = vsel %vm12367_vm4, %v9035_v35, %v9057_v5  ;;  %v958_v31 = vsel %vm12366_vm12, %v8953_v57, %v898_v18  ;;  %v491_v32 = vsel %vm490_vm3, 1, %v8460_v33  ;;  %v492_v34 = vadd.s32 %v486_v62, %v482_v17  ;;  %v9128_v57 = vld [vmem:[%s12342_s0 + $0x70] sm:$0xff] }
  0x90   :  { %v867_v61 = vadd.f32 %v849_v11, %v9003_v12  ;;  %v470_v39 = vadd.s32 %v469_v14, %v460_v51  ;;  %v487_v43 = vshrl.u32 %v483_v28, 16  ;;  %v493_v10 = vadd.s32 %v491_v32, %v485_v63  ;;  %v7246_v28 = vld [vmem:[#allocation2 + $0x320] sm:$0xf]  ;;  %v8034_v32 = vld [vmem:[#allocation2 + $0x12c] sm:$0xf0] }
  0x91   :  { %v489_v38 = vshrl.u32 %v9096_v0, 16  ;;  %vm494_vm7 = vc.u32 %v492_v34, %v488_v13  ;;  %v7119_v48 = vor.u32 %v8066_v16, %v7118_v41  ;;  %v508_v9 = vand.u32 65535, %v9109_v8  ;;  %v8098_v0 = vld [vmem:[#allocation2 + $0x32c] sm:$0xf0] }
  0x92   :  { %v976_v20 = vadd.f32 %v958_v31, %v867_v61  ;;  %v471_v5 = vshrl.u32 %v470_v39, 3  ;;  %v495_v49 = vsel %vm494_vm7, 1, %v8460_v33  ;;  %v509_v18 = vshrl.u32 %v9109_v8, 16  ;;  %v8002_v41 = vld [vmem:[#allocation2 + $0x2c] sm:$0xf0] }
  0x93   :  { %v497_v37 = vadd.s32 %v495_v49, %v493_v10  ;;  %v778_v55 = vrot.slane %v9094_v52, 7  ;;  %2326 = vmatpush.bf16.msrb.mxu2 %v7119_v48  ;;  %v511_v60 = vmul.u32 14564, %v508_v9  ;;  %v512_v56 = vmul.u32 58254, %v508_v9  ;;  %v6990_v31 = vld [vmem:[#allocation2 + $0x120] sm:$0xf] }
  0x94   :  { %6783 = vmatmul.msk.f32.gmra.mxu0 %vm997_vm8, %v976_v20  ;;  %6801 = vmatmul.msk.f32.gmra.mxu1 %vm997_vm8, %v976_v20  ;;  %v472_v3 = vmul.u32 9, %v471_v5  ;;  %v789_v53 = vsel %vm783_vm0, %v776_v45, %v777_v47  ;;  %v897_v59 = vsel %vm892_vm1, %v886_v7, %v887_v27  ;;  %v513_v17 = vmul.u32 14564, %v509_v18  ;;  %v6862_v45 = vld [vmem:[#allocation2 + $0x20] sm:$0xf] }
  0x95   :  { %6819 = vmatmul.msk.f32.gmra.mxu2 %vm997_vm8, %v976_v20  ;;  %6837 = vmatmul.msk.f32.gmra.mxu3 %vm997_vm8, %v976_v20  ;;  %v498_v58 = vadd.s32 %v497_v37, %v487_v43  ;;  %v888_v2 = vrot.slane %v9128_v57, 1  ;;  %v514_v51 = vmul.u32 58254, %v509_v18  ;;  %v515_v24 = vshll.u32 %v512_v56, 16 }
  0x96   :  { %v473_v63 = vsub.s32 %v9045_v4, %v472_v3  ;;  %v516_v62 = vshrl.u32 %v512_v56, 16  ;;  %v517_v13 = vshll.u32 %v513_v17, 16  ;;  %v518_v14 = vshrl.u32 %v513_v17, 16 }
  0x97   :  { %v499_v7 = vadd.s32 %v498_v58, %v489_v38  ;;  %vm519_vm15 = vc.u32 %v511_v60, %v515_v24  ;;  %v521_v16 = vadd.s32 %v515_v24, %v511_v60  ;;  %v7247_v11 = vor.u32 %v8098_v0, %v7246_v28 }
  0x98   :  { %vm633_vm3 = vcmp.ne.s32.totalorder %v473_v63, 0  ;;  %vm651_vm7 = vcmp.lt.s32.totalorder %v473_v63, 0  ;;  %v687_v34 = vadd.s32 9, %v473_v63  ;;  %v520_v61 = vsel %vm519_vm15, 1, %v8460_v33 }
  0x99   :  { %vm669_vm12 = vmand %vm651_vm7, %vm633_vm3  ;;  %v500_v39 = vshrl.u32 %v499_v7, 3  ;;  %v522_v43 = vadd.s32 %v520_v61, %v514_v51  ;;  %vm523_vm4 = vc.u32 %v521_v16, %v517_v13  ;;  %2380 = vmatpush.bf16.msrb.mxu3 %v7247_v11  ;;  %v6863_v4 = vor.u32 %v8002_v41, %v6862_v45 }
  0x9a   :  { %v9151_v10 = vsel %vm669_vm12, %v687_v34, %v473_v63  ;;  %v524_v38 = vsel %vm523_vm4, 1, %v8460_v33  ;;  %v6991_v48 = vor.u32 %v8034_v32, %v6990_v31  ;;  %v9155_v9 = vadd.s32 120, %v8524_v1 }
  0x9b   :  { %12570 = vst [vmem:[#allocation24_spill] sm:$0xff] %v9151_v10  ;;  %vm723_vm13 = vcmp.eq.s32.totalorder %v9151_v10, 0  ;;  %vm741_vm2 = vcmp.eq.s32.totalorder %v9151_v10, 8  ;;  %v501_v20 = vmul.u32 9, %v500_v39  ;;  %v526_v5 = vadd.s32 %v524_v38, %v522_v43  ;;  %2218 = vmatpush.bf16.msrb.mxu0 %v6863_v4 }
  0x9c   :  { %v850_v49 = vsel %vm723_vm13, %v9094_v52, %v789_v53  ;;  %v959_v18 = vsel %vm741_vm2, %v9003_v12, %v897_v59  ;;  %2272 = vmatpush.bf16.msrb.mxu1 %v6991_v48  ;;  %v537_v37 = vand.u32 65535, %v9155_v9  ;;  %v538_v60 = vshrl.u32 %v9155_v9, 16 }
  0x9d   :  { %v868_v56 = vadd.f32 %v850_v49, %v9035_v35  ;;  %v502_v3 = vsub.s32 %v9064_v26, %v501_v20  ;;  %v527_v17 = vadd.s32 %v526_v5, %v516_v62  ;;  %v788_v53 = vsel %vm783_vm0, %v777_v47, %v778_v55 }
  0x9e   :  { %v540_v28 = vmul.u32 14564, %v537_v37  ;;  %v541_v0 = vmul.u32 58254, %v537_v37  ;;  %v542_v12 = vmul.u32 14564, %v538_v60  ;;  %v896_v26 = vsel %vm892_vm1, %v887_v27, %v888_v2  ;;  %v9192_v27 = vld [vmem:[%s12342_s0 + $0x78] sm:$0xff] }
  0x9f   :  { %v977_v59 = vadd.f32 %v959_v18, %v868_v56  ;;  %vm634_vm12 = vcmp.ne.s32.totalorder %v502_v3, 0  ;;  %vm652_vm4 = vcmp.lt.s32.totalorder %v502_v3, 0  ;;  %v688_v58 = vadd.s32 9, %v502_v3 }
  0xa0   :  { %vm670_vm15 = vmand %vm652_vm4, %vm634_vm12  ;;  %v528_v51 = vadd.s32 %v527_v17, %v518_v14  ;;  %v543_v24 = vmul.u32 58254, %v538_v60  ;;  %v544_v45 = vshll.u32 %v541_v0, 16  ;;  %v546_v63 = vshll.u32 %v542_v12, 16 }
  0xa1   :  { %6784 = vmatmul.msk.f32.gmra.mxu0 %vm997_vm8, %v977_v59  ;;  %6802 = vmatmul.msk.f32.gmra.mxu1 %vm997_vm8, %v977_v59  ;;  %v9183_v47 = vsel %vm670_vm15, %v688_v58, %v502_v3  ;;  %v779_v31 = vrot.slane %v9128_v57, 7  ;;  %v889_v34 = vrot.slane %v9192_v27, 1  ;;  %v545_v61 = vshrl.u32 %v541_v0, 16 }
  0xa2   :  { %12571 = vst [vmem:[#allocation25_spill] sm:$0xff] %v9183_v47  ;;  %6820 = vmatmul.msk.f32.gmra.mxu2 %vm997_vm8, %v977_v59  ;;  %6838 = vmatmul.msk.f32.gmra.mxu3 %vm997_vm8, %v977_v59  ;;  %vm12375_vm3 = vcmp.eq.s32.totalorder %v9183_v47, 0  ;;  %vm12372_vm7 = vcmp.eq.s32.totalorder %v9183_v47, 8  ;;  %v529_v62 = vshrl.u32 %v528_v51, 3  ;;  %vm548_vm12 = vc.u32 %v540_v28, %v544_v45  ;;  %v8062_v51 = vld [vmem:[#allocation2 + $0x20c] sm:$0xf0] }
  0xa3   :  { %v851_v13 = vsel %vm12375_vm3, %v9128_v57, %v788_v53  ;;  %v960_v14 = vsel %vm12372_vm7, %v9035_v35, %v896_v26  ;;  %v549_v41 = vsel %vm548_vm12, 1, %v8460_v33  ;;  %v550_v7 = vadd.s32 %v544_v45, %v540_v28  ;;  %v7102_v26 = vld [vmem:[#allocation2 + $0x200] sm:$0xf] }
  0xa4   :  { %v869_v16 = vadd.f32 %v851_v13, %v9094_v52  ;;  %v530_v11 = vmul.u32 9, %v529_v62  ;;  %v551_v32 = vadd.s32 %v549_v41, %v543_v24  ;;  %v9205_v39 = vadd.s32 128, %v8524_v1  ;;  %v7230_v62 = vld [vmem:[#allocation2 + $0x300] sm:$0xf]  ;;  %v8094_v13 = vld [vmem:[#allocation2 + $0x30c] sm:$0xf0] }
  0xa5   :  { %vm552_vm4 = vc.u32 %v550_v7, %v546_v63  ;;  %v547_v38 = vshrl.u32 %v542_v12, 16  ;;  %v787_v18 = vsel %vm783_vm0, %v778_v55, %v779_v31  ;;  %v6846_v7 = vld [vmem:[#allocation2] sm:$0xf] }
  0xa6   :  { %v978_v43 = vadd.f32 %v960_v14, %v869_v16  ;;  %v531_v4 = vsub.s32 %v9109_v8, %v530_v11  ;;  %v553_v35 = vsel %vm552_vm4, 1, %v8460_v33  ;;  %v566_v20 = vand.u32 65535, %v9205_v39  ;;  %v7998_v16 = vld [vmem:[#allocation2 + $0xc] sm:$0xf0] }
  0xa7   :  { %v555_v48 = vadd.s32 %v553_v35, %v551_v32  ;;  %v567_v5 = vshrl.u32 %v9205_v39, 16  ;;  %v895_v8 = vsel %vm892_vm1, %v888_v2, %v889_v34  ;;  %v9238_v2 = vld [vmem:[%s12342_s0 + $0x80] sm:$0xff]  ;;  %v780_v14 = vrot.slane %v9192_v27, 7 }
  0xa8   :  { %vm635_vm15 = vcmp.ne.s32.totalorder %v531_v4, 0  ;;  %vm653_vm12 = vcmp.lt.s32.totalorder %v531_v4, 0  ;;  %v689_v49 = vadd.s32 9, %v531_v4  ;;  %v9225_v60 = vmul.u32 58254, %v566_v20 }
  0xa9   :  { %6785 = vmatmul.msk.f32.gmra.mxu0 %vm997_vm8, %v978_v43  ;;  %6803 = vmatmul.msk.f32.gmra.mxu1 %vm997_vm8, %v978_v43  ;;  %vm671_vm4 = vmand %vm653_vm12, %vm635_vm15  ;;  %v556_v37 = vadd.s32 %v555_v48, %v545_v61  ;;  %v9227_v56 = vmul.u32 14564, %v567_v5  ;;  %v569_v3 = vmul.u32 14564, %v566_v20  ;;  %v572_v58 = vmul.u32 58254, %v567_v5 }
  0xaa   :  { %6821 = vmatmul.msk.f32.gmra.mxu2 %vm997_vm8, %v978_v43  ;;  %6839 = vmatmul.msk.f32.gmra.mxu3 %vm997_vm8, %v978_v43  ;;  %v9231_v55 = vsel %vm671_vm4, %v689_v49, %v531_v4  ;;  %v573_v0 = vshll.u32 %v9225_v60, 16  ;;  %v890_v41 = vrot.slane %v9238_v2, 1  ;;  %v6974_v43 = vld [vmem:[#allocation2 + $0x100] sm:$0xf]  ;;  %v8030_v4 = vld [vmem:[#allocation2 + $0x10c] sm:$0xf0]  ;;  %v7103_v48 = vor.u32 %v8062_v51, %v7102_v26 }
  0xab   :  { %12572 = vst [vmem:[#allocation26_spill] sm:$0xff] %v9231_v55  ;;  %vm12371_vm15 = vcmp.eq.s32.totalorder %v9231_v55, 0  ;;  %vm12370_vm12 = vcmp.eq.s32.totalorder %v9231_v55, 8  ;;  %v557_v17 = vadd.s32 %v556_v37, %v547_v38  ;;  %v575_v63 = vshll.u32 %v9227_v56, 16 }
  0xac   :  { %v852_v12 = vsel %vm12371_vm15, %v9192_v27, %v787_v18  ;;  %v961_v59 = vsel %vm12370_vm12, %v9094_v52, %v895_v8  ;;  %vm577_vm4 = vc.u32 %v569_v3, %v573_v0  ;;  %v579_v61 = vadd.s32 %v573_v0, %v569_v3  ;;  %2327 = vmatpush.bf16.msrb.mxu2 %v7103_v48  ;;  %v9310_v48 = vld [vmem:[%s12342_s0 + $0x88] sm:$0xff] }
  0xad   :  { %v870_v24 = vadd.f32 %v852_v12, %v9128_v57  ;;  %v558_v45 = vshrl.u32 %v557_v17, 3  ;;  %v578_v52 = vsel %vm577_vm4, 1, %v8460_v33  ;;  %v574_v35 = vshrl.u32 %v9225_v60, 16 }
  0xae   :  { %v580_v38 = vadd.s32 %v578_v52, %v572_v58  ;;  %v7231_v20 = vor.u32 %v8094_v13, %v7230_v62  ;;  %vm581_vm12 = vc.u32 %v579_v61, %v575_v63  ;;  %v6847_v49 = vor.u32 %v7998_v16, %v6846_v7 }
  0xaf   :  { %v9240_v53 = vpop.f32.mrf.mxu0  ;;  %v9242_v28 = vpop.f32.mrf.mxu1  ;;  %v979_v11 = vadd.f32 %v961_v59, %v870_v24  ;;  %v559_v32 = vmul.u32 9, %v558_v45  ;;  %v9261_v18 = vadd.s32 136, %v8524_v1  ;;  %v576_v8 = vshrl.u32 %v9227_v56, 16 }
  0xb0   :  { %v582_v37 = vsel %vm581_vm12, 1, %v8460_v33  ;;  %v6975_v17 = vor.u32 %v8030_v4, %v6974_v43  ;;  %2381 = vmatpush.bf16.msrb.mxu3 %v7231_v20  ;;  %v786_v56 = vsel %vm783_vm0, %v779_v31, %v780_v14  ;;  %v894_v58 = vsel %vm892_vm1, %v889_v34, %v890_v41  ;;  %2219 = vmatpush.bf16.msrb.mxu0 %v6847_v49 }
  0xb1   :  { %6786 = vmatmul.msk.f32.gmra.mxu0 %vm997_vm8, %v979_v11  ;;  %6804 = vmatmul.msk.f32.gmra.mxu1 %vm997_vm8, %v979_v11  ;;  %v560_v5 = vsub.s32 %v9155_v9, %v559_v32  ;;  %v584_v0 = vadd.s32 %v582_v37, %v580_v38  ;;  %v595_v26 = vand.u32 65535, %v9261_v18  ;;  %v596_v45 = vshrl.u32 %v9261_v18, 16 }
  0xb2   :  { %6822 = vmatmul.msk.f32.gmra.mxu2 %vm997_vm8, %v979_v11  ;;  %6840 = vmatmul.msk.f32.gmra.mxu3 %vm997_vm8, %v979_v11  ;;  %v891_v20 = vrot.slane %v9310_v48, 1 }
  0xb3   :  { %vm636_vm4 = vcmp.ne.s32.totalorder %v560_v5, 0  ;;  %vm654_vm15 = vcmp.lt.s32.totalorder %v560_v5, 0  ;;  %v690_v9 = vadd.s32 9, %v560_v5  ;;  %2273 = vmatpush.bf16.msrb.mxu1 %v6975_v17  ;;  %v585_v24 = vadd.s32 %v584_v0, %v574_v35 }
  0xb4   :  { %vm672_vm7 = vmand %vm654_vm15, %vm636_vm4  ;;  %v598_v13 = vmul.u32 14564, %v595_v26  ;;  %v599_v7 = vmul.u32 58254, %v595_v26  ;;  %v600_v11 = vmul.u32 14564, %v596_v45  ;;  %v601_v52 = vmul.u32 58254, %v596_v45  ;;  %v8120_v45 = vld [vmem:[#allocation2 + $0x3e4] sm:$0xf] }
  0xb5   :  { %v9288_v51 = vsel %vm672_vm7, %v690_v9, %v560_v5  ;;  %v586_v63 = vadd.s32 %v585_v24, %v576_v8 }
  0xb6   :  { %v9267_v60 = vpop.f32.mrf.mxu2  ;;  %v9269_v3 = vpop.f32.mrf.mxu3  ;;  %12573 = vst [vmem:[#allocation27_spill] sm:$0xff] %v9288_v51  ;;  %vm12374_vm15 = vcmp.eq.s32.totalorder %v9288_v51, 0  ;;  %vm12373_vm12 = vcmp.eq.s32.totalorder %v9288_v51, 8  ;;  %v602_v61 = vshll.u32 %v599_v7, 16  ;;  %v604_v38 = vshll.u32 %v600_v11, 16 }
  0xb7   :  { %v9271_v12 = vpop.f32.mrf.mxu0  ;;  %v9273_v59 = vpop.f32.mrf.mxu1  ;;  %v853_v31 = vsel %vm12374_vm15, %v9238_v2, %v786_v56  ;;  %v962_v34 = vsel %vm12373_vm12, %v9128_v57, %v894_v58  ;;  %v587_v16 = vshrl.u32 %v586_v63, 3  ;;  %v781_v57 = vrot.slane %v9238_v2, 7  ;;  %v8088_v56 = vld [vmem:[#allocation2 + $0x2e4] sm:$0xf]  ;;  %v7216_v58 = vld [vmem:[#allocation2 + $0x2f0] sm:$0xf0] }
  0xb8   :  { %v871_v62 = vadd.f32 %v853_v31, %v9192_v27  ;;  %vm606_vm7 = vc.u32 %v598_v13, %v602_v61  ;;  %v608_v5 = vadd.s32 %v602_v61, %v598_v13  ;;  %v603_v9 = vshrl.u32 %v599_v7, 16 }
  0xb9   :  { %v588_v35 = vmul.u32 9, %v587_v16  ;;  %v607_v17 = vsel %vm606_vm7, 1, %v8460_v33  ;;  %v893_v31 = vsel %vm892_vm1, %v890_v41, %v891_v20  ;;  %v7219_v7 = vor.u32 %v8088_v56, %v7216_v58  ;;  %v8056_v41 = vld [vmem:[#allocation2 + $0x1e4] sm:$0xf] }
  0xba   :  { %v980_v32 = vadd.f32 %v962_v34, %v871_v62  ;;  %v609_v0 = vadd.s32 %v607_v17, %v601_v52  ;;  %vm610_vm4 = vc.u32 %v608_v5, %v604_v38  ;;  %v605_v34 = vshrl.u32 %v600_v11, 16  ;;  %v7344_v62 = vld [vmem:[#allocation2 + $0x3f0] sm:$0xf0] }
  0xbb   :  { %v589_v37 = vsub.s32 %v9205_v39, %v588_v35  ;;  %v611_v24 = vsel %vm610_vm4, 1, %v8460_v33  ;;  %v785_v39 = vsel %vm783_vm0, %v780_v14, %v781_v57  ;;  %v8024_v33 = vld [vmem:[#allocation2 + $0xe4] sm:$0xf]  ;;  %v7347_v16 = vor.u32 %v8120_v45, %v7344_v62  ;;  %v7088_v11 = vld [vmem:[#allocation2 + $0x1f0] sm:$0xf0]  ;;  %2536 = vmatpush.bf16.msra.mxu2 %v7219_v7 }
  0xbc   :  { %6787 = vmatmul.msk.f32.gmra.mxu0 %vm997_vm8, %v980_v32  ;;  %6805 = vmatmul.msk.f32.gmra.mxu1 %vm997_vm8, %v980_v32  ;;  %v613_v63 = vadd.s32 %v611_v24, %v609_v0  ;;  %v987_v24 = vld [vmem:[%s12344_s2] sm:$0xf] }
  0xbd   :  { %6823 = vmatmul.msk.f32.gmra.mxu2 %vm997_vm8, %v980_v32  ;;  %6841 = vmatmul.msk.f32.gmra.mxu3 %vm997_vm8, %v980_v32  ;;  %vm637_vm12 = vcmp.ne.s32.totalorder %v589_v37, 0  ;;  %vm655_vm15 = vcmp.lt.s32.totalorder %v589_v37, 0  ;;  %v691_v26 = vadd.s32 9, %v589_v37  ;;  %v6960_v32 = vld [vmem:[#allocation2 + $0xf0] sm:$0xf0]  ;;  %v9371_v7 = vperm.slane %v987_v24, 3 }
  0xbe   :  { %v9300_v43 = vpop.f32.mrf.mxu2  ;;  %v9302_v4 = vpop.f32.mrf.mxu3  ;;  %vm673_vm3 = vmand %vm655_vm15, %vm637_vm12  ;;  %v614_v14 = vadd.s32 %v613_v63, %v603_v9  ;;  %v6963_v35 = vor.u32 %v8024_v33, %v6960_v32  ;;  %2590 = vmatpush.bf16.msra.mxu3 %v7347_v16  ;;  %v7091_v9 = vor.u32 %v8056_v41, %v7088_v11  ;;  %v9369_v33 = vperm.slane %v987_v24, 2  ;;  %v8116_v41 = vld [vmem:[#allocation2 + $0x3c4] sm:$0xf] }
  0xbf   :  { %v9313_v49 = vpop.f32.mrf.mxu0  ;;  %v9315_v8 = vpop.f32.mrf.mxu1  ;;  %v9334_v13 = vsel %vm673_vm3, %v691_v26, %v589_v37  ;;  %v910_v16 = vsel %vm892_vm1, %v891_v20, %v874_v30  ;;  %v8020_v11 = vld [vmem:[#allocation2 + $0xc4] sm:$0xf] }
  0xc0   :  { %12574 = vst [vmem:[#allocation28_spill] sm:$0xff] %v9334_v13  ;;  %vm727_vm15 = vcmp.eq.s32.totalorder %v9334_v13, 0  ;;  %vm745_vm12 = vcmp.eq.s32.totalorder %v9334_v13, 8  ;;  %v615_v17 = vadd.s32 %v614_v14, %v605_v34  ;;  %2428 = vmatpush.bf16.msra.mxu0 %v6963_v35  ;;  %2482 = vmatpush.bf16.msra.mxu1 %v7091_v9  ;;  %v8084_v14 = vld [vmem:[#allocation2 + $0x2c4] sm:$0xf] }
  0xc1   :  { %v854_v38 = vsel %vm727_vm15, %v9310_v48, %v785_v39  ;;  %v963_v5 = vsel %vm745_vm12, %v9192_v27, %v893_v31  ;;  %v9361_v39 = vperm.slane %v987_v24, 0  ;;  %v9363_v31 = vperm.slane %v987_v24, 1  ;;  %v7200_v35 = vld [vmem:[#allocation2 + $0x2d0] sm:$0xf0] }
  0xc2   :  { %v872_v37 = vadd.f32 %v854_v38, %v9238_v2  ;;  %v616_v56 = vshrl.u32 %v615_v17, 3  ;;  %v6944_v38 = vld [vmem:[#allocation2 + $0xd0] sm:$0xf0]  ;;  %v7203_v9 = vor.u32 %v8084_v14, %v7200_v35  ;;  %v1215_v24 = vadd.f32 %v9300_v43, %v9369_v33 }
  0xc3   :  { %v1070_v43 = vadd.f32 %v9240_v53, %v9361_v39 }
  0xc4   :  { %v981_v0 = vadd.f32 %v963_v5, %v872_v37  ;;  %v617_v27 = vmul.u32 9, %v616_v56  ;;  %v8052_v5 = vld [vmem:[#allocation2 + $0x1c4] sm:$0xf]  ;;  %v7072_v37 = vld [vmem:[#allocation2 + $0x1d0] sm:$0xf0]  ;;  %v6947_v56 = vor.u32 %v8020_v11, %v6944_v38  ;;  %2537 = vmatpush.bf16.msra.mxu2 %v7203_v9 }
  0xc5   :  { %v8112_v9 = vld [vmem:[#allocation2 + $0x3a4] sm:$0xf] }
  0xc6   :  { %v9338_v52 = vpop.f32.mrf.mxu2  ;;  %v9340_v61 = vpop.f32.mrf.mxu3  ;;  %6788 = vmatmul.msk.f32.gmra.mxu0 %vm997_vm8, %v981_v0  ;;  %6806 = vmatmul.msk.f32.gmra.mxu1 %vm997_vm8, %v981_v0  ;;  %v618_v45 = vsub.s32 %v9261_v18, %v617_v27  ;;  %v784_v18 = vsel %vm783_vm0, %v781_v57, %v782_v29  ;;  %v1286_v27 = vadd.f32 %v9302_v4, %v9371_v7 }
  0xc7   :  { %v9349_v58 = vpop.f32.mrf.mxu0  ;;  %v9351_v26 = vpop.f32.mrf.mxu1  ;;  %6824 = vmatmul.msk.f32.gmra.mxu2 %vm997_vm8, %v981_v0  ;;  %6842 = vmatmul.msk.f32.gmra.mxu3 %vm997_vm8, %v981_v0  ;;  %v7331_v0 = vor.u32 %v8116_v41, %v7328_v25  ;;  %v1336_v25 = vmax.f32 %v1070_v43, 0.0 }
  0xc8   :  { %vm638_vm3 = vcmp.ne.s32.totalorder %v618_v45, 0  ;;  %vm656_vm7 = vcmp.lt.s32.totalorder %v618_v45, 0  ;;  %v692_v34 = vadd.s32 9, %v618_v45  ;;  %2429 = vmatpush.bf16.msra.mxu0 %v6947_v56  ;;  %v7312_v56 = vld [vmem:[#allocation2 + $0x3b0] sm:$0xf0] }
  0xc9   :  { %vm674_vm4 = vmand %vm656_vm7, %vm638_vm3  ;;  %2591 = vmatpush.bf16.msra.mxu3 %v7331_v0 }
  0xca   :  { %v9385_v32 = vsel %vm674_vm4, %v692_v34, %v618_v45  ;;  %v7075_v45 = vor.u32 %v8052_v5, %v7072_v37  ;;  %v1144_v34 = vadd.f32 %v9273_v59, %v9363_v31  ;;  %v1343_v59 = vmax.f32 %v1286_v27, 0.0  ;;  %v8080_v37 = vld [vmem:[#allocation2 + $0x2a4] sm:$0xf]  ;;  %v6928_v27 = vld [vmem:[#allocation2 + $0xb0] sm:$0xf0] }
  0xcb   :  { %12575 = vst [vmem:[#allocation29_spill] sm:$0xff] %v9385_v32  ;;  %vm728_vm3 = vcmp.eq.s32.totalorder %v9385_v32, 0  ;;  %vm746_vm7 = vcmp.eq.s32.totalorder %v9385_v32, 8  ;;  %vm12600_vm4 = vcmp.eq.s32.totalorder %v8799_v6, 8 }
  0xcc   :  { %v855_v29 = vsel %vm728_vm3, %v8348_v21, %v784_v18  ;;  %v964_v30 = vsel %vm746_vm7, %v9238_v2, %v910_v16  ;;  %v1073_v2 = vadd.f32 %v9271_v12, %v9361_v39  ;;  %v1283_v16 = vadd.f32 %v9269_v3, %v9371_v7  ;;  %2483 = vmatpush.bf16.msra.mxu1 %v7075_v45 }
  0xcd   :  { %v873_v17 = vadd.f32 %v9310_v48, %v855_v29  ;;  %v1212_v48 = vadd.f32 %v9267_v60, %v9369_v33  ;;  %v1141_v12 = vadd.f32 %v9242_v28, %v9363_v31  ;;  %v1342_v60 = vmax.f32 %v1215_v24, 0.0  ;;  %v8016_v24 = vld [vmem:[#allocation2 + $0xa4] sm:$0xf] }
  0xce   :  { %v9365_v63 = vpop.f32.mrf.mxu2  ;;  %v9367_v62 = vpop.f32.mrf.mxu3  ;;  %v1340_v14 = vmax.f32 %v1073_v2, 0.0  ;;  %v1341_v35 = vmax.f32 %v1144_v34, 0.0  ;;  %v1339_v41 = vmax.f32 %v1283_v16, 0.0  ;;  %v7315_v34 = vor.u32 %v8112_v9, %v7312_v56  ;;  %v7056_v16 = vld [vmem:[#allocation2 + $0x1b0] sm:$0xf0] }
  0xcf   :  { %v9397_v57 = vpop.f32.mrf.mxu0  ;;  %v9399_v20 = vpop.f32.mrf.mxu1  ;;  %v982_v18 = vadd.f32 %v964_v30, %v873_v17  ;;  %v1338_v53 = vmax.f32 %v1212_v48, 0.0  ;;  %v1337_v28 = vmax.f32 %v1141_v12, 0.0  ;;  %v7184_v17 = vld [vmem:[#allocation2 + $0x2b0] sm:$0xf0]  ;;  %v8048_v48 = vld [vmem:[#allocation2 + $0x1a4] sm:$0xf]  ;;  %v1221_v12 = vadd.f32 %v9365_v63, %v9369_v33 }
  0xd0   :  { %v9428_v21 = vpack.c.bf16 %v1343_v59, %v1339_v41  ;;  %v9434_v38 = vpack.c.bf16 %v1340_v14, %v1336_v25  ;;  %v7187_v0 = vor.u32 %v8080_v37, %v7184_v17  ;;  %v7059_v43 = vor.u32 %v8048_v48, %v7056_v16  ;;  %2592 = vmatpush.bf16.msra.mxu3 %v7315_v34  ;;  %v8076_v48 = vld [vmem:[#allocation2 + $0x284] sm:$0xf]  ;;  %v7168_v16 = vld [vmem:[#allocation2 + $0x290] sm:$0xf0] }
  0xd1   :  { %6789 = vmatmul.msk.f32.gmra.mxu0 %vm997_vm8, %v982_v18  ;;  %6807 = vmatmul.msk.f32.gmra.mxu1 %vm997_vm8, %v982_v18  ;;  %v9426_v11 = vpack.c.bf16 %v1342_v60, %v1338_v53  ;;  %v9436_v5 = vpack.c.bf16 %v1341_v35, %v1337_v28  ;;  %v1292_v60 = vadd.f32 %v9367_v62, %v9371_v7  ;;  %v1350_v25 = vmax.f32 %v1221_v12, 0.0  ;;  %v8108_v12 = vld [vmem:[#allocation2 + $0x384] sm:$0xf] }
  0xd2   :  { %6825 = vmatmul.msk.f32.gmra.mxu2 %vm997_vm8, %v982_v18  ;;  %6843 = vmatmul.msk.f32.gmra.mxu3 %vm997_vm8, %v982_v18  ;;  %12577 = vst [vmem:[#allocation31_spill] sm:$0xff] %v9428_v21  ;;  %v6931_v18 = vor.u32 %v8016_v24, %v6928_v27  ;;  %v1079_v59 = vadd.f32 %v9349_v58, %v9361_v39  ;;  %vm12598_vm8 = vcmp.eq.s32.totalorder %v8799_v6, 0 }
  0xd3   :  { %12576 = vst [vmem:[#allocation30_spill] sm:$0xff] %v9426_v11  ;;  %2538 = vmatpush.bf16.msra.mxu2 %v7187_v0  ;;  %v1150_v14 = vadd.f32 %v9351_v26, %v9363_v31  ;;  %2484 = vmatpush.bf16.msra.mxu1 %v7059_v43  ;;  %v1218_v35 = vadd.f32 %v9338_v52, %v9369_v33  ;;  %v1351_v28 = vmax.f32 %v1292_v60, 0.0  ;;  %v7296_v60 = vld [vmem:[#allocation2 + $0x390] sm:$0xf0] }
  0xd4   :  { %12578 = vst [vmem:[#allocation32_spill] sm:$0xff] %v9434_v38  ;;  %2430 = vmatpush.bf16.msra.mxu0 %v6931_v18  ;;  %v1289_v53 = vadd.f32 %v9340_v61, %v9371_v7  ;;  %v1076_v62 = vadd.f32 %v9313_v49, %v9361_v39  ;;  %v1147_v58 = vadd.f32 %v9315_v8, %v9363_v31  ;;  %v1348_v26 = vmax.f32 %v1079_v59, 0.0  ;;  %v8012_v59 = vld [vmem:[#allocation2 + $0x84] sm:$0xf] }
  0xd5   :  { %12579 = vst [vmem:[#allocation33_spill] sm:$0xff] %v9436_v5  ;;  %v1349_v37 = vmax.f32 %v1150_v14, 0.0  ;;  %v1346_v17 = vmax.f32 %v1218_v35, 0.0  ;;  %v7171_v43 = vor.u32 %v8076_v48, %v7168_v16  ;;  %v7299_v14 = vor.u32 %v8108_v12, %v7296_v60  ;;  %v6912_v35 = vld [vmem:[#allocation2 + $0x90] sm:$0xf0] }
  0xd6   :  { %v9422_v4 = vpop.f32.mrf.mxu2  ;;  %v9424_v3 = vpop.f32.mrf.mxu3  ;;  %v1347_v9 = vmax.f32 %v1289_v53, 0.0  ;;  %v1344_v52 = vmax.f32 %v1076_v62, 0.0  ;;  %v1345_v0 = vmax.f32 %v1147_v58, 0.0  ;;  %v8044_v53 = vld [vmem:[#allocation2 + $0x184] sm:$0xf]  ;;  %v6915_v58 = vor.u32 %v8012_v59, %v6912_v35 }
  0xd7   :  { %v9466_v24 = vpack.c.bf16 %v1350_v25, %v1346_v17  ;;  %v7040_v62 = vld [vmem:[#allocation2 + $0x190] sm:$0xf0]  ;;  %2539 = vmatpush.bf16.msra.mxu2 %v7171_v43  ;;  %2593 = vmatpush.bf16.msra.mxu3 %v7299_v14  ;;  %v1295_v48 = vadd.f32 %v9424_v3, %v9371_v7 }
  0xd8   :  { %v9468_v27 = vpack.c.bf16 %v1351_v28, %v1347_v9  ;;  %v9470_v49 = vpack.c.bf16 %v1348_v26, %v1344_v52  ;;  %v9472_v34 = vpack.c.bf16 %v1349_v37, %v1345_v0  ;;  %v7043_v25 = vor.u32 %v8044_v53, %v7040_v62  ;;  %2431 = vmatpush.bf16.msra.mxu0 %v6915_v58 }
  0xd9   :  { %2220 = vmatmul.bf16.vlgmr.msrb.gmra.mxu0 %v9434_v38  ;;  %2274 = vmatmul.bf16.vlgmr.msrb.gmra.mxu1 %v9436_v5  ;;  %12580 = vst [vmem:[#allocation34_spill] sm:$0xff] %v9466_v24  ;;  %v1224_v0 = vadd.f32 %v9422_v4, %v9369_v33  ;;  %v1355_v60 = vmax.f32 %v1295_v48, 0.0  ;;  %v8008_v48 = vld [vmem:[#allocation2 + $0x64] sm:$0xf] }
  0xda   :  { %v9430_v29 = vpop.f32.mrf.mxu0  ;;  %v9432_v30 = vpop.f32.mrf.mxu1  ;;  %2328 = vmatmul.bf16.vlgmr.msrb.gmra.mxu2 %v9426_v11  ;;  %2382 = vmatmul.bf16.vlgmr.msrb.gmra.mxu3 %v9428_v21  ;;  %12581 = vst [vmem:[#allocation35_spill] sm:$0xff] %v9468_v27 }
  0xdb   :  { %12582 = vst [vmem:[#allocation36_spill] sm:$0xff] %v9470_v49  ;;  %v1085_v37 = vadd.f32 %v9430_v29, %v9361_v39  ;;  %v1156_v17 = vadd.f32 %v9432_v30, %v9363_v31  ;;  %2485 = vmatpush.bf16.msra.mxu1 %v7043_v25  ;;  %v1354_v12 = vmax.f32 %v1224_v0, 0.0  ;;  %v8072_v25 = vld [vmem:[#allocation2 + $0x264] sm:$0xf] }
  0xdc   :  { %12583 = vst [vmem:[#allocation37_spill] sm:$0xff] %v9472_v34 }
  0xdd   :  { %v1356_v43 = vmax.f32 %v1085_v37, 0.0  ;;  %v1357_v30 = vmax.f32 %v1156_v17, 0.0  ;;  %v7280_v17 = vld [vmem:[#allocation2 + $0x370] sm:$0xf0] }
  0xe1   :  { %v1226_v45 = vpop.f32.mrf.mxu2  ;;  %v1297_v2 = vpop.f32.mrf.mxu3 }
  0xe2   :  { %v9454_v41 = vpop.f32.mrf.mxu0  ;;  %v9456_v63 = vpop.f32.mrf.mxu1  ;;  %v1227_v28 = vadd.f32 %v1226_v45, %v9369_v33  ;;  %v1298_v26 = vadd.f32 %v1297_v2, %v9371_v7  ;;  %v1082_v45 = vadd.f32 %v9397_v57, %v9361_v39  ;;  %v1153_v2 = vadd.f32 %v9399_v20, %v9363_v31 }
  0xe4   :  { %v1358_v29 = vmax.f32 %v1227_v28, 0.0  ;;  %v1359_v16 = vmax.f32 %v1298_v26, 0.0  ;;  %v1352_v4 = vmax.f32 %v1082_v45, 0.0  ;;  %v1353_v35 = vmax.f32 %v1153_v2, 0.0  ;;  %v7152_v28 = vld [vmem:[#allocation2 + $0x270] sm:$0xf0] }
  0xe5   :  { %v8104_v26 = vld [vmem:[#allocation2 + $0x364] sm:$0xf]  ;;  %v7155_v37 = vor.u32 %v8072_v25, %v7152_v28  ;;  %v6896_v45 = vld [vmem:[#allocation2 + $0x70] sm:$0xf0] }
  0xe6   :  { %v9500_v53 = vpack.c.bf16 %v1358_v29, %v1354_v12  ;;  %v9502_v3 = vpack.c.bf16 %v1359_v16, %v1355_v60  ;;  %v9504_v57 = vpack.c.bf16 %v1356_v43, %v1352_v4  ;;  %v9506_v62 = vpack.c.bf16 %v1357_v30, %v1353_v35  ;;  %v8040_v2 = vld [vmem:[#allocation2 + $0x164] sm:$0xf]  ;;  %v7024_v60 = vld [vmem:[#allocation2 + $0x170] sm:$0xf0] }
  0xe7   :  { %2540 = vmatpush.bf16.msra.mxu2 %v7155_v37  ;;  %v7283_v0 = vor.u32 %v8104_v26, %v7280_v17  ;;  %v6899_v12 = vor.u32 %v8008_v48, %v6896_v45  ;;  %v7027_v25 = vor.u32 %v8040_v2, %v7024_v60  ;;  %v1159_v26 = vadd.f32 %v9456_v63, %v9363_v31 }
  0xe9   :  { %v9462_v56 = vpop.f32.mrf.mxu2  ;;  %v9464_v61 = vpop.f32.mrf.mxu3  ;;  %2225 = vmatmul.bf16.gmra.mxu0 %v9470_v49  ;;  %2279 = vmatmul.bf16.gmra.mxu1 %v9472_v34  ;;  %v1361_v60 = vmax.f32 %v1159_v26, 0.0 }
  0xea   :  { %2333 = vmatmul.bf16.gmra.mxu2 %v9466_v24  ;;  %2387 = vmatmul.bf16.gmra.mxu3 %v9468_v27  ;;  %v1230_v28 = vadd.f32 %v9462_v56, %v9369_v33 }
  0xeb   :  { %2594 = vmatpush.bf16.msra.mxu3 %v7283_v0  ;;  %2432 = vmatpush.bf16.msra.mxu0 %v6899_v12 }
  0xec   :  { %v9478_v8 = vpop.f32.mrf.mxu0  ;;  %v9480_v18 = vpop.f32.mrf.mxu1  ;;  %2486 = vmatpush.bf16.msra.mxu1 %v7027_v25  ;;  %v1362_v45 = vmax.f32 %v1230_v28, 0.0  ;;  %v8068_v28 = vld [vmem:[#allocation2 + $0x244] sm:$0xf] }
  0xed   :  { %v1091_v4 = vadd.f32 %v9478_v8, %v9361_v39  ;;  %v1162_v35 = vadd.f32 %v9480_v18, %v9363_v31 }
  0xef   :  { %v1364_v17 = vmax.f32 %v1091_v4, 0.0  ;;  %v1365_v18 = vmax.f32 %v1162_v35, 0.0 }
  0xf3   :  { %v1232_v9 = vpop.f32.mrf.mxu2  ;;  %v1303_v52 = vpop.f32.mrf.mxu3 }
  0xf4   :  { %v1233_v29 = vadd.f32 %v1232_v9, %v9369_v33  ;;  %v1304_v16 = vadd.f32 %v1303_v52, %v9371_v7  ;;  %v1301_v9 = vadd.f32 %v9464_v61, %v9371_v7  ;;  %v1088_v52 = vadd.f32 %v9454_v41, %v9361_v39 }
  0xf5   :  { %v9532_v41 = vpack.c.bf16 %v1365_v18, %v1361_v60 }
  0xf6   :  { %v9496_v59 = vpop.f32.mrf.mxu0  ;;  %v9498_v14 = vpop.f32.mrf.mxu1  ;;  %v1366_v8 = vmax.f32 %v1233_v29, 0.0  ;;  %v1367_v37 = vmax.f32 %v1304_v16, 0.0  ;;  %v1363_v2 = vmax.f32 %v1301_v9, 0.0  ;;  %v1360_v56 = vmax.f32 %v1088_v52, 0.0  ;;  %v7136_v9 = vld [vmem:[#allocation2 + $0x250] sm:$0xf0] }
  0xf8   :  { %v9526_v32 = vpack.c.bf16 %v1366_v8, %v1362_v45  ;;  %v9528_v61 = vpack.c.bf16 %v1367_v37, %v1363_v2  ;;  %v9530_v12 = vpack.c.bf16 %v1364_v17, %v1360_v56  ;;  %v7139_v8 = vor.u32 %v8068_v28, %v7136_v9  ;;  %v8100_v37 = vld [vmem:[#allocation2 + $0x344] sm:$0xf]  ;;  %v7264_v17 = vld [vmem:[#allocation2 + $0x350] sm:$0xf0] }
  0xf9   :  { %2230 = vmatmul.bf16.gmra.mxu0 %v9504_v57  ;;  %2284 = vmatmul.bf16.gmra.mxu1 %v9506_v62  ;;  %v7267_v2 = vor.u32 %v8100_v37, %v7264_v17  ;;  %v1094_v56 = vadd.f32 %v9496_v59, %v9361_v39 }
  0xfa   :  { %2338 = vmatmul.bf16.gmra.mxu2 %v9500_v53  ;;  %2392 = vmatmul.bf16.gmra.mxu3 %v9502_v3 }
  0xfb   :  { %2541 = vmatpush.bf16.msra.mxu2 %v7139_v8  ;;  %2595 = vmatpush.bf16.msra.mxu3 %v7267_v2 }
  0xfd   :  { %v1235_v20 = vpop.f32.mrf.mxu2  ;;  %v1306_v58 = vpop.f32.mrf.mxu3 }
  0xfe   :  { %v1236_v18 = vadd.f32 %v1235_v20, %v9369_v33  ;;  %v1307_v45 = vadd.f32 %v1306_v58, %v9371_v7  ;;  %v1368_v20 = vmax.f32 %v1094_v56, 0.0 }
  0xff   :  { %v1096_v43 = vpop.f32.mrf.mxu0  ;;  %v1167_v30 = vpop.f32.mrf.mxu1 }
 0x100   :  { %v1097_v52 = vadd.f32 %v1096_v43, %v9361_v39  ;;  %v1168_v26 = vadd.f32 %v1167_v30, %v9363_v31  ;;  %v1370_v9 = vmax.f32 %v1236_v18, 0.0  ;;  %v1371_v13 = vmax.f32 %v1307_v45, 0.0 }
 0x102   :  { %v1372_v30 = vmax.f32 %v1097_v52, 0.0  ;;  %v1373_v28 = vmax.f32 %v1168_v26, 0.0  ;;  %v6880_v52 = vld [vmem:[#allocation2 + $0x50] sm:$0xf0]  ;;  %v8036_v26 = vld [vmem:[#allocation2 + $0x144] sm:$0xf] }
 0x104   :  { %v9552_v59 = vpack.c.bf16 %v1372_v30, %v1368_v20 }
 0x106   :  { %v1238_v0 = vpop.f32.mrf.mxu2  ;;  %v1309_v48 = vpop.f32.mrf.mxu3 }
 0x107   :  { %v1239_v4 = vadd.f32 %v1238_v0, %v9369_v33  ;;  %v1310_v35 = vadd.f32 %v1309_v48, %v9371_v7  ;;  %v1165_v0 = vadd.f32 %v9498_v14, %v9363_v31 }
 0x108   :  { %v1099_v63 = vpop.f32.mrf.mxu0  ;;  %v1170_v25 = vpop.f32.mrf.mxu1 }
 0x109   :  { %2235 = vmatmul.bf16.gmra.mxu0 %v9530_v12  ;;  %2289 = vmatmul.bf16.gmra.mxu1 %v9532_v41  ;;  %v1374_v48 = vmax.f32 %v1239_v4, 0.0  ;;  %v1375_v60 = vmax.f32 %v1310_v35, 0.0  ;;  %v1369_v51 = vmax.f32 %v1165_v0, 0.0  ;;  %v8004_v35 = vld [vmem:[#allocation2 + $0x44] sm:$0xf] }
 0x10a   :  { %2343 = vmatmul.bf16.gmra.mxu2 %v9526_v32  ;;  %2397 = vmatmul.bf16.gmra.mxu3 %v9528_v61  ;;  %v6883_v8 = vor.u32 %v8004_v35, %v6880_v52 }
 0x10b   :  { %v9548_v58 = vpack.c.bf16 %v1374_v48, %v1370_v9  ;;  %v9550_v37 = vpack.c.bf16 %v1375_v60, %v1371_v13  ;;  %v9554_v17 = vpack.c.bf16 %v1373_v28, %v1369_v51  ;;  %v7008_v13 = vld [vmem:[#allocation2 + $0x150] sm:$0xf0]  ;;  %v1100_v28 = vadd.f32 %v1099_v63, %v9361_v39 }
 0x10c   :  { %v7011_v18 = vor.u32 %v8036_v26, %v7008_v13  ;;  %2433 = vmatpush.bf16.msra.mxu0 %v6883_v8  ;;  %v1171_v9 = vadd.f32 %v1170_v25, %v9363_v31 }
 0x10d   :  { %v1376_v55 = vmax.f32 %v1100_v28, 0.0  ;;  %v6864_v28 = vld [vmem:[#allocation2 + $0x30] sm:$0xf0] }
 0x10e   :  { %2487 = vmatpush.bf16.msra.mxu1 %v7011_v18  ;;  %v8064_v18 = vld [vmem:[#allocation2 + $0x224] sm:$0xf] }
 0x10f   :  { %v1241_v29 = vpop.f32.mrf.mxu2  ;;  %v1312_v16 = vpop.f32.mrf.mxu3 }
 0x110   :  { %v1242_v60 = vadd.f32 %v1241_v29, %v9369_v33  ;;  %v1313_v30 = vadd.f32 %v1312_v16, %v9371_v7 }
 0x111   :  { %v1102_v43 = vpop.f32.mrf.mxu0  ;;  %v1173_v54 = vpop.f32.mrf.mxu1 }
 0x112   :  { %v1103_v0 = vadd.f32 %v1102_v43, %v9361_v39  ;;  %v1174_v48 = vadd.f32 %v1173_v54, %v9363_v31  ;;  %v1378_v13 = vmax.f32 %v1242_v60, 0.0  ;;  %v7120_v43 = vld [vmem:[#allocation2 + $0x230] sm:$0xf0]  ;;  %v1377_v54 = vmax.f32 %v1171_v9, 0.0 }
 0x113   :  { %v7123_v47 = vor.u32 %v8064_v18, %v7120_v43 }
 0x114   :  { %v1380_v8 = vmax.f32 %v1103_v0, 0.0  ;;  %v8096_v0 = vld [vmem:[#allocation2 + $0x324] sm:$0xf] }
 0x115   :  { %2542 = vmatpush.bf16.msra.mxu2 %v7123_v47 }
 0x116   :  { %v9572_v25 = vpack.c.bf16 %v1380_v8, %v1376_v55  ;;  %v8032_v55 = vld [vmem:[#allocation2 + $0x124] sm:$0xf] }
 0x118   :  { %v1244_v14 = vpop.f32.mrf.mxu2  ;;  %v1315_v4 = vpop.f32.mrf.mxu3  ;;  %12586 = vst [vmem:[#allocation40_spill] sm:$0xff] %v9572_v25 }
 0x119   :  { %2240 = vmatmul.bf16.gmra.mxu0 %v9552_v59  ;;  %2294 = vmatmul.bf16.gmra.mxu1 %v9554_v17  ;;  %v1245_v51 = vadd.f32 %v1244_v14, %v9369_v33  ;;  %v1316_v56 = vadd.f32 %v1315_v4, %v9371_v7  ;;  %v1381_v14 = vmax.f32 %v1174_v48, 0.0  ;;  %v1379_v4 = vmax.f32 %v1313_v30, 0.0  ;;  %v7248_v48 = vld [vmem:[#allocation2 + $0x330] sm:$0xf0]  ;;  %v8000_v30 = vld [vmem:[#allocation2 + $0x24] sm:$0xf] }
 0x11a   :  { %2348 = vmatmul.bf16.gmra.mxu2 %v9548_v58  ;;  %2402 = vmatmul.bf16.gmra.mxu3 %v9550_v37  ;;  %v7251_v60 = vor.u32 %v8096_v0, %v7248_v48  ;;  %v6867_v9 = vor.u32 %v8000_v30, %v6864_v28 }
 0x11b   :  { %v1382_v52 = vmax.f32 %v1245_v51, 0.0  ;;  %v1383_v26 = vmax.f32 %v1316_v56, 0.0  ;;  %v9574_v46 = vpack.c.bf16 %v1381_v14, %v1377_v54 }
 0x11c   :  { %2596 = vmatpush.bf16.msra.mxu3 %v7251_v60  ;;  %2434 = vmatpush.bf16.msra.mxu0 %v6867_v9 }
 0x11d   :  { %v9568_v29 = vpack.c.bf16 %v1382_v52, %v1378_v13  ;;  %v9570_v16 = vpack.c.bf16 %v1383_v26, %v1379_v4  ;;  %12587 = vst [vmem:[#allocation41_spill] sm:$0xff] %v9574_v46  ;;  %v6992_v52 = vld [vmem:[#allocation2 + $0x130] sm:$0xf0] }
 0x11e   :  { %v1105_v45 = vpop.f32.mrf.mxu0  ;;  %v1176_v2 = vpop.f32.mrf.mxu1  ;;  %v6995_v47 = vor.u32 %v8032_v55, %v6992_v52 }
 0x11f   :  { %12584 = vst [vmem:[#allocation38_spill] sm:$0xff] %v9568_v29  ;;  %v1106_v0 = vadd.f32 %v1105_v45, %v9361_v39  ;;  %v1177_v48 = vadd.f32 %v1176_v2, %v9363_v31 }
 0x120   :  { %12585 = vst [vmem:[#allocation39_spill] sm:$0xff] %v9570_v16  ;;  %2488 = vmatpush.bf16.msra.mxu1 %v6995_v47 }
 0x121   :  { %v1384_v52 = vmax.f32 %v1106_v0, 0.0  ;;  %v7232_v0 = vld [vmem:[#allocation2 + $0x310] sm:$0xf0] }
 0x125   :  { %v1247_v20 = vpop.f32.mrf.mxu2  ;;  %v1318_v35 = vpop.f32.mrf.mxu3 }
 0x126   :  { %v1108_v63 = vpop.f32.mrf.mxu0  ;;  %v1179_v10 = vpop.f32.mrf.mxu1  ;;  %v1248_v4 = vadd.f32 %v1247_v20, %v9369_v33  ;;  %v1319_v18 = vadd.f32 %v1318_v35, %v9371_v7 }
 0x127   :  { %v1109_v14 = vadd.f32 %v1108_v63, %v9361_v39  ;;  %v1180_v13 = vadd.f32 %v1179_v10, %v9363_v31  ;;  %v1385_v10 = vmax.f32 %v1177_v48, 0.0  ;;  %v7996_v48 = vld [vmem:[#allocation2 + $0x4] sm:$0xf] }
 0x128   :  { %v1386_v9 = vmax.f32 %v1248_v4, 0.0  ;;  %v1387_v63 = vmax.f32 %v1319_v18, 0.0  ;;  %v8092_v18 = vld [vmem:[#allocation2 + $0x304] sm:$0xf] }
 0x129   :  { %2245 = vmatmul.bf16.gmra.mxu0 %v9572_v25  ;;  %2299 = vmatmul.bf16.gmra.mxu1 %v9574_v46  ;;  %v1389_v55 = vmax.f32 %v1180_v13, 0.0 }
 0x12a   :  { %2353 = vmatmul.bf16.gmra.mxu2 %v9568_v29  ;;  %2407 = vmatmul.bf16.gmra.mxu3 %v9570_v16 }
 0x12b   :  { %v9594_v16 = vpack.c.bf16 %v1389_v55, %v1385_v10  ;;  %v6976_v55 = vld [vmem:[#allocation2 + $0x110] sm:$0xf0] }
 0x12d   :  { %v1250_v51 = vpop.f32.mrf.mxu2  ;;  %v1321_v56 = vpop.f32.mrf.mxu3  ;;  %12591 = vst [vmem:[#allocation45_spill] sm:$0xff] %v9594_v16 }
 0x12e   :  { %v1251_v26 = vadd.f32 %v1250_v51, %v9369_v33  ;;  %v1322_v8 = vadd.f32 %v1321_v56, %v9371_v7  ;;  %v1111_v43 = vpop.f32.mrf.mxu0  ;;  %v1182_v54 = vpop.f32.mrf.mxu1  ;;  %v1388_v56 = vmax.f32 %v1109_v14, 0.0 }
 0x130   :  { %v1390_v60 = vmax.f32 %v1251_v26, 0.0  ;;  %v1391_v30 = vmax.f32 %v1322_v8, 0.0  ;;  %v9592_v35 = vpack.c.bf16 %v1388_v56, %v1384_v52  ;;  %v8060_v26 = vld [vmem:[#allocation2 + $0x204] sm:$0xf]  ;;  %v7104_v8 = vld [vmem:[#allocation2 + $0x210] sm:$0xf0] }
 0x131   :  { %v7107_v14 = vor.u32 %v8060_v26, %v7104_v8  ;;  %v8028_v56 = vld [vmem:[#allocation2 + $0x104] sm:$0xf] }
 0x132   :  { %v9588_v47 = vpack.c.bf16 %v1390_v60, %v1386_v9  ;;  %v9590_v20 = vpack.c.bf16 %v1391_v30, %v1387_v63  ;;  %12590 = vst [vmem:[#allocation44_spill] sm:$0xff] %v9592_v35  ;;  %v7235_v60 = vor.u32 %v8092_v18, %v7232_v0  ;;  %v6848_v30 = vld [vmem:[#allocation2 + $0x10] sm:$0xf0]  ;;  %v6979_v10 = vor.u32 %v8028_v56, %v6976_v55 }
 0x133   :  { %2543 = vmatpush.bf16.msra.mxu2 %v7107_v14  ;;  %v6851_v52 = vor.u32 %v7996_v48, %v6848_v30  ;;  %v1112_v14 = vadd.f32 %v1111_v43, %v9361_v39  ;;  %v1183_v18 = vadd.f32 %v1182_v54, %v9363_v31 }
 0x134   :  { %12588 = vst [vmem:[#allocation42_spill] sm:$0xff] %v9588_v47  ;;  %2597 = vmatpush.bf16.msra.mxu3 %v7235_v60  ;;  %2489 = vmatpush.bf16.msra.mxu1 %v6979_v10  ;;  %v8123_v10 = vld [vmem:[#allocation2 + $0x3f4] sm:$0xf0] }
 0x135   :  { %v1253_v51 = vpop.f32.mrf.mxu2  ;;  %v1324_v28 = vpop.f32.mrf.mxu3  ;;  %12589 = vst [vmem:[#allocation43_spill] sm:$0xff] %v9590_v20  ;;  %2435 = vmatpush.bf16.msra.mxu0 %v6851_v52  ;;  %v1393_v60 = vmax.f32 %v1183_v18, 0.0 }
 0x136   :  { %v1254_v8 = vadd.f32 %v1253_v51, %v9369_v33 }
 0x138   :  { %v1394_v30 = vmax.f32 %v1254_v8, 0.0 }
 0x139   :  { %2250 = vmatmul.bf16.gmra.mxu0 %v9592_v35  ;;  %2304 = vmatmul.bf16.gmra.mxu1 %v9594_v16  ;;  %v1114_v45 = vpop.f32.mrf.mxu0  ;;  %v1185_v2 = vpop.f32.mrf.mxu1 }
 0x13a   :  { %2358 = vmatmul.bf16.gmra.mxu2 %v9588_v47  ;;  %2412 = vmatmul.bf16.gmra.mxu3 %v9590_v20  ;;  %v1115_v20 = vadd.f32 %v1114_v45, %v9361_v39  ;;  %v1186_v26 = vadd.f32 %v1185_v2, %v9363_v31  ;;  %v1325_v47 = vadd.f32 %v1324_v28, %v9371_v7  ;;  %v1392_v2 = vmax.f32 %v1112_v14, 0.0 }
 0x13c   :  { %v1397_v48 = vmax.f32 %v1186_v26, 0.0  ;;  %v1395_v56 = vmax.f32 %v1325_v47, 0.0  ;;  %v7222_v47 = vld [vmem:[#allocation2 + $0x2e8] sm:$0xf] }
 0x13e   :  { %v9614_v52 = vpack.c.bf16 %v1397_v48, %v1393_v60 }
 0x140   :  { %v1256_v13 = vpop.f32.mrf.mxu2  ;;  %v1327_v4 = vpop.f32.mrf.mxu3 }
 0x141   :  { %v1257_v9 = vadd.f32 %v1256_v13, %v9369_v33  ;;  %v1328_v63 = vadd.f32 %v1327_v4, %v9371_v7  ;;  %v1396_v4 = vmax.f32 %v1115_v20, 0.0  ;;  %v8091_v20 = vld [vmem:[#allocation2 + $0x2f4] sm:$0xf0] }
 0x143   :  { %v1398_v13 = vmax.f32 %v1257_v9, 0.0  ;;  %v1399_v0 = vmax.f32 %v1328_v63, 0.0  ;;  %v1117_v45 = vpop.f32.mrf.mxu0  ;;  %v1188_v55 = vpop.f32.mrf.mxu1  ;;  %v9612_v28 = vpack.c.bf16 %v1396_v4, %v1392_v2  ;;  %v7350_v9 = vld [vmem:[#allocation2 + $0x3e8] sm:$0xf]  ;;  %v7223_v63 = vor.u32 %v8091_v20, %v7222_v47 }
 0x144   :  { %v7351_v14 = vor.u32 %v8123_v10, %v7350_v9  ;;  %v1189_v4 = vadd.f32 %v1188_v55, %v9363_v31 }
 0x145   :  { %v9608_v16 = vpack.c.bf16 %v1398_v13, %v1394_v30  ;;  %v9610_v51 = vpack.c.bf16 %v1399_v0, %v1395_v56  ;;  %2752 = vmatpush.bf16.msrb.mxu2 %v7223_v63  ;;  %v1118_v0 = vadd.f32 %v1117_v45, %v9361_v39  ;;  %v8027_v45 = vld [vmem:[#allocation2 + $0xf4] sm:$0xf0] }
 0x146   :  { %2806 = vmatpush.bf16.msrb.mxu3 %v7351_v14  ;;  %v1401_v47 = vmax.f32 %v1189_v4, 0.0 }
 0x147   :  { %12592 = vst [vmem:[#allocation46_spill] sm:$0xff] %v9610_v51  ;;  %v1400_v60 = vmax.f32 %v1118_v0, 0.0 }
 0x149   :  { %2255 = vmatmul.bf16.gmra.mxu0 %v9612_v28  ;;  %2309 = vmatmul.bf16.gmra.mxu1 %v9614_v52 }
 0x14a   :  { %2363 = vmatmul.bf16.gmra.mxu2 %v9608_v16  ;;  %2417 = vmatmul.bf16.gmra.mxu3 %v9610_v51  ;;  %v1259_v43 = vpop.f32.mrf.mxu2  ;;  %v1330_v54 = vpop.f32.mrf.mxu3 }
 0x14b   :  { %v1260_v48 = vadd.f32 %v1259_v43, %v9369_v33  ;;  %v1331_v2 = vadd.f32 %v1330_v54, %v9371_v7 }
 0x14d   :  { %v1402_v20 = vmax.f32 %v1260_v48, 0.0  ;;  %v1403_v0 = vmax.f32 %v1331_v2, 0.0 }
 0x14e   :  { %v1120_v26 = vpop.f32.mrf.mxu0  ;;  %v1191_v8 = vpop.f32.mrf.mxu1 }
 0x14f   :  { %v1121_v18 = vadd.f32 %v1120_v26, %v9361_v39  ;;  %v1192_v13 = vadd.f32 %v1191_v8, %v9363_v31  ;;  %v6966_v39 = vld [vmem:[#allocation2 + $0xe8] sm:$0xf] }
 0x150   :  { %v7094_v31 = vld [vmem:[#allocation2 + $0x1e8] sm:$0xf]  ;;  %v6967_v54 = vor.u32 %v8027_v45, %v6966_v39  ;;  %v8023_v45 = vld [vmem:[#allocation2 + $0xd4] sm:$0xf0] }
 0x151   :  { %v1404_v30 = vmax.f32 %v1121_v18, 0.0  ;;  %v1405_v56 = vmax.f32 %v1192_v13, 0.0  ;;  %v8059_v13 = vld [vmem:[#allocation2 + $0x1f4] sm:$0xf0] }
 0x152   :  { %v7095_v51 = vor.u32 %v8059_v13, %v7094_v31  ;;  %2644 = vmatpush.bf16.msrb.mxu0 %v6967_v54  ;;  %v7078_v31 = vld [vmem:[#allocation2 + $0x1c8] sm:$0xf]  ;;  %v8055_v13 = vld [vmem:[#allocation2 + $0x1d4] sm:$0xf0] }
 0x153   :  { %v9628_v55 = vpack.c.bf16 %v1404_v30, %v1400_v60  ;;  %v9630_v43 = vpack.c.bf16 %v1405_v56, %v1401_v47  ;;  %v7206_v30 = vld [vmem:[#allocation2 + $0x2c8] sm:$0xf]  ;;  %v8087_v56 = vld [vmem:[#allocation2 + $0x2d4] sm:$0xf0] }
 0x154   :  { %2698 = vmatpush.bf16.msrb.mxu1 %v7095_v51  ;;  %v7207_v47 = vor.u32 %v8087_v56, %v7206_v30  ;;  %v6950_v51 = vld [vmem:[#allocation2 + $0xc8] sm:$0xf] }
 0x155   :  { %v1262_v9 = vpop.f32.mrf.mxu2  ;;  %v1333_v10 = vpop.f32.mrf.mxu3  ;;  %12593 = vst [vmem:[#allocation47_spill] sm:$0xff] %v9628_v55  ;;  %v6951_v54 = vor.u32 %v8023_v45, %v6950_v51 }
 0x156   :  { %v1263_v26 = vadd.f32 %v1262_v9, %v9369_v33  ;;  %v1334_v63 = vadd.f32 %v1333_v10, %v9371_v7  ;;  %v2221_v8 = vpop.f32.mrf.mxu0  ;;  %v2275_v14 = vpop.f32.mrf.mxu1  ;;  %12594 = vst [vmem:[#allocation48_spill] sm:$0xff] %v9630_v43  ;;  %2753 = vmatpush.bf16.msrb.mxu2 %v7207_v47 }
 0x157   :  { %v2276_v18 = vadd.f32 %v2275_v14, %v2221_v8  ;;  %v7334_v8 = vld [vmem:[#allocation2 + $0x3c8] sm:$0xf]  ;;  %v8119_v14 = vld [vmem:[#allocation2 + $0x3d4] sm:$0xf0]  ;;  %2645 = vmatpush.bf16.msrb.mxu0 %v6951_v54 }
 0x158   :  { %v1406_v4 = vmax.f32 %v1263_v26, 0.0  ;;  %v1407_v48 = vmax.f32 %v1334_v63, 0.0  ;;  %v7335_v39 = vor.u32 %v8119_v14, %v7334_v8 }
 0x159   :  { %2260 = vmatmul.bf16.gmra.mxu0 %v9628_v55  ;;  %2314 = vmatmul.bf16.gmra.mxu1 %v9630_v43 }
 0x15a   :  { %v9634_v33 = vpack.c.bf16 %v1406_v4, %v1402_v20  ;;  %v9636_v7 = vpack.c.bf16 %v1407_v48, %v1403_v0  ;;  %2807 = vmatpush.bf16.msrb.mxu3 %v7335_v39  ;;  %v7079_v48 = vor.u32 %v8055_v13, %v7078_v31  ;;  %v7190_v13 = vld [vmem:[#allocation2 + $0x2a8] sm:$0xf] }
 0x15c   :  { %12595 = vst [vmem:[#allocation49_spill] sm:$0xff] %v9634_v33  ;;  %2368 = vmatmul.bf16.gmra.mxu2 %v9634_v33  ;;  %2422 = vmatmul.bf16.gmra.mxu3 %v9636_v7 }
 0x15d   :  { %12596 = vst [vmem:[#allocation50_spill] sm:$0xff] %v9636_v7  ;;  %v2329_v2 = vpop.f32.mrf.mxu2  ;;  %v2383_v60 = vpop.f32.mrf.mxu3  ;;  %2699 = vmatpush.bf16.msrb.mxu1 %v7079_v48 }
 0x15e   :  { %v2223_v9 = vpop.f32.mrf.mxu0  ;;  %v2277_v10 = vpop.f32.mrf.mxu1  ;;  %v2330_v26 = vadd.f32 %v2329_v2, %v2276_v18 }
 0x15f   :  { %v2278_v63 = vadd.f32 %v2277_v10, %v2223_v9 }
 0x160   :  { %v9640_v20 = vadd.f32 %v2383_v60, %v2330_v26 }
 0x162   :  { %v12404_v8 = vrot.slane %v9640_v20, 7 }
 0x165   :  { %v2331_v0 = vpop.f32.mrf.mxu2  ;;  %v2385_v4 = vpop.f32.mrf.mxu3 }
 0x166   :  { %v2226_v30 = vpop.f32.mrf.mxu0  ;;  %v2280_v56 = vpop.f32.mrf.mxu1  ;;  %v2332_v7 = vadd.f32 %v2331_v0, %v2278_v63  ;;  %v8083_v0 = vld [vmem:[#allocation2 + $0x2b4] sm:$0xf0] }
 0x167   :  { %v2281_v18 = vadd.f32 %v2280_v56, %v2226_v30  ;;  %v7191_v48 = vor.u32 %v8083_v0, %v7190_v13  ;;  %v7318_v30 = vld [vmem:[#allocation2 + $0x3a8] sm:$0xf]  ;;  %v8115_v56 = vld [vmem:[#allocation2 + $0x3b4] sm:$0xf0] }
 0x168   :  { %v9642_v2 = vadd.f32 %v2385_v4, %v2332_v7 }
 0x169   :  { %2436 = vmatmul.bf16.vlgmr.msra.gmra.mxu0 %v9434_v38  ;;  %2490 = vmatmul.bf16.vlgmr.msra.gmra.mxu1 %v9436_v5 }
 0x16a   :  { %v3080_v60 = vrot.slane %v9642_v2, 7  ;;  %v12411_v39 = vrot.slane %v9642_v2, 1  ;;  %2754 = vmatpush.bf16.msrb.mxu2 %v7191_v48 }
 0x16c   :  { %2544 = vmatmul.bf16.vlgmr.msra.gmra.mxu2 %v9426_v11  ;;  %2598 = vmatmul.bf16.vlgmr.msra.gmra.mxu3 %v9428_v21  ;;  %v3212_v51 = vsel %vm783_vm0, %v12404_v8, %v3080_v60 }
 0x16d   :  { %v2334_v47 = vpop.f32.mrf.mxu2  ;;  %v2388_v9 = vpop.f32.mrf.mxu3 }
 0x16e   :  { %v2228_v10 = vpop.f32.mrf.mxu0  ;;  %v2282_v26 = vpop.f32.mrf.mxu1  ;;  %v2335_v63 = vadd.f32 %v2334_v47, %v2281_v18  ;;  %v6934_v18 = vld [vmem:[#allocation2 + $0xa8] sm:$0xf] }
 0x16f   :  { %v2283_v14 = vadd.f32 %v2282_v26, %v2228_v10  ;;  %v7319_v10 = vor.u32 %v8115_v56, %v7318_v30  ;;  %v8019_v26 = vld [vmem:[#allocation2 + $0xb4] sm:$0xf0] }
 0x170   :  { %v9650_v7 = vadd.f32 %v2388_v9, %v2335_v63  ;;  %v7062_v63 = vld [vmem:[#allocation2 + $0x1a8] sm:$0xf]  ;;  %v6935_v8 = vor.u32 %v8019_v26, %v6934_v18 }
 0x171   :  { %2808 = vmatpush.bf16.msrb.mxu3 %v7319_v10  ;;  %v9696_v10 = vld [vmem:[%s12346_s4] sm:$0xf] }
 0x172   :  { %v3084_v45 = vrot.slane %v9650_v7, 7  ;;  %v3224_v31 = vsel %vm712_vm5, %v9650_v7, %v3212_v51  ;;  %v3372_v54 = vrot.slane %v9650_v7, 1  ;;  %v8051_v51 = vld [vmem:[#allocation2 + $0x1b4] sm:$0xf0]  ;;  %2646 = vmatpush.bf16.msrb.mxu0 %v6935_v8  ;;  %12597 = vst [vmem:[#allocation51_spill] sm:$0xff] %v9696_v10 }
 0x173   :  { %v3296_v4 = vadd.f32 %v3224_v31, %v9642_v2  ;;  %v7063_v21 = vor.u32 %v8051_v51, %v7062_v63 }
 0x174   :  { %v3496_v47 = vsel %vm892_vm1, %v12411_v39, %v3372_v54  ;;  %v3208_v9 = vsel %vm783_vm0, %v3080_v60, %v3084_v45 }
 0x175   :  { %v3512_v31 = vsel %vm730_vm6, %v9640_v20, %v3496_v47  ;;  %v2336_v13 = vpop.f32.mrf.mxu2  ;;  %v2390_v0 = vpop.f32.mrf.mxu3  ;;  %2700 = vmatpush.bf16.msrb.mxu1 %v7063_v21 }
 0x176   :  { %v9672_v11 = vadd.f32 %v3512_v31, %v3296_v4  ;;  %v2231_v5 = vpop.f32.mrf.mxu0  ;;  %v2285_v39 = vpop.f32.mrf.mxu1  ;;  %v2337_v38 = vadd.f32 %v2336_v13, %v2283_v14 }
 0x177   :  { %v2286_v60 = vadd.f32 %v2285_v39, %v2231_v5 }
 0x178   :  { %v9674_v30 = vadd.f32 %v2390_v0, %v2337_v38  ;;  %v7174_v0 = vld [vmem:[#allocation2 + $0x288] sm:$0xf] }
 0x179   :  { %2441 = vmatmul.bf16.gmra.mxu0 %v9470_v49  ;;  %2495 = vmatmul.bf16.gmra.mxu1 %v9472_v34 }
 0x17a   :  { %v3088_v56 = vrot.slane %v9674_v30, 7  ;;  %v3228_v4 = vsel %vm713_vm11, %v9674_v30, %v3208_v9  ;;  %v3376_v48 = vrot.slane %v9674_v30, 1 }
 0x17b   :  { %v3300_v14 = vadd.f32 %v3228_v4, %v9650_v7 }
 0x17c   :  { %2549 = vmatmul.bf16.gmra.mxu2 %v9466_v24  ;;  %2603 = vmatmul.bf16.gmra.mxu3 %v9468_v27  ;;  %v3204_v21 = vsel %vm783_vm0, %v3084_v45, %v3088_v56  ;;  %v3492_v38 = vsel %vm892_vm1, %v3372_v54, %v3376_v48  ;;  %v9701_v54 = vperm.slane %v9696_v10, 0  ;;  %v8047_v10 = vld [vmem:[#allocation2 + $0x194] sm:$0xf0] }
 0x17d   :  { %v2339_v5 = vpop.f32.mrf.mxu2  ;;  %v2393_v8 = vpop.f32.mrf.mxu3  ;;  %v3516_v39 = vsel %vm731_vm14, %v9642_v2, %v3492_v38  ;;  %v7302_v38 = vld [vmem:[#allocation2 + $0x388] sm:$0xf] }
 0x17e   :  { %v2233_v18 = vpop.f32.mrf.mxu0  ;;  %v2287_v47 = vpop.f32.mrf.mxu1  ;;  %v2340_v9 = vadd.f32 %v2339_v5, %v2286_v60  ;;  %v3588_v26 = vadd.f32 %v3516_v39, %v3300_v14  ;;  %v8079_v60 = vld [vmem:[#allocation2 + $0x294] sm:$0xf0]  ;;  %v6918_v14 = vld [vmem:[#allocation2 + $0x88] sm:$0xf] }
 0x17f   :  { %v2288_v63 = vadd.f32 %v2287_v47, %v2233_v18  ;;  %v7175_v4 = vor.u32 %v8079_v60, %v7174_v0  ;;  %v8111_v5 = vld [vmem:[#allocation2 + $0x394] sm:$0xf0] }
 0x180   :  { %v9698_v45 = vadd.f32 %v2393_v8, %v2340_v9  ;;  %v7303_v18 = vor.u32 %v8111_v5, %v7302_v38  ;;  %v8015_v47 = vld [vmem:[#allocation2 + $0x94] sm:$0xf0]  ;;  %v7046_v9 = vld [vmem:[#allocation2 + $0x188] sm:$0xf] }
 0x181   :  { %2755 = vmatpush.bf16.msrb.mxu2 %v7175_v4  ;;  %v6919_v44 = vor.u32 %v8015_v47, %v6918_v14  ;;  %v7047_v0 = vor.u32 %v8047_v10, %v7046_v9 }
 0x182   :  { %v3092_v51 = vrot.slane %v9698_v45, 7  ;;  %v3232_v31 = vsel %vm714_vm9, %v9698_v45, %v3204_v21  ;;  %v3380_v13 = vrot.slane %v9698_v45, 1  ;;  %2809 = vmatpush.bf16.msrb.mxu3 %v7303_v18 }
 0x183   :  { %v3304_v8 = vadd.f32 %v3232_v31, %v9674_v30  ;;  %v3670_v31 = vadd.f32 %v9701_v54, %v3588_v26  ;;  %2647 = vmatpush.bf16.msrb.mxu0 %v6919_v44  ;;  %2701 = vmatpush.bf16.msrb.mxu1 %v7047_v0 }
 0x184   :  { %v3200_v39 = vsel %vm783_vm0, %v3088_v56, %v3092_v51  ;;  %v3488_v21 = vsel %vm892_vm1, %v3376_v48, %v3380_v13 }
 0x185   :  { %v2341_v27 = vpop.f32.mrf.mxu2  ;;  %v2395_v24 = vpop.f32.mrf.mxu3  ;;  %v3520_v60 = vsel %vm732_vm10, %v9650_v7, %v3488_v21  ;;  %v3742_v10 = vmax.f32 %v3670_v31, 0.0 }
 0x186   :  { %v2236_v34 = vpop.f32.mrf.mxu0  ;;  %v2290_v56 = vpop.f32.mrf.mxu1  ;;  %v2342_v38 = vadd.f32 %v2341_v27, %v2288_v63  ;;  %v3592_v5 = vadd.f32 %v3520_v60, %v3304_v8 }
 0x187   :  { %v2291_v49 = vadd.f32 %v2290_v56, %v2236_v34 }
 0x188   :  { %v9717_v48 = vadd.f32 %v2395_v24, %v2342_v38  ;;  %v3674_v4 = vadd.f32 %v9701_v54, %v3592_v5  ;;  %v7158_v38 = vld [vmem:[#allocation2 + $0x268] sm:$0xf]  ;;  %v8075_v5 = vld [vmem:[#allocation2 + $0x274] sm:$0xf0] }
 0x189   :  { %2446 = vmatmul.bf16.gmra.mxu0 %v9504_v57  ;;  %2500 = vmatmul.bf16.gmra.mxu1 %v9506_v62 }
 0x18a   :  { %v3096_v7 = vrot.slane %v9717_v48, 7  ;;  %v3236_v27 = vsel %vm12598_vm8, %v9717_v48, %v3200_v39  ;;  %v3384_v26 = vrot.slane %v9717_v48, 1  ;;  %v3746_v34 = vmax.f32 %v3674_v4, 0.0 }
 0x18b   :  { %v3308_v44 = vadd.f32 %v3236_v27, %v9698_v45  ;;  %vm12601_vm8 = vcmp.eq.s32.totalorder %v8854_v15, 0  ;;  %v7159_v4 = vor.u32 %v8075_v5, %v7158_v38  ;;  %v6902_v5 = vld [vmem:[#allocation2 + $0x68] sm:$0xf] }
 0x18c   :  { %2554 = vmatmul.bf16.gmra.mxu2 %v9500_v53  ;;  %2608 = vmatmul.bf16.gmra.mxu3 %v9502_v3  ;;  %v3196_v24 = vsel %vm783_vm0, %v3092_v51, %v3096_v7  ;;  %v9732_v63 = vpack.c.bf16 %v3746_v34, %v3742_v10  ;;  %v3484_v14 = vsel %vm892_vm1, %v3380_v13, %v3384_v26  ;;  %v7286_v10 = vld [vmem:[#allocation2 + $0x368] sm:$0xf] }
 0x18d   :  { %v2344_v8 = vpop.f32.mrf.mxu2  ;;  %v2398_v18 = vpop.f32.mrf.mxu3  ;;  %v3524_v39 = vsel %vm12600_vm4, %v9674_v30, %v3484_v14  ;;  %v8107_v30 = vld [vmem:[#allocation2 + $0x374] sm:$0xf0]  ;;  %2756 = vmatpush.bf16.msrb.mxu2 %v7159_v4  ;;  %vm12602_vm4 = vcmp.eq.s32.totalorder %v8854_v15, 8 }
 0x18e   :  { %12599 = vst [vmem:[#allocation52_spill] sm:$0xff] %v9732_v63  ;;  %v2238_v47 = vpop.f32.mrf.mxu0  ;;  %v2292_v9 = vpop.f32.mrf.mxu1  ;;  %v2345_v21 = vadd.f32 %v2344_v8, %v2291_v49  ;;  %v3596_v0 = vadd.f32 %v3524_v39, %v3308_v44  ;;  %v7287_v34 = vor.u32 %v8107_v30, %v7286_v10  ;;  %v8011_v4 = vld [vmem:[#allocation2 + $0x74] sm:$0xf0] }
 0x18f   :  { %v2293_v60 = vadd.f32 %v2292_v9, %v2238_v47  ;;  %v6903_v10 = vor.u32 %v8011_v4, %v6902_v5  ;;  %v8043_v30 = vld [vmem:[#allocation2 + $0x174] sm:$0xf0] }
 0x190   :  { %v9739_v31 = vadd.f32 %v2398_v18, %v2345_v21  ;;  %2810 = vmatpush.bf16.msrb.mxu3 %v7287_v34 }
 0x191   :  { %2648 = vmatpush.bf16.msrb.mxu0 %v6903_v10 }
 0x192   :  { %v3100_v51 = vrot.slane %v9739_v31, 7  ;;  %v3240_v56 = vsel %vm12601_vm8, %v9739_v31, %v3196_v24  ;;  %v3388_v13 = vrot.slane %v9739_v31, 1  ;;  %vm12603_vm8 = vcmp.eq.s32.totalorder %v8880_v40, 0 }
 0x193   :  { %v3312_v27 = vadd.f32 %v3240_v56, %v9717_v48  ;;  %v3678_v56 = vadd.f32 %v9701_v54, %v3596_v0  ;;  %v7030_v0 = vld [vmem:[#allocation2 + $0x168] sm:$0xf] }
 0x194   :  { %v3192_v49 = vsel %vm783_vm0, %v3096_v7, %v3100_v51  ;;  %v3480_v44 = vsel %vm892_vm1, %v3384_v26, %v3388_v13 }
 0x195   :  { %v2346_v14 = vpop.f32.mrf.mxu2  ;;  %v2400_v8 = vpop.f32.mrf.mxu3  ;;  %v3528_v24 = vsel %vm12602_vm4, %v9698_v45, %v3480_v44  ;;  %vm12605_vm4 = vcmp.eq.s32.totalorder %v8880_v40, 8 }
 0x196   :  { %v2241_v18 = vpop.f32.mrf.mxu0  ;;  %v2295_v39 = vpop.f32.mrf.mxu1  ;;  %v2347_v47 = vadd.f32 %v2346_v14, %v2293_v60  ;;  %v3600_v9 = vadd.f32 %v3528_v24, %v3312_v27  ;;  %v3750_v27 = vmax.f32 %v3678_v56, 0.0 }
 0x197   :  { %v2296_v21 = vadd.f32 %v2295_v39, %v2241_v18 }
 0x198   :  { %v9755_v7 = vadd.f32 %v2400_v8, %v2347_v47  ;;  %v3682_v38 = vadd.f32 %v9701_v54, %v3600_v9  ;;  %v7031_v8 = vor.u32 %v8043_v30, %v7030_v0  ;;  %v7142_v0 = vld [vmem:[#allocation2 + $0x248] sm:$0xf]  ;;  %v8071_v30 = vld [vmem:[#allocation2 + $0x254] sm:$0xf0] }
 0x199   :  { %2451 = vmatmul.bf16.gmra.mxu0 %v9530_v12  ;;  %2505 = vmatmul.bf16.gmra.mxu1 %v9532_v41 }
 0x19a   :  { %v3104_v26 = vrot.slane %v9755_v7, 7  ;;  %v3244_v45 = vsel %vm12603_vm8, %v9755_v7, %v3192_v49  ;;  %v3392_v60 = vrot.slane %v9755_v7, 1  ;;  %v3754_v34 = vmax.f32 %v3682_v38, 0.0  ;;  %2702 = vmatpush.bf16.msrb.mxu1 %v7031_v8 }
 0x19b   :  { %v3316_v44 = vadd.f32 %v3244_v45, %v9739_v31  ;;  %vm12606_vm8 = vcmp.eq.s32.totalorder %v8935_v19, 0 }
 0x19c   :  { %2559 = vmatmul.bf16.gmra.mxu2 %v9526_v32  ;;  %2613 = vmatmul.bf16.gmra.mxu3 %v9528_v61  ;;  %v3188_v14 = vsel %vm783_vm0, %v3100_v51, %v3104_v26  ;;  %v3476_v49 = vsel %vm892_vm1, %v3388_v13, %v3392_v60  ;;  %v9772_v39 = vpack.c.bf16 %v3754_v34, %v3750_v27 }
 0x19d   :  { %v2349_v24 = vpop.f32.mrf.mxu2  ;;  %v2403_v18 = vpop.f32.mrf.mxu3  ;;  %v3532_v47 = vsel %vm12605_vm4, %v9717_v48, %v3476_v49  ;;  %v7143_v27 = vor.u32 %v8071_v30, %v7142_v0  ;;  %vm12607_vm4 = vcmp.eq.s32.totalorder %v8935_v19, 8  ;;  %v8103_v0 = vld [vmem:[#allocation2 + $0x354] sm:$0xf0] }
 0x19e   :  { %12604 = vst [vmem:[#allocation53_spill] sm:$0xff] %v9772_v39  ;;  %v2243_v9 = vpop.f32.mrf.mxu0  ;;  %v2297_v56 = vpop.f32.mrf.mxu1  ;;  %v2350_v38 = vadd.f32 %v2349_v24, %v2296_v21  ;;  %v3604_v45 = vadd.f32 %v3532_v47, %v3316_v44 }
 0x19f   :  { %v2298_v5 = vadd.f32 %v2297_v56, %v2243_v9  ;;  %2757 = vmatpush.bf16.msrb.mxu2 %v7143_v27  ;;  %v6886_v27 = vld [vmem:[#allocation2 + $0x48] sm:$0xf] }
 0x1a0   :  { %v9777_v51 = vadd.f32 %v2403_v18, %v2350_v38  ;;  %v3686_v49 = vadd.f32 %v9701_v54, %v3604_v45 }
 0x1a2   :  { %v3108_v4 = vrot.slane %v9777_v51, 7  ;;  %v3248_v13 = vsel %vm12606_vm8, %v9777_v51, %v3188_v14  ;;  %v3396_v10 = vrot.slane %v9777_v51, 1  ;;  %vm12608_vm8 = vcmp.eq.s32.totalorder %v8981_v50, 0 }
 0x1a3   :  { %v3320_v48 = vadd.f32 %v3248_v13, %v9755_v7 }
 0x1a4   :  { %v3184_v21 = vsel %vm783_vm0, %v3104_v26, %v3108_v4  ;;  %v3472_v34 = vsel %vm892_vm1, %v3392_v60, %v3396_v10  ;;  %v3758_v60 = vmax.f32 %v3686_v49, 0.0  ;;  %v8039_v49 = vld [vmem:[#allocation2 + $0x154] sm:$0xf0] }
 0x1a5   :  { %v2351_v44 = vpop.f32.mrf.mxu2  ;;  %v2405_v8 = vpop.f32.mrf.mxu3  ;;  %v3536_v14 = vsel %vm12607_vm4, %v9739_v31, %v3472_v34  ;;  %v7014_v34 = vld [vmem:[#allocation2 + $0x148] sm:$0xf]  ;;  %vm12609_vm4 = vcmp.eq.s32.totalorder %v8981_v50, 8 }
 0x1a6   :  { %v2246_v24 = vpop.f32.mrf.mxu0  ;;  %v2300_v18 = vpop.f32.mrf.mxu1  ;;  %v2352_v47 = vadd.f32 %v2351_v44, %v2298_v5  ;;  %v3608_v9 = vadd.f32 %v3536_v14, %v3320_v48  ;;  %v7270_v5 = vld [vmem:[#allocation2 + $0x348] sm:$0xf]  ;;  %v8007_v48 = vld [vmem:[#allocation2 + $0x54] sm:$0xf0] }
 0x1a7   :  { %v2301_v56 = vadd.f32 %v2300_v18, %v2246_v24  ;;  %v7271_v30 = vor.u32 %v8103_v0, %v7270_v5  ;;  %v6887_v14 = vor.u32 %v8007_v48, %v6886_v27 }
 0x1a8   :  { %v9793_v38 = vadd.f32 %v2405_v8, %v2352_v47  ;;  %v3690_v26 = vadd.f32 %v9701_v54, %v3608_v9  ;;  %v7015_v9 = vor.u32 %v8039_v49, %v7014_v34 }
 0x1a9   :  { %2456 = vmatmul.bf16.gmra.mxu0 %v9552_v59  ;;  %2510 = vmatmul.bf16.gmra.mxu1 %v9554_v17 }
 0x1aa   :  { %v3112_v13 = vrot.slane %v9793_v38, 7  ;;  %v3252_v31 = vsel %vm12608_vm8, %v9793_v38, %v3184_v21  ;;  %v3400_v45 = vrot.slane %v9793_v38, 1  ;;  %v3762_v21 = vmax.f32 %v3690_v26, 0.0  ;;  %2811 = vmatpush.bf16.msrb.mxu3 %v7271_v30  ;;  %2649 = vmatpush.bf16.msrb.mxu0 %v6887_v14 }
 0x1ab   :  { %v3324_v44 = vadd.f32 %v3252_v31, %v9777_v51  ;;  %2703 = vmatpush.bf16.msrb.mxu1 %v7015_v9  ;;  %vm12611_vm8 = vcmp.eq.s32.totalorder %v9020_v42, 0 }
 0x1ac   :  { %2564 = vmatmul.bf16.gmra.mxu2 %v9548_v58  ;;  %2618 = vmatmul.bf16.gmra.mxu3 %v9550_v37  ;;  %v3180_v8 = vsel %vm783_vm0, %v3108_v4, %v3112_v13  ;;  %v3468_v24 = vsel %vm892_vm1, %v3396_v10, %v3400_v45  ;;  %v9813_v63 = vpack.c.bf16 %v3762_v21, %v3758_v60 }
 0x1ad   :  { %v2354_v18 = vpop.f32.mrf.mxu2  ;;  %v2408_v47 = vpop.f32.mrf.mxu3  ;;  %v3540_v31 = vsel %vm12609_vm4, %v9755_v7, %v3468_v24  ;;  %vm12612_vm4 = vcmp.eq.s32.totalorder %v9020_v42, 8 }
 0x1ae   :  { %v2248_v5 = vpop.f32.mrf.mxu0  ;;  %v2302_v0 = vpop.f32.mrf.mxu1  ;;  %v2355_v39 = vadd.f32 %v2354_v18, %v2301_v56  ;;  %12610 = vst [vmem:[#allocation54_spill] sm:$0xff] %v9813_v63  ;;  %v3612_v4 = vadd.f32 %v3540_v31, %v3324_v44  ;;  %v7126_v31 = vld [vmem:[#allocation2 + $0x228] sm:$0xf] }
 0x1af   :  { %v2303_v27 = vadd.f32 %v2302_v0, %v2248_v5  ;;  %v8067_v5 = vld [vmem:[#allocation2 + $0x234] sm:$0xf0] }
 0x1b0   :  { %v9815_v26 = vadd.f32 %v2408_v47, %v2355_v39  ;;  %v3694_v18 = vadd.f32 %v9701_v54, %v3612_v4  ;;  %v7127_v0 = vor.u32 %v8067_v5, %v7126_v31  ;;  %v7254_v4 = vld [vmem:[#allocation2 + $0x328] sm:$0xf] }
 0x1b2   :  { %v3116_v10 = vrot.slane %v9815_v26, 7  ;;  %v3256_v30 = vsel %vm12611_vm8, %v9815_v26, %v3180_v8  ;;  %v3404_v48 = vrot.slane %v9815_v26, 1  ;;  %vm12613_vm8 = vcmp.eq.s32.totalorder %v9070_v23, 0  ;;  %2758 = vmatpush.bf16.msrb.mxu2 %v7127_v0 }
 0x1b3   :  { %v3328_v7 = vadd.f32 %v3256_v30, %v9793_v38  ;;  %v3766_v30 = vmax.f32 %v3694_v18, 0.0 }
 0x1b4   :  { %v3176_v56 = vsel %vm783_vm0, %v3112_v13, %v3116_v10  ;;  %v3464_v60 = vsel %vm892_vm1, %v3400_v45, %v3404_v48 }
 0x1b5   :  { %v2356_v34 = vpop.f32.mrf.mxu2  ;;  %v2410_v44 = vpop.f32.mrf.mxu3  ;;  %v3544_v39 = vsel %vm12612_vm4, %v9777_v51, %v3464_v60  ;;  %vm12616_vm4 = vcmp.eq.s32.totalorder %v9070_v23, 8 }
 0x1b6   :  { %v2251_v14 = vpop.f32.mrf.mxu0  ;;  %v2305_v49 = vpop.f32.mrf.mxu1  ;;  %v2357_v21 = vadd.f32 %v2356_v34, %v2303_v27  ;;  %v3616_v8 = vadd.f32 %v3544_v39, %v3328_v7  ;;  %v8099_v27 = vld [vmem:[#allocation2 + $0x334] sm:$0xf0]  ;;  %v12614_v34 = vld [vmem:[#allocation39_spill] sm:$0xff] }
 0x1b7   :  { %v2306_v24 = vadd.f32 %v2305_v49, %v2251_v14  ;;  %v7255_v39 = vor.u32 %v8099_v27, %v7254_v4  ;;  %v8003_v14 = vld [vmem:[#allocation2 + $0x34] sm:$0xf0]  ;;  %v6998_v49 = vld [vmem:[#allocation2 + $0x128] sm:$0xf] }
 0x1b8   :  { %v9831_v47 = vadd.f32 %v2410_v44, %v2357_v21  ;;  %v3698_v13 = vadd.f32 %v9701_v54, %v3616_v8 }
 0x1b9   :  { %2461 = vmatmul.bf16.gmra.mxu0 %v9572_v25  ;;  %2515 = vmatmul.bf16.gmra.mxu1 %v9574_v46 }
 0x1ba   :  { %v3120_v45 = vrot.slane %v9831_v47, 7  ;;  %v3260_v51 = vsel %vm12613_vm8, %v9831_v47, %v3176_v56  ;;  %v3408_v9 = vrot.slane %v9831_v47, 1  ;;  %v3770_v7 = vmax.f32 %v3698_v13, 0.0  ;;  %v6870_v56 = vld [vmem:[#allocation2 + $0x28] sm:$0xf]  ;;  %2812 = vmatpush.bf16.msrb.mxu3 %v7255_v39 }
 0x1bb   :  { %v3332_v60 = vadd.f32 %v3260_v51, %v9815_v26  ;;  %v6871_v18 = vor.u32 %v8003_v14, %v6870_v56  ;;  %v8035_v13 = vld [vmem:[#allocation2 + $0x134] sm:$0xf0] }
 0x1bc   :  { %2569 = vmatmul.bf16.gmra.mxu2 %v9568_v29  ;;  %2623 = vmatmul.bf16.gmra.mxu3 %v12614_v34  ;;  %v3172_v44 = vsel %vm783_vm0, %v3116_v10, %v3120_v45  ;;  %v3460_v21 = vsel %vm892_vm1, %v3404_v48, %v3408_v9  ;;  %v9848_v51 = vpack.c.bf16 %v3770_v7, %v3766_v30  ;;  %v12617_v30 = vld [vmem:[#allocation23_spill] sm:$0xff] }
 0x1bd   :  { %v2359_v8 = vpop.f32.mrf.mxu2  ;;  %v2413_v31 = vpop.f32.mrf.mxu3  ;;  %v3548_v5 = vsel %vm12616_vm4, %v9793_v38, %v3460_v21  ;;  %v6999_v27 = vor.u32 %v8035_v13, %v6998_v49  ;;  %2650 = vmatpush.bf16.msrb.mxu0 %v6871_v18  ;;  %vm12618_vm8 = vcmp.eq.s32.totalorder %v12617_v30, 0  ;;  %vm12619_vm4 = vcmp.eq.s32.totalorder %v12617_v30, 8 }
 0x1be   :  { %12615 = vst [vmem:[#allocation55_spill] sm:$0xff] %v9848_v51  ;;  %v2253_v63 = vpop.f32.mrf.mxu0  ;;  %v2307_v10 = vpop.f32.mrf.mxu1  ;;  %v2360_v4 = vadd.f32 %v2359_v8, %v2306_v24  ;;  %v3620_v34 = vadd.f32 %v3548_v5, %v3332_v60  ;;  %v8063_v51 = vld [vmem:[#allocation2 + $0x214] sm:$0xf0] }
 0x1bf   :  { %v2308_v29 = vadd.f32 %v2307_v10, %v2253_v63  ;;  %2704 = vmatpush.bf16.msrb.mxu1 %v6999_v27 }
 0x1c0   :  { %v9853_v48 = vadd.f32 %v2413_v31, %v2360_v4  ;;  %v3702_v49 = vadd.f32 %v9701_v54, %v3620_v34 }
 0x1c2   :  { %v3124_v0 = vrot.slane %v9853_v48, 7  ;;  %v3264_v7 = vsel %vm12618_vm8, %v9853_v48, %v3172_v44  ;;  %v3412_v56 = vrot.slane %v9853_v48, 1  ;;  %v3774_v5 = vmax.f32 %v3702_v49, 0.0 }
 0x1c3   :  { %v3336_v38 = vadd.f32 %v3264_v7, %v9831_v47  ;;  %v12622_v7 = vld [vmem:[#allocation42_spill] sm:$0xff] }
 0x1c4   :  { %v3168_v24 = vsel %vm783_vm0, %v3120_v45, %v3124_v0  ;;  %v3456_v63 = vsel %vm892_vm1, %v3408_v9, %v3412_v56  ;;  %v12620_v9 = vld [vmem:[#allocation45_spill] sm:$0xff] }
 0x1c5   :  { %v2361_v60 = vpop.f32.mrf.mxu2  ;;  %v2415_v39 = vpop.f32.mrf.mxu3  ;;  %v3552_v14 = vsel %vm12619_vm4, %v9815_v26, %v3456_v63 }
 0x1c6   :  { %v2256_v21 = vpop.f32.mrf.mxu0  ;;  %v2310_v44 = vpop.f32.mrf.mxu1  ;;  %v2362_v8 = vadd.f32 %v2361_v60, %v2308_v29  ;;  %v3624_v31 = vadd.f32 %v3552_v14, %v3336_v38  ;;  %v12623_v38 = vld [vmem:[#allocation43_spill] sm:$0xff] }
 0x1c7   :  { %v2311_v18 = vadd.f32 %v2310_v44, %v2256_v21 }
 0x1c8   :  { %v9869_v13 = vadd.f32 %v2415_v39, %v2362_v8  ;;  %v3706_v45 = vadd.f32 %v9701_v54, %v3624_v31 }
 0x1c9   :  { %2466 = vmatmul.bf16.gmra.mxu0 %v9592_v35  ;;  %2520 = vmatmul.bf16.gmra.mxu1 %v12620_v9 }
 0x1ca   :  { %v3128_v10 = vrot.slane %v9869_v13, 7  ;;  %v3268_v34 = vsel %vm723_vm13, %v9869_v13, %v3168_v24  ;;  %v3416_v4 = vrot.slane %v9869_v13, 1  ;;  %v3778_v29 = vmax.f32 %v3706_v45, 0.0 }
 0x1cb   :  { %v3340_v27 = vadd.f32 %v3268_v34, %v9853_v48 }
 0x1cc   :  { %2574 = vmatmul.bf16.gmra.mxu2 %v12622_v7  ;;  %2628 = vmatmul.bf16.gmra.mxu3 %v12623_v38  ;;  %v3164_v63 = vsel %vm783_vm0, %v3124_v0, %v3128_v10  ;;  %v9884_v60 = vpack.c.bf16 %v3778_v29, %v3774_v5  ;;  %v3452_v39 = vsel %vm892_vm1, %v3412_v56, %v3416_v4  ;;  %v12625_v5 = vld [vmem:[#allocation25_spill] sm:$0xff]  ;;  %v7238_v7 = vld [vmem:[#allocation2 + $0x308] sm:$0xf] }
 0x1cd   :  { %v2364_v14 = vpop.f32.mrf.mxu2  ;;  %v2418_v49 = vpop.f32.mrf.mxu3  ;;  %v3556_v24 = vsel %vm741_vm2, %v9831_v47, %v3452_v39  ;;  %vm12626_vm8 = vcmp.eq.s32.totalorder %v12625_v5, 0  ;;  %v8095_v47 = vld [vmem:[#allocation2 + $0x314] sm:$0xf0]  ;;  %v6854_v39 = vld [vmem:[#allocation2 + $0x8] sm:$0xf]  ;;  %vm12627_vm4 = vcmp.eq.s32.totalorder %v12625_v5, 8 }
 0x1ce   :  { %12624 = vst [vmem:[#allocation56_spill] sm:$0xff] %v9884_v60  ;;  %v2258_v21 = vpop.f32.mrf.mxu0  ;;  %v2312_v44 = vpop.f32.mrf.mxu1  ;;  %v2365_v8 = vadd.f32 %v2364_v14, %v2311_v18  ;;  %v3628_v31 = vadd.f32 %v3556_v24, %v3340_v27  ;;  %v7110_v60 = vld [vmem:[#allocation2 + $0x208] sm:$0xf]  ;;  %v7239_v14 = vor.u32 %v8095_v47, %v7238_v7 }
 0x1cf   :  { %v2313_v45 = vadd.f32 %v2312_v44, %v2258_v21  ;;  %v7111_v38 = vor.u32 %v8063_v51, %v7110_v60  ;;  %v6982_v24 = vld [vmem:[#allocation2 + $0x108] sm:$0xf]  ;;  %v8031_v21 = vld [vmem:[#allocation2 + $0x114] sm:$0xf0] }
 0x1d0   :  { %v9891_v34 = vadd.f32 %v2418_v49, %v2365_v8  ;;  %v7999_v49 = vld [vmem:[#allocation2 + $0x14] sm:$0xf0]  ;;  %v6983_v51 = vor.u32 %v8031_v21, %v6982_v24  ;;  %2813 = vmatpush.bf16.msrb.mxu3 %v7239_v14  ;;  %v8089_v24 = vld [vmem:[#allocation2 + $0x2ec] sm:$0xf]  ;;  %v7224_v21 = vld [vmem:[#allocation2 + $0x2f8] sm:$0xf0] }
 0x1d1   :  { %2759 = vmatpush.bf16.msrb.mxu2 %v7111_v38  ;;  %v6855_v26 = vor.u32 %v7999_v49, %v6854_v39  ;;  %v12630_v14 = vld [vmem:[#allocation46_spill] sm:$0xff] }
 0x1d2   :  { %v3132_v0 = vrot.slane %v9891_v34, 7  ;;  %v3272_v29 = vsel %vm12626_vm8, %v9891_v34, %v3164_v63  ;;  %v3420_v56 = vrot.slane %v9891_v34, 1  ;;  %2705 = vmatpush.bf16.msrb.mxu1 %v6983_v51  ;;  %v7352_v51 = vld [vmem:[#allocation2 + $0x3f8] sm:$0xf0] }
 0x1d3   :  { %v3344_v18 = vadd.f32 %v3272_v29, %v9869_v13  ;;  %v3710_v29 = vadd.f32 %v9701_v54, %v3628_v31  ;;  %2651 = vmatpush.bf16.msrb.mxu0 %v6855_v26  ;;  %v12628_v31 = vld [vmem:[#allocation26_spill] sm:$0xff] }
 0x1d4   :  { %v3160_v27 = vsel %vm783_vm0, %v3128_v10, %v3132_v0  ;;  %v3448_v63 = vsel %vm892_vm1, %v3416_v4, %v3420_v56  ;;  %vm12629_vm8 = vcmp.eq.s32.totalorder %v12628_v31, 0 }
 0x1d5   :  { %v2366_v44 = vpop.f32.mrf.mxu2  ;;  %v2420_v8 = vpop.f32.mrf.mxu3  ;;  %v3560_v60 = vsel %vm12627_vm4, %v9853_v48, %v3448_v63  ;;  %v3782_v39 = vmax.f32 %v3710_v29, 0.0  ;;  %v8121_v63 = vld [vmem:[#allocation2 + $0x3ec] sm:$0xf]  ;;  %vm12632_vm4 = vcmp.eq.s32.totalorder %v12628_v31, 8 }
 0x1d6   :  { %v2261_v9 = vpop.f32.mrf.mxu0  ;;  %v2315_v10 = vpop.f32.mrf.mxu1  ;;  %v2367_v7 = vadd.f32 %v2366_v44, %v2313_v45  ;;  %v3632_v47 = vadd.f32 %v3560_v60, %v3344_v18 }
 0x1d7   :  { %v2316_v35 = vadd.f32 %v2315_v10, %v2261_v9 }
 0x1d8   :  { %v9907_v4 = vadd.f32 %v2420_v8, %v2367_v7  ;;  %v3714_v38 = vadd.f32 %v9701_v54, %v3632_v47  ;;  %v7227_v8 = vor.u32 %v8089_v24, %v7224_v21  ;;  %v7355_v7 = vor.u32 %v8121_v63, %v7352_v51 }
 0x1d9   :  { %2471 = vmatmul.bf16.gmra.mxu0 %v9612_v28  ;;  %2525 = vmatmul.bf16.gmra.mxu1 %v9614_v52 }
 0x1da   :  { %v3136_v48 = vrot.slane %v9907_v4, 7  ;;  %v3276_v45 = vsel %vm12629_vm8, %v9907_v4, %v3160_v27  ;;  %v3424_v18 = vrot.slane %v9907_v4, 1  ;;  %v3786_v9 = vmax.f32 %v3714_v38, 0.0  ;;  %2968 = vmatpush.bf16.msra.mxu2 %v7227_v8  ;;  %3022 = vmatpush.bf16.msra.mxu3 %v7355_v7 }
 0x1db   :  { %v3348_v26 = vadd.f32 %v3276_v45, %v9891_v34 }
 0x1dc   :  { %2579 = vmatmul.bf16.gmra.mxu2 %v9608_v16  ;;  %2633 = vmatmul.bf16.gmra.mxu3 %v12630_v14  ;;  %v3156_v49 = vsel %vm783_vm0, %v3132_v0, %v3136_v48  ;;  %v9922_v44 = vpack.c.bf16 %v3786_v9, %v3782_v39  ;;  %v3444_v27 = vsel %vm892_vm1, %v3420_v56, %v3424_v18 }
 0x1dd   :  { %v3564_v60 = vsel %vm12632_vm4, %v9869_v13, %v3444_v27 }
 0x1de   :  { %12631 = vst [vmem:[#allocation57_spill] sm:$0xff] %v9922_v44  ;;  %v2263_v29 = vpop.f32.mrf.mxu0  ;;  %v2317_v10 = vpop.f32.mrf.mxu1  ;;  %v3636_v47 = vadd.f32 %v3564_v60, %v3348_v26  ;;  %v12633_v44 = vld [vmem:[#allocation27_spill] sm:$0xff] }
 0x1df   :  { %v2318_v38 = vadd.f32 %v2317_v10, %v2263_v29  ;;  %v2369_v0 = vpop.f32.mrf.mxu2  ;;  %v2423_v45 = vpop.f32.mrf.mxu3  ;;  %vm12634_vm8 = vcmp.eq.s32.totalorder %v12633_v44, 0  ;;  %vm12635_vm4 = vcmp.eq.s32.totalorder %v12633_v44, 8  ;;  %v6968_v29 = vld [vmem:[#allocation2 + $0xf8] sm:$0xf0]  ;;  %v8057_v10 = vld [vmem:[#allocation2 + $0x1ec] sm:$0xf] }
 0x1e0   :  { %v2370_v14 = vadd.f32 %v2369_v0, %v2316_v35  ;;  %v3364_v0 = vrot.slane %v9640_v20, 1 }
 0x1e2   :  { %v2424_v39 = vadd.f32 %v2423_v45, %v2370_v14  ;;  %v3718_v45 = vadd.f32 %v9701_v54, %v3636_v47 }
 0x1e4   :  { %v3140_v9 = vrot.slane %v2424_v39, 7  ;;  %v3280_v56 = vsel %vm12634_vm8, %v2424_v39, %v3156_v49  ;;  %v3428_v24 = vrot.slane %v2424_v39, 1  ;;  %v8025_v49 = vld [vmem:[#allocation2 + $0xec] sm:$0xf] }
 0x1e5   :  { %v3352_v21 = vadd.f32 %v3280_v56, %v9907_v4 }
 0x1e6   :  { %v3152_v13 = vsel %vm783_vm0, %v3136_v48, %v3140_v9  ;;  %v2437_v27 = vpop.f32.mrf.mxu0  ;;  %v2491_v63 = vpop.f32.mrf.mxu1  ;;  %v3440_v26 = vsel %vm892_vm1, %v3424_v18, %v3428_v24  ;;  %v6971_v48 = vor.u32 %v8025_v49, %v6968_v29  ;;  %v7096_v18 = vld [vmem:[#allocation2 + $0x1f8] sm:$0xf0]  ;;  %v12638_v29 = vld [vmem:[#allocation12_spill] sm:$0xff] }
 0x1e7   :  { %v2371_v51 = vpop.f32.mrf.mxu2  ;;  %v2425_v8 = vpop.f32.mrf.mxu3  ;;  %v2492_v35 = vadd.f32 %v2491_v63, %v2437_v27  ;;  %v3568_v14 = vsel %vm12635_vm4, %v9891_v34, %v3440_v26  ;;  %v7099_v27 = vor.u32 %v8057_v10, %v7096_v18  ;;  %v12636_v34 = vrot.slane %v9642_v2, 1  ;;  %v7208_v10 = vld [vmem:[#allocation2 + $0x2d8] sm:$0xf0] }
 0x1e8   :  { %v2372_v60 = vadd.f32 %v2371_v51, %v2318_v38  ;;  %v3640_v7 = vadd.f32 %v3568_v14, %v3352_v21  ;;  %2860 = vmatpush.bf16.msra.mxu0 %v6971_v48  ;;  %v3666_v21 = vadd.f32 %v9701_v54, %v9672_v11  ;;  %vm12639_vm8 = vcmp.eq.s32.totalorder %v12638_v29, 8 }
 0x1e9   :  { %2476 = vmatmul.bf16.gmra.mxu0 %v9628_v55  ;;  %2530 = vmatmul.bf16.gmra.mxu1 %v9630_v43  ;;  %v3500_v38 = vsel %vm892_vm1, %v3364_v0, %v12636_v34  ;;  %v3790_v48 = vmax.f32 %v3718_v45, 0.0  ;;  %v12641_v11 = vrot.slane %v9640_v20, 7  ;;  %vm12642_vm4 = vcmp.eq.s32.totalorder %v12638_v29, 0 }
 0x1ea   :  { %v2426_v56 = vadd.f32 %v2425_v8, %v2372_v60  ;;  %v3722_v63 = vadd.f32 %v9701_v54, %v3640_v7  ;;  %v12640_v8 = vld [vmem:[#allocation50_spill] sm:$0xff]  ;;  %v8085_v60 = vld [vmem:[#allocation2 + $0x2cc] sm:$0xf]  ;;  %2914 = vmatpush.bf16.msra.mxu1 %v7099_v27 }
 0x1eb   :  { %v7211_v7 = vor.u32 %v8085_v60, %v7208_v10 }
 0x1ec   :  { %v3144_v26 = vrot.slane %v2426_v56, 7  ;;  %v3284_v14 = vsel %vm727_vm15, %v2426_v56, %v3152_v13  ;;  %v3432_v49 = vrot.slane %v2426_v56, 1  ;;  %v3508_v47 = vsel %vm12639_vm8, %v2426_v56, %v3500_v38  ;;  %2584 = vmatmul.bf16.gmra.mxu2 %v9634_v33  ;;  %2638 = vmatmul.bf16.gmra.mxu3 %v12640_v8 }
 0x1ed   :  { %v3794_v18 = vmax.f32 %v3722_v63, 0.0  ;;  %v3356_v34 = vadd.f32 %v3284_v14, %v2424_v39  ;;  %2969 = vmatpush.bf16.msra.mxu2 %v7211_v7  ;;  %vm12658_vm8 = vcmp.eq.s32.totalorder %v8799_v6, 0 }
 0x1ee   :  { %v3216_v13 = vsel %vm783_vm0, %v3144_v26, %v12641_v11  ;;  %v2439_v43 = vpop.f32.mrf.mxu0  ;;  %v2493_v55 = vpop.f32.mrf.mxu1  ;;  %v3148_v38 = vsel %vm783_vm0, %v3140_v9, %v3144_v26  ;;  %v3436_v8 = vsel %vm892_vm1, %v3428_v24, %v3432_v49  ;;  %v3504_v27 = vsel %vm892_vm1, %v3432_v49, %v3364_v0 }
 0x1ef   :  { %v3220_v45 = vsel %vm12642_vm4, %v9642_v2, %v3216_v13  ;;  %v2494_v63 = vadd.f32 %v2493_v55, %v2439_v43  ;;  %v2545_v14 = vpop.f32.mrf.mxu2  ;;  %v2599_v60 = vpop.f32.mrf.mxu3  ;;  %v9969_v10 = vpack.c.bf16 %v3794_v18, %v3790_v48  ;;  %v3288_v9 = vsel %vm728_vm3, %v9640_v20, %v3148_v38  ;;  %v8117_v18 = vld [vmem:[#allocation2 + $0x3cc] sm:$0xf]  ;;  %v7336_v13 = vld [vmem:[#allocation2 + $0x3d8] sm:$0xf0] }
 0x1f0   :  { %v3292_v26 = vadd.f32 %v3220_v45, %v9640_v20  ;;  %v2546_v24 = vadd.f32 %v2545_v14, %v2492_v35  ;;  %v3360_v33 = vadd.f32 %v3288_v9, %v2426_v56  ;;  %v3572_v0 = vsel %vm745_vm12, %v9907_v4, %v3436_v8  ;;  %v8021_v45 = vld [vmem:[#allocation2 + $0xcc] sm:$0xf]  ;;  %v6952_v4 = vld [vmem:[#allocation2 + $0xd8] sm:$0xf0] }
 0x1f1   :  { %12643 = vst [vmem:[#allocation58_spill] sm:$0xff] %v9969_v10  ;;  %v3576_v55 = vsel %vm746_vm7, %v2424_v39, %v3504_v27  ;;  %v3644_v43 = vadd.f32 %v3572_v0, %v3356_v34  ;;  %v3738_v35 = vmax.f32 %v3666_v21, 0.0  ;;  %v7339_v38 = vor.u32 %v8117_v18, %v7336_v13  ;;  %v8053_v8 = vld [vmem:[#allocation2 + $0x1cc] sm:$0xf]  ;;  %v12650_v18 = vld [vmem:[#allocation31_spill] sm:$0xff] }
 0x1f2   :  { %v3580_v2 = vadd.f32 %v3508_v47, %v3292_v26  ;;  %v9980_v49 = vadd.f32 %v2599_v60, %v2546_v24  ;;  %v3648_v7 = vadd.f32 %v3576_v55, %v3360_v33  ;;  %v6955_v34 = vor.u32 %v8021_v45, %v6952_v4  ;;  %v7080_v47 = vld [vmem:[#allocation2 + $0x1d8] sm:$0xf0] }
 0x1f3   :  { %v3726_v48 = vadd.f32 %v9701_v54, %v3644_v43  ;;  %3023 = vmatpush.bf16.msra.mxu3 %v7339_v38  ;;  %v7083_v0 = vor.u32 %v8053_v8, %v7080_v47  ;;  %v12647_v43 = vld [vmem:[#allocation32_spill] sm:$0xff]  ;;  %vm12660_vm4 = vcmp.eq.s32.totalorder %v8799_v6, 8 }
 0x1f4   :  { %v3662_v20 = vadd.f32 %v9701_v54, %v3580_v2  ;;  %v3730_v56 = vadd.f32 %v9701_v54, %v3648_v7  ;;  %2861 = vmatpush.bf16.msra.mxu0 %v6955_v34  ;;  %v12648_v2 = vld [vmem:[#allocation33_spill] sm:$0xff]  ;;  %v12442_v4 = vrot.slane %v9980_v49, 7 }
 0x1f5   :  { %v3798_v60 = vmax.f32 %v3726_v48, 0.0  ;;  %2915 = vmatpush.bf16.msra.mxu1 %v7083_v0  ;;  %v12649_v48 = vld [vmem:[#allocation30_spill] sm:$0xff] }
 0x1f6   :  { %v2442_v14 = vpop.f32.mrf.mxu0  ;;  %v2496_v39 = vpop.f32.mrf.mxu1  ;;  %v3734_v27 = vmax.f32 %v3662_v20, 0.0  ;;  %v3802_v33 = vmax.f32 %v3730_v56, 0.0  ;;  %v7320_v0 = vld [vmem:[#allocation2 + $0x3b8] sm:$0xf0] }
 0x1f7   :  { %v2497_v9 = vadd.f32 %v2496_v39, %v2442_v14  ;;  %v2547_v26 = vpop.f32.mrf.mxu2  ;;  %v2601_v24 = vpop.f32.mrf.mxu3 }
 0x1f8   :  { %v2548_v55 = vadd.f32 %v2547_v26, %v2494_v63  ;;  %v9985_v21 = vpack.c.bf16 %v3738_v35, %v3734_v27  ;;  %v9987_v54 = vpack.c.bf16 %v3802_v33, %v3798_v60  ;;  %v8081_v60 = vld [vmem:[#allocation2 + $0x2ac] sm:$0xf]  ;;  %v7192_v33 = vld [vmem:[#allocation2 + $0x2b8] sm:$0xf0] }
 0x1f9   :  { %2652 = vmatmul.bf16.vlgmr.msrb.gmra.mxu0 %v12647_v43  ;;  %2706 = vmatmul.bf16.vlgmr.msrb.gmra.mxu1 %v12648_v2  ;;  %v7195_v26 = vor.u32 %v8081_v60, %v7192_v33  ;;  %v12652_v2 = vld [vmem:[#allocation36_spill] sm:$0xff] }
 0x1fa   :  { %12645 = vst [vmem:[#allocation59_spill] sm:$0xff] %v9985_v21  ;;  %v9991_v7 = vadd.f32 %v2601_v24, %v2548_v55  ;;  %v8113_v24 = vld [vmem:[#allocation2 + $0x3ac] sm:$0xf] }
 0x1fb   :  { %12646 = vst [vmem:[#allocation60_spill] sm:$0xff] %v9987_v54  ;;  %v8017_v55 = vld [vmem:[#allocation2 + $0xac] sm:$0xf]  ;;  %v7064_v54 = vld [vmem:[#allocation2 + $0x1b8] sm:$0xf0]  ;;  %2970 = vmatpush.bf16.msra.mxu2 %v7195_v26 }
 0x1fc   :  { %2760 = vmatmul.bf16.vlgmr.msrb.gmra.mxu2 %v12649_v48  ;;  %2814 = vmatmul.bf16.vlgmr.msrb.gmra.mxu3 %v12650_v18  ;;  %v3081_v63 = vrot.slane %v9991_v7, 7  ;;  %v12446_v14 = vrot.slane %v9991_v7, 1 }
 0x1fe   :  { %v2444_v13 = vpop.f32.mrf.mxu0  ;;  %v2498_v20 = vpop.f32.mrf.mxu1  ;;  %v3213_v39 = vsel %vm783_vm0, %v12442_v4, %v3081_v63  ;;  %v8049_v4 = vld [vmem:[#allocation2 + $0x1ac] sm:$0xf] }
 0x1ff   :  { %v2499_v56 = vadd.f32 %v2498_v20, %v2444_v13  ;;  %v2550_v35 = vpop.f32.mrf.mxu2  ;;  %v2604_v38 = vpop.f32.mrf.mxu3  ;;  %v7067_v18 = vor.u32 %v8049_v4, %v7064_v54  ;;  %v12655_v4 = vld [vmem:[#allocation34_spill] sm:$0xff] }
 0x200   :  { %v2551_v45 = vadd.f32 %v2550_v35, %v2497_v9 }
 0x201   :  { %2916 = vmatpush.bf16.msra.mxu1 %v7067_v18 }
 0x202   :  { %v9997_v8 = vadd.f32 %v2604_v38, %v2551_v45  ;;  %v7323_v45 = vor.u32 %v8113_v24, %v7320_v0 }
 0x204   :  { %v3085_v34 = vrot.slane %v9997_v8, 7  ;;  %v3225_v47 = vsel %vm712_vm5, %v9997_v8, %v3213_v39  ;;  %v3373_v27 = vrot.slane %v9997_v8, 1  ;;  %v6936_v39 = vld [vmem:[#allocation2 + $0xb8] sm:$0xf0]  ;;  %3024 = vmatpush.bf16.msra.mxu3 %v7323_v45 }
 0x205   :  { %v3297_v9 = vadd.f32 %v3225_v47, %v9991_v7  ;;  %v6939_v21 = vor.u32 %v8017_v55, %v6936_v39 }
 0x206   :  { %v3497_v13 = vsel %vm892_vm1, %v12446_v14, %v3373_v27  ;;  %v2447_v20 = vpop.f32.mrf.mxu0  ;;  %v2501_v35 = vpop.f32.mrf.mxu1  ;;  %v3209_v38 = vsel %vm783_vm0, %v3081_v63, %v3085_v34  ;;  %v12653_v63 = vld [vmem:[#allocation37_spill] sm:$0xff] }
 0x207   :  { %v3513_v47 = vsel %vm730_vm6, %v9980_v49, %v3497_v13  ;;  %v2502_v60 = vadd.f32 %v2501_v35, %v2447_v20  ;;  %v2552_v33 = vpop.f32.mrf.mxu2  ;;  %v2606_v10 = vpop.f32.mrf.mxu3  ;;  %2862 = vmatpush.bf16.msra.mxu0 %v6939_v21  ;;  %v8109_v13 = vld [vmem:[#allocation2 + $0x38c] sm:$0xf] }
 0x208   :  { %v10019_v14 = vadd.f32 %v3513_v47, %v3297_v9  ;;  %v2553_v48 = vadd.f32 %v2552_v33, %v2499_v56  ;;  %v12656_v56 = vld [vmem:[#allocation35_spill] sm:$0xff] }
 0x209   :  { %2657 = vmatmul.bf16.gmra.mxu0 %v12652_v2  ;;  %2711 = vmatmul.bf16.gmra.mxu1 %v12653_v63  ;;  %v12657_v33 = vld [vmem:[#allocation51_spill] sm:$0xff]  ;;  %v8045_v63 = vld [vmem:[#allocation2 + $0x18c] sm:$0xf]  ;;  %v7048_v2 = vld [vmem:[#allocation2 + $0x198] sm:$0xf0] }
 0x20a   :  { %12651 = vst [vmem:[#allocation61_spill] sm:$0xff] %v10019_v14  ;;  %v10023_v24 = vadd.f32 %v2606_v10, %v2553_v48 }
 0x20c   :  { %v3089_v0 = vrot.slane %v10023_v24, 7  ;;  %v3229_v26 = vsel %vm713_vm11, %v10023_v24, %v3209_v38  ;;  %v3377_v54 = vrot.slane %v10023_v24, 1  ;;  %2765 = vmatmul.bf16.gmra.mxu2 %v12655_v4  ;;  %2819 = vmatmul.bf16.gmra.mxu3 %v12656_v56 }
 0x20d   :  { %v3301_v9 = vadd.f32 %v3229_v26, %v9997_v8  ;;  %v10043_v26 = vperm.slane %v12657_v33, 1  ;;  %v6920_v33 = vld [vmem:[#allocation2 + $0x98] sm:$0xf0] }
 0x20e   :  { %v2449_v55 = vpop.f32.mrf.mxu0  ;;  %v2503_v20 = vpop.f32.mrf.mxu1  ;;  %v3205_v10 = vsel %vm783_vm0, %v3085_v34, %v3089_v0  ;;  %v3493_v21 = vsel %vm892_vm1, %v3373_v27, %v3377_v54 }
 0x20f   :  { %v2504_v48 = vadd.f32 %v2503_v20, %v2449_v55  ;;  %v2555_v18 = vpop.f32.mrf.mxu2  ;;  %v2609_v35 = vpop.f32.mrf.mxu3  ;;  %v3517_v38 = vsel %vm731_vm14, %v9991_v7, %v3493_v21  ;;  %v8077_v55 = vld [vmem:[#allocation2 + $0x28c] sm:$0xf]  ;;  %v7176_v20 = vld [vmem:[#allocation2 + $0x298] sm:$0xf0] }
 0x210   :  { %v2556_v45 = vadd.f32 %v2555_v18, %v2502_v60  ;;  %v3589_v39 = vadd.f32 %v3517_v38, %v3301_v9  ;;  %v7179_v4 = vor.u32 %v8077_v55, %v7176_v20  ;;  %v7304_v21 = vld [vmem:[#allocation2 + $0x398] sm:$0xf0]  ;;  %v8013_v60 = vld [vmem:[#allocation2 + $0x8c] sm:$0xf] }
 0x211   :  { %v6923_v14 = vor.u32 %v8013_v60, %v6920_v33 }
 0x212   :  { %v10040_v47 = vadd.f32 %v2609_v35, %v2556_v45  ;;  %v7307_v45 = vor.u32 %v8109_v13, %v7304_v21  ;;  %v3671_v22 = vadd.f32 %v10043_v26, %v3589_v39  ;;  %2971 = vmatpush.bf16.msra.mxu2 %v7179_v4 }
 0x213   :  { %2863 = vmatpush.bf16.msra.mxu0 %v6923_v14 }
 0x214   :  { %v3093_v56 = vrot.slane %v10040_v47, 7  ;;  %v3233_v34 = vsel %vm714_vm9, %v10040_v47, %v3205_v10  ;;  %v3381_v27 = vrot.slane %v10040_v47, 1  ;;  %3025 = vmatpush.bf16.msra.mxu3 %v7307_v45  ;;  %v3743_v4 = vmax.f32 %v3671_v22, 0.0 }
 0x215   :  { %v3305_v9 = vadd.f32 %v3233_v34, %v10023_v24  ;;  %v7051_v34 = vor.u32 %v8045_v63, %v7048_v2 }
 0x216   :  { %v2452_v18 = vpop.f32.mrf.mxu0  ;;  %v2506_v35 = vpop.f32.mrf.mxu1  ;;  %v3201_v38 = vsel %vm783_vm0, %v3089_v0, %v3093_v56  ;;  %v3489_v10 = vsel %vm892_vm1, %v3377_v54, %v3381_v27 }
 0x217   :  { %v2507_v55 = vadd.f32 %v2506_v35, %v2452_v18  ;;  %v2557_v20 = vpop.f32.mrf.mxu2  ;;  %v2611_v43 = vpop.f32.mrf.mxu3  ;;  %v3521_v11 = vsel %vm732_vm10, %v9997_v8, %v3489_v10  ;;  %2917 = vmatpush.bf16.msra.mxu1 %v7051_v34 }
 0x218   :  { %v2558_v0 = vadd.f32 %v2557_v20, %v2504_v48  ;;  %v3593_v13 = vadd.f32 %v3521_v11, %v3305_v9 }
 0x219   :  { %2662 = vmatmul.bf16.gmra.mxu0 %v9504_v57  ;;  %2716 = vmatmul.bf16.gmra.mxu1 %v9506_v62 }
 0x21a   :  { %v10061_v54 = vadd.f32 %v2611_v43, %v2558_v0  ;;  %v3675_v39 = vadd.f32 %v10043_v26, %v3593_v13  ;;  %v7160_v0 = vld [vmem:[#allocation2 + $0x278] sm:$0xf0] }
 0x21c   :  { %v3097_v2 = vrot.slane %v10061_v54, 7  ;;  %v3237_v8 = vsel %vm12658_vm8, %v10061_v54, %v3201_v38  ;;  %v3385_v63 = vrot.slane %v10061_v54, 1  ;;  %2770 = vmatmul.bf16.gmra.mxu2 %v9500_v53  ;;  %2824 = vmatmul.bf16.gmra.mxu3 %v9502_v3  ;;  %v3747_v11 = vmax.f32 %v3675_v39, 0.0  ;;  %v8105_v39 = vld [vmem:[#allocation2 + $0x36c] sm:$0xf] }
 0x21d   :  { %v3309_v43 = vadd.f32 %v3237_v8, %v10040_v47  ;;  %vm12661_vm8 = vcmp.eq.s32.totalorder %v8854_v15, 0 }
 0x21e   :  { %v2454_v14 = vpop.f32.mrf.mxu0  ;;  %v2508_v48 = vpop.f32.mrf.mxu1  ;;  %v3197_v22 = vsel %vm783_vm0, %v3093_v56, %v3097_v2  ;;  %v10074_v21 = vpack.c.bf16 %v3747_v11, %v3743_v4  ;;  %v3485_v60 = vsel %vm892_vm1, %v3381_v27, %v3385_v63  ;;  %v8073_v27 = vld [vmem:[#allocation2 + $0x26c] sm:$0xf]  ;;  %v7288_v4 = vld [vmem:[#allocation2 + $0x378] sm:$0xf0] }
 0x21f   :  { %v2509_v9 = vadd.f32 %v2508_v48, %v2454_v14  ;;  %v2560_v18 = vpop.f32.mrf.mxu2  ;;  %v2614_v35 = vpop.f32.mrf.mxu3  ;;  %v3525_v38 = vsel %vm12660_vm4, %v10023_v24, %v3485_v60  ;;  %v7163_v13 = vor.u32 %v8073_v27, %v7160_v0  ;;  %vm12662_vm4 = vcmp.eq.s32.totalorder %v8854_v15, 8  ;;  %v6904_v0 = vld [vmem:[#allocation2 + $0x78] sm:$0xf0] }
 0x220   :  { %12659 = vst [vmem:[#allocation51_spill] sm:$0xff] %v10074_v21  ;;  %v2561_v45 = vadd.f32 %v2560_v18, %v2507_v55  ;;  %v3597_v33 = vadd.f32 %v3525_v38, %v3309_v43  ;;  %v7291_v43 = vor.u32 %v8105_v39, %v7288_v4  ;;  %v7032_v39 = vld [vmem:[#allocation2 + $0x178] sm:$0xf0] }
 0x221   :  { %2972 = vmatpush.bf16.msra.mxu2 %v7163_v13 }
 0x222   :  { %v10081_v10 = vadd.f32 %v2614_v35, %v2561_v45  ;;  %3026 = vmatpush.bf16.msra.mxu3 %v7291_v43 }
 0x224   :  { %v3101_v20 = vrot.slane %v10081_v10, 7  ;;  %v3241_v56 = vsel %vm12661_vm8, %v10081_v10, %v3197_v22  ;;  %v3389_v34 = vrot.slane %v10081_v10, 1  ;;  %vm12663_vm8 = vcmp.eq.s32.totalorder %v8880_v40, 0 }
 0x225   :  { %v3313_v8 = vadd.f32 %v3241_v56, %v10061_v54 }
 0x226   :  { %v2457_v24 = vpop.f32.mrf.mxu0  ;;  %v2511_v55 = vpop.f32.mrf.mxu1  ;;  %v3193_v11 = vsel %vm783_vm0, %v3097_v2, %v3101_v20  ;;  %v3481_v14 = vsel %vm892_vm1, %v3385_v63, %v3389_v34  ;;  %v3679_v2 = vadd.f32 %v10043_v26, %v3597_v33  ;;  %v8041_v33 = vld [vmem:[#allocation2 + $0x16c] sm:$0xf] }
 0x227   :  { %v2512_v48 = vadd.f32 %v2511_v55, %v2457_v24  ;;  %v2562_v22 = vpop.f32.mrf.mxu2  ;;  %v2616_v60 = vpop.f32.mrf.mxu3  ;;  %v3529_v18 = vsel %vm12662_vm4, %v10040_v47, %v3481_v14  ;;  %v7035_v14 = vor.u32 %v8041_v33, %v7032_v39  ;;  %vm12665_vm4 = vcmp.eq.s32.totalorder %v8880_v40, 8  ;;  %v7144_v33 = vld [vmem:[#allocation2 + $0x258] sm:$0xf0] }
 0x228   :  { %v2563_v35 = vadd.f32 %v2562_v22, %v2509_v9  ;;  %v3601_v38 = vadd.f32 %v3529_v18, %v3313_v8  ;;  %v8009_v9 = vld [vmem:[#allocation2 + $0x6c] sm:$0xf]  ;;  %v3751_v4 = vmax.f32 %v3679_v2, 0.0 }
 0x229   :  { %2667 = vmatmul.bf16.gmra.mxu0 %v9530_v12  ;;  %2721 = vmatmul.bf16.gmra.mxu1 %v9532_v41  ;;  %v6907_v13 = vor.u32 %v8009_v9, %v6904_v0 }
 0x22a   :  { %v10099_v45 = vadd.f32 %v2616_v60, %v2563_v35  ;;  %v3683_v63 = vadd.f32 %v10043_v26, %v3601_v38  ;;  %2918 = vmatpush.bf16.msra.mxu1 %v7035_v14 }
 0x22b   :  { %2864 = vmatpush.bf16.msra.mxu0 %v6907_v13  ;;  %v8069_v13 = vld [vmem:[#allocation2 + $0x24c] sm:$0xf] }
 0x22c   :  { %v3105_v56 = vrot.slane %v10099_v45, 7  ;;  %v3245_v27 = vsel %vm12663_vm8, %v10099_v45, %v3193_v11  ;;  %v3393_v47 = vrot.slane %v10099_v45, 1  ;;  %2775 = vmatmul.bf16.gmra.mxu2 %v9526_v32  ;;  %2829 = vmatmul.bf16.gmra.mxu3 %v9528_v61  ;;  %v3755_v8 = vmax.f32 %v3683_v63, 0.0 }
 0x22d   :  { %v3317_v24 = vadd.f32 %v3245_v27, %v10081_v10  ;;  %vm12666_vm8 = vcmp.eq.s32.totalorder %v8935_v19, 0  ;;  %v7147_v39 = vor.u32 %v8069_v13, %v7144_v33  ;;  %v8005_v33 = vld [vmem:[#allocation2 + $0x4c] sm:$0xf] }
 0x22e   :  { %v2459_v55 = vpop.f32.mrf.mxu0  ;;  %v2513_v43 = vpop.f32.mrf.mxu1  ;;  %v3189_v11 = vsel %vm783_vm0, %v3101_v20, %v3105_v56  ;;  %v3477_v22 = vsel %vm892_vm1, %v3389_v34, %v3393_v47  ;;  %v10114_v38 = vpack.c.bf16 %v3755_v8, %v3751_v4 }
 0x22f   :  { %v2514_v60 = vadd.f32 %v2513_v43, %v2459_v55  ;;  %v2565_v18 = vpop.f32.mrf.mxu2  ;;  %v2619_v35 = vpop.f32.mrf.mxu3  ;;  %v3533_v2 = vsel %vm12665_vm4, %v10061_v54, %v3477_v22  ;;  %2973 = vmatpush.bf16.msra.mxu2 %v7147_v39  ;;  %vm12667_vm4 = vcmp.eq.s32.totalorder %v8935_v19, 8  ;;  %v6888_v39 = vld [vmem:[#allocation2 + $0x58] sm:$0xf0] }
 0x230   :  { %12664 = vst [vmem:[#allocation62_spill] sm:$0xff] %v10114_v38  ;;  %v2566_v63 = vadd.f32 %v2565_v18, %v2512_v48  ;;  %v3605_v27 = vadd.f32 %v3533_v2, %v3317_v24 }
 0x232   :  { %v10119_v9 = vadd.f32 %v2619_v35, %v2566_v63  ;;  %v3687_v22 = vadd.f32 %v10043_v26, %v3605_v27  ;;  %v7272_v27 = vld [vmem:[#allocation2 + $0x358] sm:$0xf0] }
 0x234   :  { %v3109_v20 = vrot.slane %v10119_v9, 7  ;;  %v3249_v34 = vsel %vm12666_vm8, %v10119_v9, %v3189_v11  ;;  %v3397_v0 = vrot.slane %v10119_v9, 1  ;;  %v3759_v2 = vmax.f32 %v3687_v22, 0.0 }
 0x235   :  { %v3321_v4 = vadd.f32 %v3249_v34, %v10099_v45  ;;  %vm12668_vm8 = vcmp.eq.s32.totalorder %v8981_v50, 0 }
 0x236   :  { %v2462_v8 = vpop.f32.mrf.mxu0  ;;  %v2516_v54 = vpop.f32.mrf.mxu1  ;;  %v3185_v48 = vsel %vm783_vm0, %v3105_v56, %v3109_v20  ;;  %v3473_v24 = vsel %vm892_vm1, %v3393_v47, %v3397_v0 }
 0x237   :  { %v2517_v55 = vadd.f32 %v2516_v54, %v2462_v8  ;;  %v2567_v43 = vpop.f32.mrf.mxu2  ;;  %v2621_v14 = vpop.f32.mrf.mxu3  ;;  %v3537_v11 = vsel %vm12667_vm4, %v10081_v10, %v3473_v24  ;;  %vm12669_vm4 = vcmp.eq.s32.totalorder %v8981_v50, 8 }
 0x238   :  { %v2568_v18 = vadd.f32 %v2567_v43, %v2514_v60  ;;  %v3609_v35 = vadd.f32 %v3537_v11, %v3321_v4  ;;  %v8101_v60 = vld [vmem:[#allocation2 + $0x34c] sm:$0xf] }
 0x239   :  { %2672 = vmatmul.bf16.gmra.mxu0 %v9552_v59  ;;  %2726 = vmatmul.bf16.gmra.mxu1 %v9554_v17  ;;  %v7275_v13 = vor.u32 %v8101_v60, %v7272_v27  ;;  %v8037_v4 = vld [vmem:[#allocation2 + $0x14c] sm:$0xf] }
 0x23a   :  { %v10137_v56 = vadd.f32 %v2621_v14, %v2568_v18  ;;  %v3691_v47 = vadd.f32 %v10043_v26, %v3609_v35  ;;  %v7016_v14 = vld [vmem:[#allocation2 + $0x158] sm:$0xf0] }
 0x23b   :  { %3027 = vmatpush.bf16.msra.mxu3 %v7275_v13  ;;  %v7019_v60 = vor.u32 %v8037_v4, %v7016_v14 }
 0x23c   :  { %v3113_v63 = vrot.slane %v10137_v56, 7  ;;  %v3253_v34 = vsel %vm12668_vm8, %v10137_v56, %v3185_v48  ;;  %v3401_v10 = vrot.slane %v10137_v56, 1  ;;  %2780 = vmatmul.bf16.gmra.mxu2 %v9548_v58  ;;  %2834 = vmatmul.bf16.gmra.mxu3 %v9550_v37  ;;  %v6891_v48 = vor.u32 %v8005_v33, %v6888_v39 }
 0x23d   :  { %v3325_v8 = vadd.f32 %v3253_v34, %v10119_v9  ;;  %v3763_v11 = vmax.f32 %v3691_v47, 0.0  ;;  %2919 = vmatpush.bf16.msra.mxu1 %v7019_v60  ;;  %vm12671_vm8 = vcmp.eq.s32.totalorder %v9020_v42, 0  ;;  %v12674_v60 = vld [vmem:[#allocation38_spill] sm:$0xff] }
 0x23e   :  { %v2464_v54 = vpop.f32.mrf.mxu0  ;;  %v2518_v24 = vpop.f32.mrf.mxu1  ;;  %v3181_v43 = vsel %vm783_vm0, %v3109_v20, %v3113_v63  ;;  %v3469_v22 = vsel %vm892_vm1, %v3397_v0, %v3401_v10  ;;  %2865 = vmatpush.bf16.msra.mxu0 %v6891_v48 }
 0x23f   :  { %v2519_v18 = vadd.f32 %v2518_v24, %v2464_v54  ;;  %v2570_v35 = vpop.f32.mrf.mxu2  ;;  %v2624_v38 = vpop.f32.mrf.mxu3  ;;  %v3541_v34 = vsel %vm12669_vm4, %v10099_v45, %v3469_v22  ;;  %v10155_v21 = vpack.c.bf16 %v3763_v11, %v3759_v2  ;;  %vm12672_vm4 = vcmp.eq.s32.totalorder %v9020_v42, 8 }
 0x240   :  { %v2571_v27 = vadd.f32 %v2570_v35, %v2517_v55  ;;  %v3613_v20 = vadd.f32 %v3541_v34, %v3325_v8  ;;  %v8065_v34 = vld [vmem:[#allocation2 + $0x22c] sm:$0xf] }
 0x241   :  { %12670 = vst [vmem:[#allocation63_spill] sm:$0xff] %v10155_v21 }
 0x242   :  { %v10157_v33 = vadd.f32 %v2624_v38, %v2571_v27  ;;  %v7128_v27 = vld [vmem:[#allocation2 + $0x238] sm:$0xf0] }
 0x244   :  { %v3117_v47 = vrot.slane %v10157_v33, 7  ;;  %v3257_v0 = vsel %vm12671_vm8, %v10157_v33, %v3181_v43  ;;  %v3405_v13 = vrot.slane %v10157_v33, 1  ;;  %v3695_v43 = vadd.f32 %v10043_v26, %v3613_v20 }
 0x245   :  { %v3329_v39 = vadd.f32 %v3257_v0, %v10137_v56  ;;  %vm12673_vm8 = vcmp.eq.s32.totalorder %v9070_v23, 0  ;;  %v7131_v20 = vor.u32 %v8065_v34, %v7128_v27  ;;  %v8097_v0 = vld [vmem:[#allocation2 + $0x32c] sm:$0xf] }
 0x246   :  { %v2467_v4 = vpop.f32.mrf.mxu0  ;;  %v2521_v45 = vpop.f32.mrf.mxu1  ;;  %v3177_v55 = vsel %vm783_vm0, %v3113_v63, %v3117_v47  ;;  %v3465_v2 = vsel %vm892_vm1, %v3401_v10, %v3405_v13  ;;  %v3767_v10 = vmax.f32 %v3695_v43, 0.0  ;;  %v8033_v43 = vld [vmem:[#allocation2 + $0x12c] sm:$0xf] }
 0x247   :  { %v2522_v38 = vadd.f32 %v2521_v45, %v2467_v4  ;;  %v2572_v8 = vpop.f32.mrf.mxu2  ;;  %v2626_v54 = vpop.f32.mrf.mxu3  ;;  %v3545_v24 = vsel %vm12672_vm4, %v10119_v9, %v3465_v2  ;;  %v8001_v4 = vld [vmem:[#allocation2 + $0x2c] sm:$0xf]  ;;  %2974 = vmatpush.bf16.msra.mxu2 %v7131_v20  ;;  %vm12676_vm4 = vcmp.eq.s32.totalorder %v9070_v23, 8 }
 0x248   :  { %v2573_v48 = vadd.f32 %v2572_v8, %v2519_v18  ;;  %v3617_v14 = vadd.f32 %v3545_v24, %v3329_v39  ;;  %v12675_v18 = vld [vmem:[#allocation39_spill] sm:$0xff]  ;;  %v7256_v39 = vld [vmem:[#allocation2 + $0x338] sm:$0xf0] }
 0x249   :  { %2677 = vmatmul.bf16.gmra.mxu0 %v9572_v25  ;;  %2731 = vmatmul.bf16.gmra.mxu1 %v9574_v46  ;;  %v6872_v24 = vld [vmem:[#allocation2 + $0x38] sm:$0xf0] }
 0x24a   :  { %v10175_v11 = vadd.f32 %v2626_v54, %v2573_v48  ;;  %v3699_v63 = vadd.f32 %v10043_v26, %v3617_v14  ;;  %v7000_v48 = vld [vmem:[#allocation2 + $0x138] sm:$0xf0]  ;;  %v6875_v27 = vor.u32 %v8001_v4, %v6872_v24  ;;  %v12680_v24 = vld [vmem:[#allocation44_spill] sm:$0xff] }
 0x24c   :  { %v3121_v22 = vrot.slane %v10175_v11, 7  ;;  %v3261_v35 = vsel %vm12673_vm8, %v10175_v11, %v3177_v55  ;;  %v3409_v9 = vrot.slane %v10175_v11, 1  ;;  %2785 = vmatmul.bf16.gmra.mxu2 %v12674_v60  ;;  %2839 = vmatmul.bf16.gmra.mxu3 %v12675_v18  ;;  %v7259_v55 = vor.u32 %v8097_v0, %v7256_v39 }
 0x24d   :  { %v3333_v45 = vadd.f32 %v3261_v35, %v10157_v33  ;;  %v7003_v60 = vor.u32 %v8033_v43, %v7000_v48  ;;  %v3771_v46 = vmax.f32 %v3699_v63, 0.0  ;;  %2866 = vmatpush.bf16.msra.mxu0 %v6875_v27  ;;  %vm12678_vm8 = vcmp.eq.s32.totalorder %v12617_v30, 0  ;;  %v12681_v43 = vld [vmem:[#allocation45_spill] sm:$0xff] }
 0x24e   :  { %v2469_v2 = vpop.f32.mrf.mxu0  ;;  %v2523_v8 = vpop.f32.mrf.mxu1  ;;  %v3173_v54 = vsel %vm783_vm0, %v3117_v47, %v3121_v22  ;;  %v3461_v14 = vsel %vm892_vm1, %v3405_v13, %v3409_v9  ;;  %3028 = vmatpush.bf16.msra.mxu3 %v7259_v55 }
 0x24f   :  { %v2524_v21 = vadd.f32 %v2523_v8, %v2469_v2  ;;  %v2575_v18 = vpop.f32.mrf.mxu2  ;;  %v2629_v34 = vpop.f32.mrf.mxu3  ;;  %v3549_v47 = vsel %vm12676_vm4, %v10137_v56, %v3461_v14  ;;  %2920 = vmatpush.bf16.msra.mxu1 %v7003_v60  ;;  %v10193_v0 = vpack.c.bf16 %v3771_v46, %v3767_v10  ;;  %vm12679_vm4 = vcmp.eq.s32.totalorder %v12617_v30, 8 }
 0x250   :  { %v2576_v35 = vadd.f32 %v2575_v18, %v2522_v38  ;;  %v3621_v39 = vadd.f32 %v3549_v47, %v3333_v45 }
 0x251   :  { %12677 = vst [vmem:[#allocation64_spill] sm:$0xff] %v10193_v0  ;;  %v8093_v0 = vld [vmem:[#allocation2 + $0x30c] sm:$0xf] }
 0x252   :  { %v10195_v25 = vadd.f32 %v2629_v34, %v2576_v35  ;;  %v3703_v8 = vadd.f32 %v10043_v26, %v3621_v39  ;;  %v12683_v35 = vld [vmem:[#allocation42_spill] sm:$0xff]  ;;  %v7462_v34 = vld [vmem:[#allocation5 + $0xc8] sm:$0xf] }
 0x254   :  { %v3125_v13 = vrot.slane %v10195_v25, 7  ;;  %v3265_v20 = vsel %vm12678_vm8, %v10195_v25, %v3173_v54  ;;  %v3413_v38 = vrot.slane %v10195_v25, 1  ;;  %vm12686_vm8 = vcmp.eq.s32.totalorder %v12625_v5, 0 }
 0x255   :  { %v3337_v63 = vadd.f32 %v3265_v20, %v10175_v11 }
 0x256   :  { %v2472_v18 = vpop.f32.mrf.mxu0  ;;  %v2526_v4 = vpop.f32.mrf.mxu1  ;;  %v3169_v56 = vsel %vm783_vm0, %v3121_v22, %v3125_v13  ;;  %v3457_v46 = vsel %vm892_vm1, %v3409_v9, %v3413_v38  ;;  %v3775_v9 = vmax.f32 %v3703_v8, 0.0 }
 0x257   :  { %v2527_v10 = vadd.f32 %v2526_v4, %v2472_v18  ;;  %v2577_v60 = vpop.f32.mrf.mxu2  ;;  %v2631_v45 = vpop.f32.mrf.mxu3  ;;  %v3553_v2 = vsel %vm12679_vm4, %v10157_v33, %v3457_v46  ;;  %vm12687_vm4 = vcmp.eq.s32.totalorder %v12625_v5, 8 }
 0x258   :  { %v2578_v54 = vadd.f32 %v2577_v60, %v2524_v21  ;;  %v3625_v55 = vadd.f32 %v3553_v2, %v3337_v63  ;;  %v12684_v21 = vld [vmem:[#allocation43_spill] sm:$0xff] }
 0x259   :  { %2682 = vmatmul.bf16.gmra.mxu0 %v12680_v24  ;;  %2736 = vmatmul.bf16.gmra.mxu1 %v12681_v43 }
 0x25a   :  { %v10213_v48 = vadd.f32 %v2631_v45, %v2578_v54  ;;  %v3707_v22 = vadd.f32 %v10043_v26, %v3625_v55 }
 0x25c   :  { %v3129_v14 = vrot.slane %v10213_v48, 7  ;;  %v3269_v27 = vsel %vm723_vm13, %v10213_v48, %v3169_v56  ;;  %v3417_v33 = vrot.slane %v10213_v48, 1  ;;  %2790 = vmatmul.bf16.gmra.mxu2 %v12683_v35  ;;  %2844 = vmatmul.bf16.gmra.mxu3 %v12684_v21  ;;  %v3779_v47 = vmax.f32 %v3707_v22, 0.0  ;;  %v8061_v22 = vld [vmem:[#allocation2 + $0x20c] sm:$0xf] }
 0x25d   :  { %v3341_v39 = vadd.f32 %v3269_v27, %v10195_v25  ;;  %v7112_v27 = vld [vmem:[#allocation2 + $0x218] sm:$0xf0] }
 0x25e   :  { %v2474_v20 = vpop.f32.mrf.mxu0  ;;  %v2528_v63 = vpop.f32.mrf.mxu1  ;;  %v3165_v18 = vsel %vm783_vm0, %v3125_v13, %v3129_v14  ;;  %v10226_v4 = vpack.c.bf16 %v3779_v47, %v3775_v9  ;;  %v3453_v46 = vsel %vm892_vm1, %v3413_v38, %v3417_v33  ;;  %v7115_v13 = vor.u32 %v8061_v22, %v7112_v27  ;;  %v7240_v9 = vld [vmem:[#allocation2 + $0x318] sm:$0xf0]  ;;  %v7997_v47 = vld [vmem:[#allocation2 + $0xc] sm:$0xf] }
 0x25f   :  { %v2529_v56 = vadd.f32 %v2528_v63, %v2474_v20  ;;  %v2580_v60 = vpop.f32.mrf.mxu2  ;;  %v2634_v45 = vpop.f32.mrf.mxu3  ;;  %v3557_v2 = vsel %vm741_vm2, %v10175_v11, %v3453_v46  ;;  %v7243_v11 = vor.u32 %v8093_v0, %v7240_v9 }
 0x260   :  { %12685 = vst [vmem:[#allocation44_spill] sm:$0xff] %v10226_v4  ;;  %v2581_v8 = vadd.f32 %v2580_v60, %v2527_v10  ;;  %v3629_v54 = vadd.f32 %v3557_v2, %v3341_v39  ;;  %v6856_v4 = vld [vmem:[#allocation2 + $0x18] sm:$0xf0]  ;;  %v8029_v10 = vld [vmem:[#allocation2 + $0x10c] sm:$0xf]  ;;  %2975 = vmatpush.bf16.msra.mxu2 %v7115_v13 }
 0x261   :  { %v6984_v39 = vld [vmem:[#allocation2 + $0x118] sm:$0xf0]  ;;  %v6859_v46 = vor.u32 %v7997_v47, %v6856_v4  ;;  %3029 = vmatpush.bf16.msra.mxu3 %v7243_v11 }
 0x262   :  { %v10233_v55 = vadd.f32 %v2634_v45, %v2581_v8  ;;  %v6987_v60 = vor.u32 %v8029_v10, %v6984_v39  ;;  %v3711_v4 = vadd.f32 %v10043_v26, %v3629_v54 }
 0x263   :  { %2867 = vmatpush.bf16.msra.mxu0 %v6859_v46 }
 0x264   :  { %v3133_v38 = vrot.slane %v10233_v55, 7  ;;  %v3273_v20 = vsel %vm12686_vm8, %v10233_v55, %v3165_v18  ;;  %v3421_v63 = vrot.slane %v10233_v55, 1  ;;  %2921 = vmatpush.bf16.msra.mxu1 %v6987_v60  ;;  %v3783_v47 = vmax.f32 %v3711_v4, 0.0 }
 0x265   :  { %v3345_v45 = vadd.f32 %v3273_v20, %v10213_v48  ;;  %vm12688_vm8 = vcmp.eq.s32.totalorder %v12628_v31, 0 }
 0x266   :  { %v2477_v2 = vpop.f32.mrf.mxu0  ;;  %v2531_v8 = vpop.f32.mrf.mxu1  ;;  %v3161_v22 = vsel %vm783_vm0, %v3129_v14, %v3133_v38  ;;  %v3449_v27 = vsel %vm892_vm1, %v3417_v33, %v3421_v63 }
 0x267   :  { %v2532_v18 = vadd.f32 %v2531_v8, %v2477_v2  ;;  %v2582_v21 = vpop.f32.mrf.mxu2  ;;  %v2636_v35 = vpop.f32.mrf.mxu3  ;;  %v3561_v0 = vsel %vm12687_vm4, %v10195_v25, %v3449_v27  ;;  %vm12691_vm4 = vcmp.eq.s32.totalorder %v12628_v31, 8 }
 0x268   :  { %v2583_v13 = vadd.f32 %v2582_v21, %v2529_v56  ;;  %v3633_v9 = vadd.f32 %v3561_v0, %v3345_v45  ;;  %v12689_v21 = vld [vmem:[#allocation46_spill] sm:$0xff] }
 0x269   :  { %2687 = vmatmul.bf16.gmra.mxu0 %v9612_v28  ;;  %2741 = vmatmul.bf16.gmra.mxu1 %v9614_v52 }
 0x26a   :  { %v10251_v14 = vadd.f32 %v2636_v35, %v2583_v13  ;;  %v3715_v33 = vadd.f32 %v10043_v26, %v3633_v9 }
 0x26c   :  { %v3137_v20 = vrot.slane %v10251_v14, 7  ;;  %v3277_v11 = vsel %vm12688_vm8, %v10251_v14, %v3161_v22  ;;  %v3425_v25 = vrot.slane %v10251_v14, 1  ;;  %2795 = vmatmul.bf16.gmra.mxu2 %v9608_v16  ;;  %2849 = vmatmul.bf16.gmra.mxu3 %v12689_v21  ;;  %v3787_v56 = vmax.f32 %v3715_v33, 0.0 }
 0x26d   :  { %v3349_v54 = vadd.f32 %v3277_v11, %v10233_v55  ;;  %vm12692_vm8 = vcmp.eq.s32.totalorder %v12633_v44, 0 }
 0x26e   :  { %v2479_v35 = vpop.f32.mrf.mxu0  ;;  %v2533_v10 = vpop.f32.mrf.mxu1  ;;  %v3157_v39 = vsel %vm783_vm0, %v3133_v38, %v3137_v20  ;;  %v10264_v46 = vpack.c.bf16 %v3787_v56, %v3783_v47  ;;  %v3445_v60 = vsel %vm892_vm1, %v3421_v63, %v3425_v25 }
 0x26f   :  { %v2534_v45 = vadd.f32 %v2533_v10, %v2479_v35  ;;  %v2585_v2 = vpop.f32.mrf.mxu2  ;;  %v2639_v8 = vpop.f32.mrf.mxu3  ;;  %v3565_v22 = vsel %vm12691_vm4, %v10213_v48, %v3445_v60  ;;  %vm12693_vm4 = vcmp.eq.s32.totalorder %v12633_v44, 8  ;;  %v3365_v60 = vrot.slane %v9980_v49, 1 }
 0x270   :  { %12690 = vst [vmem:[#allocation45_spill] sm:$0xff] %v10264_v46  ;;  %v2586_v27 = vadd.f32 %v2585_v2, %v2532_v18  ;;  %v3637_v0 = vadd.f32 %v3565_v22, %v3349_v54  ;;  %v12694_v2 = vld [vmem:[#allocation47_spill] sm:$0xff] }
 0x272   :  { %v2640_v4 = vadd.f32 %v2639_v8, %v2586_v27  ;;  %v12695_v8 = vld [vmem:[#allocation48_spill] sm:$0xff]  ;;  %v12696_v27 = vrot.slane %v9991_v7, 1 }
 0x274   :  { %v3141_v13 = vrot.slane %v2640_v4, 7  ;;  %v3281_v9 = vsel %vm12692_vm8, %v2640_v4, %v3157_v39  ;;  %v3429_v38 = vrot.slane %v2640_v4, 1  ;;  %vm12697_vm8 = vcmp.eq.s32.totalorder %v12638_v29, 8 }
 0x275   :  { %v3353_v33 = vadd.f32 %v3281_v9, %v10251_v14  ;;  %v3501_v9 = vsel %vm892_vm1, %v3365_v60, %v12696_v27 }
 0x276   :  { %v3153_v63 = vsel %vm783_vm0, %v3137_v20, %v3141_v13  ;;  %v2653_v47 = vpop.f32.mrf.mxu0  ;;  %v2707_v11 = vpop.f32.mrf.mxu1  ;;  %v3441_v56 = vsel %vm892_vm1, %v3425_v25, %v3429_v38  ;;  %v3719_v20 = vadd.f32 %v10043_v26, %v3637_v0 }
 0x277   :  { %v2587_v35 = vpop.f32.mrf.mxu2  ;;  %v2641_v48 = vpop.f32.mrf.mxu3  ;;  %v2708_v18 = vadd.f32 %v2707_v11, %v2653_v47  ;;  %v3569_v54 = vsel %vm12693_vm4, %v10233_v55, %v3441_v56  ;;  %v12698_v11 = vld [vmem:[#allocation49_spill] sm:$0xff]  ;;  %v12699_v56 = vld [vmem:[#allocation50_spill] sm:$0xff]  ;;  %vm12701_vm4 = vcmp.eq.s32.totalorder %v12638_v29, 0 }
 0x278   :  { %v2588_v10 = vadd.f32 %v2587_v35, %v2534_v45  ;;  %v3641_v39 = vadd.f32 %v3569_v54, %v3353_v33  ;;  %v3791_v0 = vmax.f32 %v3719_v20, 0.0  ;;  %v12700_v54 = vrot.slane %v9980_v49, 7 }
 0x279   :  { %2692 = vmatmul.bf16.gmra.mxu0 %v12694_v2  ;;  %2746 = vmatmul.bf16.gmra.mxu1 %v12695_v8 }
 0x27a   :  { %v2642_v22 = vadd.f32 %v2641_v48, %v2588_v10  ;;  %v3723_v25 = vadd.f32 %v10043_v26, %v3641_v39 }
 0x27c   :  { %v3145_v47 = vrot.slane %v2642_v22, 7  ;;  %v3285_v55 = vsel %vm727_vm15, %v2642_v22, %v3153_v63  ;;  %v3433_v45 = vrot.slane %v2642_v22, 1  ;;  %v3509_v33 = vsel %vm12697_vm8, %v2642_v22, %v3501_v9  ;;  %2800 = vmatmul.bf16.gmra.mxu2 %v12698_v11  ;;  %2854 = vmatmul.bf16.gmra.mxu3 %v12699_v56 }
 0x27d   :  { %v3795_v35 = vmax.f32 %v3723_v25, 0.0  ;;  %v3357_v48 = vadd.f32 %v3285_v55, %v2640_v4  ;;  %vm12718_vm8 = vcmp.eq.s32.totalorder %v8799_v6, 0 }
 0x27e   :  { %v3217_v10 = vsel %vm783_vm0, %v3145_v47, %v12700_v54  ;;  %v2655_v39 = vpop.f32.mrf.mxu0  ;;  %v2709_v27 = vpop.f32.mrf.mxu1  ;;  %v3149_v63 = vsel %vm783_vm0, %v3141_v13, %v3145_v47  ;;  %v3437_v9 = vsel %vm892_vm1, %v3429_v38, %v3433_v45  ;;  %v3505_v46 = vsel %vm892_vm1, %v3433_v45, %v3365_v60  ;;  %v8187_v54 = vld [vmem:[#allocation5 + $0x1f4] sm:$0xf0] }
 0x27f   :  { %v3221_v20 = vsel %vm12701_vm4, %v9991_v7, %v3217_v10  ;;  %v2710_v25 = vadd.f32 %v2709_v27, %v2655_v39  ;;  %v2761_v55 = vpop.f32.mrf.mxu2  ;;  %v2815_v56 = vpop.f32.mrf.mxu3  ;;  %v10309_v11 = vpack.c.bf16 %v3795_v35, %v3791_v0  ;;  %v3289_v8 = vsel %vm728_vm3, %v9980_v49, %v3149_v63  ;;  %v12704_v0 = vld [vmem:[#allocation61_spill] sm:$0xff] }
 0x280   :  { %v3293_v13 = vadd.f32 %v3221_v20, %v9980_v49  ;;  %v2762_v47 = vadd.f32 %v2761_v55, %v2708_v18  ;;  %v3361_v38 = vadd.f32 %v3289_v8, %v2642_v22  ;;  %v3573_v60 = vsel %vm745_vm12, %v10251_v14, %v3437_v9 }
 0x281   :  { %12702 = vst [vmem:[#allocation46_spill] sm:$0xff] %v10309_v11  ;;  %v3577_v7 = vsel %vm746_vm7, %v2640_v4, %v3505_v46  ;;  %v3645_v45 = vadd.f32 %v3573_v60, %v3357_v48  ;;  %v3667_v35 = vadd.f32 %v10043_v26, %v12704_v0  ;;  %v12716_v11 = vld [vmem:[#allocation35_spill] sm:$0xff]  ;;  %vm12720_vm4 = vcmp.eq.s32.totalorder %v8799_v6, 8 }
 0x282   :  { %v3581_v10 = vadd.f32 %v3509_v33, %v3293_v13  ;;  %v10320_v39 = vadd.f32 %v2815_v56, %v2762_v47  ;;  %v3649_v27 = vadd.f32 %v3577_v7, %v3361_v38  ;;  %v12707_v47 = vld [vmem:[#allocation32_spill] sm:$0xff]  ;;  %v12708_v38 = vld [vmem:[#allocation33_spill] sm:$0xff]  ;;  %v12710_v7 = vld [vmem:[#allocation31_spill] sm:$0xff] }
 0x283   :  { %v3727_v63 = vadd.f32 %v10043_v26, %v3645_v45  ;;  %v3739_v9 = vmax.f32 %v3667_v35, 0.0 }
 0x284   :  { %v3663_v49 = vadd.f32 %v10043_v26, %v3581_v10  ;;  %v3731_v18 = vadd.f32 %v10043_v26, %v3649_v27  ;;  %v12709_v26 = vld [vmem:[#allocation30_spill] sm:$0xff] }
 0x285   :  { %v3799_v20 = vmax.f32 %v3727_v63, 0.0 }
 0x286   :  { %v2658_v8 = vpop.f32.mrf.mxu0  ;;  %v2712_v22 = vpop.f32.mrf.mxu1  ;;  %v3735_v14 = vmax.f32 %v3663_v49, 0.0  ;;  %v3803_v46 = vmax.f32 %v3731_v18, 0.0  ;;  %v12459_v49 = vrot.slane %v10320_v39, 7 }
 0x287   :  { %v2713_v4 = vadd.f32 %v2712_v22, %v2658_v8  ;;  %v2763_v33 = vpop.f32.mrf.mxu2  ;;  %v2817_v56 = vpop.f32.mrf.mxu3 }
 0x288   :  { %v2764_v48 = vadd.f32 %v2763_v33, %v2710_v25  ;;  %v10327_v55 = vpack.c.bf16 %v3739_v9, %v3735_v14  ;;  %v10329_v13 = vpack.c.bf16 %v3803_v46, %v3799_v20 }
 0x289   :  { %2868 = vmatmul.bf16.vlgmr.msra.gmra.mxu0 %v12707_v47  ;;  %2922 = vmatmul.bf16.vlgmr.msra.gmra.mxu1 %v12708_v38 }
 0x28a   :  { %12705 = vst [vmem:[#allocation47_spill] sm:$0xff] %v10327_v55  ;;  %v10333_v60 = vadd.f32 %v2817_v56, %v2764_v48 }
 0x28b   :  { %12706 = vst [vmem:[#allocation61_spill] sm:$0xff] %v10329_v13  ;;  %v12715_v13 = vld [vmem:[#allocation34_spill] sm:$0xff] }
 0x28c   :  { %2976 = vmatmul.bf16.vlgmr.msra.gmra.mxu2 %v12709_v26  ;;  %3030 = vmatmul.bf16.vlgmr.msra.gmra.mxu3 %v12710_v7  ;;  %v3082_v0 = vrot.slane %v10333_v60, 7  ;;  %v12460_v22 = vrot.slane %v10333_v60, 1 }
 0x28e   :  { %v2660_v45 = vpop.f32.mrf.mxu0  ;;  %v2714_v10 = vpop.f32.mrf.mxu1  ;;  %v3214_v8 = vsel %vm783_vm0, %v12459_v49, %v3082_v0 }
 0x28f   :  { %v2715_v35 = vadd.f32 %v2714_v10, %v2660_v45  ;;  %v2766_v25 = vpop.f32.mrf.mxu2  ;;  %v2820_v27 = vpop.f32.mrf.mxu3 }
 0x290   :  { %v2767_v63 = vadd.f32 %v2766_v25, %v2713_v4 }
 0x292   :  { %v2821_v18 = vadd.f32 %v2820_v27, %v2767_v63  ;;  %v12712_v27 = vld [vmem:[#allocation36_spill] sm:$0xff]  ;;  %v12713_v63 = vld [vmem:[#allocation37_spill] sm:$0xff] }
 0x294   :  { %v3086_v14 = vrot.slane %v2821_v18, 7  ;;  %v3226_v20 = vsel %vm712_vm5, %v2821_v18, %v3214_v8  ;;  %v3374_v46 = vrot.slane %v2821_v18, 1 }
 0x295   :  { %v3298_v33 = vadd.f32 %v3226_v20, %v10333_v60 }
 0x296   :  { %v3498_v4 = vsel %vm892_vm1, %v12460_v22, %v3374_v46  ;;  %v2663_v56 = vpop.f32.mrf.mxu0  ;;  %v2717_v48 = vpop.f32.mrf.mxu1  ;;  %v3210_v47 = vsel %vm783_vm0, %v3082_v0, %v3086_v14 }
 0x297   :  { %v3514_v38 = vsel %vm730_vm6, %v10320_v39, %v3498_v4  ;;  %v2718_v26 = vadd.f32 %v2717_v48, %v2663_v56  ;;  %v2768_v7 = vpop.f32.mrf.mxu2  ;;  %v2822_v45 = vpop.f32.mrf.mxu3 }
 0x298   :  { %v10356_v10 = vadd.f32 %v3514_v38, %v3298_v33  ;;  %v2769_v25 = vadd.f32 %v2768_v7, %v2715_v35 }
 0x299   :  { %2873 = vmatmul.bf16.gmra.mxu0 %v12712_v27  ;;  %2927 = vmatmul.bf16.gmra.mxu1 %v12713_v63 }
 0x29a   :  { %v2823_v8 = vadd.f32 %v2822_v45, %v2769_v25 }
 0x29c   :  { %v3090_v20 = vrot.slane %v2823_v8, 7  ;;  %v3230_v22 = vsel %vm713_vm11, %v2823_v8, %v3210_v47  ;;  %v3378_v0 = vrot.slane %v2823_v8, 1  ;;  %2981 = vmatmul.bf16.gmra.mxu2 %v12715_v13  ;;  %3035 = vmatmul.bf16.gmra.mxu3 %v12716_v11 }
 0x29d   :  { %v3302_v4 = vadd.f32 %v3230_v22, %v2821_v18 }
 0x29e   :  { %v2665_v56 = vpop.f32.mrf.mxu0  ;;  %v2719_v48 = vpop.f32.mrf.mxu1  ;;  %v3206_v35 = vsel %vm783_vm0, %v3086_v14, %v3090_v20  ;;  %v3494_v33 = vsel %vm892_vm1, %v3374_v46, %v3378_v0  ;;  %v10376_v14 = vld [vmem:[%s12346_s4] sm:$0xf] }
 0x29f   :  { %v2720_v38 = vadd.f32 %v2719_v48, %v2665_v56  ;;  %v2771_v7 = vpop.f32.mrf.mxu2  ;;  %v2825_v45 = vpop.f32.mrf.mxu3  ;;  %v3518_v47 = vsel %vm731_vm14, %v10333_v60, %v3494_v33  ;;  %12717 = vst [vmem:[#allocation32_spill] sm:$0xff] %v10376_v14  ;;  %v10379_v46 = vperm.slane %v10376_v14, 2 }
 0x2a0   :  { %v2772_v25 = vadd.f32 %v2771_v7, %v2718_v26  ;;  %v3590_v13 = vadd.f32 %v3518_v47, %v3302_v4 }
 0x2a2   :  { %v2826_v27 = vadd.f32 %v2825_v45, %v2772_v25  ;;  %v3672_v47 = vadd.f32 %v10379_v46, %v3590_v13 }
 0x2a4   :  { %v3094_v11 = vrot.slane %v2826_v27, 7  ;;  %v3234_v22 = vsel %vm714_vm9, %v2826_v27, %v3206_v35  ;;  %v3382_v63 = vrot.slane %v2826_v27, 1  ;;  %v3744_v9 = vmax.f32 %v3672_v47, 0.0 }
 0x2a5   :  { %v3306_v56 = vadd.f32 %v3234_v22, %v2823_v8 }
 0x2a6   :  { %v2668_v48 = vpop.f32.mrf.mxu0  ;;  %v2722_v49 = vpop.f32.mrf.mxu1  ;;  %v3202_v26 = vsel %vm783_vm0, %v3090_v20, %v3094_v11  ;;  %v3490_v4 = vsel %vm892_vm1, %v3378_v0, %v3382_v63 }
 0x2a7   :  { %v2723_v33 = vadd.f32 %v2722_v49, %v2668_v48  ;;  %v2773_v35 = vpop.f32.mrf.mxu2  ;;  %v2827_v7 = vpop.f32.mrf.mxu3  ;;  %v3522_v45 = vsel %vm732_vm10, %v2821_v18, %v3490_v4 }
 0x2a8   :  { %v2774_v25 = vadd.f32 %v2773_v35, %v2720_v38  ;;  %v3594_v14 = vadd.f32 %v3522_v45, %v3306_v56 }
 0x2a9   :  { %2878 = vmatmul.bf16.gmra.mxu0 %v9504_v57  ;;  %2932 = vmatmul.bf16.gmra.mxu1 %v9506_v62 }
 0x2aa   :  { %v2828_v22 = vadd.f32 %v2827_v7, %v2774_v25  ;;  %v3676_v20 = vadd.f32 %v10379_v46, %v3594_v14 }
 0x2ac   :  { %v3098_v55 = vrot.slane %v2828_v22, 7  ;;  %v3238_v49 = vsel %vm12718_vm8, %v2828_v22, %v3202_v26  ;;  %v3386_v0 = vrot.slane %v2828_v22, 1  ;;  %2986 = vmatmul.bf16.gmra.mxu2 %v9500_v53  ;;  %3040 = vmatmul.bf16.gmra.mxu3 %v9502_v3  ;;  %v3748_v18 = vmax.f32 %v3676_v20, 0.0 }
 0x2ad   :  { %v3310_v38 = vadd.f32 %v3238_v49, %v2826_v27  ;;  %vm12721_vm8 = vcmp.eq.s32.totalorder %v8854_v15, 0 }
 0x2ae   :  { %v2670_v13 = vpop.f32.mrf.mxu0  ;;  %v2724_v56 = vpop.f32.mrf.mxu1  ;;  %v3198_v57 = vsel %vm783_vm0, %v3094_v11, %v3098_v55  ;;  %v10397_v62 = vpack.c.bf16 %v3748_v18, %v3744_v9  ;;  %v3486_v14 = vsel %vm892_vm1, %v3382_v63, %v3386_v0 }
 0x2af   :  { %v2725_v48 = vadd.f32 %v2724_v56, %v2670_v13  ;;  %v2776_v4 = vpop.f32.mrf.mxu2  ;;  %v2830_v26 = vpop.f32.mrf.mxu3  ;;  %v3526_v53 = vsel %vm12720_vm4, %v2823_v8, %v3486_v14  ;;  %vm12722_vm4 = vcmp.eq.s32.totalorder %v8854_v15, 8 }
 0x2b0   :  { %12719 = vst [vmem:[#allocation33_spill] sm:$0xff] %v10397_v62  ;;  %v2777_v35 = vadd.f32 %v2776_v4, %v2723_v33  ;;  %v3598_v3 = vadd.f32 %v3526_v53, %v3310_v38 }
 0x2b2   :  { %v2831_v7 = vadd.f32 %v2830_v26, %v2777_v35  ;;  %v3680_v38 = vadd.f32 %v10379_v46, %v3598_v3 }
 0x2b4   :  { %v3102_v45 = vrot.slane %v2831_v7, 7  ;;  %v3242_v47 = vsel %vm12721_vm8, %v2831_v7, %v3198_v57  ;;  %v3390_v25 = vrot.slane %v2831_v7, 1  ;;  %v3752_v4 = vmax.f32 %v3680_v38, 0.0 }
 0x2b5   :  { %v3314_v11 = vadd.f32 %v3242_v47, %v2828_v22  ;;  %vm12723_vm8 = vcmp.eq.s32.totalorder %v8880_v40, 0 }
 0x2b6   :  { %v2673_v9 = vpop.f32.mrf.mxu0  ;;  %v2727_v20 = vpop.f32.mrf.mxu1  ;;  %v3194_v63 = vsel %vm783_vm0, %v3098_v55, %v3102_v45  ;;  %v3482_v49 = vsel %vm892_vm1, %v3386_v0, %v3390_v25 }
 0x2b7   :  { %v2728_v18 = vadd.f32 %v2727_v20, %v2673_v9  ;;  %v2778_v13 = vpop.f32.mrf.mxu2  ;;  %v2832_v8 = vpop.f32.mrf.mxu3  ;;  %v3530_v33 = vsel %vm12722_vm4, %v2826_v27, %v3482_v49  ;;  %vm12724_vm4 = vcmp.eq.s32.totalorder %v8880_v40, 8 }
 0x2b8   :  { %v2779_v56 = vadd.f32 %v2778_v13, %v2725_v48  ;;  %v3602_v57 = vadd.f32 %v3530_v33, %v3314_v11 }
 0x2b9   :  { %2883 = vmatmul.bf16.gmra.mxu0 %v9530_v12  ;;  %2937 = vmatmul.bf16.gmra.mxu1 %v9532_v41 }
 0x2ba   :  { %v2833_v14 = vadd.f32 %v2832_v8, %v2779_v56  ;;  %v3684_v55 = vadd.f32 %v10379_v46, %v3602_v57 }
 0x2bc   :  { %v3106_v26 = vrot.slane %v2833_v14, 7  ;;  %v3246_v0 = vsel %vm12723_vm8, %v2833_v14, %v3194_v63  ;;  %v3394_v53 = vrot.slane %v2833_v14, 1  ;;  %2991 = vmatmul.bf16.gmra.mxu2 %v9526_v32  ;;  %3045 = vmatmul.bf16.gmra.mxu3 %v9528_v61  ;;  %v3756_v27 = vmax.f32 %v3684_v55, 0.0 }
 0x2bd   :  { %v3318_v48 = vadd.f32 %v3246_v0, %v2831_v7  ;;  %vm12725_vm8 = vcmp.eq.s32.totalorder %v8935_v19, 0 }
 0x2be   :  { %v2675_v35 = vpop.f32.mrf.mxu0  ;;  %v2729_v3 = vpop.f32.mrf.mxu1  ;;  %v3190_v12 = vsel %vm783_vm0, %v3102_v45, %v3106_v26  ;;  %v10421_v41 = vpack.c.bf16 %v3756_v27, %v3752_v4  ;;  %v3478_v47 = vsel %vm892_vm1, %v3390_v25, %v3394_v53 }
 0x2bf   :  { %v2730_v11 = vadd.f32 %v2729_v3, %v2675_v35  ;;  %v2781_v9 = vpop.f32.mrf.mxu2  ;;  %v2835_v20 = vpop.f32.mrf.mxu3  ;;  %v3534_v32 = vsel %vm12724_vm4, %v2828_v22, %v3478_v47  ;;  %vm12726_vm4 = vcmp.eq.s32.totalorder %v8935_v19, 8 }
 0x2c0   :  { %v2782_v63 = vadd.f32 %v2781_v9, %v2728_v18  ;;  %v3606_v61 = vadd.f32 %v3534_v32, %v3318_v48 }
 0x2c2   :  { %v2836_v49 = vadd.f32 %v2835_v20, %v2782_v63  ;;  %v3688_v0 = vadd.f32 %v10379_v46, %v3606_v61 }
 0x2c4   :  { %v3110_v13 = vrot.slane %v2836_v49, 7  ;;  %v3250_v8 = vsel %vm12725_vm8, %v2836_v49, %v3190_v12  ;;  %v3398_v33 = vrot.slane %v2836_v49, 1  ;;  %v3760_v3 = vmax.f32 %v3688_v0, 0.0 }
 0x2c5   :  { %v3322_v45 = vadd.f32 %v3250_v8, %v2833_v14  ;;  %vm12727_vm8 = vcmp.eq.s32.totalorder %v8981_v50, 0 }
 0x2c6   :  { %v2678_v38 = vpop.f32.mrf.mxu0  ;;  %v2732_v56 = vpop.f32.mrf.mxu1  ;;  %v3186_v25 = vsel %vm783_vm0, %v3106_v26, %v3110_v13  ;;  %v3474_v57 = vsel %vm892_vm1, %v3394_v53, %v3398_v33 }
 0x2c7   :  { %v2733_v55 = vadd.f32 %v2732_v56, %v2678_v38  ;;  %v2783_v4 = vpop.f32.mrf.mxu2  ;;  %v2837_v22 = vpop.f32.mrf.mxu3  ;;  %v3538_v18 = vsel %vm12726_vm4, %v2831_v7, %v3474_v57  ;;  %vm12728_vm4 = vcmp.eq.s32.totalorder %v8981_v50, 8 }
 0x2c8   :  { %v2784_v27 = vadd.f32 %v2783_v4, %v2730_v11  ;;  %v3610_v48 = vadd.f32 %v3538_v18, %v3322_v45 }
 0x2c9   :  { %2888 = vmatmul.bf16.gmra.mxu0 %v9552_v59  ;;  %2942 = vmatmul.bf16.gmra.mxu1 %v9554_v17 }
 0x2ca   :  { %v10438_v35 = vadd.f32 %v2837_v22, %v2784_v27  ;;  %v3692_v26 = vadd.f32 %v10379_v46, %v3610_v48 }
 0x2cc   :  { %v3114_v53 = vrot.slane %v10438_v35, 7  ;;  %v3254_v12 = vsel %vm12727_vm8, %v10438_v35, %v3186_v25  ;;  %v3402_v7 = vrot.slane %v10438_v35, 1  ;;  %2996 = vmatmul.bf16.gmra.mxu2 %v9548_v58  ;;  %3050 = vmatmul.bf16.gmra.mxu3 %v9550_v37  ;;  %v3764_v59 = vmax.f32 %v3692_v26, 0.0  ;;  %v7470_v26 = vld [vmem:[#allocation5 + $0xe0] sm:$0xf] }
 0x2cd   :  { %v3326_v47 = vadd.f32 %v3254_v12, %v2836_v49  ;;  %vm12729_vm8 = vcmp.eq.s32.totalorder %v9020_v42, 0  ;;  %v7598_v12 = vld [vmem:[#allocation5 + $0x1e0] sm:$0xf] }
 0x2ce   :  { %v2680_v17 = vpop.f32.mrf.mxu0  ;;  %v2734_v11 = vpop.f32.mrf.mxu1  ;;  %v3182_v9 = vsel %vm783_vm0, %v3110_v13, %v3114_v53  ;;  %v10450_v20 = vpack.c.bf16 %v3764_v59, %v3760_v3  ;;  %v3470_v32 = vsel %vm892_vm1, %v3398_v33, %v3402_v7  ;;  %v8154_v3 = vld [vmem:[#allocation5 + $0xec] sm:$0xf0] }
 0x2cf   :  { %v2735_v63 = vadd.f32 %v2734_v11, %v2680_v17  ;;  %v2786_v61 = vpop.f32.mrf.mxu2  ;;  %v2840_v8 = vpop.f32.mrf.mxu3  ;;  %v3542_v58 = vsel %vm12728_vm4, %v2833_v14, %v3470_v32  ;;  %vm12730_vm4 = vcmp.eq.s32.totalorder %v9020_v42, 8  ;;  %v12732_v17 = vld [vmem:[#allocation41_spill] sm:$0xff]  ;;  %v7471_v11 = vor.u32 %v8154_v3, %v7470_v26 }
 0x2d0   :  { %v2787_v45 = vadd.f32 %v2786_v61, %v2733_v55  ;;  %v3614_v37 = vadd.f32 %v3542_v58, %v3326_v47  ;;  %v12731_v47 = vld [vmem:[#allocation40_spill] sm:$0xff]  ;;  %v7726_v61 = vld [vmem:[#allocation5 + $0x2e0] sm:$0xf] }
 0x2d1   :  { %4610 = vmatpush.bf16.msrb.mxu0 %v7471_v11 }
 0x2d2   :  { %v10456_v38 = vadd.f32 %v2840_v8, %v2787_v45  ;;  %v8218_v8 = vld [vmem:[#allocation5 + $0x2ec] sm:$0xf0] }
 0x2d4   :  { %v3118_v56 = vrot.slane %v10456_v38, 7  ;;  %v3258_v13 = vsel %vm12729_vm8, %v10456_v38, %v3182_v9  ;;  %v3406_v25 = vrot.slane %v10456_v38, 1  ;;  %v3696_v9 = vadd.f32 %v10379_v46, %v3614_v37  ;;  %v12735_v37 = vld [vmem:[#allocation39_spill] sm:$0xff] }
 0x2d5   :  { %v3330_v33 = vadd.f32 %v3258_v13, %v10438_v35  ;;  %vm12733_vm8 = vcmp.eq.s32.totalorder %v9070_v23, 0 }
 0x2d6   :  { %v2683_v57 = vpop.f32.mrf.mxu0  ;;  %v2737_v4 = vpop.f32.mrf.mxu1  ;;  %v3178_v22 = vsel %vm783_vm0, %v3114_v53, %v3118_v56  ;;  %v3466_v14 = vsel %vm892_vm1, %v3402_v7, %v3406_v25  ;;  %v8186_v53 = vld [vmem:[#allocation5 + $0x1ec] sm:$0xf0] }
 0x2d7   :  { %v2738_v55 = vadd.f32 %v2737_v4, %v2683_v57  ;;  %v2788_v18 = vpop.f32.mrf.mxu2  ;;  %v2842_v0 = vpop.f32.mrf.mxu3  ;;  %v3546_v27 = vsel %vm12730_vm4, %v2836_v49, %v3466_v14  ;;  %v7599_v32 = vor.u32 %v8186_v53, %v7598_v12  ;;  %v7454_v57 = vld [vmem:[#allocation5 + $0xc0] sm:$0xf]  ;;  %v8150_v4 = vld [vmem:[#allocation5 + $0xcc] sm:$0xf0]  ;;  %vm12737_vm4 = vcmp.eq.s32.totalorder %v9070_v23, 8 }
 0x2d8   :  { %v2789_v48 = vadd.f32 %v2788_v18, %v2735_v63  ;;  %v3618_v59 = vadd.f32 %v3546_v27, %v3330_v33  ;;  %v7727_v63 = vor.u32 %v8218_v8, %v7726_v61  ;;  %v12734_v33 = vld [vmem:[#allocation38_spill] sm:$0xff]  ;;  %v7455_v14 = vor.u32 %v8150_v4, %v7454_v57  ;;  %v7582_v18 = vld [vmem:[#allocation5 + $0x1c0] sm:$0xf] }
 0x2d9   :  { %2893 = vmatmul.bf16.gmra.mxu0 %v12731_v47  ;;  %2947 = vmatmul.bf16.gmra.mxu1 %v12732_v17  ;;  %v3768_v27 = vmax.f32 %v3696_v9, 0.0  ;;  %v7710_v47 = vld [vmem:[#allocation5 + $0x2c0] sm:$0xf]  ;;  %v8214_v17 = vld [vmem:[#allocation5 + $0x2cc] sm:$0xf0] }
 0x2da   :  { %v10473_v7 = vadd.f32 %v2842_v0, %v2789_v48  ;;  %v3700_v49 = vadd.f32 %v10379_v46, %v3618_v59  ;;  %4664 = vmatpush.bf16.msrb.mxu1 %v7599_v32  ;;  %4718 = vmatpush.bf16.msrb.mxu2 %v7727_v63  ;;  %v8182_v0 = vld [vmem:[#allocation5 + $0x1cc] sm:$0xf0]  ;;  %v7711_v8 = vor.u32 %v8214_v17, %v7710_v47 }
 0x2db   :  { %v7583_v59 = vor.u32 %v8182_v0, %v7582_v18  ;;  %4611 = vmatpush.bf16.msrb.mxu0 %v7455_v14  ;;  %v7694_v14 = vld [vmem:[#allocation5 + $0x2a0] sm:$0xf]  ;;  %v8210_v0 = vld [vmem:[#allocation5 + $0x2ac] sm:$0xf0] }
 0x2dc   :  { %v3122_v58 = vrot.slane %v10473_v7, 7  ;;  %v3262_v45 = vsel %vm12733_vm8, %v10473_v7, %v3178_v22  ;;  %v3410_v13 = vrot.slane %v10473_v7, 1  ;;  %3001 = vmatmul.bf16.gmra.mxu2 %v12734_v33  ;;  %3055 = vmatmul.bf16.gmra.mxu3 %v12735_v37  ;;  %v3772_v48 = vmax.f32 %v3700_v49, 0.0  ;;  %v7566_v33 = vld [vmem:[#allocation5 + $0x1a0] sm:$0xf] }
 0x2dd   :  { %v3334_v26 = vadd.f32 %v3262_v45, %v10456_v38  ;;  %v7438_v45 = vld [vmem:[#allocation5 + $0xa0] sm:$0xf]  ;;  %vm12738_vm8 = vcmp.eq.s32.totalorder %v12617_v30, 0  ;;  %v8174_v47 = vld [vmem:[#allocation5 + $0x18c] sm:$0xf0] }
 0x2de   :  { %v2685_v3 = vpop.f32.mrf.mxu0  ;;  %v2739_v12 = vpop.f32.mrf.mxu1  ;;  %v3174_v22 = vsel %vm783_vm0, %v3118_v56, %v3122_v58  ;;  %v3462_v11 = vsel %vm892_vm1, %v3406_v25, %v3410_v13  ;;  %v10488_v9 = vpack.c.bf16 %v3772_v48, %v3768_v27  ;;  %v8146_v56 = vld [vmem:[#allocation5 + $0xac] sm:$0xf0]  ;;  %4665 = vmatpush.bf16.msrb.mxu1 %v7583_v59  ;;  %4719 = vmatpush.bf16.msrb.mxu2 %v7711_v8  ;;  %v7550_v59 = vld [vmem:[#allocation5 + $0x180] sm:$0xf] }
 0x2df   :  { %v2740_v53 = vadd.f32 %v2739_v12, %v2685_v3  ;;  %v2791_v32 = vpop.f32.mrf.mxu2  ;;  %v2845_v61 = vpop.f32.mrf.mxu3  ;;  %v3550_v49 = vsel %vm12737_vm4, %v10438_v35, %v3462_v11  ;;  %v7439_v57 = vor.u32 %v8146_v56, %v7438_v45  ;;  %v8178_v25 = vld [vmem:[#allocation5 + $0x1ac] sm:$0xf0]  ;;  %v7695_v27 = vor.u32 %v8210_v0, %v7694_v14  ;;  %v7406_v14 = vld [vmem:[#allocation5 + $0x60] sm:$0xf] }
 0x2e0   :  { %12736 = vst [vmem:[#allocation30_spill] sm:$0xff] %v10488_v9  ;;  %v2792_v63 = vadd.f32 %v2791_v32, %v2738_v55  ;;  %v3622_v37 = vadd.f32 %v3550_v49, %v3334_v26  ;;  %v7567_v18 = vor.u32 %v8178_v25, %v7566_v33  ;;  %v7422_v26 = vld [vmem:[#allocation5 + $0x80] sm:$0xf]  ;;  %v8142_v3 = vld [vmem:[#allocation5 + $0x8c] sm:$0xf0]  ;;  %v7551_v8 = vor.u32 %v8174_v47, %v7550_v59 }
 0x2e1   :  { %4612 = vmatpush.bf16.msrb.mxu0 %v7439_v57  ;;  %v7423_v12 = vor.u32 %v8142_v3, %v7422_v26  ;;  %v7678_v49 = vld [vmem:[#allocation5 + $0x280] sm:$0xf]  ;;  %vm12739_vm4 = vcmp.eq.s32.totalorder %v12617_v30, 8 }
 0x2e2   :  { %v10493_v4 = vadd.f32 %v2845_v61, %v2792_v63  ;;  %4666 = vmatpush.bf16.msrb.mxu1 %v7567_v18  ;;  %4720 = vmatpush.bf16.msrb.mxu2 %v7695_v27  ;;  %v8206_v63 = vld [vmem:[#allocation5 + $0x28c] sm:$0xf0]  ;;  %v7534_v0 = vld [vmem:[#allocation5 + $0x160] sm:$0xf]  ;;  %v3704_v26 = vadd.f32 %v10379_v46, %v3622_v37  ;;  %v12740_v37 = vld [vmem:[#allocation42_spill] sm:$0xff] }
 0x2e3   :  { %v7679_v57 = vor.u32 %v8206_v63, %v7678_v49  ;;  %v7662_v59 = vld [vmem:[#allocation5 + $0x260] sm:$0xf] }
 0x2e4   :  { %v3126_v48 = vrot.slane %v10493_v4, 7  ;;  %v3266_v35 = vsel %vm12738_vm8, %v10493_v4, %v3174_v22  ;;  %v3414_v55 = vrot.slane %v10493_v4, 1  ;;  %v7518_v63 = vld [vmem:[#allocation5 + $0x140] sm:$0xf]  ;;  %vm12743_vm8 = vcmp.eq.s32.totalorder %v12625_v5, 0 }
 0x2e5   :  { %v3338_v17 = vadd.f32 %v3266_v35, %v10473_v7  ;;  %4613 = vmatpush.bf16.msrb.mxu0 %v7423_v12 }
 0x2e6   :  { %v2688_v11 = vpop.f32.mrf.mxu0  ;;  %v2742_v32 = vpop.f32.mrf.mxu1  ;;  %v3170_v61 = vsel %vm783_vm0, %v3122_v58, %v3126_v48  ;;  %v3458_v22 = vsel %vm892_vm1, %v3410_v13, %v3414_v55  ;;  %v8138_v58 = vld [vmem:[#allocation5 + $0x6c] sm:$0xf0]  ;;  %4667 = vmatpush.bf16.msrb.mxu1 %v7551_v8  ;;  %4721 = vmatpush.bf16.msrb.mxu2 %v7679_v57 }
 0x2e7   :  { %v2743_v45 = vadd.f32 %v2742_v32, %v2688_v11  ;;  %v2793_v56 = vpop.f32.mrf.mxu2  ;;  %v2847_v33 = vpop.f32.mrf.mxu3  ;;  %v3554_v25 = vsel %vm12739_vm4, %v10456_v38, %v3458_v22  ;;  %v7407_v35 = vor.u32 %v8138_v58, %v7406_v14  ;;  %v8170_v13 = vld [vmem:[#allocation5 + $0x16c] sm:$0xf0]  ;;  %v12741_v11 = vld [vmem:[#allocation43_spill] sm:$0xff]  ;;  %vm12744_vm4 = vcmp.eq.s32.totalorder %v12625_v5, 8 }
 0x2e8   :  { %v2794_v18 = vadd.f32 %v2793_v56, %v2740_v53  ;;  %v3626_v27 = vadd.f32 %v3554_v25, %v3338_v17  ;;  %v7535_v12 = vor.u32 %v8170_v13, %v7534_v0  ;;  %v8202_v38 = vld [vmem:[#allocation5 + $0x26c] sm:$0xf0]  ;;  %v7390_v32 = vld [vmem:[#allocation5 + $0x40] sm:$0xf]  ;;  %v3776_v56 = vmax.f32 %v3704_v26, 0.0 }
 0x2e9   :  { %2898 = vmatmul.bf16.gmra.mxu0 %v12680_v24  ;;  %2952 = vmatmul.bf16.gmra.mxu1 %v12681_v43  ;;  %v7663_v47 = vor.u32 %v8202_v38, %v7662_v59  ;;  %v8134_v8 = vld [vmem:[#allocation5 + $0x4c] sm:$0xf0]  ;;  %v7646_v58 = vld [vmem:[#allocation5 + $0x240] sm:$0xf] }
 0x2ea   :  { %v10513_v3 = vadd.f32 %v2847_v33, %v2794_v18  ;;  %v3708_v53 = vadd.f32 %v10379_v46, %v3626_v27  ;;  %4614 = vmatpush.bf16.msrb.mxu0 %v7407_v35  ;;  %v7391_v49 = vor.u32 %v8134_v8, %v7390_v32  ;;  %v8166_v22 = vld [vmem:[#allocation5 + $0x14c] sm:$0xf0]  ;;  %4668 = vmatpush.bf16.msrb.mxu1 %v7535_v12 }
 0x2eb   :  { %4722 = vmatpush.bf16.msrb.mxu2 %v7663_v47  ;;  %v7519_v14 = vor.u32 %v8166_v22, %v7518_v63  ;;  %v8198_v0 = vld [vmem:[#allocation5 + $0x24c] sm:$0xf0] }
 0x2ec   :  { %v3130_v17 = vrot.slane %v10513_v3, 7  ;;  %v3270_v24 = vsel %vm723_vm13, %v10513_v3, %v3170_v61  ;;  %v3418_v43 = vrot.slane %v10513_v3, 1  ;;  %3006 = vmatmul.bf16.gmra.mxu2 %v12740_v37  ;;  %3060 = vmatmul.bf16.gmra.mxu3 %v12741_v11  ;;  %v3780_v33 = vmax.f32 %v3708_v53, 0.0  ;;  %v7374_v53 = vld [vmem:[#allocation5 + $0x20] sm:$0xf] }
 0x2ed   :  { %v3342_v57 = vadd.f32 %v3270_v24, %v10493_v4  ;;  %v7647_v59 = vor.u32 %v8198_v0, %v7646_v58  ;;  %v8130_v47 = vld [vmem:[#allocation5 + $0x2c] sm:$0xf0]  ;;  %v7502_v24 = vld [vmem:[#allocation5 + $0x120] sm:$0xf] }
 0x2ee   :  { %v2690_v25 = vpop.f32.mrf.mxu0  ;;  %v2744_v18 = vpop.f32.mrf.mxu1  ;;  %v3166_v61 = vsel %vm783_vm0, %v3126_v48, %v3130_v17  ;;  %v3454_v27 = vsel %vm892_vm1, %v3414_v55, %v3418_v43  ;;  %4615 = vmatpush.bf16.msrb.mxu0 %v7391_v49  ;;  %v10530_v38 = vpack.c.bf16 %v3780_v33, %v3776_v56  ;;  %v7375_v11 = vor.u32 %v8130_v47, %v7374_v53  ;;  %v8162_v32 = vld [vmem:[#allocation5 + $0x12c] sm:$0xf0]  ;;  %v7630_v49 = vld [vmem:[#allocation5 + $0x220] sm:$0xf] }
 0x2ef   :  { %v2745_v35 = vadd.f32 %v2744_v18, %v2690_v25  ;;  %v2796_v13 = vpop.f32.mrf.mxu2  ;;  %v2850_v26 = vpop.f32.mrf.mxu3  ;;  %v3558_v48 = vsel %vm741_vm2, %v10473_v7, %v3454_v27  ;;  %4669 = vmatpush.bf16.msrb.mxu1 %v7519_v14  ;;  %4723 = vmatpush.bf16.msrb.mxu2 %v7647_v59  ;;  %v7503_v55 = vor.u32 %v8162_v32, %v7502_v24  ;;  %v8194_v63 = vld [vmem:[#allocation5 + $0x22c] sm:$0xf0]  ;;  %v7358_v33 = vld [vmem:[#allocation5] sm:$0xf] }
 0x2f0   :  { %12742 = vst [vmem:[#allocation31_spill] sm:$0xff] %v10530_v38  ;;  %v2797_v12 = vadd.f32 %v2796_v13, %v2743_v45  ;;  %v3630_v37 = vadd.f32 %v3558_v48, %v3342_v57  ;;  %v7631_v22 = vor.u32 %v8194_v63, %v7630_v49  ;;  %v8126_v57 = vld [vmem:[#allocation5 + $0xc] sm:$0xf0]  ;;  %v7486_v18 = vld [vmem:[#allocation5 + $0x100] sm:$0xf] }
 0x2f1   :  { %v7359_v25 = vor.u32 %v8126_v57, %v7358_v33  ;;  %v8158_v58 = vld [vmem:[#allocation5 + $0x10c] sm:$0xf0]  ;;  %v7614_v59 = vld [vmem:[#allocation5 + $0x200] sm:$0xf] }
 0x2f2   :  { %v10535_v8 = vadd.f32 %v2850_v26, %v2797_v12  ;;  %4616 = vmatpush.bf16.msrb.mxu0 %v7375_v11  ;;  %v7487_v26 = vor.u32 %v8158_v58, %v7486_v18  ;;  %v8190_v48 = vld [vmem:[#allocation5 + $0x20c] sm:$0xf0] }
 0x2f3   :  { %4670 = vmatpush.bf16.msrb.mxu1 %v7503_v55  ;;  %4724 = vmatpush.bf16.msrb.mxu2 %v7631_v22  ;;  %v7615_v24 = vor.u32 %v8190_v48, %v7614_v59 }
 0x2f4   :  { %v3134_v56 = vrot.slane %v10535_v8, 7  ;;  %v3274_v7 = vsel %vm12743_vm8, %v10535_v8, %v3166_v61  ;;  %v3422_v45 = vrot.slane %v10535_v8, 1  ;;  %vm12745_vm8 = vcmp.eq.s32.totalorder %v12628_v31, 0 }
 0x2f5   :  { %v3346_v14 = vadd.f32 %v3274_v7, %v10513_v3 }
 0x2f6   :  { %v2693_v0 = vpop.f32.mrf.mxu0  ;;  %v2747_v27 = vpop.f32.mrf.mxu1  ;;  %v3162_v13 = vsel %vm783_vm0, %v3130_v17, %v3134_v56  ;;  %v3450_v61 = vsel %vm892_vm1, %v3418_v43, %v3422_v45  ;;  %4617 = vmatpush.bf16.msrb.mxu0 %v7359_v25  ;;  %v3712_v17 = vadd.f32 %v10379_v46, %v3630_v37 }
 0x2f7   :  { %v2748_v12 = vadd.f32 %v2747_v27, %v2693_v0  ;;  %v2798_v53 = vpop.f32.mrf.mxu2  ;;  %v2852_v47 = vpop.f32.mrf.mxu3  ;;  %v3562_v11 = vsel %vm12744_vm4, %v10493_v4, %v3450_v61  ;;  %4671 = vmatpush.bf16.msrb.mxu1 %v7487_v26  ;;  %4725 = vmatpush.bf16.msrb.mxu2 %v7615_v24  ;;  %vm12747_vm4 = vcmp.eq.s32.totalorder %v12628_v31, 8  ;;  %v12819_v51 = vld [vmem:[#allocation31_spill] sm:$0xff] }
 0x2f8   :  { %v2799_v32 = vadd.f32 %v2798_v53, %v2745_v35  ;;  %v3634_v49 = vadd.f32 %v3562_v11, %v3346_v14  ;;  %v3784_v22 = vmax.f32 %v3712_v17, 0.0 }
 0x2f9   :  { %2903 = vmatmul.bf16.gmra.mxu0 %v9612_v28  ;;  %2957 = vmatmul.bf16.gmra.mxu1 %v9614_v52  ;;  %v7854_v28 = vld [vmem:[#allocation5 + $0x3e0] sm:$0xf]  ;;  %v8250_v52 = vld [vmem:[#allocation5 + $0x3ec] sm:$0xf0] }
 0x2fa   :  { %v10553_v55 = vadd.f32 %v2852_v47, %v2799_v32  ;;  %v3716_v43 = vadd.f32 %v10379_v46, %v3634_v49  ;;  %v7855_v37 = vor.u32 %v8250_v52, %v7854_v28  ;;  %v3366_v28 = vrot.slane %v10320_v39, 1 }
 0x2fc   :  { %v3138_v63 = vrot.slane %v10553_v55, 7  ;;  %v3278_v4 = vsel %vm12745_vm8, %v10553_v55, %v3162_v13  ;;  %v3426_v35 = vrot.slane %v10553_v55, 1  ;;  %3011 = vmatmul.bf16.gmra.mxu2 %v9608_v16  ;;  %3065 = vmatmul.bf16.gmra.mxu3 %v12689_v21  ;;  %v3788_v7 = vmax.f32 %v3716_v43, 0.0 }
 0x2fd   :  { %v3350_v33 = vadd.f32 %v3278_v4, %v10535_v8  ;;  %4772 = vmatpush.bf16.msrb.mxu3 %v7855_v37  ;;  %vm12748_vm8 = vcmp.eq.s32.totalorder %v12633_v44, 0  ;;  %v12750_v4 = vld [vmem:[#allocation48_spill] sm:$0xff] }
 0x2fe   :  { %v2695_v57 = vpop.f32.mrf.mxu0  ;;  %v2749_v25 = vpop.f32.mrf.mxu1  ;;  %v3158_v18 = vsel %vm783_vm0, %v3134_v56, %v3138_v63  ;;  %v3446_v58 = vsel %vm892_vm1, %v3422_v45, %v3426_v35  ;;  %v10568_v16 = vpack.c.bf16 %v3788_v7, %v3784_v22 }
 0x2ff   :  { %v2801_v14 = vpop.f32.mrf.mxu2  ;;  %v2855_v0 = vpop.f32.mrf.mxu3  ;;  %v3566_v21 = vsel %vm12747_vm4, %v10513_v3, %v3446_v58  ;;  %v2750_v45 = vadd.f32 %v2749_v25, %v2695_v57  ;;  %vm12749_vm4 = vcmp.eq.s32.totalorder %v12633_v44, 8  ;;  %v12753_v57 = vld [vmem:[#allocation50_spill] sm:$0xff]  ;;  %v7838_v25 = vld [vmem:[#allocation5 + $0x3c0] sm:$0xf] }
 0x300   :  { %12746 = vst [vmem:[#allocation36_spill] sm:$0xff] %v10568_v16  ;;  %v2802_v27 = vadd.f32 %v2801_v14, %v2748_v12  ;;  %v3638_v13 = vadd.f32 %v3566_v21, %v3350_v33 }
 0x302   :  { %v2856_v26 = vadd.f32 %v2855_v0, %v2802_v27  ;;  %v12754_v27 = vrot.slane %v10320_v39, 7 }
 0x304   :  { %v3142_v59 = vrot.slane %v2856_v26, 7  ;;  %v3282_v48 = vsel %vm12748_vm8, %v2856_v26, %v3158_v18  ;;  %v3430_v56 = vrot.slane %v2856_v26, 1  ;;  %v8246_v18 = vld [vmem:[#allocation5 + $0x3cc] sm:$0xf0]  ;;  %vm12755_vm8 = vcmp.eq.s32.totalorder %v12638_v29, 0 }
 0x305   :  { %v3354_v61 = vadd.f32 %v3282_v48, %v10553_v55  ;;  %v7839_v58 = vor.u32 %v8246_v18, %v7838_v25 }
 0x306   :  { %v3154_v53 = vsel %vm783_vm0, %v3138_v63, %v3142_v59  ;;  %v2869_v47 = vpop.f32.mrf.mxu0  ;;  %v2923_v24 = vpop.f32.mrf.mxu1  ;;  %v3442_v11 = vsel %vm892_vm1, %v3426_v35, %v3430_v56  ;;  %v3720_v63 = vadd.f32 %v10379_v46, %v3638_v13 }
 0x307   :  { %v2803_v3 = vpop.f32.mrf.mxu2  ;;  %v2857_v12 = vpop.f32.mrf.mxu3  ;;  %v2924_v32 = vadd.f32 %v2923_v24, %v2869_v47  ;;  %v3570_v49 = vsel %vm12749_vm4, %v10535_v8, %v3442_v11  ;;  %v12751_v8 = vrot.slane %v10333_v60, 1  ;;  %4773 = vmatpush.bf16.msrb.mxu3 %v7839_v58  ;;  %vm12756_vm4 = vcmp.eq.s32.totalorder %v12638_v29, 8 }
 0x308   :  { %v2804_v17 = vadd.f32 %v2803_v3, %v2750_v45  ;;  %v3642_v43 = vadd.f32 %v3570_v49, %v3354_v61  ;;  %v3792_v14 = vmax.f32 %v3720_v63, 0.0 }
 0x309   :  { %2908 = vmatmul.bf16.gmra.mxu0 %v12694_v2  ;;  %2962 = vmatmul.bf16.gmra.mxu1 %v12750_v4  ;;  %v3502_v33 = vsel %vm892_vm1, %v3366_v28, %v12751_v8  ;;  %v12752_v2 = vld [vmem:[#allocation49_spill] sm:$0xff] }
 0x30a   :  { %v2858_v52 = vadd.f32 %v2857_v12, %v2804_v17  ;;  %v3724_v35 = vadd.f32 %v10379_v46, %v3642_v43 }
 0x30c   :  { %v3146_v37 = vrot.slane %v2858_v52, 7  ;;  %v3286_v22 = vsel %vm727_vm15, %v2858_v52, %v3154_v53  ;;  %v3434_v7 = vrot.slane %v2858_v52, 1  ;;  %3016 = vmatmul.bf16.gmra.mxu2 %v12752_v2  ;;  %3070 = vmatmul.bf16.gmra.mxu3 %v12753_v57  ;;  %v3796_v0 = vmax.f32 %v3724_v35, 0.0 }
 0x30d   :  { %v3358_v21 = vadd.f32 %v3286_v22, %v2856_v26  ;;  %v3668_v22 = vadd.f32 %v10379_v46, %v10356_v10 }
 0x30e   :  { %v3218_v13 = vsel %vm783_vm0, %v3146_v37, %v12754_v27  ;;  %v2871_v48 = vpop.f32.mrf.mxu0  ;;  %v2925_v61 = vpop.f32.mrf.mxu1  ;;  %v3150_v45 = vsel %vm783_vm0, %v3142_v59, %v3146_v37  ;;  %v3438_v53 = vsel %vm892_vm1, %v3430_v56, %v3434_v7  ;;  %v3506_v47 = vsel %vm892_vm1, %v3434_v7, %v3366_v28  ;;  %v12759_v27 = vld [vmem:[#allocation47_spill] sm:$0xff] }
 0x30f   :  { %v3222_v24 = vsel %vm12755_vm8, %v10333_v60, %v3218_v13  ;;  %v2926_v11 = vadd.f32 %v2925_v61, %v2871_v48  ;;  %v2977_v3 = vpop.f32.mrf.mxu2  ;;  %v3031_v12 = vpop.f32.mrf.mxu3  ;;  %v10609_v49 = vpack.c.bf16 %v3796_v0, %v3792_v14  ;;  %v3290_v59 = vsel %vm728_vm3, %v10320_v39, %v3150_v45  ;;  %v8242_v48 = vld [vmem:[#allocation5 + $0x3ac] sm:$0xf0] }
 0x310   :  { %v3294_v17 = vadd.f32 %v3222_v24, %v10320_v39  ;;  %v2978_v56 = vadd.f32 %v2977_v3, %v2924_v32  ;;  %v3362_v43 = vadd.f32 %v3290_v59, %v2858_v52  ;;  %v3574_v4 = vsel %vm745_vm12, %v10553_v55, %v3438_v53 }
 0x311   :  { %v3510_v60 = vsel %vm12756_vm4, %v2858_v52, %v3502_v33  ;;  %v3578_v63 = vsel %vm746_vm7, %v2856_v26, %v3506_v47  ;;  %v3646_v28 = vadd.f32 %v3574_v4, %v3358_v21  ;;  %v3740_v33 = vmax.f32 %v3668_v22, 0.0  ;;  %v12758_v21 = vld [vmem:[#allocation59_spill] sm:$0xff] }
 0x312   :  { %v3582_v35 = vadd.f32 %v3510_v60, %v3294_v17  ;;  %v10622_v37 = vadd.f32 %v3031_v12, %v2978_v56  ;;  %v3650_v39 = vadd.f32 %v3578_v63, %v3362_v43  ;;  %vm12767_vm8 = vcmp.eq.s32.totalorder %v8799_v6, 0 }
 0x313   :  { %v3728_v32 = vadd.f32 %v10379_v46, %v3646_v28  ;;  %vm12769_vm4 = vcmp.eq.s32.totalorder %v8799_v6, 8 }
 0x314   :  { %v3664_v7 = vadd.f32 %v10379_v46, %v3582_v35  ;;  %v3732_v55 = vadd.f32 %v10379_v46, %v3650_v39  ;;  %v7822_v46 = vld [vmem:[#allocation5 + $0x3a0] sm:$0xf]  ;;  %v12467_v59 = vrot.slane %v10622_v37, 7 }
 0x315   :  { %v3800_v57 = vmax.f32 %v3728_v32, 0.0  ;;  %v7823_v61 = vor.u32 %v8242_v48, %v7822_v46 }
 0x316   :  { %v2874_v8 = vpop.f32.mrf.mxu0  ;;  %v2928_v2 = vpop.f32.mrf.mxu1  ;;  %v3736_v52 = vmax.f32 %v3664_v7, 0.0  ;;  %v3804_v26 = vmax.f32 %v3732_v55, 0.0 }
 0x317   :  { %v2929_v25 = vadd.f32 %v2928_v2, %v2874_v8  ;;  %v2979_v18 = vpop.f32.mrf.mxu2  ;;  %v3033_v58 = vpop.f32.mrf.mxu3  ;;  %4774 = vmatpush.bf16.msrb.mxu3 %v7823_v61 }
 0x318   :  { %v2980_v14 = vadd.f32 %v2979_v18, %v2926_v11  ;;  %v10629_v0 = vpack.c.bf16 %v3740_v33, %v3736_v52  ;;  %v10631_v10 = vpack.c.bf16 %v3804_v26, %v3800_v57  ;;  %v12761_v26 = vld [vmem:[#allocation52_spill] sm:$0xff] }
 0x319   :  { %4618 = vmatmul.bf16.vlgmr.msrb.gmra.mxu0 %v12758_v21  ;;  %4672 = vmatmul.bf16.vlgmr.msrb.gmra.mxu1 %v12759_v27 }
 0x31a   :  { %12757 = vst [vmem:[#allocation37_spill] sm:$0xff] %v10629_v0  ;;  %v10635_v13 = vadd.f32 %v3033_v58, %v2980_v14 }
 0x31c   :  { %4726 = vmatmul.bf16.vlgmr.msrb.gmra.mxu2 %v10629_v0  ;;  %v3083_v47 = vrot.slane %v10635_v13, 7  ;;  %v12468_v43 = vrot.slane %v10635_v13, 1 }
 0x31e   :  { %v2876_v45 = vpop.f32.mrf.mxu0  ;;  %v2930_v53 = vpop.f32.mrf.mxu1  ;;  %v3215_v56 = vsel %vm783_vm0, %v12467_v59, %v3083_v47 }
 0x31f   :  { %v2931_v24 = vadd.f32 %v2930_v53, %v2876_v45  ;;  %v2982_v11 = vpop.f32.mrf.mxu2  ;;  %v3036_v3 = vpop.f32.mrf.mxu3 }
 0x320   :  { %v2983_v12 = vadd.f32 %v2982_v11, %v2929_v25  ;;  %v12762_v25 = vld [vmem:[#allocation51_spill] sm:$0xff] }
 0x322   :  { %v3037_v17 = vadd.f32 %v3036_v3, %v2983_v12 }
 0x324   :  { %v3087_v4 = vrot.slane %v3037_v17, 7  ;;  %v3227_v63 = vsel %vm712_vm5, %v3037_v17, %v3215_v56  ;;  %v3375_v28 = vrot.slane %v3037_v17, 1 }
 0x325   :  { %v3299_v35 = vadd.f32 %v3227_v63, %v10635_v13 }
 0x326   :  { %v3499_v22 = vsel %vm892_vm1, %v12468_v43, %v3375_v28  ;;  %v2879_v39 = vpop.f32.mrf.mxu0  ;;  %v2933_v32 = vpop.f32.mrf.mxu1  ;;  %v3211_v7 = vsel %vm783_vm0, %v3083_v47, %v3087_v4 }
 0x327   :  { %v3515_v55 = vsel %vm730_vm6, %v10622_v37, %v3499_v22  ;;  %v2934_v8 = vadd.f32 %v2933_v32, %v2879_v39  ;;  %v2984_v2 = vpop.f32.mrf.mxu2  ;;  %v3038_v52 = vpop.f32.mrf.mxu3 }
 0x328   :  { %v10657_v33 = vadd.f32 %v3515_v55, %v3299_v35  ;;  %v2985_v57 = vadd.f32 %v2984_v2, %v2931_v24  ;;  %v7806_v55 = vld [vmem:[#allocation5 + $0x380] sm:$0xf] }
 0x329   :  { %4623 = vmatmul.bf16.gmra.mxu0 %v12761_v26  ;;  %4677 = vmatmul.bf16.gmra.mxu1 %v12762_v25 }
 0x32a   :  { %v3039_v18 = vadd.f32 %v3038_v52, %v2985_v57  ;;  %v12764_v52 = vld [vmem:[#allocation32_spill] sm:$0xff] }
 0x32c   :  { %v3091_v58 = vrot.slane %v3039_v18, 7  ;;  %v3231_v46 = vsel %vm713_vm11, %v3039_v18, %v3211_v7  ;;  %v3379_v48 = vrot.slane %v3039_v18, 1  ;;  %4731 = vmatmul.bf16.gmra.mxu2 %v10397_v62 }
 0x32d   :  { %v3303_v61 = vadd.f32 %v3231_v46, %v3037_v17 }
 0x32e   :  { %v2881_v45 = vpop.f32.mrf.mxu0  ;;  %v2935_v53 = vpop.f32.mrf.mxu1  ;;  %v3207_v47 = vsel %vm783_vm0, %v3087_v4, %v3091_v58  ;;  %v3495_v24 = vsel %vm892_vm1, %v3375_v28, %v3379_v48  ;;  %v8238_v4 = vld [vmem:[#allocation5 + $0x38c] sm:$0xf0]  ;;  %v10674_v28 = vperm.slane %v12764_v52, 3 }
 0x32f   :  { %v2936_v11 = vadd.f32 %v2935_v53, %v2881_v45  ;;  %v2987_v3 = vpop.f32.mrf.mxu2  ;;  %v3041_v12 = vpop.f32.mrf.mxu3  ;;  %v3519_v56 = vsel %vm731_vm14, %v10635_v13, %v3495_v24  ;;  %v7807_v2 = vor.u32 %v8238_v4, %v7806_v55  ;;  %v12766_v55 = vld [vmem:[#allocation62_spill] sm:$0xff] }
 0x330   :  { %v2988_v63 = vadd.f32 %v2987_v3, %v2934_v8  ;;  %v3591_v35 = vadd.f32 %v3519_v56, %v3303_v61 }
 0x331   :  { %4775 = vmatpush.bf16.msrb.mxu3 %v7807_v2 }
 0x332   :  { %v3042_v22 = vadd.f32 %v3041_v12, %v2988_v63  ;;  %v3673_v12 = vadd.f32 %v10674_v28, %v3591_v35 }
 0x334   :  { %v3095_v39 = vrot.slane %v3042_v22, 7  ;;  %v3235_v32 = vsel %vm714_vm9, %v3042_v22, %v3207_v47  ;;  %v3383_v7 = vrot.slane %v3042_v22, 1  ;;  %v3745_v52 = vmax.f32 %v3673_v12, 0.0 }
 0x335   :  { %v3307_v57 = vadd.f32 %v3235_v32, %v3039_v18  ;;  %v12765_v32 = vld [vmem:[#allocation53_spill] sm:$0xff] }
 0x336   :  { %v2884_v46 = vpop.f32.mrf.mxu0  ;;  %v2938_v45 = vpop.f32.mrf.mxu1  ;;  %v3203_v53 = vsel %vm783_vm0, %v3091_v58, %v3095_v39  ;;  %v3491_v8 = vsel %vm892_vm1, %v3379_v48, %v3383_v7 }
 0x337   :  { %v2939_v61 = vadd.f32 %v2938_v45, %v2884_v46  ;;  %v2989_v24 = vpop.f32.mrf.mxu2  ;;  %v3043_v3 = vpop.f32.mrf.mxu3  ;;  %v3523_v47 = vsel %vm732_vm10, %v3037_v17, %v3491_v8 }
 0x338   :  { %v2990_v56 = vadd.f32 %v2989_v24, %v2936_v11  ;;  %v3595_v63 = vadd.f32 %v3523_v47, %v3307_v57 }
 0x339   :  { %4628 = vmatmul.bf16.gmra.mxu0 %v12765_v32  ;;  %4682 = vmatmul.bf16.gmra.mxu1 %v12766_v55 }
 0x33a   :  { %v3044_v4 = vadd.f32 %v3043_v3, %v2990_v56  ;;  %v3677_v58 = vadd.f32 %v10674_v28, %v3595_v63 }
 0x33c   :  { %v3099_v48 = vrot.slane %v3044_v4, 7  ;;  %v3239_v46 = vsel %vm12767_vm8, %v3044_v4, %v3203_v53  ;;  %v3387_v2 = vrot.slane %v3044_v4, 1  ;;  %4736 = vmatmul.bf16.gmra.mxu2 %v10421_v41  ;;  %v3749_v17 = vmax.f32 %v3677_v58, 0.0 }
 0x33d   :  { %v3311_v45 = vadd.f32 %v3239_v46, %v3042_v22  ;;  %vm12770_vm8 = vcmp.eq.s32.totalorder %v8854_v15, 0 }
 0x33e   :  { %v2886_v35 = vpop.f32.mrf.mxu0  ;;  %v2940_v11 = vpop.f32.mrf.mxu1  ;;  %v3199_v57 = vsel %vm783_vm0, %v3095_v39, %v3099_v48  ;;  %v10691_v8 = vpack.c.bf16 %v3749_v17, %v3745_v52  ;;  %v3487_v24 = vsel %vm892_vm1, %v3383_v7, %v3387_v2  ;;  %v7790_v39 = vld [vmem:[#allocation5 + $0x360] sm:$0xf]  ;;  %v8234_v52 = vld [vmem:[#allocation5 + $0x36c] sm:$0xf0] }
 0x33f   :  { %v2941_v3 = vadd.f32 %v2940_v11, %v2886_v35  ;;  %v2992_v47 = vpop.f32.mrf.mxu2  ;;  %v3046_v12 = vpop.f32.mrf.mxu3  ;;  %v3527_v53 = vsel %vm12769_vm4, %v3039_v18, %v3487_v24  ;;  %v7791_v17 = vor.u32 %v8234_v52, %v7790_v39  ;;  %vm12771_vm4 = vcmp.eq.s32.totalorder %v8854_v15, 8 }
 0x340   :  { %12768 = vst [vmem:[#allocation34_spill] sm:$0xff] %v10691_v8  ;;  %v2993_v56 = vadd.f32 %v2992_v47, %v2939_v61  ;;  %v3599_v63 = vadd.f32 %v3527_v53, %v3311_v45  ;;  %v12773_v53 = vld [vmem:[#allocation63_spill] sm:$0xff] }
 0x341   :  { %4776 = vmatpush.bf16.msrb.mxu3 %v7791_v17 }
 0x342   :  { %v3047_v58 = vadd.f32 %v3046_v12, %v2993_v56  ;;  %v3681_v24 = vadd.f32 %v10674_v28, %v3599_v63 }
 0x344   :  { %v3103_v46 = vrot.slane %v3047_v58, 7  ;;  %v3243_v59 = vsel %vm12770_vm8, %v3047_v58, %v3199_v57  ;;  %v3391_v43 = vrot.slane %v3047_v58, 1  ;;  %v3753_v39 = vmax.f32 %v3681_v24, 0.0 }
 0x345   :  { %v3315_v36 = vadd.f32 %v3243_v59, %v3044_v4  ;;  %v12772_v59 = vld [vmem:[#allocation54_spill] sm:$0xff]  ;;  %vm12774_vm8 = vcmp.eq.s32.totalorder %v8880_v40, 0 }
 0x346   :  { %v2889_v14 = vpop.f32.mrf.mxu0  ;;  %v2943_v7 = vpop.f32.mrf.mxu1  ;;  %v3195_v35 = vsel %vm783_vm0, %v3099_v48, %v3103_v46  ;;  %v3483_v18 = vsel %vm892_vm1, %v3387_v2, %v3391_v43 }
 0x347   :  { %v2944_v61 = vadd.f32 %v2943_v7, %v2889_v14  ;;  %v2994_v45 = vpop.f32.mrf.mxu2  ;;  %v3048_v11 = vpop.f32.mrf.mxu3  ;;  %v3531_v57 = vsel %vm12771_vm4, %v3042_v22, %v3483_v18  ;;  %vm12776_vm4 = vcmp.eq.s32.totalorder %v8880_v40, 8 }
 0x348   :  { %v2995_v47 = vadd.f32 %v2994_v45, %v2941_v3  ;;  %v3603_v12 = vadd.f32 %v3531_v57, %v3315_v36 }
 0x349   :  { %4633 = vmatmul.bf16.gmra.mxu0 %v12772_v59  ;;  %4687 = vmatmul.bf16.gmra.mxu1 %v12773_v53 }
 0x34a   :  { %v3049_v56 = vadd.f32 %v3048_v11, %v2995_v47  ;;  %v3685_v48 = vadd.f32 %v10674_v28, %v3603_v12 }
 0x34c   :  { %v3107_v2 = vrot.slane %v3049_v56, 7  ;;  %v3247_v14 = vsel %vm12774_vm8, %v3049_v56, %v3195_v35  ;;  %v3395_v52 = vrot.slane %v3049_v56, 1  ;;  %4741 = vmatmul.bf16.gmra.mxu2 %v10450_v20  ;;  %v3757_v22 = vmax.f32 %v3685_v48, 0.0 }
 0x34d   :  { %v3319_v17 = vadd.f32 %v3247_v14, %v3047_v58  ;;  %vm12777_vm8 = vcmp.eq.s32.totalorder %v8935_v19, 0 }
 0x34e   :  { %v2891_v63 = vpop.f32.mrf.mxu0  ;;  %v2945_v3 = vpop.f32.mrf.mxu1  ;;  %v3191_v36 = vsel %vm783_vm0, %v3103_v46, %v3107_v2  ;;  %v10714_v7 = vpack.c.bf16 %v3757_v22, %v3753_v39  ;;  %v3479_v18 = vsel %vm892_vm1, %v3391_v43, %v3395_v52  ;;  %v7774_v46 = vld [vmem:[#allocation5 + $0x340] sm:$0xf]  ;;  %v8230_v39 = vld [vmem:[#allocation5 + $0x34c] sm:$0xf0] }
 0x34f   :  { %v2946_v45 = vadd.f32 %v2945_v3, %v2891_v63  ;;  %v2997_v11 = vpop.f32.mrf.mxu2  ;;  %v3051_v57 = vpop.f32.mrf.mxu3  ;;  %v3535_v35 = vsel %vm12776_vm4, %v3044_v4, %v3479_v18  ;;  %v7775_v22 = vor.u32 %v8230_v39, %v7774_v46  ;;  %vm12778_vm4 = vcmp.eq.s32.totalorder %v8935_v19, 8 }
 0x350   :  { %12775 = vst [vmem:[#allocation35_spill] sm:$0xff] %v10714_v7  ;;  %v2998_v24 = vadd.f32 %v2997_v11, %v2944_v61  ;;  %v3607_v47 = vadd.f32 %v3535_v35, %v3319_v17  ;;  %v12779_v35 = vld [vmem:[#allocation55_spill] sm:$0xff] }
 0x351   :  { %4777 = vmatpush.bf16.msrb.mxu3 %v7775_v22 }
 0x352   :  { %v3052_v12 = vadd.f32 %v3051_v57, %v2998_v24  ;;  %v3689_v18 = vadd.f32 %v10674_v28, %v3607_v47  ;;  %v12780_v24 = vld [vmem:[#allocation64_spill] sm:$0xff] }
 0x354   :  { %v3111_v48 = vrot.slane %v3052_v12, 7  ;;  %v3251_v14 = vsel %vm12777_vm8, %v3052_v12, %v3191_v36  ;;  %v3399_v15 = vrot.slane %v3052_v12, 1  ;;  %vm12781_vm8 = vcmp.eq.s32.totalorder %v8981_v50, 0 }
 0x355   :  { %v3323_v6 = vadd.f32 %v3251_v14, %v3049_v56 }
 0x356   :  { %v2894_v60 = vpop.f32.mrf.mxu0  ;;  %v2948_v43 = vpop.f32.mrf.mxu1  ;;  %v3187_v63 = vsel %vm783_vm0, %v3107_v2, %v3111_v48  ;;  %v3475_v4 = vsel %vm892_vm1, %v3395_v52, %v3399_v15  ;;  %v3761_v52 = vmax.f32 %v3689_v18, 0.0 }
 0x357   :  { %v2949_v61 = vadd.f32 %v2948_v43, %v2894_v60  ;;  %v2999_v17 = vpop.f32.mrf.mxu2  ;;  %v3053_v3 = vpop.f32.mrf.mxu3  ;;  %v3539_v36 = vsel %vm12778_vm4, %v3047_v58, %v3475_v4  ;;  %vm12783_vm4 = vcmp.eq.s32.totalorder %v8981_v50, 8 }
 0x358   :  { %v3000_v11 = vadd.f32 %v2999_v17, %v2946_v45  ;;  %v3611_v57 = vadd.f32 %v3539_v36, %v3323_v6 }
 0x359   :  { %4638 = vmatmul.bf16.gmra.mxu0 %v12779_v35  ;;  %4692 = vmatmul.bf16.gmra.mxu1 %v12780_v24 }
 0x35a   :  { %v10731_v14 = vadd.f32 %v3053_v3, %v3000_v11  ;;  %v3693_v2 = vadd.f32 %v10674_v28, %v3611_v57 }
 0x35c   :  { %v3115_v60 = vrot.slane %v10731_v14, 7  ;;  %v3255_v46 = vsel %vm12781_vm8, %v10731_v14, %v3187_v63  ;;  %v3403_v58 = vrot.slane %v10731_v14, 1  ;;  %4746 = vmatmul.bf16.gmra.mxu2 %v10488_v9  ;;  %v3765_v6 = vmax.f32 %v3693_v2, 0.0  ;;  %v7456_v9 = vld [vmem:[#allocation5 + $0xd0] sm:$0xf0] }
 0x35d   :  { %v3327_v45 = vadd.f32 %v3255_v46, %v3052_v12  ;;  %vm12784_vm8 = vcmp.eq.s32.totalorder %v9020_v42, 0  ;;  %v7758_v46 = vld [vmem:[#allocation5 + $0x320] sm:$0xf] }
 0x35e   :  { %v2896_v47 = vpop.f32.mrf.mxu0  ;;  %v2950_v39 = vpop.f32.mrf.mxu1  ;;  %v3183_v22 = vsel %vm783_vm0, %v3111_v48, %v3115_v60  ;;  %v10742_v43 = vpack.c.bf16 %v3765_v6, %v3761_v52  ;;  %v3471_v4 = vsel %vm892_vm1, %v3399_v15, %v3403_v58  ;;  %v8226_v15 = vld [vmem:[#allocation5 + $0x32c] sm:$0xf0] }
 0x35f   :  { %v2951_v17 = vadd.f32 %v2950_v39, %v2896_v47  ;;  %v3002_v3 = vpop.f32.mrf.mxu2  ;;  %v3056_v36 = vpop.f32.mrf.mxu3  ;;  %v3543_v63 = vsel %vm12783_vm4, %v3049_v56, %v3471_v4  ;;  %v7759_v6 = vor.u32 %v8226_v15, %v7758_v46  ;;  %vm12785_vm4 = vcmp.eq.s32.totalorder %v9020_v42, 8  ;;  %v12787_v46 = vld [vmem:[#allocation44_spill] sm:$0xff]  ;;  %v7728_v42 = vld [vmem:[#allocation5 + $0x2f0] sm:$0xf0] }
 0x360   :  { %12782 = vst [vmem:[#allocation40_spill] sm:$0xff] %v10742_v43  ;;  %v3003_v18 = vadd.f32 %v3002_v3, %v2949_v61  ;;  %v3615_v11 = vadd.f32 %v3543_v63, %v3327_v45 }
 0x361   :  { %4778 = vmatpush.bf16.msrb.mxu3 %v7759_v6 }
 0x362   :  { %v10748_v57 = vadd.f32 %v3056_v36, %v3003_v18  ;;  %v3697_v36 = vadd.f32 %v10674_v28, %v3615_v11  ;;  %v7472_v11 = vld [vmem:[#allocation5 + $0xf0] sm:$0xf0] }
 0x364   :  { %v3119_v2 = vrot.slane %v10748_v57, 7  ;;  %v3259_v48 = vsel %vm12784_vm8, %v10748_v57, %v3183_v22  ;;  %v3407_v52 = vrot.slane %v10748_v57, 1  ;;  %vm12788_vm8 = vcmp.eq.s32.totalorder %v9070_v23, 0 }
 0x365   :  { %v3331_v47 = vadd.f32 %v3259_v48, %v10731_v14  ;;  %v12786_v48 = vld [vmem:[#allocation56_spill] sm:$0xff] }
 0x366   :  { %v2899_v39 = vpop.f32.mrf.mxu0  ;;  %v2953_v50 = vpop.f32.mrf.mxu1  ;;  %v3179_v56 = vsel %vm783_vm0, %v3115_v60, %v3119_v2  ;;  %v3467_v61 = vsel %vm892_vm1, %v3403_v58, %v3407_v52  ;;  %v3769_v58 = vmax.f32 %v3697_v36, 0.0 }
 0x367   :  { %v2954_v45 = vadd.f32 %v2953_v50, %v2899_v39  ;;  %v3004_v4 = vpop.f32.mrf.mxu2  ;;  %v3058_v3 = vpop.f32.mrf.mxu3  ;;  %v3547_v22 = vsel %vm12785_vm4, %v3052_v12, %v3467_v61  ;;  %v8184_v39 = vld [vmem:[#allocation5 + $0x1e4] sm:$0xf]  ;;  %v7600_v61 = vld [vmem:[#allocation5 + $0x1f0] sm:$0xf0]  ;;  %vm12789_vm4 = vcmp.eq.s32.totalorder %v9070_v23, 8 }
 0x368   :  { %v3005_v63 = vadd.f32 %v3004_v4, %v2951_v17  ;;  %v3619_v18 = vadd.f32 %v3547_v22, %v3331_v47  ;;  %v8152_v17 = vld [vmem:[#allocation5 + $0xe4] sm:$0xf] }
 0x369   :  { %4643 = vmatmul.bf16.gmra.mxu0 %v12786_v48  ;;  %4697 = vmatmul.bf16.gmra.mxu1 %v12787_v46  ;;  %v7475_v47 = vor.u32 %v8152_v17, %v7472_v11  ;;  %v8216_v4 = vld [vmem:[#allocation5 + $0x2e4] sm:$0xf] }
 0x36a   :  { %v10765_v15 = vadd.f32 %v3058_v3, %v3005_v63  ;;  %v3701_v60 = vadd.f32 %v10674_v28, %v3619_v18  ;;  %v7603_v18 = vor.u32 %v8184_v39, %v7600_v61  ;;  %v7731_v17 = vor.u32 %v8216_v4, %v7728_v42  ;;  %v8148_v48 = vld [vmem:[#allocation5 + $0xc4] sm:$0xf]  ;;  %v7712_v42 = vld [vmem:[#allocation5 + $0x2d0] sm:$0xf0] }
 0x36b   :  { %4826 = vmatpush.bf16.msra.mxu0 %v7475_v47  ;;  %v7459_v61 = vor.u32 %v8148_v48, %v7456_v9  ;;  %v8212_v47 = vld [vmem:[#allocation5 + $0x2c4] sm:$0xf] }
 0x36c   :  { %v3123_v50 = vrot.slane %v10765_v15, 7  ;;  %v3263_v6 = vsel %vm12788_vm8, %v10765_v15, %v3179_v56  ;;  %v3411_v12 = vrot.slane %v10765_v15, 1  ;;  %4751 = vmatmul.bf16.gmra.mxu2 %v10530_v38  ;;  %v3773_v56 = vmax.f32 %v3701_v60, 0.0  ;;  %4880 = vmatpush.bf16.msra.mxu1 %v7603_v18  ;;  %v8176_v48 = vld [vmem:[#allocation5 + $0x1a4] sm:$0xf] }
 0x36d   :  { %v3335_v3 = vadd.f32 %v3263_v6, %v10748_v57  ;;  %4934 = vmatpush.bf16.msra.mxu2 %v7731_v17  ;;  %v7715_v4 = vor.u32 %v8212_v47, %v7712_v42  ;;  %vm12791_vm8 = vcmp.eq.s32.totalorder %v12617_v30, 0 }
 0x36e   :  { %v2901_v22 = vpop.f32.mrf.mxu0  ;;  %v2955_v36 = vpop.f32.mrf.mxu1  ;;  %v3175_v63 = vsel %vm783_vm0, %v3119_v2, %v3123_v50  ;;  %v3463_v19 = vsel %vm892_vm1, %v3407_v52, %v3411_v12  ;;  %v8180_v2 = vld [vmem:[#allocation5 + $0x1c4] sm:$0xf]  ;;  %v10782_v39 = vpack.c.bf16 %v3773_v56, %v3769_v58  ;;  %v7584_v52 = vld [vmem:[#allocation5 + $0x1d0] sm:$0xf0] }
 0x36f   :  { %v2956_v40 = vadd.f32 %v2955_v36, %v2901_v22  ;;  %v3007_v38 = vpop.f32.mrf.mxu2  ;;  %v3061_v46 = vpop.f32.mrf.mxu3  ;;  %v3551_v6 = vsel %vm12789_vm4, %v10731_v14, %v3463_v19  ;;  %v7587_v36 = vor.u32 %v8180_v2, %v7584_v52  ;;  %4827 = vmatpush.bf16.msra.mxu0 %v7459_v61  ;;  %v7440_v58 = vld [vmem:[#allocation5 + $0xb0] sm:$0xf0]  ;;  %vm12792_vm4 = vcmp.eq.s32.totalorder %v12617_v30, 8 }
 0x370   :  { %v3008_v11 = vadd.f32 %v3007_v38, %v2954_v45  ;;  %12790 = vst [vmem:[#allocation41_spill] sm:$0xff] %v10782_v39  ;;  %v3623_v60 = vadd.f32 %v3551_v6, %v3335_v3  ;;  %v8144_v45 = vld [vmem:[#allocation5 + $0xa4] sm:$0xf]  ;;  %v7696_v2 = vld [vmem:[#allocation5 + $0x2b0] sm:$0xf0] }
 0x371   :  { %4881 = vmatpush.bf16.msra.mxu1 %v7587_v36  ;;  %4935 = vmatpush.bf16.msra.mxu2 %v7715_v4  ;;  %v7443_v9 = vor.u32 %v8144_v45, %v7440_v58  ;;  %v8208_v3 = vld [vmem:[#allocation5 + $0x2a4] sm:$0xf]  ;;  %v7424_v45 = vld [vmem:[#allocation5 + $0x90] sm:$0xf0] }
 0x372   :  { %v10784_v22 = vadd.f32 %v3061_v46, %v3008_v11  ;;  %v7568_v46 = vld [vmem:[#allocation5 + $0x1b0] sm:$0xf0]  ;;  %v7699_v47 = vor.u32 %v8208_v3, %v7696_v2  ;;  %v8172_v58 = vld [vmem:[#allocation5 + $0x184] sm:$0xf] }
 0x373   :  { %v7571_v11 = vor.u32 %v8176_v48, %v7568_v46  ;;  %4828 = vmatpush.bf16.msra.mxu0 %v7443_v9  ;;  %v12793_v48 = vld [vmem:[#allocation57_spill] sm:$0xff]  ;;  %v8204_v2 = vld [vmem:[#allocation5 + $0x284] sm:$0xf] }
 0x374   :  { %v3127_v19 = vrot.slane %v10784_v22, 7  ;;  %v3267_v38 = vsel %vm12791_vm8, %v10784_v22, %v3175_v63  ;;  %v3415_v14 = vrot.slane %v10784_v22, 1  ;;  %v12794_v46 = vld [vmem:[#allocation45_spill] sm:$0xff]  ;;  %vm12796_vm8 = vcmp.eq.s32.totalorder %v12625_v5, 0 }
 0x375   :  { %v3339_v18 = vadd.f32 %v3267_v38, %v10765_v15  ;;  %4882 = vmatpush.bf16.msra.mxu1 %v7571_v11  ;;  %v8140_v38 = vld [vmem:[#allocation5 + $0x84] sm:$0xf]  ;;  %4936 = vmatpush.bf16.msra.mxu2 %v7699_v47 }
 0x376   :  { %v2904_v56 = vpop.f32.mrf.mxu0  ;;  %v2958_v17 = vpop.f32.mrf.mxu1  ;;  %v3171_v6 = vsel %vm783_vm0, %v3123_v50, %v3127_v19  ;;  %v3459_v63 = vsel %vm892_vm1, %v3411_v12, %v3415_v14  ;;  %v7427_v12 = vor.u32 %v8140_v38, %v7424_v45 }
 0x377   :  { %v2959_v61 = vadd.f32 %v2958_v17, %v2904_v56  ;;  %v3009_v52 = vpop.f32.mrf.mxu2  ;;  %v3063_v36 = vpop.f32.mrf.mxu3  ;;  %v3555_v42 = vsel %vm12792_vm4, %v10748_v57, %v3459_v63  ;;  %v7552_v56 = vld [vmem:[#allocation5 + $0x190] sm:$0xf0]  ;;  %v3705_v17 = vadd.f32 %v10674_v28, %v3623_v60  ;;  %v8136_v60 = vld [vmem:[#allocation5 + $0x64] sm:$0xf]  ;;  %vm12798_vm4 = vcmp.eq.s32.totalorder %v12625_v5, 8 }
 0x378   :  { %v3010_v4 = vadd.f32 %v3009_v52, %v2956_v40  ;;  %v3627_v50 = vadd.f32 %v3555_v42, %v3339_v18  ;;  %v7555_v3 = vor.u32 %v8172_v58, %v7552_v56  ;;  %v7680_v57 = vld [vmem:[#allocation5 + $0x290] sm:$0xf0]  ;;  %4829 = vmatpush.bf16.msra.mxu0 %v7427_v12  ;;  %v8168_v42 = vld [vmem:[#allocation5 + $0x164] sm:$0xf] }
 0x379   :  { %4648 = vmatmul.bf16.gmra.mxu0 %v12793_v48  ;;  %4702 = vmatmul.bf16.gmra.mxu1 %v12794_v46  ;;  %v7683_v11 = vor.u32 %v8204_v2, %v7680_v57  ;;  %v3777_v38 = vmax.f32 %v3705_v17, 0.0  ;;  %v8200_v2 = vld [vmem:[#allocation5 + $0x264] sm:$0xf] }
 0x37a   :  { %v10802_v9 = vadd.f32 %v3063_v36, %v3010_v4  ;;  %v3709_v40 = vadd.f32 %v10674_v28, %v3627_v50  ;;  %4883 = vmatpush.bf16.msra.mxu1 %v7555_v3  ;;  %v7408_v36 = vld [vmem:[#allocation5 + $0x70] sm:$0xf0] }
 0x37b   :  { %v7411_v47 = vor.u32 %v8136_v60, %v7408_v36  ;;  %v7536_v4 = vld [vmem:[#allocation5 + $0x170] sm:$0xf0]  ;;  %4937 = vmatpush.bf16.msra.mxu2 %v7683_v11 }
 0x37c   :  { %v12489_v18 = vrot.slane %v10802_v9, 7  ;;  %v3271_v63 = vsel %vm723_vm13, %v10802_v9, %v3171_v6  ;;  %v3419_v52 = vrot.slane %v10802_v9, 1  ;;  %4756 = vmatmul.bf16.gmra.mxu2 %v10568_v16  ;;  %v3781_v45 = vmax.f32 %v3709_v40, 0.0  ;;  %v7664_v3 = vld [vmem:[#allocation5 + $0x270] sm:$0xf0] }
 0x37d   :  { %v3343_v58 = vadd.f32 %v3271_v63, %v10784_v22  ;;  %v7539_v56 = vor.u32 %v8168_v42, %v7536_v4  ;;  %4830 = vmatpush.bf16.msra.mxu0 %v7411_v47  ;;  %v7667_v63 = vor.u32 %v8200_v2, %v7664_v3  ;;  %v8132_v42 = vld [vmem:[#allocation5 + $0x44] sm:$0xf]  ;;  %v7392_v4 = vld [vmem:[#allocation5 + $0x50] sm:$0xf0] }
 0x37e   :  { %v2906_v50 = vpop.f32.mrf.mxu0  ;;  %v2960_v12 = vpop.f32.mrf.mxu1  ;;  %v3167_v6 = vsel %vm783_vm0, %v3127_v19, %v12489_v18  ;;  %v3455_v57 = vsel %vm892_vm1, %v3415_v14, %v3419_v52  ;;  %v10820_v36 = vpack.c.bf16 %v3781_v45, %v3777_v38  ;;  %v8164_v18 = vld [vmem:[#allocation5 + $0x144] sm:$0xf]  ;;  %v7395_v23 = vor.u32 %v8132_v42, %v7392_v4  ;;  %v7520_v16 = vld [vmem:[#allocation5 + $0x150] sm:$0xf0] }
 0x37f   :  { %v2961_v17 = vadd.f32 %v2960_v12, %v2906_v50  ;;  %v3012_v40 = vpop.f32.mrf.mxu2  ;;  %v3066_v60 = vpop.f32.mrf.mxu3  ;;  %v3559_v19 = vsel %vm741_vm2, %v10765_v15, %v3455_v57  ;;  %4884 = vmatpush.bf16.msra.mxu1 %v7539_v56  ;;  %v7742_v50 = vld [vmem:[#allocation5 + $0x300] sm:$0xf]  ;;  %v8222_v12 = vld [vmem:[#allocation5 + $0x30c] sm:$0xf0]  ;;  %4938 = vmatpush.bf16.msra.mxu2 %v7667_v63  ;;  %v7523_v47 = vor.u32 %v8164_v18, %v7520_v16  ;;  %v8196_v38 = vld [vmem:[#allocation5 + $0x244] sm:$0xf] }
 0x380   :  { %12795 = vst [vmem:[#allocation38_spill] sm:$0xff] %v10820_v36  ;;  %v3013_v11 = vadd.f32 %v3012_v40, %v2959_v61  ;;  %v3631_v30 = vadd.f32 %v3559_v19, %v3343_v58  ;;  %v7743_v45 = vor.u32 %v8222_v12, %v7742_v50  ;;  %v7648_v2 = vld [vmem:[#allocation5 + $0x250] sm:$0xf0]  ;;  %v8128_v3 = vld [vmem:[#allocation5 + $0x24] sm:$0xf]  ;;  %v12797_v4 = vrot.slane %v10802_v9, 7 }
 0x381   :  { %4831 = vmatpush.bf16.msra.mxu0 %v7395_v23  ;;  %v7376_v15 = vld [vmem:[#allocation5 + $0x30] sm:$0xf0]  ;;  %v7651_v57 = vor.u32 %v8196_v38, %v7648_v2  ;;  %v8160_v40 = vld [vmem:[#allocation5 + $0x124] sm:$0xf] }
 0x382   :  { %v10825_v14 = vadd.f32 %v3066_v60, %v3013_v11  ;;  %v7504_v60 = vld [vmem:[#allocation5 + $0x130] sm:$0xf0]  ;;  %4779 = vmatpush.bf16.msrb.mxu3 %v7743_v45  ;;  %v7379_v16 = vor.u32 %v8128_v3, %v7376_v15  ;;  %v8192_v63 = vld [vmem:[#allocation5 + $0x224] sm:$0xf]  ;;  %v3713_v3 = vadd.f32 %v10674_v28, %v3631_v30 }
 0x383   :  { %4885 = vmatpush.bf16.msra.mxu1 %v7523_v47  ;;  %v7507_v18 = vor.u32 %v8160_v40, %v7504_v60  ;;  %v7632_v23 = vld [vmem:[#allocation5 + $0x230] sm:$0xf0]  ;;  %4939 = vmatpush.bf16.msra.mxu2 %v7651_v57  ;;  %v8156_v40 = vld [vmem:[#allocation5 + $0x104] sm:$0xf] }
 0x384   :  { %v3135_v61 = vrot.slane %v10825_v14, 7  ;;  %v3275_v58 = vsel %vm12796_vm8, %v10825_v14, %v3167_v6  ;;  %v3423_v56 = vrot.slane %v10825_v14, 1  ;;  %v7635_v50 = vor.u32 %v8192_v63, %v7632_v23  ;;  %v7360_v57 = vld [vmem:[#allocation5 + $0x10] sm:$0xf0]  ;;  %v12799_v63 = vld [vmem:[#allocation58_spill] sm:$0xff] }
 0x385   :  { %v3347_v19 = vadd.f32 %v3275_v58, %v10802_v9  ;;  %4832 = vmatpush.bf16.msra.mxu0 %v7379_v16  ;;  %v8124_v58 = vld [vmem:[#allocation5 + $0x4] sm:$0xf]  ;;  %v12800_v23 = vld [vmem:[#allocation46_spill] sm:$0xff]  ;;  %v7616_v16 = vld [vmem:[#allocation5 + $0x210] sm:$0xf0]  ;;  %vm12801_vm8 = vcmp.eq.s32.totalorder %v12628_v31, 0 }
 0x386   :  { %v2909_v11 = vpop.f32.mrf.mxu0  ;;  %v2963_v42 = vpop.f32.mrf.mxu1  ;;  %v3163_v6 = vsel %vm783_vm0, %v12797_v4, %v3135_v61  ;;  %v3451_v12 = vsel %vm892_vm1, %v3419_v52, %v3423_v56  ;;  %v7363_v52 = vor.u32 %v8124_v58, %v7360_v57  ;;  %v8248_v30 = vld [vmem:[#allocation5 + $0x3e4] sm:$0xf] }
 0x387   :  { %v2964_v47 = vadd.f32 %v2963_v42, %v2909_v11  ;;  %v3014_v38 = vpop.f32.mrf.mxu2  ;;  %v3068_v45 = vpop.f32.mrf.mxu3  ;;  %v3563_v2 = vsel %vm12798_vm4, %v10784_v22, %v3451_v12  ;;  %4886 = vmatpush.bf16.msra.mxu1 %v7507_v18  ;;  %v7488_v11 = vld [vmem:[#allocation5 + $0x110] sm:$0xf0]  ;;  %v8188_v42 = vld [vmem:[#allocation5 + $0x204] sm:$0xf]  ;;  %4940 = vmatpush.bf16.msra.mxu2 %v7635_v50  ;;  %vm12803_vm4 = vcmp.eq.s32.totalorder %v12628_v31, 8 }
 0x388   :  { %v3015_v15 = vadd.f32 %v3014_v38, %v2961_v17  ;;  %v3635_v60 = vadd.f32 %v3563_v2, %v3347_v19  ;;  %v7491_v22 = vor.u32 %v8156_v40, %v7488_v11  ;;  %v7619_v12 = vor.u32 %v8188_v42, %v7616_v16  ;;  %v7856_v17 = vld [vmem:[#allocation5 + $0x3f0] sm:$0xf0] }
 0x389   :  { %4653 = vmatmul.bf16.gmra.mxu0 %v12799_v63  ;;  %4707 = vmatmul.bf16.gmra.mxu1 %v12800_v23  ;;  %v7859_v38 = vor.u32 %v8248_v30, %v7856_v17  ;;  %v3785_v19 = vmax.f32 %v3713_v3, 0.0 }
 0x38a   :  { %v10847_v4 = vadd.f32 %v3068_v45, %v3015_v15  ;;  %v3717_v18 = vadd.f32 %v10674_v28, %v3635_v60  ;;  %4833 = vmatpush.bf16.msra.mxu0 %v7363_v52 }
 0x38b   :  { %4887 = vmatpush.bf16.msra.mxu1 %v7491_v22  ;;  %4988 = vmatpush.bf16.msra.mxu3 %v7859_v38 }
 0x38c   :  { %v3139_v2 = vrot.slane %v10847_v4, 7  ;;  %v3279_v58 = vsel %vm12801_vm8, %v10847_v4, %v3163_v6  ;;  %v3427_v57 = vrot.slane %v10847_v4, 1  ;;  %4761 = vmatmul.bf16.gmra.mxu2 %v10609_v49  ;;  %v3789_v50 = vmax.f32 %v3717_v18, 0.0 }
 0x38d   :  { %v3351_v45 = vadd.f32 %v3279_v58, %v10825_v14  ;;  %4941 = vmatpush.bf16.msra.mxu2 %v7619_v12  ;;  %vm12804_vm8 = vcmp.eq.s32.totalorder %v12633_v44, 0 }
 0x38e   :  { %v2911_v15 = vpop.f32.mrf.mxu0  ;;  %v2965_v40 = vpop.f32.mrf.mxu1  ;;  %v3159_v3 = vsel %vm783_vm0, %v3135_v61, %v3139_v2  ;;  %v10859_v60 = vpack.c.bf16 %v3789_v50, %v3785_v19  ;;  %v3447_v6 = vsel %vm892_vm1, %v3423_v56, %v3427_v57 }
 0x38f   :  { %v3017_v52 = vpop.f32.mrf.mxu2  ;;  %v3071_v11 = vpop.f32.mrf.mxu3  ;;  %v3567_v42 = vsel %vm12803_vm4, %v10802_v9, %v3447_v6  ;;  %v2966_v38 = vadd.f32 %v2965_v40, %v2911_v15  ;;  %vm12805_vm4 = vcmp.eq.s32.totalorder %v12633_v44, 8  ;;  %v12807_v15 = vld [vmem:[#allocation61_spill] sm:$0xff]  ;;  %v3367_v40 = vrot.slane %v10622_v37, 1 }
 0x390   :  { %12802 = vst [vmem:[#allocation39_spill] sm:$0xff] %v10859_v60  ;;  %v3018_v16 = vadd.f32 %v3017_v52, %v2964_v47  ;;  %v3639_v22 = vadd.f32 %v3567_v42, %v3351_v45 }
 0x392   :  { %v3072_v30 = vadd.f32 %v3071_v11, %v3018_v16  ;;  %v12806_v11 = vld [vmem:[#allocation60_spill] sm:$0xff] }
 0x394   :  { %v3143_v17 = vrot.slane %v3072_v30, 7  ;;  %v3283_v18 = vsel %vm12804_vm8, %v3072_v30, %v3159_v3  ;;  %v3431_v61 = vrot.slane %v3072_v30, 1  ;;  %vm12810_vm8 = vcmp.eq.s32.totalorder %v12638_v29, 0 }
 0x395   :  { %v3355_v12 = vadd.f32 %v3283_v18, %v10847_v4 }
 0x396   :  { %v3155_v56 = vsel %vm783_vm0, %v3139_v2, %v3143_v17  ;;  %v4619_v19 = vpop.f32.mrf.mxu0  ;;  %v4673_v58 = vpop.f32.mrf.mxu1  ;;  %v3443_v50 = vsel %vm892_vm1, %v3427_v57, %v3431_v61  ;;  %v3721_v2 = vadd.f32 %v10674_v28, %v3639_v22 }
 0x397   :  { %v3019_v9 = vpop.f32.mrf.mxu2  ;;  %v4674_v47 = vadd.f32 %v4673_v58, %v4619_v19  ;;  %v3571_v45 = vsel %vm12805_vm4, %v10825_v14, %v3443_v50  ;;  %v3073_v52 = vpop.f32.mrf.mxu3  ;;  %v12808_v14 = vrot.slane %v10635_v13, 1  ;;  %v7840_v58 = vld [vmem:[#allocation5 + $0x3d0] sm:$0xf0]  ;;  %vm12812_vm4 = vcmp.eq.s32.totalorder %v12638_v29, 8 }
 0x398   :  { %v3020_v6 = vadd.f32 %v3019_v9, %v2966_v38  ;;  %v3643_v3 = vadd.f32 %v3571_v45, %v3355_v12  ;;  %v8244_v38 = vld [vmem:[#allocation5 + $0x3c4] sm:$0xf]  ;;  %v3793_v50 = vmax.f32 %v3721_v2, 0.0 }
 0x399   :  { %4658 = vmatmul.bf16.gmra.mxu0 %v12806_v11  ;;  %4712 = vmatmul.bf16.gmra.mxu1 %v12807_v15  ;;  %v3503_v12 = vsel %vm892_vm1, %v3367_v40, %v12808_v14  ;;  %v7843_v22 = vor.u32 %v8244_v38, %v7840_v58 }
 0x39a   :  { %v3074_v42 = vadd.f32 %v3073_v52, %v3020_v6  ;;  %v3725_v57 = vadd.f32 %v10674_v28, %v3643_v3  ;;  %v12809_v6 = vrot.slane %v10622_v37, 7 }
 0x39b   :  { %4989 = vmatpush.bf16.msra.mxu3 %v7843_v22 }
 0x39c   :  { %v3147_v16 = vrot.slane %v3074_v42, 7  ;;  %v3287_v18 = vsel %vm727_vm15, %v3074_v42, %v3155_v56  ;;  %v3435_v19 = vrot.slane %v3074_v42, 1  ;;  %4766 = vmatmul.bf16.gmra.mxu2 %v10631_v10  ;;  %v3797_v9 = vmax.f32 %v3725_v57, 0.0 }
 0x39d   :  { %v3359_v45 = vadd.f32 %v3287_v18, %v3072_v30 }
 0x39e   :  { %v3219_v3 = vsel %vm783_vm0, %v3147_v16, %v12809_v6  ;;  %v4621_v56 = vpop.f32.mrf.mxu0  ;;  %v4675_v52 = vpop.f32.mrf.mxu1  ;;  %v3151_v44 = vsel %vm783_vm0, %v3143_v17, %v3147_v16  ;;  %v3439_v14 = vsel %vm892_vm1, %v3431_v61, %v3435_v19  ;;  %v3507_v31 = vsel %vm892_vm1, %v3435_v19, %v3367_v40 }
 0x39f   :  { %v3223_v2 = vsel %vm12810_vm8, %v10635_v13, %v3219_v3  ;;  %v4676_v57 = vadd.f32 %v4675_v52, %v4621_v56  ;;  %v4727_v18 = vpop.f32.mrf.mxu2  ;;  %v10901_v38 = vpack.c.bf16 %v3797_v9, %v3793_v50  ;;  %v3291_v58 = vsel %vm728_vm3, %v10622_v37, %v3151_v44 }
 0x3a0   :  { %v3295_v17 = vadd.f32 %v3223_v2, %v10622_v37  ;;  %v10907_v16 = vadd.f32 %v4727_v18, %v4674_v47  ;;  %v3363_v61 = vadd.f32 %v3291_v58, %v3074_v42  ;;  %v3575_v40 = vsel %vm745_vm12, %v10847_v4, %v3439_v14  ;;  %v7824_v2 = vld [vmem:[#allocation5 + $0x3b0] sm:$0xf0] }
 0x3a1   :  { %12811 = vst [vmem:[#allocation42_spill] sm:$0xff] %v10901_v38  ;;  %v3511_v13 = vsel %vm12812_vm4, %v3074_v42, %v3503_v12  ;;  %v3579_v19 = vsel %vm746_vm7, %v3072_v30, %v3507_v31  ;;  %v3647_v22 = vadd.f32 %v3575_v40, %v3359_v45  ;;  %v3669_v44 = vadd.f32 %v10674_v28, %v10657_v33 }
 0x3a2   :  { %v3583_v50 = vadd.f32 %v3511_v13, %v3295_v17  ;;  %v3651_v9 = vadd.f32 %v3579_v19, %v3363_v61 }
 0x3a3   :  { %v3729_v37 = vadd.f32 %v10674_v28, %v3647_v22  ;;  %v3741_v52 = vmax.f32 %v3669_v44, 0.0 }
 0x3a4   :  { %v3665_v47 = vadd.f32 %v10674_v28, %v3583_v50  ;;  %v3733_v6 = vadd.f32 %v10674_v28, %v3651_v9  ;;  %v8240_v28 = vld [vmem:[#allocation5 + $0x3a4] sm:$0xf] }
 0x3a5   :  { %v3801_v42 = vmax.f32 %v3729_v37, 0.0  ;;  %v7827_v18 = vor.u32 %v8240_v28, %v7824_v2 }
 0x3a6   :  { %v4624_v3 = vpop.f32.mrf.mxu0  ;;  %v4678_v4 = vpop.f32.mrf.mxu1  ;;  %v3737_v56 = vmax.f32 %v3665_v47, 0.0  ;;  %v3805_v12 = vmax.f32 %v3733_v6, 0.0 }
 0x3a7   :  { %v4679_v14 = vadd.f32 %v4678_v4, %v4624_v3  ;;  %v4729_v31 = vpop.f32.mrf.mxu2  ;;  %4990 = vmatpush.bf16.msra.mxu3 %v7827_v18  ;;  %v8236_v4 = vld [vmem:[#allocation5 + $0x384] sm:$0xf] }
 0x3a8   :  { %v10921_v30 = vadd.f32 %v4729_v31, %v4676_v57  ;;  %v10923_v45 = vpack.c.bf16 %v3741_v52, %v3737_v56  ;;  %v10925_v33 = vpack.c.bf16 %v3805_v12, %v3801_v42  ;;  %v7808_v56 = vld [vmem:[#allocation5 + $0x390] sm:$0xf0] }
 0x3a9   :  { %4834 = vmatmul.bf16.vlgmr.msra.gmra.mxu0 %v12758_v21  ;;  %4888 = vmatmul.bf16.vlgmr.msra.gmra.mxu1 %v12759_v27  ;;  %v7811_v52 = vor.u32 %v8236_v4, %v7808_v56 }
 0x3aa   :  { %12813 = vst [vmem:[#allocation43_spill] sm:$0xff] %v10923_v45  ;;  %4780 = vmatmul.bf16.vlgmr.msrb.gmra.mxu3 %v10923_v45 }
 0x3ab   :  { %4991 = vmatpush.bf16.msra.mxu3 %v7811_v52 }
 0x3ac   :  { %4942 = vmatmul.bf16.vlgmr.msra.gmra.mxu2 %v10629_v0 }
 0x3ae   :  { %v4626_v58 = vpop.f32.mrf.mxu0  ;;  %v4680_v17 = vpop.f32.mrf.mxu1 }
 0x3af   :  { %v4681_v61 = vadd.f32 %v4680_v17, %v4626_v58  ;;  %v4732_v57 = vpop.f32.mrf.mxu2 }
 0x3b0   :  { %v10931_v40 = vadd.f32 %v4732_v57, %v4679_v14  ;;  %v8232_v57 = vld [vmem:[#allocation5 + $0x364] sm:$0xf] }
 0x3b6   :  { %v4629_v13 = vpop.f32.mrf.mxu0  ;;  %v4683_v19 = vpop.f32.mrf.mxu1 }
 0x3b7   :  { %v4684_v22 = vadd.f32 %v4683_v19, %v4629_v13  ;;  %v4734_v50 = vpop.f32.mrf.mxu2  ;;  %v7792_v13 = vld [vmem:[#allocation5 + $0x370] sm:$0xf0] }
 0x3b8   :  { %v10933_v44 = vadd.f32 %v4734_v50, %v4681_v61  ;;  %v7795_v19 = vor.u32 %v8232_v57, %v7792_v13  ;;  %v12814_v13 = vld [vmem:[#allocation30_spill] sm:$0xff] }
 0x3b9   :  { %4839 = vmatmul.bf16.gmra.mxu0 %v12761_v26  ;;  %4893 = vmatmul.bf16.gmra.mxu1 %v12762_v25 }
 0x3ba   :  { %4785 = vmatmul.bf16.gmra.mxu3 %v10691_v8 }
 0x3bb   :  { %4992 = vmatpush.bf16.msra.mxu3 %v7795_v19 }
 0x3bc   :  { %4947 = vmatmul.bf16.gmra.mxu2 %v10397_v62 }
 0x3be   :  { %v4631_v9 = vpop.f32.mrf.mxu0  ;;  %v4685_v37 = vpop.f32.mrf.mxu1 }
 0x3bf   :  { %v4686_v47 = vadd.f32 %v4685_v37, %v4631_v9  ;;  %v4737_v6 = vpop.f32.mrf.mxu2 }
 0x3c0   :  { %v10939_v3 = vadd.f32 %v4737_v6, %v4684_v22 }
 0x3c6   :  { %v4634_v42 = vpop.f32.mrf.mxu0  ;;  %v4688_v12 = vpop.f32.mrf.mxu1 }
 0x3c7   :  { %v4689_v14 = vadd.f32 %v4688_v12, %v4634_v42  ;;  %v4739_v31 = vpop.f32.mrf.mxu2  ;;  %v8228_v12 = vld [vmem:[#allocation5 + $0x344] sm:$0xf] }
 0x3c8   :  { %v10941_v28 = vadd.f32 %v4739_v31, %v4686_v47 }
 0x3c9   :  { %4844 = vmatmul.bf16.gmra.mxu0 %v12765_v32  ;;  %4898 = vmatmul.bf16.gmra.mxu1 %v12766_v55 }
 0x3ca   :  { %4790 = vmatmul.bf16.gmra.mxu3 %v10714_v7 }
 0x3cc   :  { %4952 = vmatmul.bf16.gmra.mxu2 %v10421_v41 }
 0x3ce   :  { %v4636_v2 = vpop.f32.mrf.mxu0  ;;  %v4690_v18 = vpop.f32.mrf.mxu1 }
 0x3cf   :  { %v4691_v58 = vadd.f32 %v4690_v18, %v4636_v2  ;;  %v4742_v17 = vpop.f32.mrf.mxu2 }
 0x3d0   :  { %v10947_v61 = vadd.f32 %v4742_v17, %v4689_v14  ;;  %v7776_v14 = vld [vmem:[#allocation5 + $0x350] sm:$0xf0] }
 0x3d1   :  { %v7779_v31 = vor.u32 %v8228_v12, %v7776_v14 }
 0x3d3   :  { %4993 = vmatpush.bf16.msra.mxu3 %v7779_v31 }
 0x3d6   :  { %v4639_v22 = vpop.f32.mrf.mxu0  ;;  %v4693_v50 = vpop.f32.mrf.mxu1 }
 0x3d7   :  { %v4694_v9 = vadd.f32 %v4693_v50, %v4639_v22  ;;  %v4744_v37 = vpop.f32.mrf.mxu2 }
 0x3d8   :  { %v10949_v47 = vadd.f32 %v4744_v37, %v4691_v58 }
 0x3d9   :  { %4849 = vmatmul.bf16.gmra.mxu0 %v12772_v59  ;;  %4903 = vmatmul.bf16.gmra.mxu1 %v12773_v53 }
 0x3da   :  { %4795 = vmatmul.bf16.gmra.mxu3 %v10742_v43 }
 0x3dc   :  { %4957 = vmatmul.bf16.gmra.mxu2 %v10450_v20 }
 0x3de   :  { %v4641_v6 = vpop.f32.mrf.mxu0  ;;  %v4695_v4 = vpop.f32.mrf.mxu1 }
 0x3df   :  { %v4696_v56 = vadd.f32 %v4695_v4, %v4641_v6  ;;  %v4747_v52 = vpop.f32.mrf.mxu2  ;;  %v8224_v6 = vld [vmem:[#allocation5 + $0x324] sm:$0xf]  ;;  %v7760_v4 = vld [vmem:[#allocation5 + $0x330] sm:$0xf0] }
 0x3e0   :  { %v10955_v42 = vadd.f32 %v4747_v52, %v4694_v9  ;;  %v7763_v52 = vor.u32 %v8224_v6, %v7760_v4  ;;  %v7734_v4 = vld [vmem:[#allocation5 + $0x2e8] sm:$0xf] }
 0x3e2   :  { %4994 = vmatpush.bf16.msra.mxu3 %v7763_v52  ;;  %v8219_v52 = vld [vmem:[#allocation5 + $0x2f4] sm:$0xf0] }
 0x3e6   :  { %v4644_v2 = vpop.f32.mrf.mxu0  ;;  %v4698_v18 = vpop.f32.mrf.mxu1 }
 0x3e7   :  { %v4699_v58 = vadd.f32 %v4698_v18, %v4644_v2  ;;  %v4749_v17 = vpop.f32.mrf.mxu2  ;;  %v12817_v18 = vld [vmem:[#allocation56_spill] sm:$0xff] }
 0x3e8   :  { %v10957_v57 = vadd.f32 %v4749_v17, %v4696_v56  ;;  %v12818_v17 = vld [vmem:[#allocation44_spill] sm:$0xff] }
 0x3e9   :  { %4854 = vmatmul.bf16.gmra.mxu0 %v12779_v35  ;;  %4908 = vmatmul.bf16.gmra.mxu1 %v12780_v24 }
 0x3ea   :  { %4800 = vmatmul.bf16.gmra.mxu3 %v10782_v39 }
 0x3ec   :  { %4962 = vmatmul.bf16.gmra.mxu2 %v12814_v13 }
 0x3ee   :  { %v4646_v19 = vpop.f32.mrf.mxu0  ;;  %v4700_v22 = vpop.f32.mrf.mxu1 }
 0x3ef   :  { %v4701_v50 = vadd.f32 %v4700_v22, %v4646_v19  ;;  %v4752_v9 = vpop.f32.mrf.mxu2  ;;  %v7478_v19 = vld [vmem:[#allocation5 + $0xe8] sm:$0xf]  ;;  %v8155_v22 = vld [vmem:[#allocation5 + $0xf4] sm:$0xf0] }
 0x3f0   :  { %v10963_v37 = vadd.f32 %v4752_v9, %v4699_v58  ;;  %v7606_v58 = vld [vmem:[#allocation5 + $0x1e8] sm:$0xf]  ;;  %v7479_v9 = vor.u32 %v8155_v22, %v7478_v19  ;;  %v8183_v22 = vld [vmem:[#allocation5 + $0x1d4] sm:$0xf0] }
 0x3f1   :  { %v7607_v6 = vor.u32 %v8187_v54, %v7606_v58 }
 0x3f2   :  { %12815 = vst [vmem:[#allocation48_spill] sm:$0xff] %v10963_v37  ;;  %5042 = vmatpush.bf16.msrb.mxu0 %v7479_v9  ;;  %v8147_v9 = vld [vmem:[#allocation5 + $0xb4] sm:$0xf0] }
 0x3f3   :  { %5096 = vmatpush.bf16.msrb.mxu1 %v7607_v6  ;;  %v8179_v6 = vld [vmem:[#allocation5 + $0x1b4] sm:$0xf0] }
 0x3f6   :  { %v4649_v56 = vpop.f32.mrf.mxu0  ;;  %v4703_v12 = vpop.f32.mrf.mxu1 }
 0x3f7   :  { %v4704_v14 = vadd.f32 %v4703_v12, %v4649_v56  ;;  %v4754_v31 = vpop.f32.mrf.mxu2  ;;  %v7735_v56 = vor.u32 %v8219_v52, %v7734_v4  ;;  %v7574_v4 = vld [vmem:[#allocation5 + $0x1a8] sm:$0xf] }
 0x3f8   :  { %v10965_v2 = vadd.f32 %v4754_v31, %v4701_v50 }
 0x3f9   :  { %4859 = vmatmul.bf16.gmra.mxu0 %v12817_v18  ;;  %4913 = vmatmul.bf16.gmra.mxu1 %v12818_v17  ;;  %v7590_v17 = vld [vmem:[#allocation5 + $0x1c8] sm:$0xf] }
 0x3fa   :  { %12816 = vst [vmem:[#allocation49_spill] sm:$0xff] %v10965_v2  ;;  %4805 = vmatmul.bf16.gmra.mxu3 %v10820_v36  ;;  %5150 = vmatpush.bf16.msrb.mxu2 %v7735_v56  ;;  %v8151_v36 = vld [vmem:[#allocation5 + $0xd4] sm:$0xf0]  ;;  %v7718_v18 = vld [vmem:[#allocation5 + $0x2c8] sm:$0xf]  ;;  %v7591_v54 = vor.u32 %v8183_v22, %v7590_v17 }
 0x3fb   :  { %v7463_v19 = vor.u32 %v8151_v36, %v7462_v34  ;;  %v7446_v2 = vld [vmem:[#allocation5 + $0xa8] sm:$0xf]  ;;  %v8220_v22 = vld [vmem:[#allocation5 + $0x304] sm:$0xf] }
 0x3fc   :  { %4967 = vmatmul.bf16.gmra.mxu2 %v12819_v51  ;;  %v8215_v51 = vld [vmem:[#allocation5 + $0x2d4] sm:$0xf0]  ;;  %v7447_v52 = vor.u32 %v8147_v9, %v7446_v2  ;;  %5097 = vmatpush.bf16.msrb.mxu1 %v7591_v54  ;;  %v7558_v17 = vld [vmem:[#allocation5 + $0x188] sm:$0xf]  ;;  %v7744_v54 = vld [vmem:[#allocation5 + $0x310] sm:$0xf0] }
 0x3fd   :  { %v7719_v58 = vor.u32 %v8215_v51, %v7718_v18  ;;  %5043 = vmatpush.bf16.msrb.mxu0 %v7463_v19  ;;  %v7430_v51 = vld [vmem:[#allocation5 + $0x88] sm:$0xf]  ;;  %v8143_v18 = vld [vmem:[#allocation5 + $0x94] sm:$0xf0] }
 0x3fe   :  { %v4651_v50 = vpop.f32.mrf.mxu0  ;;  %v4705_v12 = vpop.f32.mrf.mxu1  ;;  %v7431_v2 = vor.u32 %v8143_v18, %v7430_v51  ;;  %v8175_v19 = vld [vmem:[#allocation5 + $0x194] sm:$0xf0]  ;;  %v7686_v9 = vld [vmem:[#allocation5 + $0x288] sm:$0xf] }
 0x3ff   :  { %v4706_v31 = vadd.f32 %v4705_v12, %v4651_v50  ;;  %v4757_v29 = vpop.f32.mrf.mxu2  ;;  %v7702_v50 = vld [vmem:[#allocation5 + $0x2a8] sm:$0xf]  ;;  %v8211_v12 = vld [vmem:[#allocation5 + $0x2b4] sm:$0xf0]  ;;  %5151 = vmatpush.bf16.msrb.mxu2 %v7719_v58  ;;  %v7747_v58 = vor.u32 %v8220_v22, %v7744_v54 }
 0x400   :  { %v10971_v5 = vadd.f32 %v4757_v29, %v4704_v14  ;;  %v7575_v29 = vor.u32 %v8179_v6, %v7574_v4  ;;  %v7703_v14 = vor.u32 %v8211_v12, %v7702_v50  ;;  %v7414_v4 = vld [vmem:[#allocation5 + $0x68] sm:$0xf]  ;;  %v8139_v6 = vld [vmem:[#allocation5 + $0x74] sm:$0xf0] }
 0x401   :  { %5044 = vmatpush.bf16.msrb.mxu0 %v7447_v52  ;;  %v7542_v50 = vld [vmem:[#allocation5 + $0x168] sm:$0xf]  ;;  %v8171_v12 = vld [vmem:[#allocation5 + $0x174] sm:$0xf0]  ;;  %4995 = vmatpush.bf16.msra.mxu3 %v7747_v58 }
 0x402   :  { %12820 = vst [vmem:[#allocation50_spill] sm:$0xff] %v10971_v5  ;;  %5098 = vmatpush.bf16.msrb.mxu1 %v7575_v29  ;;  %v12821_v29 = vld [vmem:[#allocation36_spill] sm:$0xff]  ;;  %v8199_v58 = vld [vmem:[#allocation5 + $0x254] sm:$0xf0] }
 0x403   :  { %5152 = vmatpush.bf16.msrb.mxu2 %v7703_v14  ;;  %v7415_v14 = vor.u32 %v8139_v6, %v7414_v4  ;;  %v7670_v18 = vld [vmem:[#allocation5 + $0x268] sm:$0xf]  ;;  %v8167_v4 = vld [vmem:[#allocation5 + $0x154] sm:$0xf0] }
 0x404   :  { %v7654_v6 = vld [vmem:[#allocation5 + $0x248] sm:$0xf] }
 0x405   :  { %5045 = vmatpush.bf16.msrb.mxu0 %v7431_v2 }
 0x406   :  { %v4654_v56 = vpop.f32.mrf.mxu0  ;;  %v4708_v5 = vpop.f32.mrf.mxu1 }
 0x407   :  { %v4709_v34 = vadd.f32 %v4708_v5, %v4654_v56  ;;  %v4759_v36 = vpop.f32.mrf.mxu2  ;;  %v7559_v5 = vor.u32 %v8175_v19, %v7558_v17  ;;  %v7543_v56 = vor.u32 %v8171_v12, %v7542_v50  ;;  %v8203_v17 = vld [vmem:[#allocation5 + $0x274] sm:$0xf0]  ;;  %v7655_v50 = vor.u32 %v8199_v58, %v7654_v6  ;;  %v7382_v12 = vld [vmem:[#allocation5 + $0x28] sm:$0xf] }
 0x408   :  { %v10973_v37 = vadd.f32 %v4759_v36, %v4706_v31  ;;  %v8207_v31 = vld [vmem:[#allocation5 + $0x294] sm:$0xf0]  ;;  %v7671_v54 = vor.u32 %v8203_v17, %v7670_v18  ;;  %v7638_v18 = vld [vmem:[#allocation5 + $0x228] sm:$0xf] }
 0x409   :  { %4864 = vmatmul.bf16.gmra.mxu0 %v12793_v48  ;;  %4918 = vmatmul.bf16.gmra.mxu1 %v12794_v46  ;;  %v7687_v52 = vor.u32 %v8207_v31, %v7686_v9  ;;  %v7398_v9 = vld [vmem:[#allocation5 + $0x48] sm:$0xf]  ;;  %v8135_v31 = vld [vmem:[#allocation5 + $0x54] sm:$0xf0] }
 0x40a   :  { %4810 = vmatmul.bf16.gmra.mxu3 %v10859_v60  ;;  %5099 = vmatpush.bf16.msrb.mxu1 %v7559_v5  ;;  %v7526_v60 = vld [vmem:[#allocation5 + $0x148] sm:$0xf]  ;;  %v7399_v5 = vor.u32 %v8135_v31, %v7398_v9  ;;  %v8195_v17 = vld [vmem:[#allocation5 + $0x234] sm:$0xf0] }
 0x40b   :  { %5153 = vmatpush.bf16.msrb.mxu2 %v7687_v52  ;;  %5046 = vmatpush.bf16.msrb.mxu0 %v7415_v14  ;;  %v7527_v52 = vor.u32 %v8167_v4, %v7526_v60  ;;  %v7510_v46 = vld [vmem:[#allocation5 + $0x128] sm:$0xf]  ;;  %v8163_v14 = vld [vmem:[#allocation5 + $0x134] sm:$0xf0]  ;;  %v7639_v9 = vor.u32 %v8195_v17, %v7638_v18 }
 0x40c   :  { %4972 = vmatmul.bf16.gmra.mxu2 %v12821_v29  ;;  %v8131_v29 = vld [vmem:[#allocation5 + $0x34] sm:$0xf0]  ;;  %v7366_v60 = vld [vmem:[#allocation5 + $0x8] sm:$0xf] }
 0x40d   :  { %v8127_v4 = vld [vmem:[#allocation5 + $0x14] sm:$0xf0]  ;;  %v7494_v6 = vld [vmem:[#allocation5 + $0x108] sm:$0xf] }
 0x40e   :  { %v4656_v36 = vpop.f32.mrf.mxu0  ;;  %v4710_v51 = vpop.f32.mrf.mxu1  ;;  %5100 = vmatpush.bf16.msrb.mxu1 %v7543_v56  ;;  %v8191_v58 = vld [vmem:[#allocation5 + $0x214] sm:$0xf0] }
 0x40f   :  { %v4711_v19 = vadd.f32 %v4710_v51, %v4656_v36  ;;  %v4762_v22 = vpop.f32.mrf.mxu2  ;;  %5154 = vmatpush.bf16.msrb.mxu2 %v7671_v54  ;;  %5047 = vmatpush.bf16.msrb.mxu0 %v7399_v5  ;;  %v7383_v36 = vor.u32 %v8131_v29, %v7382_v12  ;;  %v8159_v29 = vld [vmem:[#allocation5 + $0x114] sm:$0xf0]  ;;  %v7622_v5 = vld [vmem:[#allocation5 + $0x208] sm:$0xf] }
 0x410   :  { %v10979_v2 = vadd.f32 %v4762_v22, %v4709_v34  ;;  %v7511_v34 = vor.u32 %v8163_v14, %v7510_v46  ;;  %v7367_v46 = vor.u32 %v8127_v4, %v7366_v60  ;;  %v7862_v12 = vld [vmem:[#allocation5 + $0x3e8] sm:$0xf] }
 0x412   :  { %5101 = vmatpush.bf16.msrb.mxu1 %v7527_v52  ;;  %v7495_v52 = vor.u32 %v8159_v29, %v7494_v6  ;;  %v7846_v6 = vld [vmem:[#allocation5 + $0x3c8] sm:$0xf] }
 0x413   :  { %5155 = vmatpush.bf16.msrb.mxu2 %v7655_v50  ;;  %5048 = vmatpush.bf16.msrb.mxu0 %v7383_v36  ;;  %v7623_v50 = vor.u32 %v8191_v58, %v7622_v5 }
 0x416   :  { %v4659_v56 = vpop.f32.mrf.mxu0  ;;  %v4713_v51 = vpop.f32.mrf.mxu1  ;;  %5102 = vmatpush.bf16.msrb.mxu1 %v7511_v34 }
 0x417   :  { %v4714_v22 = vadd.f32 %v4713_v51, %v4659_v56  ;;  %v4764_v54 = vpop.f32.mrf.mxu2  ;;  %5156 = vmatpush.bf16.msrb.mxu2 %v7639_v9  ;;  %5049 = vmatpush.bf16.msrb.mxu0 %v7367_v46  ;;  %v8247_v46 = vld [vmem:[#allocation5 + $0x3d4] sm:$0xf0] }
 0x418   :  { %v10981_v31 = vadd.f32 %v4764_v54, %v4711_v19  ;;  %v8251_v19 = vld [vmem:[#allocation5 + $0x3f4] sm:$0xf0]  ;;  %v7847_v5 = vor.u32 %v8247_v46, %v7846_v6 }
 0x419   :  { %4869 = vmatmul.bf16.gmra.mxu0 %v12799_v63  ;;  %4923 = vmatmul.bf16.gmra.mxu1 %v12800_v23  ;;  %v7863_v36 = vor.u32 %v8251_v19, %v7862_v12 }
 0x41a   :  { %4815 = vmatmul.bf16.gmra.mxu3 %v10901_v38  ;;  %5103 = vmatpush.bf16.msrb.mxu1 %v7495_v52 }
 0x41b   :  { %5204 = vmatpush.bf16.msrb.mxu3 %v7863_v36  ;;  %5157 = vmatpush.bf16.msrb.mxu2 %v7623_v50 }
 0x41c   :  { %4977 = vmatmul.bf16.gmra.mxu2 %v10609_v49 }
 0x41e   :  { %v4661_v14 = vpop.f32.mrf.mxu0  ;;  %v4715_v34 = vpop.f32.mrf.mxu1 }
 0x41f   :  { %v4716_v56 = vadd.f32 %v4715_v34, %v4661_v14  ;;  %v4767_v51 = vpop.f32.mrf.mxu2  ;;  %5205 = vmatpush.bf16.msrb.mxu3 %v7847_v5 }
 0x420   :  { %v10987_v18 = vadd.f32 %v4767_v51, %v4714_v22 }
 0x426   :  { %v4835_v17 = vpop.f32.mrf.mxu0  ;;  %v4889_v54 = vpop.f32.mrf.mxu1 }
 0x427   :  { %v4769_v9 = vpop.f32.mrf.mxu2  ;;  %v4890_v60 = vadd.f32 %v4889_v54, %v4835_v17 }
 0x428   :  { %v10989_v4 = vadd.f32 %v4769_v9, %v4716_v56 }
 0x429   :  { %4874 = vmatmul.bf16.gmra.mxu0 %v12806_v11  ;;  %4928 = vmatmul.bf16.gmra.mxu1 %v12807_v15 }
 0x42a   :  { %4820 = vmatmul.bf16.gmra.mxu3 %v10925_v33 }
 0x42c   :  { %4982 = vmatmul.bf16.gmra.mxu2 %v10631_v10 }
 0x42d   :  { %v4781_v29 = vpop.f32.mrf.mxu3 }
 0x42e   :  { %v10996_v22 = vadd.f32 %v4781_v29, %v10907_v16  ;;  %v4837_v58 = vpop.f32.mrf.mxu0  ;;  %v4891_v52 = vpop.f32.mrf.mxu1 }
 0x42f   :  { %v4892_v50 = vadd.f32 %v4891_v52, %v4837_v58  ;;  %v4943_v12 = vpop.f32.mrf.mxu2 }
 0x430   :  { %v10998_v19 = vadd.f32 %v4943_v12, %v4890_v60  ;;  %v12510_v9 = vrot.slane %v10996_v22, 7 }
 0x435   :  { %v4783_v36 = vpop.f32.mrf.mxu3 }
 0x436   :  { %v11001_v14 = vadd.f32 %v4783_v36, %v10921_v30  ;;  %v4840_v34 = vpop.f32.mrf.mxu0  ;;  %v4894_v56 = vpop.f32.mrf.mxu1 }
 0x437   :  { %v4895_v51 = vadd.f32 %v4894_v56, %v4840_v34  ;;  %v4945_v17 = vpop.f32.mrf.mxu2 }
 0x438   :  { %v11003_v54 = vadd.f32 %v4945_v17, %v4892_v50  ;;  %v5478_v16 = vrot.slane %v11001_v14, 7  ;;  %v12512_v29 = vrot.slane %v11001_v14, 1  ;;  %v7830_v17 = vld [vmem:[#allocation5 + $0x3a8] sm:$0xf] }
 0x439   :  { %5050 = vmatmul.bf16.vlgmr.msrb.gmra.mxu0 %v12758_v21  ;;  %5104 = vmatmul.bf16.vlgmr.msrb.gmra.mxu1 %v12759_v27 }
 0x43a   :  { %4996 = vmatmul.bf16.vlgmr.msra.gmra.mxu3 %v10923_v45  ;;  %v5610_v5 = vsel %vm783_vm0, %v12510_v9, %v5478_v16 }
 0x43c   :  { %5158 = vmatmul.bf16.vlgmr.msrb.gmra.mxu2 %v10629_v0 }
 0x43d   :  { %v4786_v30 = vpop.f32.mrf.mxu3 }
 0x43e   :  { %v4787_v60 = vadd.f32 %v4786_v30, %v10931_v40  ;;  %v4842_v6 = vpop.f32.mrf.mxu0  ;;  %v4896_v46 = vpop.f32.mrf.mxu1  ;;  %v8243_v40 = vld [vmem:[#allocation5 + $0x3b4] sm:$0xf0] }
 0x43f   :  { %v4897_v58 = vadd.f32 %v4896_v46, %v4842_v6  ;;  %v4948_v52 = vpop.f32.mrf.mxu2  ;;  %v7831_v0 = vor.u32 %v8243_v40, %v7830_v17 }
 0x440   :  { %v5482_v50 = vrot.slane %v4787_v60, 7  ;;  %v5622_v36 = vsel %vm712_vm5, %v4787_v60, %v5610_v5  ;;  %v5770_v34 = vrot.slane %v4787_v60, 1  ;;  %v11019_v56 = vadd.f32 %v4948_v52, %v4895_v51 }
 0x441   :  { %v5694_v30 = vadd.f32 %v5622_v36, %v11001_v14  ;;  %5206 = vmatpush.bf16.msrb.mxu3 %v7831_v0 }
 0x442   :  { %12823 = vst [vmem:[#allocation59_spill] sm:$0xff] %v11019_v56  ;;  %v5894_v45 = vsel %vm892_vm1, %v12512_v29, %v5770_v34  ;;  %v5606_v6 = vsel %vm783_vm0, %v5478_v16, %v5482_v50  ;;  %v8239_v16 = vld [vmem:[#allocation5 + $0x394] sm:$0xf0] }
 0x443   :  { %v5910_v46 = vsel %vm730_vm6, %v10996_v22, %v5894_v45 }
 0x444   :  { %v11031_v51 = vadd.f32 %v5910_v46, %v5694_v30 }
 0x445   :  { %v4788_v5 = vpop.f32.mrf.mxu3 }
 0x446   :  { %v4789_v52 = vadd.f32 %v4788_v5, %v10933_v44  ;;  %v4845_v36 = vpop.f32.mrf.mxu0  ;;  %v4899_v17 = vpop.f32.mrf.mxu1 }
 0x447   :  { %v4900_v40 = vadd.f32 %v4899_v17, %v4845_v36  ;;  %v4950_v9 = vpop.f32.mrf.mxu2 }
 0x448   :  { %v5486_v56 = vrot.slane %v4789_v52, 7  ;;  %v5774_v27 = vrot.slane %v4789_v52, 1  ;;  %v11034_v29 = vadd.f32 %v4950_v9, %v4897_v58  ;;  %v5626_v0 = vsel %vm713_vm11, %v4789_v52, %v5606_v6 }
 0x449   :  { %5055 = vmatmul.bf16.gmra.mxu0 %v12761_v26  ;;  %5109 = vmatmul.bf16.gmra.mxu1 %v12762_v25  ;;  %v5698_v44 = vadd.f32 %v5626_v0, %v4787_v60 }
 0x44a   :  { %12824 = vst [vmem:[#allocation32_spill] sm:$0xff] %v11034_v29  ;;  %5001 = vmatmul.bf16.gmra.mxu3 %v10691_v8  ;;  %v5602_v45 = vsel %vm783_vm0, %v5482_v50, %v5486_v56  ;;  %v5890_v30 = vsel %vm892_vm1, %v5770_v34, %v5774_v27  ;;  %v11053_v50 = vld [vmem:[%s12348_s6] sm:$0xf] }
 0x44b   :  { %v5914_v9 = vsel %vm731_vm14, %v11001_v14, %v5890_v30  ;;  %12826 = vst [vmem:[#allocation53_spill] sm:$0xff] %v11053_v50  ;;  %v7814_v30 = vld [vmem:[#allocation5 + $0x388] sm:$0xf] }
 0x44c   :  { %5163 = vmatmul.bf16.gmra.mxu2 %v10397_v62  ;;  %v5986_v58 = vadd.f32 %v5914_v9, %v5698_v44  ;;  %v7815_v9 = vor.u32 %v8239_v16, %v7814_v30 }
 0x44d   :  { %v4791_v46 = vpop.f32.mrf.mxu3 }
 0x44e   :  { %v4792_v5 = vadd.f32 %v4791_v46, %v10939_v3  ;;  %v4847_v6 = vpop.f32.mrf.mxu0  ;;  %v4901_v36 = vpop.f32.mrf.mxu1  ;;  %v11060_v3 = vperm.slane %v11053_v50, 0  ;;  %5207 = vmatpush.bf16.msrb.mxu3 %v7815_v9 }
 0x44f   :  { %v4902_v17 = vadd.f32 %v4901_v36, %v4847_v6  ;;  %v4953_v0 = vpop.f32.mrf.mxu2 }
 0x450   :  { %v5490_v34 = vrot.slane %v4792_v5, 7  ;;  %v5778_v8 = vrot.slane %v4792_v5, 1  ;;  %v11055_v25 = vadd.f32 %v4953_v0, %v4900_v40  ;;  %v5630_v44 = vsel %vm714_vm9, %v4792_v5, %v5602_v45 }
 0x451   :  { %v5702_v46 = vadd.f32 %v5630_v44, %v4789_v52  ;;  %v6068_v36 = vadd.f32 %v11060_v3, %v5986_v58 }
 0x452   :  { %12827 = vst [vmem:[#allocation62_spill] sm:$0xff] %v11055_v25  ;;  %v5886_v26 = vsel %vm892_vm1, %v5774_v27, %v5778_v8  ;;  %v5598_v6 = vsel %vm783_vm0, %v5486_v56, %v5490_v34 }
 0x453   :  { %v5918_v40 = vsel %vm732_vm10, %v4787_v60, %v5886_v26  ;;  %v6140_v29 = vmax.f32 %v6068_v36, 0.0 }
 0x454   :  { %v5990_v0 = vadd.f32 %v5918_v40, %v5702_v46 }
 0x455   :  { %v4793_v25 = vpop.f32.mrf.mxu3 }
 0x456   :  { %v11070_v16 = vadd.f32 %v4793_v25, %v10941_v28  ;;  %v4850_v45 = vpop.f32.mrf.mxu0  ;;  %v4904_v30 = vpop.f32.mrf.mxu1  ;;  %v6072_v44 = vadd.f32 %v11060_v3, %v5990_v0  ;;  %v12829_v25 = vld [vmem:[#allocation16_spill] sm:$0xff] }
 0x457   :  { %v4905_v50 = vadd.f32 %v4904_v30, %v4850_v45  ;;  %v4955_v27 = vpop.f32.mrf.mxu2  ;;  %vm12830_vm8 = vcmp.eq.s32.totalorder %v12829_v25, 0  ;;  %vm12832_vm4 = vcmp.eq.s32.totalorder %v12829_v25, 8 }
 0x458   :  { %v5494_v56 = vrot.slane %v11070_v16, 7  ;;  %v5782_v9 = vrot.slane %v11070_v16, 1  ;;  %v11075_v62 = vadd.f32 %v4955_v27, %v4902_v17  ;;  %v6144_v26 = vmax.f32 %v6072_v44, 0.0 }
 0x459   :  { %5060 = vmatmul.bf16.gmra.mxu0 %v12765_v32  ;;  %5114 = vmatmul.bf16.gmra.mxu1 %v12766_v55  ;;  %v5634_v28 = vsel %vm12830_vm8, %v11070_v16, %v5598_v6 }
 0x45a   :  { %5006 = vmatmul.bf16.gmra.mxu3 %v10714_v7  ;;  %v11083_v60 = vpack.c.bf16 %v6144_v26, %v6140_v29  ;;  %v5594_v58 = vsel %vm783_vm0, %v5490_v34, %v5494_v56  ;;  %v5706_v46 = vadd.f32 %v5634_v28, %v4792_v5  ;;  %v5882_v17 = vsel %vm892_vm1, %v5778_v8, %v5782_v9  ;;  %v7798_v28 = vld [vmem:[#allocation5 + $0x368] sm:$0xf]  ;;  %v12833_v8 = vld [vmem:[#allocation17_spill] sm:$0xff] }
 0x45b   :  { %v5922_v40 = vsel %vm12832_vm4, %v4789_v52, %v5882_v17  ;;  %vm12834_vm8 = vcmp.eq.s32.totalorder %v12833_v8, 0  ;;  %vm12835_vm4 = vcmp.eq.s32.totalorder %v12833_v8, 8 }
 0x45c   :  { %12831 = vst [vmem:[#allocation54_spill] sm:$0xff] %v11083_v60  ;;  %5168 = vmatmul.bf16.gmra.mxu2 %v10421_v41  ;;  %v5994_v36 = vadd.f32 %v5922_v40, %v5706_v46  ;;  %v8235_v60 = vld [vmem:[#allocation5 + $0x374] sm:$0xf0] }
 0x45d   :  { %v4796_v0 = vpop.f32.mrf.mxu3  ;;  %v7799_v52 = vor.u32 %v8235_v60, %v7798_v28 }
 0x45e   :  { %v4797_v6 = vadd.f32 %v4796_v0, %v10947_v61  ;;  %v4852_v45 = vpop.f32.mrf.mxu0  ;;  %v4906_v30 = vpop.f32.mrf.mxu1 }
 0x45f   :  { %v4907_v29 = vadd.f32 %v4906_v30, %v4852_v45  ;;  %v4958_v44 = vpop.f32.mrf.mxu2  ;;  %5208 = vmatpush.bf16.msrb.mxu3 %v7799_v52 }
 0x460   :  { %v5498_v27 = vrot.slane %v4797_v6, 7  ;;  %v5786_v26 = vrot.slane %v4797_v6, 1  ;;  %v11093_v34 = vadd.f32 %v4958_v44, %v4905_v50  ;;  %v5638_v7 = vsel %vm12834_vm8, %v4797_v6, %v5594_v58 }
 0x461   :  { %v5710_v17 = vadd.f32 %v5638_v7, %v11070_v16  ;;  %v6076_v50 = vadd.f32 %v11060_v3, %v5994_v36 }
 0x462   :  { %v5878_v46 = vsel %vm892_vm1, %v5782_v9, %v5786_v26  ;;  %v5590_v61 = vsel %vm783_vm0, %v5494_v56, %v5498_v27 }
 0x463   :  { %v5926_v40 = vsel %vm12835_vm4, %v4792_v5, %v5878_v46  ;;  %v6148_v28 = vmax.f32 %v6076_v50, 0.0 }
 0x464   :  { %v5998_v0 = vadd.f32 %v5926_v40, %v5710_v17 }
 0x465   :  { %v4798_v45 = vpop.f32.mrf.mxu3 }
 0x466   :  { %v11106_v30 = vadd.f32 %v4798_v45, %v10949_v47  ;;  %v4855_v60 = vpop.f32.mrf.mxu0  ;;  %v4909_v58 = vpop.f32.mrf.mxu1  ;;  %v6080_v7 = vadd.f32 %v11060_v3, %v5998_v0  ;;  %v12836_v47 = vld [vmem:[#allocation18_spill] sm:$0xff] }
 0x467   :  { %v4910_v44 = vadd.f32 %v4909_v58, %v4855_v60  ;;  %v4960_v9 = vpop.f32.mrf.mxu2  ;;  %vm12837_vm8 = vcmp.eq.s32.totalorder %v12836_v47, 0  ;;  %vm12839_vm4 = vcmp.eq.s32.totalorder %v12836_v47, 8 }
 0x468   :  { %v5502_v56 = vrot.slane %v11106_v30, 7  ;;  %v5790_v52 = vrot.slane %v11106_v30, 1  ;;  %v11111_v8 = vadd.f32 %v4960_v9, %v4907_v29  ;;  %v6152_v5 = vmax.f32 %v6080_v7, 0.0 }
 0x469   :  { %5065 = vmatmul.bf16.gmra.mxu0 %v12772_v59  ;;  %5119 = vmatmul.bf16.gmra.mxu1 %v12773_v53  ;;  %v5642_v36 = vsel %vm12837_vm8, %v11106_v30, %v5590_v61 }
 0x46a   :  { %5011 = vmatmul.bf16.gmra.mxu3 %v10742_v43  ;;  %v11119_v17 = vpack.c.bf16 %v6152_v5, %v6148_v28  ;;  %v5586_v46 = vsel %vm783_vm0, %v5498_v27, %v5502_v56  ;;  %v5714_v40 = vadd.f32 %v5642_v36, %v4797_v6  ;;  %v5874_v29 = vsel %vm892_vm1, %v5786_v26, %v5790_v52  ;;  %v7782_v36 = vld [vmem:[#allocation5 + $0x348] sm:$0xf]  ;;  %v8231_v26 = vld [vmem:[#allocation5 + $0x354] sm:$0xf0] }
 0x46b   :  { %v5930_v50 = vsel %vm12839_vm4, %v11070_v16, %v5874_v29  ;;  %v7783_v16 = vor.u32 %v8231_v26, %v7782_v36 }
 0x46c   :  { %12838 = vst [vmem:[#allocation63_spill] sm:$0xff] %v11119_v17  ;;  %5173 = vmatmul.bf16.gmra.mxu2 %v10450_v20  ;;  %v6002_v0 = vadd.f32 %v5930_v50, %v5714_v40  ;;  %v12840_v17 = vld [vmem:[#allocation19_spill] sm:$0xff] }
 0x46d   :  { %v4801_v45 = vpop.f32.mrf.mxu3  ;;  %vm12841_vm8 = vcmp.eq.s32.totalorder %v12840_v17, 0  ;;  %5209 = vmatpush.bf16.msrb.mxu3 %v7783_v16  ;;  %vm12842_vm4 = vcmp.eq.s32.totalorder %v12840_v17, 8 }
 0x46e   :  { %v4802_v61 = vadd.f32 %v4801_v45, %v10955_v42  ;;  %v4857_v60 = vpop.f32.mrf.mxu0  ;;  %v4911_v58 = vpop.f32.mrf.mxu1 }
 0x46f   :  { %v4912_v7 = vadd.f32 %v4911_v58, %v4857_v60  ;;  %v4963_v9 = vpop.f32.mrf.mxu2 }
 0x470   :  { %v5506_v28 = vrot.slane %v4802_v61, 7  ;;  %v5794_v27 = vrot.slane %v4802_v61, 1  ;;  %v11130_v5 = vadd.f32 %v4963_v9, %v4910_v44  ;;  %v5646_v43 = vsel %vm12841_vm8, %v4802_v61, %v5586_v46 }
 0x471   :  { %v5718_v29 = vadd.f32 %v5646_v43, %v11106_v30  ;;  %v6084_v44 = vadd.f32 %v11060_v3, %v6002_v0 }
 0x472   :  { %v5870_v40 = vsel %vm892_vm1, %v5790_v52, %v5794_v27  ;;  %v5582_v42 = vsel %vm783_vm0, %v5502_v56, %v5506_v28 }
 0x473   :  { %v5934_v50 = vsel %vm12842_vm4, %v4797_v6, %v5870_v40  ;;  %v6156_v26 = vmax.f32 %v6084_v44, 0.0 }
 0x474   :  { %v6006_v45 = vadd.f32 %v5934_v50, %v5718_v29 }
 0x475   :  { %v4803_v60 = vpop.f32.mrf.mxu3 }
 0x476   :  { %v11143_v58 = vadd.f32 %v4803_v60, %v10957_v57  ;;  %v4860_v46 = vpop.f32.mrf.mxu0  ;;  %v4914_v9 = vpop.f32.mrf.mxu1  ;;  %v6088_v43 = vadd.f32 %v11060_v3, %v6006_v45  ;;  %v12844_v57 = vld [vmem:[#allocation20_spill] sm:$0xff] }
 0x477   :  { %v4915_v36 = vadd.f32 %v4914_v9, %v4860_v46  ;;  %v4965_v52 = vpop.f32.mrf.mxu2  ;;  %vm12845_vm8 = vcmp.eq.s32.totalorder %v12844_v57, 0  ;;  %vm12847_vm4 = vcmp.eq.s32.totalorder %v12844_v57, 8  ;;  %v8153_v57 = vld [vmem:[#allocation5 + $0xec] sm:$0xf] }
 0x478   :  { %v5510_v56 = vrot.slane %v11143_v58, 7  ;;  %v5798_v16 = vrot.slane %v11143_v58, 1  ;;  %v11148_v17 = vadd.f32 %v4965_v52, %v4912_v7  ;;  %v6160_v6 = vmax.f32 %v6088_v43, 0.0 }
 0x479   :  { %5070 = vmatmul.bf16.gmra.mxu0 %v12779_v35  ;;  %5124 = vmatmul.bf16.gmra.mxu1 %v12780_v24  ;;  %v5650_v0 = vsel %vm12845_vm8, %v11143_v58, %v5582_v42  ;;  %v12848_v42 = vld [vmem:[#allocation48_spill] sm:$0xff]  ;;  %v7608_v24 = vld [vmem:[#allocation5 + $0x1f8] sm:$0xf0] }
 0x47a   :  { %12843 = vst [vmem:[#allocation57_spill] sm:$0xff] %v11148_v17  ;;  %5016 = vmatmul.bf16.gmra.mxu3 %v10782_v39  ;;  %v11156_v29 = vpack.c.bf16 %v6160_v6, %v6156_v26  ;;  %v5578_v40 = vsel %vm783_vm0, %v5506_v28, %v5510_v56  ;;  %v5722_v50 = vadd.f32 %v5650_v0, %v4802_v61  ;;  %v12850_v0 = vld [vmem:[#allocation21_spill] sm:$0xff] }
 0x47b   :  { %v5866_v7 = vsel %vm892_vm1, %v5794_v27, %v5798_v16  ;;  %vm12851_vm8 = vcmp.eq.s32.totalorder %v12850_v0, 0 }
 0x47c   :  { %12846 = vst [vmem:[#allocation58_spill] sm:$0xff] %v11156_v29  ;;  %v5938_v44 = vsel %vm12847_vm4, %v11106_v30, %v5866_v7  ;;  %5178 = vmatmul.bf16.gmra.mxu2 %v12814_v13  ;;  %vm12852_vm4 = vcmp.eq.s32.totalorder %v12850_v0, 8  ;;  %v12859_v0 = vld [vmem:[#allocation38_spill] sm:$0xff] }
 0x47d   :  { %v6010_v45 = vadd.f32 %v5938_v44, %v5722_v50  ;;  %v4806_v60 = vpop.f32.mrf.mxu3 }
 0x47e   :  { %v11167_v46 = vadd.f32 %v4806_v60, %v12848_v42  ;;  %v4862_v9 = vpop.f32.mrf.mxu0  ;;  %v4916_v43 = vpop.f32.mrf.mxu1 }
 0x47f   :  { %v4917_v52 = vadd.f32 %v4916_v43, %v4862_v9  ;;  %v4968_v26 = vpop.f32.mrf.mxu2  ;;  %v12853_v43 = vld [vmem:[#allocation49_spill] sm:$0xff] }
 0x480   :  { %v5514_v28 = vrot.slane %v11167_v46, 7  ;;  %v5802_v6 = vrot.slane %v11167_v46, 1  ;;  %v11171_v27 = vadd.f32 %v4968_v26, %v4915_v36  ;;  %v5654_v30 = vsel %vm12851_vm8, %v11167_v46, %v5578_v40 }
 0x481   :  { %v5726_v50 = vadd.f32 %v5654_v30, %v11143_v58  ;;  %v6092_v36 = vadd.f32 %v11060_v3, %v6010_v45 }
 0x482   :  { %12849 = vst [vmem:[#allocation46_spill] sm:$0xff] %v11171_v27  ;;  %v5862_v7 = vsel %vm892_vm1, %v5798_v16, %v5802_v6  ;;  %v5574_v44 = vsel %vm783_vm0, %v5510_v56, %v5514_v28 }
 0x483   :  { %v5942_v60 = vsel %vm12852_vm4, %v4802_v61, %v5862_v7  ;;  %v7766_v61 = vld [vmem:[#allocation5 + $0x328] sm:$0xf]  ;;  %v12855_v7 = vld [vmem:[#allocation22_spill] sm:$0xff] }
 0x484   :  { %v6014_v42 = vadd.f32 %v5942_v60, %v5726_v50  ;;  %v8227_v50 = vld [vmem:[#allocation5 + $0x334] sm:$0xf0]  ;;  %vm12856_vm8 = vcmp.eq.s32.totalorder %v12855_v7, 0  ;;  %v12857_v60 = vld [vmem:[#allocation56_spill] sm:$0xff]  ;;  %vm12861_vm4 = vcmp.eq.s32.totalorder %v12855_v7, 8 }
 0x485   :  { %v4808_v9 = vpop.f32.mrf.mxu3 }
 0x486   :  { %v11185_v26 = vadd.f32 %v4808_v9, %v12853_v43  ;;  %v4865_v29 = vpop.f32.mrf.mxu0  ;;  %v4919_v40 = vpop.f32.mrf.mxu1  ;;  %v6096_v30 = vadd.f32 %v11060_v3, %v6014_v42  ;;  %v12858_v9 = vld [vmem:[#allocation44_spill] sm:$0xff]  ;;  %v7767_v43 = vor.u32 %v8227_v50, %v7766_v61  ;;  %v6164_v42 = vmax.f32 %v6092_v36, 0.0 }
 0x487   :  { %v4920_v27 = vadd.f32 %v4919_v40, %v4865_v29  ;;  %v4970_v13 = vpop.f32.mrf.mxu2 }
 0x488   :  { %v5518_v16 = vrot.slane %v11185_v26, 7  ;;  %v5806_v56 = vrot.slane %v11185_v26, 1  ;;  %v11190_v39 = vadd.f32 %v4970_v13, %v4917_v52  ;;  %v5658_v45 = vsel %vm12856_vm8, %v11185_v26, %v5574_v44  ;;  %v7480_v13 = vld [vmem:[#allocation5 + $0xf8] sm:$0xf0]  ;;  %v8185_v52 = vld [vmem:[#allocation5 + $0x1ec] sm:$0xf]  ;;  %5210 = vmatpush.bf16.msrb.mxu3 %v7767_v43 }
 0x489   :  { %5075 = vmatmul.bf16.gmra.mxu0 %v12857_v60  ;;  %5129 = vmatmul.bf16.gmra.mxu1 %v12858_v9  ;;  %v6168_v29 = vmax.f32 %v6096_v30, 0.0  ;;  %v5730_v40 = vadd.f32 %v5658_v45, %v11167_v46  ;;  %v7483_v60 = vor.u32 %v8153_v57, %v7480_v13  ;;  %v12862_v30 = vld [vmem:[#allocation31_spill] sm:$0xff]  ;;  %v7611_v61 = vor.u32 %v8185_v52, %v7608_v24  ;;  %v8217_v57 = vld [vmem:[#allocation5 + $0x2ec] sm:$0xf]  ;;  %v7736_v43 = vld [vmem:[#allocation5 + $0x2f8] sm:$0xf0] }
 0x48a   :  { %12854 = vst [vmem:[#allocation60_spill] sm:$0xff] %v11190_v39  ;;  %5021 = vmatmul.bf16.gmra.mxu3 %v12859_v0  ;;  %v5570_v39 = vsel %vm783_vm0, %v5514_v28, %v5518_v16  ;;  %v5858_v44 = vsel %vm892_vm1, %v5802_v6, %v5806_v56  ;;  %v12863_v0 = vld [vmem:[#allocation50_spill] sm:$0xff]  ;;  %v7739_v13 = vor.u32 %v8217_v57, %v7736_v43  ;;  %v8149_v24 = vld [vmem:[#allocation5 + $0xcc] sm:$0xf] }
 0x48b   :  { %v11203_v9 = vpack.c.bf16 %v6168_v29, %v6164_v42  ;;  %v5946_v36 = vsel %vm12861_vm4, %v11143_v58, %v5858_v44  ;;  %5258 = vmatpush.bf16.msra.mxu0 %v7483_v60  ;;  %5312 = vmatpush.bf16.msra.mxu1 %v7611_v61  ;;  %v12865_v60 = vld [vmem:[#allocation23_spill] sm:$0xff]  ;;  %v7592_v61 = vld [vmem:[#allocation5 + $0x1d8] sm:$0xf0]  ;;  %v8145_v43 = vld [vmem:[#allocation5 + $0xac] sm:$0xf] }
 0x48c   :  { %5183 = vmatmul.bf16.gmra.mxu2 %v12862_v30  ;;  %v6018_v50 = vadd.f32 %v5946_v36, %v5730_v40  ;;  %v7464_v40 = vld [vmem:[#allocation5 + $0xd8] sm:$0xf0]  ;;  %vm12866_vm8 = vcmp.eq.s32.totalorder %v12865_v60, 0  ;;  %v8181_v36 = vld [vmem:[#allocation5 + $0x1cc] sm:$0xf]  ;;  %vm12867_vm4 = vcmp.eq.s32.totalorder %v12865_v60, 8 }
 0x48d   :  { %12860 = vst [vmem:[#allocation61_spill] sm:$0xff] %v11203_v9  ;;  %v4811_v45 = vpop.f32.mrf.mxu3  ;;  %5366 = vmatpush.bf16.msra.mxu2 %v7739_v13  ;;  %v7467_v52 = vor.u32 %v8149_v24, %v7464_v40  ;;  %v7720_v57 = vld [vmem:[#allocation5 + $0x2d8] sm:$0xf0]  ;;  %v8177_v13 = vld [vmem:[#allocation5 + $0x1ac] sm:$0xf] }
 0x48e   :  { %v11210_v28 = vadd.f32 %v4811_v45, %v12863_v0  ;;  %v4867_v35 = vpop.f32.mrf.mxu0  ;;  %v4921_v6 = vpop.f32.mrf.mxu1  ;;  %v8213_v45 = vld [vmem:[#allocation5 + $0x2cc] sm:$0xf]  ;;  %v7448_v30 = vld [vmem:[#allocation5 + $0xb8] sm:$0xf0]  ;;  %v6100_v7 = vadd.f32 %v11060_v3, %v6018_v50 }
 0x48f   :  { %v4922_v42 = vadd.f32 %v4921_v6, %v4867_v35  ;;  %v4973_v29 = vpop.f32.mrf.mxu2  ;;  %v7595_v6 = vor.u32 %v8181_v36, %v7592_v61  ;;  %5259 = vmatpush.bf16.msra.mxu0 %v7467_v52  ;;  %v7576_v24 = vld [vmem:[#allocation5 + $0x1b8] sm:$0xf0]  ;;  %v8141_v50 = vld [vmem:[#allocation5 + $0x8c] sm:$0xf] }
 0x490   :  { %v5522_v9 = vrot.slane %v11210_v28, 7  ;;  %v5810_v58 = vrot.slane %v11210_v28, 1  ;;  %v11214_v44 = vadd.f32 %v4973_v29, %v4920_v27  ;;  %v5662_v0 = vsel %vm12866_vm8, %v11210_v28, %v5570_v39 }
 0x491   :  { %v5734_v35 = vadd.f32 %v5662_v0, %v11185_v26  ;;  %v7451_v39 = vor.u32 %v8145_v43, %v7448_v30  ;;  %5313 = vmatpush.bf16.msra.mxu1 %v7595_v6  ;;  %v7579_v0 = vor.u32 %v8177_v13, %v7576_v24  ;;  %v7704_v30 = vld [vmem:[#allocation5 + $0x2b8] sm:$0xf0]  ;;  %v12869_v24 = vld [vmem:[#allocation45_spill] sm:$0xff] }
 0x492   :  { %12864 = vst [vmem:[#allocation16_spill] sm:$0xff] %v11214_v44  ;;  %v5854_v27 = vsel %vm892_vm1, %v5806_v56, %v5810_v58  ;;  %v5566_v29 = vsel %vm783_vm0, %v5518_v16, %v5522_v9  ;;  %v7723_v44 = vor.u32 %v8213_v45, %v7720_v57  ;;  %v8209_v45 = vld [vmem:[#allocation5 + $0x2ac] sm:$0xf] }
 0x493   :  { %v5950_v40 = vsel %vm12867_vm4, %v11167_v46, %v5854_v27  ;;  %5260 = vmatpush.bf16.msra.mxu0 %v7451_v39  ;;  %v7707_v46 = vor.u32 %v8209_v45, %v7704_v30  ;;  %v8173_v39 = vld [vmem:[#allocation5 + $0x18c] sm:$0xf]  ;;  %v7688_v45 = vld [vmem:[#allocation5 + $0x298] sm:$0xf0] }
 0x494   :  { %v6022_v36 = vadd.f32 %v5950_v40, %v5734_v35  ;;  %5367 = vmatpush.bf16.msra.mxu2 %v7723_v44 }
 0x495   :  { %v4813_v61 = vpop.f32.mrf.mxu3  ;;  %5314 = vmatpush.bf16.msra.mxu1 %v7579_v0  ;;  %v8205_v0 = vld [vmem:[#allocation5 + $0x28c] sm:$0xf] }
 0x496   :  { %v11229_v56 = vadd.f32 %v4813_v61, %v10973_v37  ;;  %v4870_v16 = vpop.f32.mrf.mxu0  ;;  %v4924_v52 = vpop.f32.mrf.mxu1  ;;  %v6104_v57 = vadd.f32 %v11060_v3, %v6022_v36  ;;  %v7432_v37 = vld [vmem:[#allocation5 + $0x98] sm:$0xf0]  ;;  %v6172_v61 = vmax.f32 %v6100_v7, 0.0  ;;  %v7691_v7 = vor.u32 %v8205_v0, %v7688_v45  ;;  %v8223_v0 = vld [vmem:[#allocation5 + $0x314] sm:$0xf0] }
 0x497   :  { %v4925_v43 = vadd.f32 %v4924_v52, %v4870_v16  ;;  %v4975_v17 = vpop.f32.mrf.mxu2  ;;  %v7435_v40 = vor.u32 %v8141_v50, %v7432_v37  ;;  %v7560_v36 = vld [vmem:[#allocation5 + $0x198] sm:$0xf0]  ;;  %v12872_v50 = vld [vmem:[#allocation36_spill] sm:$0xff] }
 0x498   :  { %v12535_v6 = vrot.slane %v11229_v56, 7  ;;  %v12536_v35 = vrot.slane %v11229_v56, 1  ;;  %v11234_v44 = vadd.f32 %v4975_v17, %v4922_v42  ;;  %v5666_v13 = vsel %vm723_vm13, %v11229_v56, %v5566_v29  ;;  %v12870_v17 = vld [vmem:[#allocation39_spill] sm:$0xff]  ;;  %5368 = vmatpush.bf16.msra.mxu2 %v7707_v46  ;;  %v8137_v37 = vld [vmem:[#allocation5 + $0x6c] sm:$0xf] }
 0x499   :  { %5080 = vmatmul.bf16.gmra.mxu0 %v12793_v48  ;;  %5134 = vmatmul.bf16.gmra.mxu1 %v12869_v24  ;;  %v6176_v16 = vmax.f32 %v6104_v57, 0.0  ;;  %v5738_v52 = vadd.f32 %v5666_v13, %v11210_v28  ;;  %v7563_v42 = vor.u32 %v8173_v39, %v7560_v36  ;;  %v7416_v13 = vld [vmem:[#allocation5 + $0x78] sm:$0xf0]  ;;  %v8169_v39 = vld [vmem:[#allocation5 + $0x16c] sm:$0xf] }
 0x49a   :  { %5026 = vmatmul.bf16.gmra.mxu3 %v12870_v17  ;;  %v5562_v29 = vsel %vm783_vm0, %v5522_v9, %v12535_v6  ;;  %v5850_v30 = vsel %vm892_vm1, %v5810_v58, %v12536_v35  ;;  %5261 = vmatpush.bf16.msra.mxu0 %v7435_v40  ;;  %v7419_v6 = vor.u32 %v8137_v37, %v7416_v13  ;;  %v7544_v17 = vld [vmem:[#allocation5 + $0x178] sm:$0xf0]  ;;  %v8133_v13 = vld [vmem:[#allocation5 + $0x4c] sm:$0xf] }
 0x49b   :  { %v11251_v57 = vpack.c.bf16 %v6176_v16, %v6172_v61  ;;  %v5954_v46 = vsel %vm741_vm2, %v11185_v26, %v5850_v30  ;;  %5315 = vmatpush.bf16.msra.mxu1 %v7563_v42  ;;  %v7750_v16 = vld [vmem:[#allocation5 + $0x308] sm:$0xf]  ;;  %v7547_v45 = vor.u32 %v8169_v39, %v7544_v17  ;;  %v8201_v26 = vld [vmem:[#allocation5 + $0x26c] sm:$0xf]  ;;  %v7528_v17 = vld [vmem:[#allocation5 + $0x158] sm:$0xf0] }
 0x49c   :  { %5188 = vmatmul.bf16.gmra.mxu2 %v12872_v50  ;;  %v6026_v9 = vadd.f32 %v5954_v46, %v5738_v52  ;;  %v7751_v42 = vor.u32 %v8223_v0, %v7750_v16  ;;  %v8197_v39 = vld [vmem:[#allocation5 + $0x24c] sm:$0xf]  ;;  %v7656_v16 = vld [vmem:[#allocation5 + $0x258] sm:$0xf0] }
 0x49d   :  { %12871 = vst [vmem:[#allocation48_spill] sm:$0xff] %v11251_v57  ;;  %v4816_v36 = vpop.f32.mrf.mxu3  ;;  %5369 = vmatpush.bf16.msra.mxu2 %v7691_v7  ;;  %v7672_v57 = vld [vmem:[#allocation5 + $0x278] sm:$0xf0]  ;;  %v8165_v7 = vld [vmem:[#allocation5 + $0x14c] sm:$0xf] }
 0x49e   :  { %v11258_v58 = vadd.f32 %v4816_v36, %v10979_v2  ;;  %v4872_v40 = vpop.f32.mrf.mxu0  ;;  %v4926_v61 = vpop.f32.mrf.mxu1  ;;  %5262 = vmatpush.bf16.msra.mxu0 %v7419_v6  ;;  %v7675_v2 = vor.u32 %v8201_v26, %v7672_v57  ;;  %v7400_v36 = vld [vmem:[#allocation5 + $0x58] sm:$0xf0]  ;;  %5211 = vmatpush.bf16.msrb.mxu3 %v7751_v42  ;;  %v8129_v0 = vld [vmem:[#allocation5 + $0x2c] sm:$0xf]  ;;  %v12878_v26 = vrot.slane %v11229_v56, 7  ;;  %v7659_v42 = vor.u32 %v8197_v39, %v7656_v16 }
 0x49f   :  { %v4927_v30 = vadd.f32 %v4926_v61, %v4872_v40  ;;  %v4978_v35 = vpop.f32.mrf.mxu2  ;;  %5316 = vmatpush.bf16.msra.mxu1 %v7547_v45  ;;  %v7403_v50 = vor.u32 %v8133_v13, %v7400_v36  ;;  %v12874_v40 = vld [vmem:[#allocation25_spill] sm:$0xff]  ;;  %v7531_v61 = vor.u32 %v8165_v7, %v7528_v17  ;;  %v7384_v52 = vld [vmem:[#allocation5 + $0x38] sm:$0xf0]  ;;  %v8161_v13 = vld [vmem:[#allocation5 + $0x12c] sm:$0xf]  ;;  %v6108_v17 = vadd.f32 %v11060_v3, %v6026_v9 }
 0x4a0   :  { %v12537_v46 = vrot.slane %v11258_v58, 1  ;;  %v11262_v37 = vadd.f32 %v4978_v35, %v4925_v43  ;;  %vm12875_vm8 = vcmp.eq.s32.totalorder %v12874_v40, 0  ;;  %v12876_v35 = vrot.slane %v11229_v56, 1  ;;  %v7512_v36 = vld [vmem:[#allocation5 + $0x138] sm:$0xf0] }
 0x4a1   :  { %v5670_v6 = vsel %vm12875_vm8, %v11258_v58, %v5562_v29  ;;  %5370 = vmatpush.bf16.msra.mxu2 %v7675_v2  ;;  %v12877_v45 = vrot.slane %v11258_v58, 7  ;;  %v7387_v2 = vor.u32 %v8129_v0, %v7384_v52  ;;  %vm12879_vm4 = vcmp.eq.s32.totalorder %v12874_v40, 8  ;;  %v7640_v52 = vld [vmem:[#allocation5 + $0x238] sm:$0xf0] }
 0x4a2   :  { %12873 = vst [vmem:[#allocation49_spill] sm:$0xff] %v11262_v37  ;;  %v5742_v43 = vadd.f32 %v5670_v6, %v11229_v56  ;;  %v5846_v57 = vsel %vm892_vm1, %v12876_v35, %v12537_v46  ;;  %5263 = vmatpush.bf16.msra.mxu0 %v7403_v50  ;;  %v7515_v6 = vor.u32 %v8161_v13, %v7512_v36  ;;  %v8193_v50 = vld [vmem:[#allocation5 + $0x22c] sm:$0xf]  ;;  %v7496_v13 = vld [vmem:[#allocation5 + $0x118] sm:$0xf0] }
 0x4a3   :  { %v5558_v29 = vsel %vm783_vm0, %v12878_v26, %v12877_v45  ;;  %v5958_v7 = vsel %vm12879_vm4, %v11210_v28, %v5846_v57  ;;  %5317 = vmatpush.bf16.msra.mxu1 %v7531_v61  ;;  %v7643_v0 = vor.u32 %v8193_v50, %v7640_v52  ;;  %v6180_v57 = vmax.f32 %v6108_v17, 0.0  ;;  %v12880_v26 = vld [vmem:[#allocation26_spill] sm:$0xff]  ;;  %v8189_v36 = vld [vmem:[#allocation5 + $0x20c] sm:$0xf] }
 0x4a4   :  { %v6030_v35 = vadd.f32 %v5958_v7, %v5742_v43  ;;  %vm12881_vm8 = vcmp.eq.s32.totalorder %v12880_v26, 0  ;;  %v7624_v17 = vld [vmem:[#allocation5 + $0x218] sm:$0xf0]  ;;  %v12883_v50 = vrot.slane %v11258_v58, 1  ;;  %vm12884_vm4 = vcmp.eq.s32.totalorder %v12880_v26, 8 }
 0x4a5   :  { %v4818_v46 = vpop.f32.mrf.mxu3  ;;  %5371 = vmatpush.bf16.msra.mxu2 %v7659_v42 }
 0x4a6   :  { %v11285_v37 = vadd.f32 %v4818_v46, %v10981_v31  ;;  %v4875_v27 = vpop.f32.mrf.mxu0  ;;  %v4929_v45 = vpop.f32.mrf.mxu1  ;;  %5264 = vmatpush.bf16.msra.mxu0 %v7387_v2  ;;  %v6112_v28 = vadd.f32 %v11060_v3, %v6030_v35  ;;  %v8125_v31 = vld [vmem:[#allocation5 + $0xc] sm:$0xf]  ;;  %v7368_v46 = vld [vmem:[#allocation5 + $0x18] sm:$0xf0] }
 0x4a7   :  { %v4930_v39 = vadd.f32 %v4929_v45, %v4875_v27  ;;  %v4980_v16 = vpop.f32.mrf.mxu2  ;;  %5318 = vmatpush.bf16.msra.mxu1 %v7515_v6  ;;  %v7371_v27 = vor.u32 %v8125_v31, %v7368_v46  ;;  %v8157_v2 = vld [vmem:[#allocation5 + $0x10c] sm:$0xf]  ;;  %v7864_v35 = vld [vmem:[#allocation5 + $0x3f8] sm:$0xf0]  ;;  %v12882_v45 = vrot.slane %v11258_v58, 7 }
 0x4a8   :  { %v5534_v9 = vrot.slane %v11285_v37, 7  ;;  %v5822_v61 = vrot.slane %v11285_v37, 1  ;;  %v11290_v43 = vadd.f32 %v4980_v16, %v4927_v30  ;;  %v5674_v42 = vsel %vm12881_vm8, %v11285_v37, %v5558_v29  ;;  %v8249_v6 = vld [vmem:[#allocation5 + $0x3ec] sm:$0xf] }
 0x4a9   :  { %5085 = vmatmul.bf16.gmra.mxu0 %v12799_v63  ;;  %5139 = vmatmul.bf16.gmra.mxu1 %v12800_v23  ;;  %v5746_v7 = vadd.f32 %v5674_v42, %v11258_v58  ;;  %v7499_v30 = vor.u32 %v8157_v2, %v7496_v13  ;;  %v7627_v16 = vor.u32 %v8189_v36, %v7624_v17  ;;  %v6184_v46 = vmax.f32 %v6112_v28, 0.0 }
 0x4aa   :  { %5031 = vmatmul.bf16.gmra.mxu3 %v10901_v38  ;;  %5372 = vmatpush.bf16.msra.mxu2 %v7643_v0  ;;  %v5554_v29 = vsel %vm783_vm0, %v12882_v45, %v5534_v9  ;;  %v5842_v52 = vsel %vm892_vm1, %v12883_v50, %v5822_v61  ;;  %v7867_v31 = vor.u32 %v8249_v6, %v7864_v35 }
 0x4ab   :  { %5265 = vmatpush.bf16.msra.mxu0 %v7371_v27  ;;  %v5962_v0 = vsel %vm12884_vm4, %v11229_v56, %v5842_v52  ;;  %5319 = vmatpush.bf16.msra.mxu1 %v7499_v30  ;;  %v11311_v13 = vpack.c.bf16 %v6184_v46, %v6180_v57  ;;  %v12886_v56 = vld [vmem:[#allocation27_spill] sm:$0xff]  ;;  %v5762_v52 = vrot.slane %v10996_v22, 1 }
 0x4ac   :  { %5193 = vmatmul.bf16.gmra.mxu2 %v10609_v49  ;;  %v6034_v42 = vadd.f32 %v5962_v0, %v5746_v7  ;;  %5420 = vmatpush.bf16.msra.mxu3 %v7867_v31  ;;  %vm12887_vm8 = vcmp.eq.s32.totalorder %v12886_v56, 0  ;;  %vm12888_vm4 = vcmp.eq.s32.totalorder %v12886_v56, 8 }
 0x4ad   :  { %v4821_v2 = vpop.f32.mrf.mxu3  ;;  %12885 = vst [vmem:[#allocation50_spill] sm:$0xff] %v11311_v13 }
 0x4ae   :  { %v4822_v45 = vadd.f32 %v4821_v2, %v10987_v18  ;;  %v4877_v38 = vpop.f32.mrf.mxu0  ;;  %v4931_v50 = vpop.f32.mrf.mxu1  ;;  %5373 = vmatpush.bf16.msra.mxu2 %v7627_v16  ;;  %v6116_v16 = vadd.f32 %v11060_v3, %v6034_v42 }
 0x4af   :  { %v4932_v27 = vadd.f32 %v4931_v50, %v4877_v38  ;;  %v4983_v36 = vpop.f32.mrf.mxu2 }
 0x4b0   :  { %v5538_v28 = vrot.slane %v4822_v45, 7  ;;  %v5826_v17 = vrot.slane %v4822_v45, 1  ;;  %v11314_v6 = vadd.f32 %v4983_v36, %v4930_v39  ;;  %v5678_v35 = vsel %vm12887_vm8, %v4822_v45, %v5554_v29 }
 0x4b1   :  { %v5750_v7 = vadd.f32 %v5678_v35, %v11285_v37  ;;  %v12890_v35 = vld [vmem:[#allocation12_spill] sm:$0xff] }
 0x4b2   :  { %v5838_v57 = vsel %vm892_vm1, %v5822_v61, %v5826_v17  ;;  %v5550_v18 = vsel %vm783_vm0, %v5534_v9, %v5538_v28  ;;  %v12889_v61 = vrot.slane %v11001_v14, 1  ;;  %vm12891_vm8 = vcmp.eq.s32.totalorder %v12890_v35, 8 }
 0x4b3   :  { %v5966_v38 = vsel %vm12888_vm4, %v11258_v58, %v5838_v57  ;;  %vm12894_vm4 = vcmp.eq.s32.totalorder %v12890_v35, 0 }
 0x4b4   :  { %v6038_v30 = vadd.f32 %v5966_v38, %v5750_v7  ;;  %v5898_v9 = vsel %vm892_vm1, %v5762_v52, %v12889_v61 }
 0x4b5   :  { %v4823_v39 = vpop.f32.mrf.mxu3 }
 0x4b6   :  { %v4824_v29 = vadd.f32 %v4823_v39, %v10989_v4  ;;  %v5051_v31 = vpop.f32.mrf.mxu0  ;;  %v5105_v46 = vpop.f32.mrf.mxu1  ;;  %v6120_v0 = vadd.f32 %v11060_v3, %v6038_v30  ;;  %v6188_v4 = vmax.f32 %v6116_v16, 0.0  ;;  %v12893_v39 = vrot.slane %v10996_v22, 7 }
 0x4b7   :  { %v4985_v2 = vpop.f32.mrf.mxu2  ;;  %v5106_v50 = vadd.f32 %v5105_v46, %v5051_v31 }
 0x4b8   :  { %v5542_v58 = vrot.slane %v4824_v29, 7  ;;  %v5830_v36 = vrot.slane %v4824_v29, 1  ;;  %v5906_v7 = vsel %vm12891_vm8, %v4824_v29, %v5898_v9  ;;  %v11336_v57 = vadd.f32 %v4985_v2, %v4932_v27 }
 0x4b9   :  { %5090 = vmatmul.bf16.gmra.mxu0 %v12806_v11  ;;  %5144 = vmatmul.bf16.gmra.mxu1 %v12807_v15  ;;  %v6192_v42 = vmax.f32 %v6120_v0, 0.0  ;;  %v5682_v30 = vsel %vm727_vm15, %v4824_v29, %v5550_v18  ;;  %vm12914_vm8 = vcmp.eq.s32.totalorder %v12829_v25, 0 }
 0x4ba   :  { %v5614_v31 = vsel %vm783_vm0, %v5542_v58, %v12893_v39  ;;  %5036 = vmatmul.bf16.gmra.mxu3 %v10925_v33  ;;  %v5546_v27 = vsel %vm783_vm0, %v5538_v28, %v5542_v58  ;;  %v5754_v46 = vadd.f32 %v5682_v30, %v4822_v45  ;;  %v5834_v61 = vsel %vm892_vm1, %v5826_v17, %v5830_v36  ;;  %v8245_v28 = vld [vmem:[#allocation5 + $0x3cc] sm:$0xf]  ;;  %v7848_v58 = vld [vmem:[#allocation5 + $0x3d8] sm:$0xf0] }
 0x4bb   :  { %v5618_v16 = vsel %vm12894_vm4, %v11001_v14, %v5614_v31  ;;  %v11354_v0 = vpack.c.bf16 %v6192_v42, %v6188_v4  ;;  %v5686_v9 = vsel %vm728_vm3, %v10996_v22, %v5546_v27  ;;  %v5902_v2 = vsel %vm892_vm1, %v5830_v36, %v5762_v52 }
 0x4bc   :  { %v5690_v39 = vadd.f32 %v5618_v16, %v10996_v22  ;;  %5198 = vmatmul.bf16.gmra.mxu2 %v10631_v10  ;;  %v5758_v17 = vadd.f32 %v5686_v9, %v4824_v29  ;;  %v5970_v14 = vsel %vm745_vm12, %v11285_v37, %v5834_v61  ;;  %v5974_v4 = vsel %vm746_vm7, %v4822_v45, %v5902_v2 }
 0x4bd   :  { %12895 = vst [vmem:[#allocation45_spill] sm:$0xff] %v11354_v0  ;;  %v4997_v42 = vpop.f32.mrf.mxu3  ;;  %v7851_v30 = vor.u32 %v8245_v28, %v7848_v58  ;;  %v6042_v31 = vadd.f32 %v5970_v14, %v5754_v46  ;;  %v6064_v16 = vadd.f32 %v11060_v3, %v11031_v51  ;;  %vm12916_vm4 = vcmp.eq.s32.totalorder %v12829_v25, 8 }
 0x4be   :  { %v5978_v27 = vadd.f32 %v5906_v7, %v5690_v39  ;;  %v11369_v52 = vadd.f32 %v4997_v42, %v10998_v19  ;;  %v5053_v22 = vpop.f32.mrf.mxu0  ;;  %v5107_v36 = vpop.f32.mrf.mxu1  ;;  %v6046_v29 = vadd.f32 %v5974_v4, %v5758_v17 }
 0x4bf   :  { %v5108_v9 = vadd.f32 %v5107_v36, %v5053_v22  ;;  %v5159_v0 = vpop.f32.mrf.mxu2  ;;  %5421 = vmatpush.bf16.msra.mxu3 %v7851_v30  ;;  %v6124_v37 = vadd.f32 %v11060_v3, %v6042_v31  ;;  %v6136_v19 = vmax.f32 %v6064_v16, 0.0  ;;  %v12900_v30 = vld [vmem:[#allocation43_spill] sm:$0xff] }
 0x4c0   :  { %v11374_v61 = vadd.f32 %v5159_v0, %v5106_v50  ;;  %v6060_v45 = vadd.f32 %v11060_v3, %v5978_v27  ;;  %v6128_v7 = vadd.f32 %v11060_v3, %v6046_v29  ;;  %v12899_v3 = vld [vmem:[#allocation47_spill] sm:$0xff]  ;;  %v12901_v27 = vld [vmem:[#allocation37_spill] sm:$0xff]  ;;  %v12541_v22 = vrot.slane %v11369_v52, 7 }
 0x4c1   :  { %v6196_v2 = vmax.f32 %v6124_v37, 0.0  ;;  %v12902_v36 = vld [vmem:[#allocation59_spill] sm:$0xff] }
 0x4c2   :  { %v6132_v46 = vmax.f32 %v6060_v45, 0.0  ;;  %v6200_v39 = vmax.f32 %v6128_v7, 0.0 }
 0x4c4   :  { %v11378_v28 = vpack.c.bf16 %v6136_v19, %v6132_v46  ;;  %v11380_v51 = vpack.c.bf16 %v6200_v39, %v6196_v2 }
 0x4c5   :  { %v4999_v58 = vpop.f32.mrf.mxu3 }
 0x4c6   :  { %12897 = vst [vmem:[#allocation25_spill] sm:$0xff] %v11378_v28  ;;  %v11383_v17 = vadd.f32 %v4999_v58, %v11003_v54  ;;  %v5056_v14 = vpop.f32.mrf.mxu0  ;;  %v5110_v4 = vpop.f32.mrf.mxu1  ;;  %v8241_v58 = vld [vmem:[#allocation5 + $0x3ac] sm:$0xf]  ;;  %v12913_v28 = vld [vmem:[#allocation53_spill] sm:$0xff] }
 0x4c7   :  { %12898 = vst [vmem:[#allocation26_spill] sm:$0xff] %v11380_v51  ;;  %v5111_v50 = vadd.f32 %v5110_v4, %v5056_v14  ;;  %v5161_v0 = vpop.f32.mrf.mxu2  ;;  %v7832_v14 = vld [vmem:[#allocation5 + $0x3b8] sm:$0xf0]  ;;  %v12906_v51 = vld [vmem:[#allocation52_spill] sm:$0xff] }
 0x4c8   :  { %v11385_v42 = vadd.f32 %v5161_v0, %v5108_v9  ;;  %v5479_v31 = vrot.slane %v11383_v17, 7  ;;  %v12542_v9 = vrot.slane %v11383_v17, 1  ;;  %v7835_v0 = vor.u32 %v8241_v58, %v7832_v14 }
 0x4c9   :  { %5266 = vmatmul.bf16.vlgmr.msra.gmra.mxu0 %v12758_v21  ;;  %5320 = vmatmul.bf16.vlgmr.msra.gmra.mxu1 %v12899_v3 }
 0x4ca   :  { %5212 = vmatmul.bf16.vlgmr.msrb.gmra.mxu3 %v12900_v30  ;;  %v5611_v21 = vsel %vm783_vm0, %v12541_v22, %v5479_v31 }
 0x4cb   :  { %5422 = vmatpush.bf16.msra.mxu3 %v7835_v0 }
 0x4cc   :  { %5374 = vmatmul.bf16.vlgmr.msra.gmra.mxu2 %v12901_v27 }
 0x4cd   :  { %v5002_v54 = vpop.f32.mrf.mxu3 }
 0x4ce   :  { %v5003_v16 = vadd.f32 %v5002_v54, %v12902_v36  ;;  %v5058_v29 = vpop.f32.mrf.mxu0  ;;  %v5112_v37 = vpop.f32.mrf.mxu1 }
 0x4cf   :  { %v5113_v45 = vadd.f32 %v5112_v37, %v5058_v29  ;;  %v5164_v7 = vpop.f32.mrf.mxu2  ;;  %v12904_v29 = vld [vmem:[#allocation32_spill] sm:$0xff] }
 0x4d0   :  { %v5483_v46 = vrot.slane %v5003_v16, 7  ;;  %v5623_v19 = vsel %vm712_vm5, %v5003_v16, %v5611_v21  ;;  %v5771_v2 = vrot.slane %v5003_v16, 1  ;;  %v11401_v39 = vadd.f32 %v5164_v7, %v5111_v50 }
 0x4d1   :  { %v5695_v4 = vadd.f32 %v5623_v19, %v11383_v17 }
 0x4d2   :  { %12903 = vst [vmem:[#allocation27_spill] sm:$0xff] %v11401_v39  ;;  %v5895_v3 = vsel %vm892_vm1, %v12542_v9, %v5771_v2  ;;  %v5607_v27 = vsel %vm783_vm0, %v5479_v31, %v5483_v46  ;;  %v12907_v31 = vld [vmem:[#allocation51_spill] sm:$0xff]  ;;  %v8237_v39 = vld [vmem:[#allocation5 + $0x38c] sm:$0xf] }
 0x4d3   :  { %v5911_v54 = vsel %vm730_vm6, %v11369_v52, %v5895_v3 }
 0x4d4   :  { %v11413_v50 = vadd.f32 %v5911_v54, %v5695_v4  ;;  %v12909_v4 = vld [vmem:[#allocation34_spill] sm:$0xff] }
 0x4d5   :  { %v5004_v36 = vpop.f32.mrf.mxu3 }
 0x4d6   :  { %v5005_v37 = vadd.f32 %v5004_v36, %v12904_v29  ;;  %v5061_v21 = vpop.f32.mrf.mxu0  ;;  %v5115_v7 = vpop.f32.mrf.mxu1  ;;  %v12910_v29 = vld [vmem:[#allocation33_spill] sm:$0xff] }
 0x4d7   :  { %v5116_v19 = vadd.f32 %v5115_v7, %v5061_v21  ;;  %v5166_v58 = vpop.f32.mrf.mxu2  ;;  %v12911_v7 = vld [vmem:[#allocation62_spill] sm:$0xff] }
 0x4d8   :  { %v5487_v14 = vrot.slane %v5005_v37, 7  ;;  %v5775_v22 = vrot.slane %v5005_v37, 1  ;;  %v11416_v9 = vadd.f32 %v5166_v58, %v5113_v45  ;;  %v5627_v0 = vsel %vm713_vm11, %v5005_v37, %v5607_v27 }
 0x4d9   :  { %5271 = vmatmul.bf16.gmra.mxu0 %v12906_v51  ;;  %5325 = vmatmul.bf16.gmra.mxu1 %v12907_v31  ;;  %v5699_v54 = vadd.f32 %v5627_v0, %v5003_v16 }
 0x4da   :  { %12905 = vst [vmem:[#allocation12_spill] sm:$0xff] %v11416_v9  ;;  %5217 = vmatmul.bf16.gmra.mxu3 %v12909_v4  ;;  %v5603_v3 = vsel %vm783_vm0, %v5483_v46, %v5487_v14  ;;  %v5891_v36 = vsel %vm892_vm1, %v5771_v2, %v5775_v22  ;;  %v7816_v2 = vld [vmem:[#allocation5 + $0x398] sm:$0xf0] }
 0x4db   :  { %v5915_v45 = vsel %vm731_vm14, %v11383_v17, %v5891_v36  ;;  %v7819_v36 = vor.u32 %v8237_v39, %v7816_v2 }
 0x4dc   :  { %5379 = vmatmul.bf16.gmra.mxu2 %v12910_v29  ;;  %v5987_v51 = vadd.f32 %v5915_v45, %v5699_v54  ;;  %v11437_v29 = vperm.slane %v12913_v28, 1 }
 0x4dd   :  { %v5007_v21 = vpop.f32.mrf.mxu3  ;;  %5423 = vmatpush.bf16.msra.mxu3 %v7819_v36 }
 0x4de   :  { %v5008_v58 = vadd.f32 %v5007_v21, %v12911_v7  ;;  %v5063_v27 = vpop.f32.mrf.mxu0  ;;  %v5117_v31 = vpop.f32.mrf.mxu1 }
 0x4df   :  { %v5118_v4 = vadd.f32 %v5117_v31, %v5063_v27  ;;  %v5169_v9 = vpop.f32.mrf.mxu2 }
 0x4e0   :  { %v5491_v12 = vrot.slane %v5008_v58, 7  ;;  %v5779_v46 = vrot.slane %v5008_v58, 1  ;;  %v11432_v0 = vadd.f32 %v5169_v9, %v5116_v19  ;;  %v5631_v13 = vsel %vm714_vm9, %v5008_v58, %v5603_v3 }
 0x4e1   :  { %v5703_v54 = vadd.f32 %v5631_v13, %v5005_v37  ;;  %v6069_v19 = vadd.f32 %v11437_v29, %v5987_v51  ;;  %v12915_v51 = vld [vmem:[#allocation35_spill] sm:$0xff] }
 0x4e2   :  { %v5887_v45 = vsel %vm892_vm1, %v5775_v22, %v5779_v46  ;;  %v5599_v21 = vsel %vm783_vm0, %v5487_v14, %v5491_v12 }
 0x4e3   :  { %v5919_v9 = vsel %vm732_vm10, %v5003_v16, %v5887_v45  ;;  %v6141_v2 = vmax.f32 %v6069_v19, 0.0 }
 0x4e4   :  { %v5991_v7 = vadd.f32 %v5919_v9, %v5703_v54 }
 0x4e5   :  { %v5009_v27 = vpop.f32.mrf.mxu3 }
 0x4e6   :  { %v11447_v39 = vadd.f32 %v5009_v27, %v11075_v62  ;;  %v5066_v28 = vpop.f32.mrf.mxu0  ;;  %v5120_v3 = vpop.f32.mrf.mxu1  ;;  %v6073_v13 = vadd.f32 %v11437_v29, %v5991_v7 }
 0x4e7   :  { %v5121_v31 = vadd.f32 %v5120_v3, %v5066_v28  ;;  %v5171_v22 = vpop.f32.mrf.mxu2 }
 0x4e8   :  { %v5495_v14 = vrot.slane %v11447_v39, 7  ;;  %v5783_v36 = vrot.slane %v11447_v39, 1  ;;  %v11452_v30 = vadd.f32 %v5171_v22, %v5118_v4  ;;  %v6145_v16 = vmax.f32 %v6073_v13, 0.0 }
 0x4e9   :  { %5276 = vmatmul.bf16.gmra.mxu0 %v12765_v32  ;;  %5330 = vmatmul.bf16.gmra.mxu1 %v12766_v55  ;;  %v5635_v62 = vsel %vm12914_vm8, %v11447_v39, %v5599_v21 }
 0x4ea   :  { %5222 = vmatmul.bf16.gmra.mxu3 %v12915_v51  ;;  %v11460_v54 = vpack.c.bf16 %v6145_v16, %v6141_v2  ;;  %v5595_v45 = vsel %vm783_vm0, %v5491_v12, %v5495_v14  ;;  %v5707_v9 = vadd.f32 %v5635_v62, %v5008_v58  ;;  %v5883_v4 = vsel %vm892_vm1, %v5779_v46, %v5783_v36  ;;  %v8233_v2 = vld [vmem:[#allocation5 + $0x36c] sm:$0xf]  ;;  %v7800_v16 = vld [vmem:[#allocation5 + $0x378] sm:$0xf0]  ;;  %v12917_v46 = vld [vmem:[#allocation17_spill] sm:$0xff] }
 0x4eb   :  { %v5923_v32 = vsel %vm12916_vm4, %v5005_v37, %v5883_v4  ;;  %vm12918_vm8 = vcmp.eq.s32.totalorder %v12917_v46, 0  ;;  %v7803_v37 = vor.u32 %v8233_v2, %v7800_v16  ;;  %vm12919_vm4 = vcmp.eq.s32.totalorder %v12917_v46, 8 }
 0x4ec   :  { %5384 = vmatmul.bf16.gmra.mxu2 %v10421_v41  ;;  %v5995_v55 = vadd.f32 %v5923_v32, %v5707_v9 }
 0x4ed   :  { %v5012_v19 = vpop.f32.mrf.mxu3  ;;  %5424 = vmatpush.bf16.msra.mxu3 %v7803_v37 }
 0x4ee   :  { %v5013_v21 = vadd.f32 %v5012_v19, %v11093_v34  ;;  %v5068_v7 = vpop.f32.mrf.mxu0  ;;  %v5122_v27 = vpop.f32.mrf.mxu1 }
 0x4ef   :  { %v5123_v28 = vadd.f32 %v5122_v27, %v5068_v7  ;;  %v5174_v3 = vpop.f32.mrf.mxu2 }
 0x4f0   :  { %v5499_v13 = vrot.slane %v5013_v21, 7  ;;  %v5787_v22 = vrot.slane %v5013_v21, 1  ;;  %v11470_v12 = vadd.f32 %v5174_v3, %v5121_v31  ;;  %v5639_v62 = vsel %vm12918_vm8, %v5013_v21, %v5595_v45 }
 0x4f1   :  { %v5711_v41 = vadd.f32 %v5639_v62, %v11447_v39  ;;  %v6077_v31 = vadd.f32 %v11437_v29, %v5995_v55  ;;  %vm12920_vm8 = vcmp.eq.s32.totalorder %v12836_v47, 0  ;;  %v12921_v55 = vld [vmem:[#allocation40_spill] sm:$0xff] }
 0x4f2   :  { %v5879_v9 = vsel %vm892_vm1, %v5783_v36, %v5787_v22  ;;  %v5591_v34 = vsel %vm783_vm0, %v5495_v14, %v5499_v13 }
 0x4f3   :  { %v5927_v4 = vsel %vm12919_vm4, %v5008_v58, %v5879_v9  ;;  %v6149_v16 = vmax.f32 %v6077_v31, 0.0  ;;  %vm12922_vm4 = vcmp.eq.s32.totalorder %v12836_v47, 8 }
 0x4f4   :  { %v5999_v32 = vadd.f32 %v5927_v4, %v5711_v41 }
 0x4f5   :  { %v5014_v19 = vpop.f32.mrf.mxu3 }
 0x4f6   :  { %v11483_v7 = vadd.f32 %v5014_v19, %v11111_v8  ;;  %v5071_v45 = vpop.f32.mrf.mxu0  ;;  %v5125_v27 = vpop.f32.mrf.mxu1  ;;  %v6081_v3 = vadd.f32 %v11437_v29, %v5999_v32 }
 0x4f7   :  { %v5126_v2 = vadd.f32 %v5125_v27, %v5071_v45  ;;  %v5176_v36 = vpop.f32.mrf.mxu2 }
 0x4f8   :  { %v5503_v14 = vrot.slane %v11483_v7, 7  ;;  %v5791_v62 = vrot.slane %v11483_v7, 1  ;;  %v11488_v37 = vadd.f32 %v5176_v36, %v5123_v28  ;;  %v6153_v58 = vmax.f32 %v6081_v3, 0.0 }
 0x4f9   :  { %5281 = vmatmul.bf16.gmra.mxu0 %v12772_v59  ;;  %5335 = vmatmul.bf16.gmra.mxu1 %v12773_v53  ;;  %v5643_v8 = vsel %vm12920_vm8, %v11483_v7, %v5591_v34 }
 0x4fa   :  { %5227 = vmatmul.bf16.gmra.mxu3 %v12921_v55  ;;  %v11496_v41 = vpack.c.bf16 %v6153_v58, %v6149_v16  ;;  %v5587_v9 = vsel %vm783_vm0, %v5499_v13, %v5503_v14  ;;  %v5715_v4 = vadd.f32 %v5643_v8, %v5013_v21  ;;  %v5875_v28 = vsel %vm892_vm1, %v5787_v22, %v5791_v62  ;;  %v8229_v16 = vld [vmem:[#allocation5 + $0x34c] sm:$0xf]  ;;  %v7784_v22 = vld [vmem:[#allocation5 + $0x358] sm:$0xf0]  ;;  %v12924_v58 = vld [vmem:[#allocation19_spill] sm:$0xff] }
 0x4fb   :  { %v5931_v59 = vsel %vm12922_vm4, %v11447_v39, %v5875_v28  ;;  %vm12925_vm8 = vcmp.eq.s32.totalorder %v12924_v58, 0  ;;  %v7787_v39 = vor.u32 %v8229_v16, %v7784_v22  ;;  %vm12926_vm4 = vcmp.eq.s32.totalorder %v12924_v58, 8  ;;  %v8259_v55 = vld [vmem:[#allocation7 + $0x38] sm:$0xff] }
 0x4fc   :  { %5389 = vmatmul.bf16.gmra.mxu2 %v10450_v20  ;;  %v6003_v53 = vadd.f32 %v5931_v59, %v5715_v4  ;;  %6500 = vmatpush.bf16.msrb.mxu0 %v8259_v55 }
 0x4fd   :  { %v5017_v31 = vpop.f32.mrf.mxu3  ;;  %5425 = vmatpush.bf16.msra.mxu3 %v7787_v39 }
 0x4fe   :  { %v5018_v34 = vadd.f32 %v5017_v31, %v11130_v5  ;;  %v5073_v32 = vpop.f32.mrf.mxu0  ;;  %v5127_v19 = vpop.f32.mrf.mxu1 }
 0x4ff   :  { %v5128_v45 = vadd.f32 %v5127_v19, %v5073_v32  ;;  %v5179_v27 = vpop.f32.mrf.mxu2  ;;  %v12927_v32 = vld [vmem:[#allocation57_spill] sm:$0xff] }
 0x500   :  { %v5507_v3 = vrot.slane %v5018_v34, 7  ;;  %v5795_v13 = vrot.slane %v5018_v34, 1  ;;  %v11507_v36 = vadd.f32 %v5179_v27, %v5126_v2  ;;  %v5647_v8 = vsel %vm12925_vm8, %v5018_v34, %v5587_v9 }
 0x501   :  { %v5719_v20 = vadd.f32 %v5647_v8, %v11483_v7  ;;  %v6085_v2 = vadd.f32 %v11437_v29, %v6003_v53  ;;  %v12929_v53 = vld [vmem:[#allocation55_spill] sm:$0xff] }
 0x502   :  { %12923 = vst [vmem:[#allocation28_spill] sm:$0xff] %v11507_v36  ;;  %v5871_v4 = vsel %vm892_vm1, %v5791_v62, %v5795_v13  ;;  %v5583_v5 = vsel %vm783_vm0, %v5503_v14, %v5507_v3 }
 0x503   :  { %v5935_v28 = vsel %vm12926_vm4, %v5013_v21, %v5871_v4  ;;  %v6157_v8 = vmax.f32 %v6085_v2, 0.0  ;;  %v12931_v4 = vld [vmem:[#allocation20_spill] sm:$0xff] }
 0x504   :  { %v6007_v59 = vadd.f32 %v5935_v28, %v5719_v20  ;;  %v12930_v20 = vld [vmem:[#allocation64_spill] sm:$0xff]  ;;  %vm12932_vm8 = vcmp.eq.s32.totalorder %v12931_v4, 0  ;;  %vm12934_vm4 = vcmp.eq.s32.totalorder %v12931_v4, 8  ;;  %v12938_v4 = vld [vmem:[#allocation21_spill] sm:$0xff] }
 0x505   :  { %v5019_v31 = vpop.f32.mrf.mxu3 }
 0x506   :  { %v11520_v19 = vadd.f32 %v5019_v31, %v12927_v32  ;;  %v5076_v9 = vpop.f32.mrf.mxu0  ;;  %v5130_v27 = vpop.f32.mrf.mxu1  ;;  %v6089_v16 = vadd.f32 %v11437_v29, %v6007_v59  ;;  %v12933_v31 = vld [vmem:[#allocation41_spill] sm:$0xff] }
 0x507   :  { %v5131_v22 = vadd.f32 %v5130_v27, %v5076_v9  ;;  %v5181_v62 = vpop.f32.mrf.mxu2  ;;  %v12935_v27 = vld [vmem:[#allocation30_spill] sm:$0xff] }
 0x508   :  { %v5511_v14 = vrot.slane %v11520_v19, 7  ;;  %v5799_v39 = vrot.slane %v11520_v19, 1  ;;  %v11525_v58 = vadd.f32 %v5181_v62, %v5128_v45  ;;  %v6161_v21 = vmax.f32 %v6089_v16, 0.0 }
 0x509   :  { %5286 = vmatmul.bf16.gmra.mxu0 %v12929_v53  ;;  %5340 = vmatmul.bf16.gmra.mxu1 %v12930_v20  ;;  %v5651_v28 = vsel %vm12932_vm8, %v11520_v19, %v5583_v5  ;;  %v12936_v5 = vld [vmem:[#allocation46_spill] sm:$0xff]  ;;  %vm12939_vm8 = vcmp.eq.s32.totalorder %v12938_v4, 0 }
 0x50a   :  { %12928 = vst [vmem:[#allocation29_spill] sm:$0xff] %v11525_v58  ;;  %5232 = vmatmul.bf16.gmra.mxu3 %v12933_v31  ;;  %v11533_v59 = vpack.c.bf16 %v6161_v21, %v6157_v8  ;;  %v5579_v2 = vsel %vm783_vm0, %v5507_v3, %v5511_v14  ;;  %v5723_v32 = vadd.f32 %v5651_v28, %v5018_v34 }
 0x50b   :  { %v5867_v45 = vsel %vm892_vm1, %v5795_v13, %v5799_v39 }
 0x50c   :  { %v5939_v9 = vsel %vm12934_vm4, %v11483_v7, %v5867_v45  ;;  %5394 = vmatmul.bf16.gmra.mxu2 %v12935_v27  ;;  %vm12940_vm4 = vcmp.eq.s32.totalorder %v12938_v4, 8  ;;  %v12947_v4 = vld [vmem:[#allocation38_spill] sm:$0xff] }
 0x50d   :  { %v6011_v16 = vadd.f32 %v5939_v9, %v5723_v32  ;;  %v5022_v62 = vpop.f32.mrf.mxu3 }
 0x50e   :  { %v11544_v53 = vadd.f32 %v5022_v62, %v12936_v5  ;;  %v5078_v8 = vpop.f32.mrf.mxu0  ;;  %v5132_v21 = vpop.f32.mrf.mxu1 }
 0x50f   :  { %v5133_v20 = vadd.f32 %v5132_v21, %v5078_v8  ;;  %v5184_v31 = vpop.f32.mrf.mxu2 }
 0x510   :  { %v5515_v3 = vrot.slane %v11544_v53, 7  ;;  %v5803_v28 = vrot.slane %v11544_v53, 1  ;;  %v11548_v13 = vadd.f32 %v5184_v31, %v5131_v22  ;;  %v5655_v7 = vsel %vm12939_vm8, %v11544_v53, %v5579_v2  ;;  %v12941_v31 = vld [vmem:[#allocation60_spill] sm:$0xff] }
 0x511   :  { %v5727_v32 = vadd.f32 %v5655_v7, %v11520_v19  ;;  %v6093_v22 = vadd.f32 %v11437_v29, %v6011_v16 }
 0x512   :  { %12937 = vst [vmem:[#allocation47_spill] sm:$0xff] %v11548_v13  ;;  %v5863_v45 = vsel %vm892_vm1, %v5799_v39, %v5803_v28  ;;  %v5575_v9 = vsel %vm783_vm0, %v5511_v14, %v5515_v3 }
 0x513   :  { %v5943_v27 = vsel %vm12940_vm4, %v5018_v34, %v5863_v45  ;;  %v8225_v34 = vld [vmem:[#allocation5 + $0x32c] sm:$0xf]  ;;  %v12943_v45 = vld [vmem:[#allocation22_spill] sm:$0xff] }
 0x514   :  { %v6015_v62 = vadd.f32 %v5943_v27, %v5727_v32  ;;  %v7768_v32 = vld [vmem:[#allocation5 + $0x338] sm:$0xf0]  ;;  %vm12944_vm8 = vcmp.eq.s32.totalorder %v12943_v45, 0  ;;  %v12945_v27 = vld [vmem:[#allocation56_spill] sm:$0xff]  ;;  %vm12948_vm4 = vcmp.eq.s32.totalorder %v12943_v45, 8 }
 0x515   :  { %v5024_v5 = vpop.f32.mrf.mxu3 }
 0x516   :  { %v11562_v8 = vadd.f32 %v5024_v5, %v12941_v31  ;;  %v5081_v21 = vpop.f32.mrf.mxu0  ;;  %v5135_v2 = vpop.f32.mrf.mxu1  ;;  %v6097_v7 = vadd.f32 %v11437_v29, %v6015_v62  ;;  %v12946_v5 = vld [vmem:[#allocation44_spill] sm:$0xff]  ;;  %v7771_v31 = vor.u32 %v8225_v34, %v7768_v32  ;;  %v6165_v62 = vmax.f32 %v6093_v22, 0.0 }
 0x517   :  { %v5136_v13 = vadd.f32 %v5135_v2, %v5081_v21  ;;  %v5186_v58 = vpop.f32.mrf.mxu2 }
 0x518   :  { %v5519_v39 = vrot.slane %v11562_v8, 7  ;;  %v5807_v14 = vrot.slane %v11562_v8, 1  ;;  %v11567_v36 = vadd.f32 %v5186_v58, %v5133_v20  ;;  %v5659_v16 = vsel %vm12944_vm8, %v11562_v8, %v5575_v9  ;;  %v8267_v58 = vld [vmem:[#allocation7 + $0x78] sm:$0xff]  ;;  %5426 = vmatpush.bf16.msra.mxu3 %v7771_v31 }
 0x519   :  { %5291 = vmatmul.bf16.gmra.mxu0 %v12945_v27  ;;  %5345 = vmatmul.bf16.gmra.mxu1 %v12946_v5  ;;  %v6169_v21 = vmax.f32 %v6097_v7, 0.0  ;;  %v5731_v2 = vadd.f32 %v5659_v16, %v11544_v53  ;;  %v12949_v7 = vld [vmem:[#allocation31_spill] sm:$0xff]  ;;  %v12950_v16 = vld [vmem:[#allocation16_spill] sm:$0xff]  ;;  %vm12952_vm8 = vcmp.eq.s32.totalorder %v12865_v60, 0 }
 0x51a   :  { %12942 = vst [vmem:[#allocation37_spill] sm:$0xff] %v11567_v36  ;;  %5237 = vmatmul.bf16.gmra.mxu3 %v12947_v4  ;;  %v5571_v20 = vsel %vm783_vm0, %v5515_v3, %v5519_v39  ;;  %v5859_v36 = vsel %vm892_vm1, %v5803_v28, %v5807_v14  ;;  %6554 = vmatpush.bf16.msrb.mxu1 %v8267_v58  ;;  %v8257_v58 = vld [vmem:[#allocation7 + $0x28] sm:$0xff] }
 0x51b   :  { %v11580_v9 = vpack.c.bf16 %v6169_v21, %v6165_v62  ;;  %v5947_v22 = vsel %vm12948_vm4, %v11520_v19, %v5859_v36  ;;  %v8258_v36 = vld [vmem:[#allocation7 + $0x30] sm:$0xff]  ;;  %vm12953_vm4 = vcmp.eq.s32.totalorder %v12865_v60, 8 }
 0x51c   :  { %5399 = vmatmul.bf16.gmra.mxu2 %v12949_v7  ;;  %v6019_v34 = vadd.f32 %v5947_v22, %v5731_v2  ;;  %v8266_v19 = vld [vmem:[#allocation7 + $0x70] sm:$0xff]  ;;  %6501 = vmatpush.bf16.msrb.mxu0 %v8258_v36  ;;  %v8265_v22 = vld [vmem:[#allocation7 + $0x68] sm:$0xff] }
 0x51d   :  { %v5027_v32 = vpop.f32.mrf.mxu3 }
 0x51e   :  { %v11587_v27 = vadd.f32 %v5027_v32, %v12950_v16  ;;  %v5083_v3 = vpop.f32.mrf.mxu0  ;;  %v5137_v5 = vpop.f32.mrf.mxu1  ;;  %6555 = vmatpush.bf16.msrb.mxu1 %v8266_v19 }
 0x51f   :  { %v11589_v4 = vadd.f32 %v5137_v5, %v5083_v3  ;;  %v5189_v28 = vpop.f32.mrf.mxu2  ;;  %v6101_v3 = vadd.f32 %v11437_v29, %v6019_v34  ;;  %v8264_v34 = vld [vmem:[#allocation7 + $0x60] sm:$0xff] }
 0x520   :  { %v5523_v31 = vrot.slane %v11587_v27, 7  ;;  %v5811_v62 = vrot.slane %v11587_v27, 1  ;;  %v11593_v21 = vadd.f32 %v5189_v28, %v5136_v13  ;;  %v5663_v55 = vsel %vm12952_vm8, %v11587_v27, %v5571_v20  ;;  %6502 = vmatpush.bf16.msrb.mxu0 %v8257_v58 }
 0x521   :  { %12951 = vst [vmem:[#allocation59_spill] sm:$0xff] %v11589_v4  ;;  %v5735_v2 = vadd.f32 %v5663_v55, %v11562_v8  ;;  %v7752_v4 = vld [vmem:[#allocation5 + $0x318] sm:$0xf0]  ;;  %vm12959_vm8 = vcmp.eq.s32.totalorder %v12874_v40, 0 }
 0x522   :  { %v5855_v7 = vsel %vm892_vm1, %v5807_v14, %v5811_v62  ;;  %v5567_v32 = vsel %vm783_vm0, %v5519_v39, %v5523_v31  ;;  %6556 = vmatpush.bf16.msrb.mxu1 %v8265_v22 }
 0x523   :  { %v5951_v13 = vsel %vm12953_vm4, %v11544_v53, %v5855_v7  ;;  %vm12960_vm4 = vcmp.eq.s32.totalorder %v12874_v40, 8 }
 0x524   :  { %v6023_v16 = vadd.f32 %v5951_v13, %v5735_v2  ;;  %v6173_v2 = vmax.f32 %v6101_v3, 0.0  ;;  %v12956_v13 = vld [vmem:[#allocation39_spill] sm:$0xff] }
 0x525   :  { %v5029_v20 = vpop.f32.mrf.mxu3 }
 0x526   :  { %v11608_v5 = vadd.f32 %v5029_v20, %v11234_v44  ;;  %v5086_v28 = vpop.f32.mrf.mxu0  ;;  %v5140_v36 = vpop.f32.mrf.mxu1  ;;  %v6105_v14 = vadd.f32 %v11437_v29, %v6023_v16  ;;  %v8256_v44 = vld [vmem:[#allocation7 + $0x20] sm:$0xff]  ;;  %6557 = vmatpush.bf16.msrb.mxu1 %v8264_v34 }
 0x527   :  { %v5141_v19 = vadd.f32 %v5140_v36, %v5086_v28  ;;  %v11611_v55 = vpop.f32.mrf.mxu2  ;;  %6503 = vmatpush.bf16.msrb.mxu0 %v8256_v44  ;;  %v12957_v28 = vld [vmem:[#allocation36_spill] sm:$0xff] }
 0x528   :  { %12954 = vst [vmem:[#allocation32_spill] sm:$0xff] %v11611_v55  ;;  %v5527_v39 = vrot.slane %v11608_v5, 7  ;;  %v5815_v53 = vrot.slane %v11608_v5, 1  ;;  %v6177_v7 = vmax.f32 %v6105_v14, 0.0  ;;  %v5667_v22 = vsel %vm723_vm13, %v11608_v5, %v5567_v32  ;;  %v8255_v14 = vld [vmem:[#allocation7 + $0x18] sm:$0xff] }
 0x529   :  { %5296 = vmatmul.bf16.gmra.mxu0 %v12793_v48  ;;  %5350 = vmatmul.bf16.gmra.mxu1 %v12869_v24  ;;  %v5739_v3 = vadd.f32 %v5667_v22, %v11587_v27  ;;  %v8221_v55 = vld [vmem:[#allocation5 + $0x30c] sm:$0xf] }
 0x52a   :  { %5242 = vmatmul.bf16.gmra.mxu3 %v12956_v13  ;;  %v11621_v16 = vpack.c.bf16 %v6177_v7, %v6173_v2  ;;  %v5563_v20 = vsel %vm783_vm0, %v5523_v31, %v5527_v39  ;;  %v5851_v48 = vsel %vm892_vm1, %v5811_v62, %v5815_v53  ;;  %v8263_v2 = vld [vmem:[#allocation7 + $0x58] sm:$0xff]  ;;  %v12958_v7 = vld [vmem:[#allocation49_spill] sm:$0xff]  ;;  %v7755_v34 = vor.u32 %v8221_v55, %v7752_v4 }
 0x52b   :  { %v5955_v24 = vsel %vm741_vm2, %v11562_v8, %v5851_v48  ;;  %6504 = vmatpush.bf16.msrb.mxu0 %v8255_v14  ;;  %6558 = vmatpush.bf16.msrb.mxu1 %v8263_v2  ;;  %v8253_v14 = vld [vmem:[#allocation7 + $0x8] sm:$0xff] }
 0x52c   :  { %5404 = vmatmul.bf16.gmra.mxu2 %v12957_v28  ;;  %v6027_v32 = vadd.f32 %v5955_v24, %v5739_v3  ;;  %v8254_v24 = vld [vmem:[#allocation7 + $0x10] sm:$0xff]  ;;  %5427 = vmatpush.bf16.msra.mxu3 %v7755_v34 }
 0x52d   :  { %v5032_v36 = vpop.f32.mrf.mxu3  ;;  %v8262_v28 = vld [vmem:[#allocation7 + $0x50] sm:$0xff] }
 0x52e   :  { %v11633_v13 = vadd.f32 %v5032_v36, %v12958_v7  ;;  %v5088_v31 = vpop.f32.mrf.mxu0  ;;  %v5142_v22 = vpop.f32.mrf.mxu1 }
 0x52f   :  { %v11635_v62 = vadd.f32 %v5142_v22, %v5088_v31  ;;  %v5194_v44 = vpop.f32.mrf.mxu2  ;;  %6505 = vmatpush.bf16.msrb.mxu0 %v8254_v24  ;;  %6559 = vmatpush.bf16.msrb.mxu1 %v8262_v28 }
 0x530   :  { %v5531_v8 = vrot.slane %v11633_v13, 7  ;;  %v5819_v3 = vrot.slane %v11633_v13, 1  ;;  %v11639_v48 = vadd.f32 %v5194_v44, %v5141_v19  ;;  %v5671_v36 = vsel %vm12959_vm8, %v11633_v13, %v5563_v20  ;;  %v8261_v19 = vld [vmem:[#allocation7 + $0x48] sm:$0xff] }
 0x531   :  { %v5743_v7 = vadd.f32 %v5671_v36, %v11608_v5  ;;  %v6109_v20 = vadd.f32 %v11437_v29, %v6027_v32  ;;  %vm12961_vm8 = vcmp.eq.s32.totalorder %v12880_v26, 0 }
 0x532   :  { %v5847_v4 = vsel %vm892_vm1, %v5815_v53, %v5819_v3  ;;  %v5559_v55 = vsel %vm783_vm0, %v5527_v39, %v5531_v8 }
 0x533   :  { %v5959_v2 = vsel %vm12960_vm4, %v11587_v27, %v5847_v4  ;;  %6506 = vmatpush.bf16.msrb.mxu0 %v8253_v14  ;;  %6560 = vmatpush.bf16.msrb.mxu1 %v8261_v19  ;;  %v8260_v4 = vld [vmem:[#allocation7 + $0x40] sm:$0xff]  ;;  %v6181_v32 = vmax.f32 %v6109_v20, 0.0  ;;  %vm12963_vm4 = vcmp.eq.s32.totalorder %v12880_v26, 8 }
 0x534   :  { %v6031_v31 = vadd.f32 %v5959_v2, %v5743_v7  ;;  %v8252_v7 = vld [vmem:[#allocation7] sm:$0xff] }
 0x535   :  { %v5034_v22 = vpop.f32.mrf.mxu3 }
 0x536   :  { %v11654_v44 = vadd.f32 %v5034_v22, %v11290_v43  ;;  %v5091_v34 = vpop.f32.mrf.mxu0  ;;  %v5145_v53 = vpop.f32.mrf.mxu1  ;;  %v6113_v36 = vadd.f32 %v11437_v29, %v6031_v31  ;;  %v12962_v31 = vld [vmem:[#allocation42_spill] sm:$0xff] }
 0x537   :  { %v5146_v39 = vadd.f32 %v5145_v53, %v5091_v34  ;;  %v11657_v24 = vpop.f32.mrf.mxu2  ;;  %6507 = vmatpush.bf16.msrb.mxu0 %v8252_v7  ;;  %6561 = vmatpush.bf16.msrb.mxu1 %v8260_v4 }
 0x538   :  { %v5535_v28 = vrot.slane %v11654_v44, 7  ;;  %v5823_v27 = vrot.slane %v11654_v44, 1  ;;  %v6185_v2 = vmax.f32 %v6113_v36, 0.0  ;;  %v5675_v43 = vsel %vm12961_vm8, %v11654_v44, %v5559_v55 }
 0x539   :  { %5301 = vmatmul.bf16.gmra.mxu0 %v12799_v63  ;;  %5355 = vmatmul.bf16.gmra.mxu1 %v12800_v23  ;;  %v5747_v22 = vadd.f32 %v5675_v43, %v11633_v13  ;;  %vm12964_vm8 = vcmp.eq.s32.totalorder %v12886_v56, 0 }
 0x53a   :  { %5247 = vmatmul.bf16.gmra.mxu3 %v12962_v31  ;;  %v11667_v14 = vpack.c.bf16 %v6185_v2, %v6181_v32  ;;  %v5555_v19 = vsel %vm783_vm0, %v5531_v8, %v5535_v28  ;;  %v5843_v20 = vsel %vm892_vm1, %v5819_v3, %v5823_v27 }
 0x53b   :  { %v5963_v63 = vsel %vm12963_vm4, %v11608_v5, %v5843_v20  ;;  %vm12965_vm4 = vcmp.eq.s32.totalorder %v12886_v56, 8  ;;  %v5763_v20 = vrot.slane %v11369_v52, 1 }
 0x53c   :  { %5409 = vmatmul.bf16.gmra.mxu2 %v10609_v49  ;;  %v6035_v23 = vadd.f32 %v5963_v63, %v5747_v22 }
 0x53d   :  { %v5037_v55 = vpop.f32.mrf.mxu3 }
 0x53e   :  { %v5038_v34 = vadd.f32 %v5037_v55, %v11314_v6  ;;  %v5093_v53 = vpop.f32.mrf.mxu0  ;;  %v5147_v36 = vpop.f32.mrf.mxu1  ;;  %v6117_v63 = vadd.f32 %v11437_v29, %v6035_v23 }
 0x53f   :  { %v11679_v8 = vadd.f32 %v5147_v36, %v5093_v53  ;;  %v5199_v32 = vpop.f32.mrf.mxu2 }
 0x540   :  { %v5539_v2 = vrot.slane %v5038_v34, 7  ;;  %v5827_v43 = vrot.slane %v5038_v34, 1  ;;  %v11681_v3 = vadd.f32 %v5199_v32, %v5146_v39  ;;  %v5679_v7 = vsel %vm12964_vm8, %v5038_v34, %v5555_v19 }
 0x541   :  { %v5751_v5 = vadd.f32 %v5679_v7, %v11654_v44  ;;  %vm12967_vm8 = vcmp.eq.s32.totalorder %v12890_v35, 8 }
 0x542   :  { %v5839_v49 = vsel %vm892_vm1, %v5823_v27, %v5827_v43  ;;  %v5551_v6 = vsel %vm783_vm0, %v5535_v28, %v5539_v2  ;;  %v12966_v27 = vrot.slane %v11383_v17, 1 }
 0x543   :  { %v5967_v4 = vsel %vm12965_vm4, %v11633_v13, %v5839_v49  ;;  %vm12969_vm4 = vcmp.eq.s32.totalorder %v12890_v35, 0 }
 0x544   :  { %v6039_v22 = vadd.f32 %v5967_v4, %v5751_v5  ;;  %v5899_v28 = vsel %vm892_vm1, %v5763_v20, %v12966_v27 }
 0x545   :  { %v5039_v39 = vpop.f32.mrf.mxu3 }
 0x546   :  { %v5040_v19 = vadd.f32 %v5039_v39, %v11336_v57  ;;  %v5267_v55 = vpop.f32.mrf.mxu0  ;;  %v5321_v53 = vpop.f32.mrf.mxu1  ;;  %v6121_v36 = vadd.f32 %v11437_v29, %v6039_v22  ;;  %v6189_v57 = vmax.f32 %v6117_v63, 0.0  ;;  %v12968_v22 = vrot.slane %v11369_v52, 7 }
 0x547   :  { %v11701_v32 = vpop.f32.mrf.mxu2  ;;  %v5322_v13 = vadd.f32 %v5321_v53, %v5267_v55 }
 0x548   :  { %v5543_v7 = vrot.slane %v5040_v19, 7  ;;  %v5831_v5 = vrot.slane %v5040_v19, 1  ;;  %v5907_v49 = vsel %vm12967_vm8, %v5040_v19, %v5899_v28  ;;  %v6193_v23 = vmax.f32 %v6121_v36, 0.0 }
 0x549   :  { %5306 = vmatmul.bf16.gmra.mxu0 %v12806_v11  ;;  %5360 = vmatmul.bf16.gmra.mxu1 %v12807_v15  ;;  %v5683_v4 = vsel %vm727_vm15, %v5040_v19, %v5551_v6  ;;  %vm12987_vm8 = vcmp.eq.s32.totalorder %v12829_v25, 0 }
 0x54a   :  { %v5615_v39 = vsel %vm783_vm0, %v5543_v7, %v12968_v22  ;;  %5252 = vmatmul.bf16.gmra.mxu3 %v10925_v33  ;;  %v5547_v55 = vsel %vm783_vm0, %v5539_v2, %v5543_v7  ;;  %v5755_v53 = vadd.f32 %v5683_v4, %v5038_v34  ;;  %v5835_v11 = vsel %vm892_vm1, %v5827_v43, %v5831_v5 }
 0x54b   :  { %v5619_v15 = vsel %vm12969_vm4, %v11383_v17, %v5615_v39  ;;  %v11721_v63 = vpack.c.bf16 %v6193_v23, %v6189_v57  ;;  %v5687_v6 = vsel %vm728_vm3, %v11369_v52, %v5547_v55  ;;  %v5903_v36 = vsel %vm892_vm1, %v5831_v5, %v5763_v20 }
 0x54c   :  { %v5691_v27 = vadd.f32 %v5619_v15, %v11369_v52  ;;  %5414 = vmatmul.bf16.gmra.mxu2 %v10631_v10  ;;  %v5759_v2 = vadd.f32 %v5687_v6, %v5040_v19  ;;  %v5971_v43 = vsel %vm745_vm12, %v11654_v44, %v5835_v11  ;;  %v5975_v17 = vsel %vm746_vm7, %v5038_v34, %v5903_v36 }
 0x54d   :  { %v5213_v28 = vpop.f32.mrf.mxu3  ;;  %v6043_v7 = vadd.f32 %v5971_v43, %v5755_v53  ;;  %v6065_v52 = vadd.f32 %v11437_v29, %v11413_v50  ;;  %v12971_v43 = vld [vmem:[#allocation25_spill] sm:$0xff]  ;;  %vm12988_vm4 = vcmp.eq.s32.totalorder %v12829_v25, 8 }
 0x54e   :  { %v5979_v57 = vadd.f32 %v5907_v49, %v5691_v27  ;;  %v11736_v23 = vadd.f32 %v5213_v28, %v11374_v61  ;;  %v5269_v4 = vpop.f32.mrf.mxu0  ;;  %v5323_v20 = vpop.f32.mrf.mxu1  ;;  %v6047_v10 = vadd.f32 %v5975_v17, %v5759_v2 }
 0x54f   :  { %v11740_v19 = vadd.f32 %v5323_v20, %v5269_v4  ;;  %v5375_v5 = vpop.f32.mrf.mxu2  ;;  %v6125_v44 = vadd.f32 %v11437_v29, %v6043_v7  ;;  %v6137_v61 = vmax.f32 %v6065_v52, 0.0 }
 0x550   :  { %v11743_v22 = vadd.f32 %v5375_v5, %v5322_v13  ;;  %v6061_v34 = vadd.f32 %v11437_v29, %v5979_v57  ;;  %v6129_v49 = vadd.f32 %v11437_v29, %v6047_v10  ;;  %v12972_v29 = vld [vmem:[#allocation43_spill] sm:$0xff]  ;;  %v12549_v28 = vrot.slane %v11736_v23, 7 }
 0x551   :  { %v6197_v55 = vmax.f32 %v6125_v44, 0.0  ;;  %v12973_v57 = vld [vmem:[#allocation27_spill] sm:$0xff] }
 0x552   :  { %v6133_v39 = vmax.f32 %v6061_v34, 0.0  ;;  %v6201_v53 = vmax.f32 %v6129_v49, 0.0 }
 0x554   :  { %v6205_v11 = vpack.c.bf16 %v6137_v61, %v6133_v39  ;;  %v11747_v6 = vpack.c.bf16 %v6201_v53, %v6197_v55 }
 0x555   :  { %v5215_v15 = vpop.f32.mrf.mxu3 }
 0x556   :  { %v11750_v50 = vadd.f32 %v5215_v15, %v11385_v42  ;;  %v5272_v36 = vpop.f32.mrf.mxu0  ;;  %v5326_v27 = vpop.f32.mrf.mxu1 }
 0x557   :  { %v5327_v2 = vadd.f32 %v5326_v27, %v5272_v36  ;;  %v11752_v13 = vpop.f32.mrf.mxu2 }
 0x558   :  { %12970 = vst [vmem:[#allocation52_spill] sm:$0xff] %v11752_v13  ;;  %v5480_v17 = vrot.slane %v11750_v50, 7  ;;  %v12550_v52 = vrot.slane %v11750_v50, 1  ;;  %v12986_v13 = vld [vmem:[#allocation63_spill] sm:$0xff] }
 0x559   :  { %6508 = vmatmul.bf16.vlgmr.msrb.gmra.mxu0 %v12971_v43  ;;  %6562 = vmatmul.bf16.vlgmr.msrb.gmra.mxu1 %v6205_v11 }
 0x55a   :  { %5428 = vmatmul.bf16.vlgmr.msra.gmra.mxu3 %v12972_v29  ;;  %v5612_v10 = vsel %vm783_vm0, %v12549_v28, %v5480_v17  ;;  %v12977_v29 = vld [vmem:[#allocation12_spill] sm:$0xff] }
 0x55d   :  { %v5218_v7 = vpop.f32.mrf.mxu3 }
 0x55e   :  { %v5219_v4 = vadd.f32 %v5218_v7, %v12973_v57  ;;  %v5274_v20 = vpop.f32.mrf.mxu0  ;;  %v5328_v42 = vpop.f32.mrf.mxu1 }
 0x55f   :  { %v11764_v5 = vadd.f32 %v5328_v42, %v5274_v20  ;;  %v5380_v44 = vpop.f32.mrf.mxu2 }
 0x560   :  { %v5484_v34 = vrot.slane %v5219_v4, 7  ;;  %v5624_v39 = vsel %vm712_vm5, %v5219_v4, %v5612_v10  ;;  %v5772_v61 = vrot.slane %v5219_v4, 1  ;;  %v11768_v55 = vadd.f32 %v5380_v44, %v5327_v2 }
 0x561   :  { %12974 = vst [vmem:[#allocation51_spill] sm:$0xff] %v11764_v5  ;;  %v5696_v53 = vadd.f32 %v5624_v39, %v11750_v50  ;;  %v12979_v39 = vld [vmem:[#allocation54_spill] sm:$0xff] }
 0x562   :  { %12976 = vst [vmem:[#allocation33_spill] sm:$0xff] %v11768_v55  ;;  %v5896_v11 = vsel %vm892_vm1, %v12550_v52, %v5772_v61  ;;  %v5608_v15 = vsel %vm783_vm0, %v5480_v17, %v5484_v34 }
 0x563   :  { %v5912_v36 = vsel %vm730_vm6, %v11736_v23, %v5896_v11  ;;  %v12981_v11 = vld [vmem:[#allocation34_spill] sm:$0xff] }
 0x564   :  { %v11780_v27 = vadd.f32 %v5912_v36, %v5696_v53 }
 0x565   :  { %v5220_v43 = vpop.f32.mrf.mxu3 }
 0x566   :  { %v5221_v2 = vadd.f32 %v5220_v43, %v12977_v29  ;;  %v5277_v7 = vpop.f32.mrf.mxu0  ;;  %v5331_v57 = vpop.f32.mrf.mxu1 }
 0x567   :  { %v5332_v20 = vadd.f32 %v5331_v57, %v5277_v7  ;;  %v11783_v42 = vpop.f32.mrf.mxu2 }
 0x568   :  { %12978 = vst [vmem:[#allocation62_spill] sm:$0xff] %v11783_v42  ;;  %v5488_v10 = vrot.slane %v5221_v2, 7  ;;  %v5776_v44 = vrot.slane %v5221_v2, 1  ;;  %v5628_v28 = vsel %vm713_vm11, %v5221_v2, %v5608_v15 }
 0x569   :  { %6513 = vmatmul.bf16.gmra.mxu0 %v12979_v39  ;;  %6567 = vmatmul.bf16.gmra.mxu1 %v11460_v54  ;;  %v5700_v36 = vadd.f32 %v5628_v28, %v5219_v4 }
 0x56a   :  { %5433 = vmatmul.bf16.gmra.mxu3 %v12981_v11  ;;  %v5604_v53 = vsel %vm783_vm0, %v5484_v34, %v5488_v10  ;;  %v5892_v43 = vsel %vm892_vm1, %v5772_v61, %v5776_v44 }
 0x56b   :  { %v5916_v29 = vsel %vm731_vm14, %v11750_v50, %v5892_v43 }
 0x56c   :  { %v5988_v7 = vadd.f32 %v5916_v29, %v5700_v36  ;;  %v11807_v36 = vld [vmem:[%s12348_s6] sm:$0xf] }
 0x56d   :  { %v5223_v57 = vpop.f32.mrf.mxu3  ;;  %12985 = vst [vmem:[#allocation17_spill] sm:$0xff] %v11807_v36 }
 0x56e   :  { %v5224_v54 = vadd.f32 %v5223_v57, %v11432_v0  ;;  %v5279_v39 = vpop.f32.mrf.mxu0  ;;  %v5333_v52 = vpop.f32.mrf.mxu1  ;;  %v11810_v0 = vperm.slane %v11807_v36, 2 }
 0x56f   :  { %v11798_v15 = vadd.f32 %v5333_v52, %v5279_v39  ;;  %v5385_v11 = vpop.f32.mrf.mxu2 }
 0x570   :  { %v5492_v42 = vrot.slane %v5224_v54, 7  ;;  %v5780_v5 = vrot.slane %v5224_v54, 1  ;;  %v11800_v34 = vadd.f32 %v5385_v11, %v5332_v20  ;;  %v5632_v61 = vsel %vm714_vm9, %v5224_v54, %v5604_v53 }
 0x571   :  { %12982 = vst [vmem:[#allocation53_spill] sm:$0xff] %v11798_v15  ;;  %v5704_v49 = vadd.f32 %v5632_v61, %v5221_v2  ;;  %v6070_v53 = vadd.f32 %v11810_v0, %v5988_v7 }
 0x572   :  { %12983 = vst [vmem:[#allocation35_spill] sm:$0xff] %v11800_v34  ;;  %v5888_v52 = vsel %vm892_vm1, %v5776_v44, %v5780_v5  ;;  %v5600_v43 = vsel %vm783_vm0, %v5488_v10, %v5492_v42 }
 0x573   :  { %v5920_v20 = vsel %vm732_vm10, %v5219_v4, %v5888_v52  ;;  %v6142_v55 = vmax.f32 %v6070_v53, 0.0 }
 0x574   :  { %v5992_v29 = vadd.f32 %v5920_v20, %v5704_v49 }
 0x575   :  { %v5225_v57 = vpop.f32.mrf.mxu3 }
 0x576   :  { %v5226_v39 = vadd.f32 %v5225_v57, %v11452_v30  ;;  %v5282_v11 = vpop.f32.mrf.mxu0  ;;  %v5336_v61 = vpop.f32.mrf.mxu1  ;;  %v6074_v15 = vadd.f32 %v11810_v0, %v5992_v29 }
 0x577   :  { %v5337_v36 = vadd.f32 %v5336_v61, %v5282_v11  ;;  %v11821_v34 = vpop.f32.mrf.mxu2 }
 0x578   :  { %v5496_v44 = vrot.slane %v5226_v39, 7  ;;  %v5784_v17 = vrot.slane %v5226_v39, 1  ;;  %v6146_v10 = vmax.f32 %v6074_v15, 0.0  ;;  %v5636_v4 = vsel %vm12987_vm8, %v5226_v39, %v5600_v43 }
 0x579   :  { %6518 = vmatmul.bf16.gmra.mxu0 %v12986_v13  ;;  %6572 = vmatmul.bf16.gmra.mxu1 %v11496_v41  ;;  %v5708_v7 = vadd.f32 %v5636_v4, %v5224_v54  ;;  %vm12989_vm8 = vcmp.eq.s32.totalorder %v12917_v46, 0 }
 0x57a   :  { %5438 = vmatmul.bf16.gmra.mxu3 %v12915_v51  ;;  %v11828_v30 = vpack.c.bf16 %v6146_v10, %v6142_v55  ;;  %v5596_v49 = vsel %vm783_vm0, %v5492_v42, %v5496_v44  ;;  %v5884_v52 = vsel %vm892_vm1, %v5780_v5, %v5784_v17 }
 0x57b   :  { %v5924_v15 = vsel %vm12988_vm4, %v5221_v2, %v5884_v52  ;;  %vm12990_vm4 = vcmp.eq.s32.totalorder %v12917_v46, 8 }
 0x57c   :  { %v5996_v13 = vadd.f32 %v5924_v15, %v5708_v7 }
 0x57d   :  { %v5228_v20 = vpop.f32.mrf.mxu3 }
 0x57e   :  { %v5229_v41 = vadd.f32 %v5228_v20, %v11470_v12  ;;  %v5284_v29 = vpop.f32.mrf.mxu0  ;;  %v5338_v43 = vpop.f32.mrf.mxu1  ;;  %v6078_v4 = vadd.f32 %v11810_v0, %v5996_v13  ;;  %v12994_v13 = vld [vmem:[#allocation40_spill] sm:$0xff] }
 0x57f   :  { %v11837_v53 = vadd.f32 %v5338_v43, %v5284_v29  ;;  %v5390_v51 = vpop.f32.mrf.mxu2 }
 0x580   :  { %v5500_v55 = vrot.slane %v5229_v41, 7  ;;  %v5788_v57 = vrot.slane %v5229_v41, 1  ;;  %v11839_v11 = vadd.f32 %v5390_v51, %v5337_v36  ;;  %v5640_v42 = vsel %vm12989_vm8, %v5229_v41, %v5596_v49 }
 0x581   :  { %v5712_v5 = vadd.f32 %v5640_v42, %v5226_v39  ;;  %v6150_v51 = vmax.f32 %v6078_v4, 0.0  ;;  %v12992_v42 = vld [vmem:[#allocation58_spill] sm:$0xff]  ;;  %vm12993_vm8 = vcmp.eq.s32.totalorder %v12836_v47, 0 }
 0x582   :  { %v5880_v2 = vsel %vm892_vm1, %v5784_v17, %v5788_v57  ;;  %v5592_v61 = vsel %vm783_vm0, %v5496_v44, %v5500_v55 }
 0x583   :  { %v5928_v12 = vsel %vm12990_vm4, %v5224_v54, %v5880_v2  ;;  %vm12995_vm4 = vcmp.eq.s32.totalorder %v12836_v47, 8 }
 0x584   :  { %v6000_v10 = vadd.f32 %v5928_v12, %v5712_v5 }
 0x585   :  { %v5230_v7 = vpop.f32.mrf.mxu3 }
 0x586   :  { %v5231_v36 = vadd.f32 %v5230_v7, %v11488_v37  ;;  %v5287_v52 = vpop.f32.mrf.mxu0  ;;  %v5341_v15 = vpop.f32.mrf.mxu1  ;;  %v6082_v49 = vadd.f32 %v11810_v0, %v6000_v10 }
 0x587   :  { %v5342_v20 = vadd.f32 %v5341_v15, %v5287_v52  ;;  %v11852_v29 = vpop.f32.mrf.mxu2 }
 0x588   :  { %12991 = vst [vmem:[#allocation57_spill] sm:$0xff] %v11852_v29  ;;  %v5504_v17 = vrot.slane %v5231_v36, 7  ;;  %v5792_v43 = vrot.slane %v5231_v36, 1  ;;  %v6154_v44 = vmax.f32 %v6082_v49, 0.0  ;;  %v5644_v54 = vsel %vm12993_vm8, %v5231_v36, %v5592_v61  ;;  %v13004_v29 = vld [vmem:[#allocation61_spill] sm:$0xff] }
 0x589   :  { %6523 = vmatmul.bf16.gmra.mxu0 %v12992_v42  ;;  %6577 = vmatmul.bf16.gmra.mxu1 %v11533_v59  ;;  %v5716_v2 = vadd.f32 %v5644_v54, %v5229_v41  ;;  %v12996_v59 = vld [vmem:[#allocation28_spill] sm:$0xff] }
 0x58a   :  { %5443 = vmatmul.bf16.gmra.mxu3 %v12994_v13  ;;  %v11859_v37 = vpack.c.bf16 %v6154_v44, %v6150_v51  ;;  %v5588_v5 = vsel %vm783_vm0, %v5500_v55, %v5504_v17  ;;  %v5876_v12 = vsel %vm892_vm1, %v5788_v57, %v5792_v43  ;;  %v12999_v55 = vld [vmem:[#allocation19_spill] sm:$0xff] }
 0x58b   :  { %v5932_v10 = vsel %vm12995_vm4, %v5226_v39, %v5876_v12  ;;  %vm13000_vm8 = vcmp.eq.s32.totalorder %v12999_v55, 0  ;;  %vm13001_vm4 = vcmp.eq.s32.totalorder %v12999_v55, 8 }
 0x58c   :  { %v6004_v4 = vadd.f32 %v5932_v10, %v5716_v2 }
 0x58d   :  { %v5233_v7 = vpop.f32.mrf.mxu3 }
 0x58e   :  { %v5234_v52 = vadd.f32 %v5233_v7, %v12996_v59  ;;  %v5289_v15 = vpop.f32.mrf.mxu0  ;;  %v5343_v61 = vpop.f32.mrf.mxu1  ;;  %v6086_v7 = vadd.f32 %v11810_v0, %v6004_v4 }
 0x58f   :  { %v11868_v49 = vadd.f32 %v5343_v61, %v5289_v15  ;;  %v5395_v51 = vpop.f32.mrf.mxu2  ;;  %v13002_v15 = vld [vmem:[#allocation29_spill] sm:$0xff] }
 0x590   :  { %v5508_v44 = vrot.slane %v5234_v52, 7  ;;  %v5796_v42 = vrot.slane %v5234_v52, 1  ;;  %v11870_v13 = vadd.f32 %v5395_v51, %v5342_v20  ;;  %v5648_v54 = vsel %vm13000_vm8, %v5234_v52, %v5588_v5 }
 0x591   :  { %12997 = vst [vmem:[#allocation55_spill] sm:$0xff] %v11868_v49  ;;  %v5720_v57 = vadd.f32 %v5648_v54, %v5231_v36  ;;  %v6158_v47 = vmax.f32 %v6086_v7, 0.0 }
 0x592   :  { %12998 = vst [vmem:[#allocation64_spill] sm:$0xff] %v11870_v13  ;;  %v5872_v39 = vsel %vm892_vm1, %v5792_v43, %v5796_v42  ;;  %v5584_v2 = vsel %vm783_vm0, %v5504_v17, %v5508_v44 }
 0x593   :  { %v5936_v12 = vsel %vm13001_vm4, %v5229_v41, %v5872_v39  ;;  %v13005_v41 = vld [vmem:[#allocation20_spill] sm:$0xff] }
 0x594   :  { %v6008_v10 = vadd.f32 %v5936_v12, %v5720_v57  ;;  %vm13006_vm8 = vcmp.eq.s32.totalorder %v13005_v41, 0  ;;  %v13007_v57 = vld [vmem:[#allocation41_spill] sm:$0xff]  ;;  %vm13008_vm4 = vcmp.eq.s32.totalorder %v13005_v41, 8 }
 0x595   :  { %v5235_v59 = vpop.f32.mrf.mxu3 }
 0x596   :  { %v5236_v20 = vadd.f32 %v5235_v59, %v13002_v15  ;;  %v5292_v61 = vpop.f32.mrf.mxu0  ;;  %v5346_v51 = vpop.f32.mrf.mxu1  ;;  %v6090_v5 = vadd.f32 %v11810_v0, %v6008_v10 }
 0x597   :  { %v5347_v54 = vadd.f32 %v5346_v51, %v5292_v61  ;;  %v11883_v49 = vpop.f32.mrf.mxu2 }
 0x598   :  { %13003 = vst [vmem:[#allocation30_spill] sm:$0xff] %v11883_v49  ;;  %v5512_v43 = vrot.slane %v5236_v20, 7  ;;  %v5800_v13 = vrot.slane %v5236_v20, 1  ;;  %v6162_v17 = vmax.f32 %v6090_v5, 0.0  ;;  %v5652_v4 = vsel %vm13006_vm8, %v5236_v20, %v5584_v2 }
 0x599   :  { %6528 = vmatmul.bf16.gmra.mxu0 %v13004_v29  ;;  %6582 = vmatmul.bf16.gmra.mxu1 %v11580_v9  ;;  %v5724_v10 = vadd.f32 %v5652_v4, %v5234_v52  ;;  %v13009_v9 = vld [vmem:[#allocation47_spill] sm:$0xff] }
 0x59a   :  { %5448 = vmatmul.bf16.gmra.mxu3 %v13007_v57  ;;  %v11890_v39 = vpack.c.bf16 %v6162_v17, %v6158_v47  ;;  %v5580_v12 = vsel %vm783_vm0, %v5508_v44, %v5512_v43  ;;  %v5868_v59 = vsel %vm892_vm1, %v5796_v42, %v5800_v13  ;;  %v13011_v44 = vld [vmem:[#allocation21_spill] sm:$0xff] }
 0x59b   :  { %v5940_v7 = vsel %vm13008_vm4, %v5231_v36, %v5868_v59  ;;  %vm13012_vm8 = vcmp.eq.s32.totalorder %v13011_v44, 0  ;;  %vm13013_vm4 = vcmp.eq.s32.totalorder %v13011_v44, 8  ;;  %v8275_v44 = vld [vmem:[#allocation7 + $0xb8] sm:$0xff] }
 0x59c   :  { %v6012_v29 = vadd.f32 %v5940_v7, %v5724_v10  ;;  %6608 = vmatpush.bf16.msrb.mxu2 %v8275_v44 }
 0x59d   :  { %v5238_v15 = vpop.f32.mrf.mxu3 }
 0x59e   :  { %v5239_v61 = vadd.f32 %v5238_v15, %v13009_v9  ;;  %v5294_v51 = vpop.f32.mrf.mxu0  ;;  %v5348_v2 = vpop.f32.mrf.mxu1  ;;  %v6094_v15 = vadd.f32 %v11810_v0, %v6012_v29 }
 0x59f   :  { %v11899_v5 = vadd.f32 %v5348_v2, %v5294_v51  ;;  %v5400_v47 = vpop.f32.mrf.mxu2  ;;  %v13014_v51 = vld [vmem:[#allocation37_spill] sm:$0xff] }
 0x5a0   :  { %v5516_v17 = vrot.slane %v5239_v61, 7  ;;  %v5804_v57 = vrot.slane %v5239_v61, 1  ;;  %v11901_v49 = vadd.f32 %v5400_v47, %v5347_v54  ;;  %v5656_v4 = vsel %vm13012_vm8, %v5239_v61, %v5580_v12 }
 0x5a1   :  { %13010 = vst [vmem:[#allocation46_spill] sm:$0xff] %v11899_v5  ;;  %v5728_v42 = vadd.f32 %v5656_v4, %v5236_v20  ;;  %vm13017_vm8 = vcmp.eq.s32.totalorder %v12943_v45, 0 }
 0x5a2   :  { %v5864_v36 = vsel %vm892_vm1, %v5800_v13, %v5804_v57  ;;  %v5576_v10 = vsel %vm783_vm0, %v5512_v43, %v5516_v17 }
 0x5a3   :  { %v5944_v59 = vsel %vm13013_vm4, %v5234_v52, %v5864_v36  ;;  %v6166_v52 = vmax.f32 %v6094_v15, 0.0  ;;  %v13016_v36 = vld [vmem:[#allocation48_spill] sm:$0xff]  ;;  %vm13019_vm4 = vcmp.eq.s32.totalorder %v12943_v45, 8 }
 0x5a4   :  { %v6016_v7 = vadd.f32 %v5944_v59, %v5728_v42  ;;  %v13018_v59 = vld [vmem:[#allocation38_spill] sm:$0xff] }
 0x5a5   :  { %v5240_v9 = vpop.f32.mrf.mxu3 }
 0x5a6   :  { %v11913_v54 = vadd.f32 %v5240_v9, %v13014_v51  ;;  %v5297_v2 = vpop.f32.mrf.mxu0  ;;  %v5351_v47 = vpop.f32.mrf.mxu1  ;;  %v6098_v12 = vadd.f32 %v11810_v0, %v6016_v7  ;;  %v8274_v7 = vld [vmem:[#allocation7 + $0xb0] sm:$0xff] }
 0x5a7   :  { %v5352_v4 = vadd.f32 %v5351_v47, %v5297_v2  ;;  %v11916_v5 = vpop.f32.mrf.mxu2  ;;  %6609 = vmatpush.bf16.msrb.mxu2 %v8274_v7 }
 0x5a8   :  { %13015 = vst [vmem:[#allocation60_spill] sm:$0xff] %v11916_v5  ;;  %v5520_v13 = vrot.slane %v11913_v54, 7  ;;  %v5808_v43 = vrot.slane %v11913_v54, 1  ;;  %v6170_v42 = vmax.f32 %v6098_v12, 0.0  ;;  %v5660_v29 = vsel %vm13017_vm8, %v11913_v54, %v5576_v10 }
 0x5a9   :  { %6533 = vmatmul.bf16.gmra.mxu0 %v13016_v36  ;;  %6587 = vmatmul.bf16.gmra.mxu1 %v11621_v16  ;;  %v5732_v2 = vadd.f32 %v5660_v29, %v5239_v61  ;;  %vm13021_vm8 = vcmp.eq.s32.totalorder %v12865_v60, 0 }
 0x5aa   :  { %5453 = vmatmul.bf16.gmra.mxu3 %v13018_v59  ;;  %v11926_v9 = vpack.c.bf16 %v6170_v42, %v6166_v52  ;;  %v5572_v51 = vsel %vm783_vm0, %v5516_v17, %v5520_v13  ;;  %v5860_v15 = vsel %vm892_vm1, %v5804_v57, %v5808_v43  ;;  %v8273_v57 = vld [vmem:[#allocation7 + $0xa8] sm:$0xff] }
 0x5ab   :  { %v5948_v16 = vsel %vm13019_vm4, %v5236_v20, %v5860_v15  ;;  %6610 = vmatpush.bf16.msrb.mxu2 %v8273_v57  ;;  %vm13022_vm4 = vcmp.eq.s32.totalorder %v12865_v60, 8 }
 0x5ac   :  { %v6020_v12 = vadd.f32 %v5948_v16, %v5732_v2 }
 0x5ad   :  { %v5243_v47 = vpop.f32.mrf.mxu3 }
 0x5ae   :  { %v11935_v10 = vadd.f32 %v5243_v47, %v11593_v21  ;;  %v5299_v36 = vpop.f32.mrf.mxu0  ;;  %v5353_v44 = vpop.f32.mrf.mxu1  ;;  %v8272_v21 = vld [vmem:[#allocation7 + $0xa0] sm:$0xff] }
 0x5af   :  { %v5354_v52 = vadd.f32 %v5353_v44, %v5299_v36  ;;  %v5405_v42 = vpop.f32.mrf.mxu2  ;;  %v13023_v47 = vld [vmem:[#allocation59_spill] sm:$0xff]  ;;  %v13024_v36 = vld [vmem:[#allocation32_spill] sm:$0xff]  ;;  %6611 = vmatpush.bf16.msrb.mxu2 %v8272_v21 }
 0x5b0   :  { %v5524_v59 = vrot.slane %v11935_v10, 7  ;;  %v5812_v17 = vrot.slane %v11935_v10, 1  ;;  %v11939_v29 = vadd.f32 %v5405_v42, %v5352_v4  ;;  %v5664_v20 = vsel %vm13021_vm8, %v11935_v10, %v5572_v51 }
 0x5b1   :  { %v5736_v2 = vadd.f32 %v5664_v20, %v11913_v54  ;;  %v6102_v4 = vadd.f32 %v11810_v0, %v6020_v12  ;;  %v5192_v44 = vadd.f32 %v13024_v36, %v13023_v47  ;;  %v13025_v47 = vld [vmem:[#allocation50_spill] sm:$0xff]  ;;  %vm13027_vm8 = vcmp.eq.s32.totalorder %v12874_v40, 0 }
 0x5b2   :  { %13020 = vst [vmem:[#allocation56_spill] sm:$0xff] %v11939_v29  ;;  %v5856_v7 = vsel %vm892_vm1, %v5808_v43, %v5812_v17  ;;  %v5568_v15 = vsel %vm783_vm0, %v5520_v13, %v5524_v59 }
 0x5b3   :  { %v5952_v16 = vsel %vm13022_vm4, %v5239_v61, %v5856_v7  ;;  %v6174_v13 = vmax.f32 %v6102_v4, 0.0  ;;  %vm13028_vm4 = vcmp.eq.s32.totalorder %v12874_v40, 8 }
 0x5b4   :  { %v6024_v42 = vadd.f32 %v5952_v16, %v5736_v2  ;;  %v8271_v2 = vld [vmem:[#allocation7 + $0x98] sm:$0xff]  ;;  %v13026_v16 = vld [vmem:[#allocation39_spill] sm:$0xff] }
 0x5b5   :  { %v5245_v51 = vpop.f32.mrf.mxu3  ;;  %6612 = vmatpush.bf16.msrb.mxu2 %v8271_v2  ;;  %v8269_v2 = vld [vmem:[#allocation7 + $0x88] sm:$0xff] }
 0x5b6   :  { %v11954_v29 = vadd.f32 %v5245_v51, %v5192_v44  ;;  %v5302_v57 = vpop.f32.mrf.mxu0  ;;  %v5356_v20 = vpop.f32.mrf.mxu1  ;;  %v6106_v43 = vadd.f32 %v11810_v0, %v6024_v42 }
 0x5b7   :  { %v5357_v45 = vadd.f32 %v5356_v20, %v5302_v57  ;;  %v5407_v5 = vpop.f32.mrf.mxu2 }
 0x5b8   :  { %v5528_v60 = vrot.slane %v11954_v29, 7  ;;  %v5816_v61 = vrot.slane %v11954_v29, 1  ;;  %v11959_v12 = vadd.f32 %v5407_v5, %v5354_v52  ;;  %v6178_v7 = vmax.f32 %v6106_v43, 0.0 }
 0x5b9   :  { %6538 = vmatmul.bf16.gmra.mxu0 %v13025_v47  ;;  %6592 = vmatmul.bf16.gmra.mxu1 %v11667_v14  ;;  %v5668_v21 = vsel %vm723_vm13, %v11954_v29, %v5568_v15  ;;  %v8270_v15 = vld [vmem:[#allocation7 + $0x90] sm:$0xff] }
 0x5ba   :  { %5458 = vmatmul.bf16.gmra.mxu3 %v13026_v16  ;;  %v11967_v36 = vpack.c.bf16 %v6178_v7, %v6174_v13  ;;  %v5564_v4 = vsel %vm783_vm0, %v5524_v59, %v5528_v60  ;;  %v5740_v5 = vadd.f32 %v5668_v21, %v11935_v10  ;;  %v5852_v52 = vsel %vm892_vm1, %v5812_v17, %v5816_v61  ;;  %v8268_v16 = vld [vmem:[#allocation7 + $0x80] sm:$0xff] }
 0x5bb   :  { %v5956_v14 = vsel %vm741_vm2, %v11913_v54, %v5852_v52  ;;  %6613 = vmatpush.bf16.msrb.mxu2 %v8270_v15 }
 0x5bc   :  { %v6028_v44 = vadd.f32 %v5956_v14, %v5740_v5 }
 0x5bd   :  { %v5248_v42 = vpop.f32.mrf.mxu3 }
 0x5be   :  { %v5249_v51 = vadd.f32 %v5248_v42, %v11639_v48  ;;  %v5304_v57 = vpop.f32.mrf.mxu0  ;;  %v5358_v20 = vpop.f32.mrf.mxu1 }
 0x5bf   :  { %v5359_v43 = vadd.f32 %v5358_v20, %v5304_v57  ;;  %v5410_v13 = vpop.f32.mrf.mxu2  ;;  %6614 = vmatpush.bf16.msrb.mxu2 %v8269_v2  ;;  %v8283_v2 = vld [vmem:[#allocation7 + $0xf8] sm:$0xff] }
 0x5c0   :  { %v5532_v59 = vrot.slane %v5249_v51, 7  ;;  %v5820_v7 = vrot.slane %v5249_v51, 1  ;;  %v11978_v47 = vadd.f32 %v5410_v13, %v5357_v45  ;;  %v5672_v17 = vsel %vm13027_vm8, %v5249_v51, %v5564_v4  ;;  %6662 = vmatpush.bf16.msrb.mxu3 %v8283_v2 }
 0x5c1   :  { %v5744_v54 = vadd.f32 %v5672_v17, %v11954_v29  ;;  %v6110_v45 = vadd.f32 %v11810_v0, %v6028_v44  ;;  %v5197_v4 = vadd.f32 %v11657_v24, %v11635_v62  ;;  %v13029_v24 = vld [vmem:[#allocation45_spill] sm:$0xff]  ;;  %vm13030_vm8 = vcmp.eq.s32.totalorder %v12880_v26, 0 }
 0x5c2   :  { %v5848_v21 = vsel %vm892_vm1, %v5816_v61, %v5820_v7  ;;  %v5560_v48 = vsel %vm783_vm0, %v5528_v60, %v5532_v59 }
 0x5c3   :  { %v5960_v5 = vsel %vm13028_vm4, %v11935_v10, %v5848_v21  ;;  %6615 = vmatpush.bf16.msrb.mxu2 %v8268_v16  ;;  %v6182_v13 = vmax.f32 %v6110_v45, 0.0  ;;  %vm13031_vm4 = vcmp.eq.s32.totalorder %v12880_v26, 8 }
 0x5c4   :  { %v6032_v52 = vadd.f32 %v5960_v5, %v5744_v54 }
 0x5c5   :  { %v5250_v14 = vpop.f32.mrf.mxu3 }
 0x5c6   :  { %v11993_v42 = vadd.f32 %v5250_v14, %v5197_v4  ;;  %v5307_v15 = vpop.f32.mrf.mxu0  ;;  %v5361_v61 = vpop.f32.mrf.mxu1  ;;  %v6114_v57 = vadd.f32 %v11810_v0, %v6032_v52 }
 0x5c7   :  { %v5362_v60 = vadd.f32 %v5361_v61, %v5307_v15  ;;  %v5412_v20 = vpop.f32.mrf.mxu2 }
 0x5c8   :  { %v5536_v17 = vrot.slane %v11993_v42, 7  ;;  %v5824_v10 = vrot.slane %v11993_v42, 1  ;;  %v11998_v44 = vadd.f32 %v5412_v20, %v5359_v43  ;;  %v6186_v62 = vmax.f32 %v6114_v57, 0.0 }
 0x5c9   :  { %6543 = vmatmul.bf16.gmra.mxu0 %v13029_v24  ;;  %6597 = vmatmul.bf16.gmra.mxu1 %v11721_v63  ;;  %v5676_v54 = vsel %vm13030_vm8, %v11993_v42, %v5560_v48  ;;  %vm13032_vm8 = vcmp.eq.s32.totalorder %v12886_v56, 0 }
 0x5ca   :  { %5463 = vmatmul.bf16.gmra.mxu3 %v12962_v31  ;;  %v12006_v21 = vpack.c.bf16 %v6186_v62, %v6182_v13  ;;  %v5556_v16 = vsel %vm783_vm0, %v5532_v59, %v5536_v17  ;;  %v5748_v5 = vadd.f32 %v5676_v54, %v5249_v51  ;;  %v5844_v43 = vsel %vm892_vm1, %v5820_v7, %v5824_v10 }
 0x5cb   :  { %v5964_v63 = vsel %vm13031_vm4, %v11954_v29, %v5844_v43  ;;  %vm13033_vm4 = vcmp.eq.s32.totalorder %v12886_v56, 8 }
 0x5cc   :  { %v6036_v45 = vadd.f32 %v5964_v63, %v5748_v5 }
 0x5cd   :  { %v5253_v4 = vpop.f32.mrf.mxu3 }
 0x5ce   :  { %v5254_v48 = vadd.f32 %v5253_v4, %v11681_v3  ;;  %v5202_v3 = vadd.f32 %v11701_v32, %v11679_v8  ;;  %v6118_v2 = vadd.f32 %v11810_v0, %v6036_v45  ;;  %v13036_v8 = vld [vmem:[#allocation26_spill] sm:$0xff]  ;;  %v8282_v32 = vld [vmem:[#allocation7 + $0xf0] sm:$0xff]  ;;  %v13037_v45 = vrot.slane %v11736_v23, 7 }
 0x5cf   :  { %v5415_v52 = vpop.f32.mrf.mxu2  ;;  %6663 = vmatpush.bf16.msrb.mxu3 %v8282_v32 }
 0x5d0   :  { %v5540_v31 = vrot.slane %v5254_v48, 7  ;;  %v5828_v14 = vrot.slane %v5254_v48, 1  ;;  %v12016_v15 = vadd.f32 %v5415_v52, %v5362_v60  ;;  %v5680_v59 = vsel %vm13032_vm8, %v5254_v48, %v5556_v16 }
 0x5d1   :  { %v5752_v61 = vadd.f32 %v5680_v59, %v11993_v42  ;;  %v5764_v60 = vrot.slane %v11736_v23, 1  ;;  %vm13035_vm8 = vcmp.eq.s32.totalorder %v12890_v35, 8  ;;  %v6190_v5 = vmax.f32 %v6118_v2, 0.0 }
 0x5d2   :  { %v5840_v7 = vsel %vm892_vm1, %v5824_v10, %v5828_v14  ;;  %v5552_v29 = vsel %vm783_vm0, %v5536_v17, %v5540_v31  ;;  %v13034_v10 = vrot.slane %v11750_v50, 1 }
 0x5d3   :  { %v5968_v57 = vsel %vm13033_vm4, %v5249_v51, %v5840_v7  ;;  %vm13038_vm4 = vcmp.eq.s32.totalorder %v12890_v35, 0 }
 0x5d4   :  { %v6040_v20 = vadd.f32 %v5968_v57, %v5752_v61  ;;  %v5900_v17 = vsel %vm892_vm1, %v5764_v60, %v13034_v10 }
 0x5d5   :  { %v5255_v13 = vpop.f32.mrf.mxu3 }
 0x5d6   :  { %v5256_v62 = vadd.f32 %v5255_v13, %v5202_v3  ;;  %v6122_v24 = vadd.f32 %v11810_v0, %v6040_v20 }
 0x5d8   :  { %v5544_v54 = vrot.slane %v5256_v62, 7  ;;  %v5832_v16 = vrot.slane %v5256_v62, 1  ;;  %v5908_v51 = vsel %vm13035_vm8, %v5256_v62, %v5900_v17  ;;  %v6194_v43 = vmax.f32 %v6122_v24, 0.0 }
 0x5d9   :  { %6548 = vmatmul.bf16.gmra.mxu0 %v13036_v8  ;;  %6602 = vmatmul.bf16.gmra.mxu1 %v11747_v6  ;;  %v5684_v63 = vsel %vm727_vm15, %v5256_v62, %v5552_v29  ;;  %v6066_v24 = vadd.f32 %v11810_v0, %v11780_v27  ;;  %vm13057_vm8 = vcmp.eq.s32.totalorder %v12999_v55, 0 }
 0x5da   :  { %v5616_v4 = vsel %vm783_vm0, %v5544_v54, %v13037_v45  ;;  %5468 = vmatmul.bf16.gmra.mxu3 %v10925_v33  ;;  %v5548_v52 = vsel %vm783_vm0, %v5540_v31, %v5544_v54  ;;  %v5756_v59 = vadd.f32 %v5684_v63, %v5254_v48  ;;  %v5836_v6 = vsel %vm892_vm1, %v5828_v14, %v5832_v16  ;;  %v13040_v45 = vld [vmem:[#allocation33_spill] sm:$0xff] }
 0x5db   :  { %v5620_v61 = vsel %vm13038_vm4, %v11750_v50, %v5616_v4  ;;  %v12054_v7 = vpack.c.bf16 %v6194_v43, %v6190_v5  ;;  %v5688_v29 = vsel %vm728_vm3, %v11736_v23, %v5548_v52  ;;  %v5904_v33 = vsel %vm892_vm1, %v5832_v16, %v5764_v60  ;;  %v8281_v5 = vld [vmem:[#allocation7 + $0xe8] sm:$0xff] }
 0x5dc   :  { %v5692_v31 = vadd.f32 %v5620_v61, %v11736_v23  ;;  %v5760_v57 = vadd.f32 %v5688_v29, %v5256_v62  ;;  %v5972_v14 = vsel %vm745_vm12, %v11993_v42, %v5836_v6  ;;  %v5976_v50 = vsel %vm746_vm7, %v5254_v48, %v5904_v33  ;;  %6664 = vmatpush.bf16.msrb.mxu3 %v8281_v5 }
 0x5dd   :  { %v5429_v3 = vpop.f32.mrf.mxu3  ;;  %v6044_v20 = vadd.f32 %v5972_v14, %v5756_v59  ;;  %v6138_v17 = vmax.f32 %v6066_v24, 0.0  ;;  %vm13058_vm4 = vcmp.eq.s32.totalorder %v12999_v55, 8 }
 0x5de   :  { %v5980_v13 = vadd.f32 %v5908_v51, %v5692_v31  ;;  %v12068_v2 = vadd.f32 %v5429_v3, %v11743_v22  ;;  %v6048_v60 = vadd.f32 %v5976_v50, %v5760_v57  ;;  %v13039_v22 = vld [vmem:[#allocation52_spill] sm:$0xff]  ;;  %v13042_v50 = vld [vmem:[#allocation51_spill] sm:$0xff]  ;;  %v13043_v3 = vld [vmem:[#allocation62_spill] sm:$0xff] }
 0x5df   :  { %v6126_v23 = vadd.f32 %v11810_v0, %v6044_v20  ;;  %v5378_v51 = vadd.f32 %v13039_v22, %v11740_v19  ;;  %v5383_v20 = vadd.f32 %v13043_v3, %v13042_v50 }
 0x5e0   :  { %v6062_v62 = vadd.f32 %v11810_v0, %v5980_v13  ;;  %v6130_v10 = vadd.f32 %v11810_v0, %v6048_v60  ;;  %v5477_v0 = vrot.slane %v12068_v2, 7 }
 0x5e1   :  { %v6198_v54 = vmax.f32 %v6126_v23, 0.0 }
 0x5e2   :  { %v6134_v42 = vmax.f32 %v6062_v62, 0.0  ;;  %v6202_v48 = vmax.f32 %v6130_v10, 0.0 }
 0x5e4   :  { %v6206_v16 = vpack.c.bf16 %v6138_v17, %v6134_v42  ;;  %v12075_v8 = vpack.c.bf16 %v6202_v48, %v6198_v54  ;;  %v8280_v17 = vld [vmem:[#allocation7 + $0xe0] sm:$0xff] }
 0x5e5   :  { %v5431_v32 = vpop.f32.mrf.mxu3  ;;  %6665 = vmatpush.bf16.msrb.mxu3 %v8280_v17 }
 0x5e6   :  { %6616 = vmatmul.bf16.vlgmr.msrb.gmra.mxu2 %v6206_v16  ;;  %v12079_v27 = vadd.f32 %v5431_v32, %v5378_v51  ;;  %v13045_v32 = vld [vmem:[#allocation35_spill] sm:$0xff] }
 0x5e8   :  { %v5481_v43 = vrot.slane %v12079_v27, 7  ;;  %v5769_v19 = vrot.slane %v12079_v27, 1 }
 0x5ea   :  { %v5613_v52 = vsel %vm783_vm0, %v5477_v0, %v5481_v43 }
 0x5ed   :  { %v5434_v63 = vpop.f32.mrf.mxu3 }
 0x5ee   :  { %v5435_v4 = vadd.f32 %v5434_v63, %v13040_v45 }
 0x5f0   :  { %v5485_v59 = vrot.slane %v5435_v4, 7  ;;  %v5625_v61 = vsel %vm712_vm5, %v5435_v4, %v5613_v52  ;;  %v5773_v29 = vrot.slane %v5435_v4, 1  ;;  %v13046_v52 = vld [vmem:[#allocation17_spill] sm:$0xff]  ;;  %vm13048_vm5 = vcmp.eq.s32.totalorder %v12829_v25, 0 }
 0x5f1   :  { %v5697_v33 = vadd.f32 %v5625_v61, %v12079_v27  ;;  %v12119_v6 = vperm.slane %v13046_v52, 3 }
 0x5f2   :  { %v5897_v31 = vsel %vm892_vm1, %v5769_v19, %v5773_v29  ;;  %v5609_v57 = vsel %vm783_vm0, %v5481_v43, %v5485_v59 }
 0x5f3   :  { %v5913_v14 = vsel %vm730_vm6, %v12068_v2, %v5897_v31  ;;  %vm13049_vm6 = vcmp.eq.s32.totalorder %v12829_v25, 8 }
 0x5f4   :  { %v12103_v13 = vadd.f32 %v5913_v14, %v5697_v33 }
 0x5f5   :  { %v5436_v24 = vpop.f32.mrf.mxu3 }
 0x5f6   :  { %v5437_v60 = vadd.f32 %v5436_v24, %v5383_v20  ;;  %6621 = vmatmul.bf16.gmra.mxu2 %v11828_v30 }
 0x5f8   :  { %v5489_v23 = vrot.slane %v5437_v60, 7  ;;  %v5777_v62 = vrot.slane %v5437_v60, 1  ;;  %v5629_v42 = vsel %vm713_vm11, %v5437_v60, %v5609_v57  ;;  %v13047_v57 = vld [vmem:[#allocation53_spill] sm:$0xff]  ;;  %vm13050_vm11 = vcmp.eq.s32.totalorder %v12917_v46, 0 }
 0x5f9   :  { %v5701_v54 = vadd.f32 %v5629_v42, %v5435_v4  ;;  %v5388_v14 = vadd.f32 %v11821_v34, %v13047_v57 }
 0x5fa   :  { %v5605_v48 = vsel %vm783_vm0, %v5485_v59, %v5489_v23  ;;  %v5893_v16 = vsel %vm892_vm1, %v5773_v29, %v5777_v62 }
 0x5fb   :  { %v5917_v22 = vsel %vm731_vm14, %v12079_v27, %v5893_v16  ;;  %vm13051_vm14 = vcmp.eq.s32.totalorder %v12917_v46, 8 }
 0x5fc   :  { %v5989_v51 = vadd.f32 %v5917_v22, %v5701_v54 }
 0x5fd   :  { %v5439_v30 = vpop.f32.mrf.mxu3 }
 0x5fe   :  { %v5440_v5 = vadd.f32 %v5439_v30, %v13045_v32  ;;  %v6071_v31 = vadd.f32 %v12119_v6, %v5989_v51  ;;  %v8279_v32 = vld [vmem:[#allocation7 + $0xd8] sm:$0xff] }
 0x5ff   :  { %6666 = vmatpush.bf16.msrb.mxu3 %v8279_v32 }
 0x600   :  { %v5493_v43 = vrot.slane %v5440_v5, 7  ;;  %v5781_v63 = vrot.slane %v5440_v5, 1  ;;  %v5633_v45 = vsel %vm714_vm9, %v5440_v5, %v5605_v48  ;;  %v6143_v10 = vmax.f32 %v6071_v31, 0.0 }
 0x601   :  { %v5705_v59 = vadd.f32 %v5633_v45, %v5437_v60 }
 0x602   :  { %v5889_v61 = vsel %vm892_vm1, %v5777_v62, %v5781_v63  ;;  %v5601_v29 = vsel %vm783_vm0, %v5489_v23, %v5493_v43 }
 0x603   :  { %v5921_v33 = vsel %vm732_vm10, %v5435_v4, %v5889_v61 }
 0x604   :  { %v5993_v50 = vadd.f32 %v5921_v33, %v5705_v59 }
 0x605   :  { %v5441_v3 = vpop.f32.mrf.mxu3 }
 0x606   :  { %v5442_v20 = vadd.f32 %v5441_v3, %v5388_v14  ;;  %6626 = vmatmul.bf16.gmra.mxu2 %v11859_v37  ;;  %v6075_v24 = vadd.f32 %v12119_v6, %v5993_v50 }
 0x608   :  { %v5497_v62 = vrot.slane %v5442_v20, 7  ;;  %v5785_v42 = vrot.slane %v5442_v20, 1  ;;  %v6147_v17 = vmax.f32 %v6075_v24, 0.0  ;;  %v5637_v28 = vsel %vm13048_vm5, %v5442_v20, %v5601_v29  ;;  %v13053_v24 = vld [vmem:[#allocation18_spill] sm:$0xff] }
 0x609   :  { %v5709_v4 = vadd.f32 %v5637_v28, %v5440_v5  ;;  %vm13054_vm9 = vcmp.eq.s32.totalorder %v13053_v24, 0  ;;  %vm13055_vm10 = vcmp.eq.s32.totalorder %v13053_v24, 8  ;;  %v13056_v28 = vld [vmem:[#allocation64_spill] sm:$0xff]  ;;  %vm13061_vm5 = vcmp.eq.s32.totalorder %v13005_v41, 0 }
 0x60a   :  { %v12134_v23 = vpack.c.bf16 %v6147_v17, %v6143_v10  ;;  %v5597_v34 = vsel %vm783_vm0, %v5493_v43, %v5497_v62  ;;  %v5885_v54 = vsel %vm892_vm1, %v5781_v63, %v5785_v42 }
 0x60b   :  { %v5925_v37 = vsel %vm13049_vm6, %v5437_v60, %v5885_v54  ;;  %vm13062_vm6 = vcmp.eq.s32.totalorder %v13005_v41, 8 }
 0x60c   :  { %v5997_v48 = vadd.f32 %v5925_v37, %v5709_v4 }
 0x60d   :  { %v5444_v16 = vpop.f32.mrf.mxu3 }
 0x60e   :  { %v5445_v22 = vadd.f32 %v5444_v16, %v11839_v11  ;;  %v6079_v60 = vadd.f32 %v12119_v6, %v5997_v48  ;;  %v13052_v11 = vld [vmem:[#allocation57_spill] sm:$0xff] }
 0x60f   :  { %v5393_v59 = vadd.f32 %v13052_v11, %v11837_v53  ;;  %v8278_v48 = vld [vmem:[#allocation7 + $0xd0] sm:$0xff] }
 0x610   :  { %v5501_v51 = vrot.slane %v5445_v22, 7  ;;  %v5789_v30 = vrot.slane %v5445_v22, 1  ;;  %v5641_v45 = vsel %vm13050_vm11, %v5445_v22, %v5597_v34  ;;  %v6151_v57 = vmax.f32 %v6079_v60, 0.0  ;;  %6667 = vmatpush.bf16.msrb.mxu3 %v8278_v48 }
 0x611   :  { %v5713_v52 = vadd.f32 %v5641_v45, %v5442_v20  ;;  %v13059_v45 = vld [vmem:[#allocation55_spill] sm:$0xff] }
 0x612   :  { %v5881_v43 = vsel %vm892_vm1, %v5785_v42, %v5789_v30  ;;  %v5593_v63 = vsel %vm783_vm0, %v5497_v62, %v5501_v51 }
 0x613   :  { %v5929_v25 = vsel %vm13051_vm14, %v5440_v5, %v5881_v43 }
 0x614   :  { %v6001_v61 = vadd.f32 %v5929_v25, %v5713_v52  ;;  %v13060_v52 = vld [vmem:[#allocation30_spill] sm:$0xff] }
 0x615   :  { %v5446_v29 = vpop.f32.mrf.mxu3  ;;  %v5398_v43 = vadd.f32 %v13060_v52, %v13059_v45 }
 0x616   :  { %v5447_v33 = vadd.f32 %v5446_v29, %v5393_v59  ;;  %6631 = vmatmul.bf16.gmra.mxu2 %v11890_v39  ;;  %v6083_v31 = vadd.f32 %v12119_v6, %v6001_v61 }
 0x618   :  { %v5505_v14 = vrot.slane %v5447_v33, 7  ;;  %v5793_v50 = vrot.slane %v5447_v33, 1  ;;  %v6155_v3 = vmax.f32 %v6083_v31, 0.0  ;;  %v5645_v46 = vsel %vm13054_vm9, %v5447_v33, %v5593_v63 }
 0x619   :  { %v5717_v5 = vadd.f32 %v5645_v46, %v5445_v22 }
 0x61a   :  { %v12158_v10 = vpack.c.bf16 %v6155_v3, %v6151_v57  ;;  %v5589_v53 = vsel %vm783_vm0, %v5501_v51, %v5505_v14  ;;  %v5877_v62 = vsel %vm892_vm1, %v5789_v30, %v5793_v50 }
 0x61b   :  { %v5933_v39 = vsel %vm13055_vm10, %v5442_v20, %v5877_v62  ;;  %v13063_v62 = vld [vmem:[#allocation21_spill] sm:$0xff] }
 0x61c   :  { %v6005_v42 = vadd.f32 %v5933_v39, %v5717_v5  ;;  %vm13064_vm11 = vcmp.eq.s32.totalorder %v13063_v62, 0  ;;  %vm13065_vm14 = vcmp.eq.s32.totalorder %v13063_v62, 8 }
 0x61d   :  { %v5449_v17 = vpop.f32.mrf.mxu3 }
 0x61e   :  { %v5450_v4 = vadd.f32 %v5449_v17, %v13056_v28  ;;  %v6087_v32 = vadd.f32 %v12119_v6, %v6005_v42  ;;  %v8277_v42 = vld [vmem:[#allocation7 + $0xc8] sm:$0xff] }
 0x61f   :  { %6668 = vmatpush.bf16.msrb.mxu3 %v8277_v42 }
 0x620   :  { %v5509_v34 = vrot.slane %v5450_v4, 7  ;;  %v5797_v54 = vrot.slane %v5450_v4, 1  ;;  %v5649_v37 = vsel %vm13057_vm8, %v5450_v4, %v5589_v53  ;;  %v6159_v59 = vmax.f32 %v6087_v32, 0.0 }
 0x621   :  { %v5721_v16 = vadd.f32 %v5649_v37, %v5447_v33 }
 0x622   :  { %v5873_v51 = vsel %vm892_vm1, %v5793_v50, %v5797_v54  ;;  %v5585_v30 = vsel %vm783_vm0, %v5505_v14, %v5509_v34 }
 0x623   :  { %v5937_v20 = vsel %vm13058_vm4, %v5445_v22, %v5873_v51 }
 0x624   :  { %v6009_v63 = vadd.f32 %v5937_v20, %v5721_v16 }
 0x625   :  { %v5451_v25 = vpop.f32.mrf.mxu3 }
 0x626   :  { %v5452_v60 = vadd.f32 %v5451_v25, %v5398_v43  ;;  %6636 = vmatmul.bf16.gmra.mxu2 %v11926_v9  ;;  %v6091_v11 = vadd.f32 %v12119_v6, %v6009_v63  ;;  %v13068_v43 = vld [vmem:[#allocation22_spill] sm:$0xff] }
 0x627   :  { %vm13069_vm9 = vcmp.eq.s32.totalorder %v13068_v43, 0  ;;  %vm13070_vm10 = vcmp.eq.s32.totalorder %v13068_v43, 8 }
 0x628   :  { %v5513_v61 = vrot.slane %v5452_v60, 7  ;;  %v5801_v29 = vrot.slane %v5452_v60, 1  ;;  %v6163_v31 = vmax.f32 %v6091_v11, 0.0  ;;  %v5653_v55 = vsel %vm13061_vm5, %v5452_v60, %v5585_v30 }
 0x629   :  { %v5725_v22 = vadd.f32 %v5653_v55, %v5450_v4  ;;  %vm13076_vm5 = vcmp.eq.s32.totalorder %v12874_v40, 8 }
 0x62a   :  { %v12182_v57 = vpack.c.bf16 %v6163_v31, %v6159_v59  ;;  %v5581_v14 = vsel %vm783_vm0, %v5509_v34, %v5513_v61  ;;  %v5869_v50 = vsel %vm892_vm1, %v5797_v54, %v5801_v29  ;;  %v13067_v54 = vld [vmem:[#allocation60_spill] sm:$0xff] }
 0x62b   :  { %v5941_v9 = vsel %vm13062_vm6, %v5447_v33, %v5869_v50  ;;  %v13071_v31 = vld [vmem:[#allocation56_spill] sm:$0xff]  ;;  %v13072_v50 = vld [vmem:[#allocation23_spill] sm:$0xff]  ;;  %vm13078_vm6 = vcmp.eq.s32.totalorder %v12880_v26, 8 }
 0x62c   :  { %v6013_v3 = vadd.f32 %v5941_v9, %v5725_v22  ;;  %vm13073_vm8 = vcmp.eq.s32.totalorder %v13072_v50, 0  ;;  %vm13074_vm4 = vcmp.eq.s32.totalorder %v13072_v50, 8 }
 0x62d   :  { %v5454_v24 = vpop.f32.mrf.mxu3 }
 0x62e   :  { %v5455_v46 = vadd.f32 %v5454_v24, %v11901_v49  ;;  %v6095_v33 = vadd.f32 %v12119_v6, %v6013_v3  ;;  %v13066_v49 = vld [vmem:[#allocation46_spill] sm:$0xff]  ;;  %v8276_v3 = vld [vmem:[#allocation7 + $0xc0] sm:$0xff] }
 0x62f   :  { %v5403_v37 = vadd.f32 %v13067_v54, %v13066_v49  ;;  %6669 = vmatpush.bf16.msrb.mxu3 %v8276_v3 }
 0x630   :  { %v5517_v5 = vrot.slane %v5455_v46, 7  ;;  %v5805_v53 = vrot.slane %v5455_v46, 1  ;;  %v5657_v39 = vsel %vm13064_vm11, %v5455_v46, %v5581_v14  ;;  %v6167_v20 = vmax.f32 %v6095_v33, 0.0 }
 0x631   :  { %v5729_v17 = vadd.f32 %v5657_v39, %v5452_v60  ;;  %vm13079_vm11 = vcmp.eq.s32.totalorder %v12886_v56, 0 }
 0x632   :  { %v5865_v28 = vsel %vm892_vm1, %v5801_v29, %v5805_v53  ;;  %v5577_v34 = vsel %vm783_vm0, %v5513_v61, %v5517_v5 }
 0x633   :  { %v5945_v41 = vsel %vm13065_vm14, %v5450_v4, %v5865_v28  ;;  %vm13080_vm14 = vcmp.eq.s32.totalorder %v12886_v56, 8 }
 0x634   :  { %v6017_v48 = vadd.f32 %v5945_v41, %v5729_v17 }
 0x635   :  { %v5456_v16 = vpop.f32.mrf.mxu3 }
 0x636   :  { %v5457_v51 = vadd.f32 %v5456_v16, %v5403_v37  ;;  %6641 = vmatmul.bf16.gmra.mxu2 %v11967_v36  ;;  %v6099_v30 = vadd.f32 %v12119_v6, %v6017_v48 }
 0x638   :  { %v5521_v32 = vrot.slane %v5457_v51, 7  ;;  %v5809_v45 = vrot.slane %v5457_v51, 1  ;;  %v6171_v52 = vmax.f32 %v6099_v30, 0.0  ;;  %v5661_v63 = vsel %vm13069_vm9, %v5457_v51, %v5577_v34 }
 0x639   :  { %v5733_v4 = vadd.f32 %v5661_v63, %v5455_v46  ;;  %vm13081_vm9 = vcmp.eq.s32.totalorder %v12890_v35, 0 }
 0x63a   :  { %v12206_v25 = vpack.c.bf16 %v6171_v52, %v6167_v20  ;;  %v5573_v11 = vsel %vm783_vm0, %v5517_v5, %v5521_v32  ;;  %v5861_v59 = vsel %vm892_vm1, %v5805_v53, %v5809_v45 }
 0x63b   :  { %v5949_v36 = vsel %vm13070_vm10, %v5452_v60, %v5861_v59 }
 0x63c   :  { %v6021_v61 = vadd.f32 %v5949_v36, %v5733_v4 }
 0x63d   :  { %v5459_v29 = vpop.f32.mrf.mxu3 }
 0x63e   :  { %v5460_v55 = vadd.f32 %v5459_v29, %v13071_v31  ;;  %v6103_v62 = vadd.f32 %v12119_v6, %v6021_v61 }
 0x640   :  { %v5525_v22 = vrot.slane %v5460_v55, 7  ;;  %v5813_v14 = vrot.slane %v5460_v55, 1  ;;  %v5665_v9 = vsel %vm13073_vm8, %v5460_v55, %v5573_v11  ;;  %v6175_v34 = vmax.f32 %v6103_v62, 0.0 }
 0x641   :  { %v5737_v24 = vadd.f32 %v5665_v9, %v5457_v51 }
 0x642   :  { %v5857_v5 = vsel %vm892_vm1, %v5809_v45, %v5813_v14  ;;  %v5569_v53 = vsel %vm783_vm0, %v5521_v32, %v5525_v22 }
 0x643   :  { %v5953_v60 = vsel %vm13074_vm4, %v5455_v46, %v5857_v5  ;;  %v5309_v5 = vpop.f32.mrf.mxu0 }
 0x644   :  { %v6025_v39 = vadd.f32 %v5953_v60, %v5737_v24 }
 0x645   :  { %v5461_v42 = vpop.f32.mrf.mxu3 }
 0x646   :  { %v5462_v17 = vadd.f32 %v5461_v42, %v11959_v12  ;;  %6646 = vmatmul.bf16.gmra.mxu2 %v12006_v21  ;;  %v6107_v28 = vadd.f32 %v12119_v6, %v6025_v39  ;;  %v5417_v42 = vpop.f32.mrf.mxu2 }
 0x648   :  { %v5529_v41 = vrot.slane %v5462_v17, 7  ;;  %v5817_v33 = vrot.slane %v5462_v17, 1  ;;  %v6179_v49 = vmax.f32 %v6107_v28, 0.0  ;;  %v5669_v54 = vsel %vm723_vm13, %v5462_v17, %v5569_v53  ;;  %v5363_v53 = vpop.f32.mrf.mxu1 }
 0x649   :  { %v5741_v37 = vadd.f32 %v5669_v54, %v5460_v55  ;;  %vm13075_vm13 = vcmp.eq.s32.totalorder %v12874_v40, 0 }
 0x64a   :  { %v12229_v48 = vpack.c.bf16 %v6179_v49, %v6175_v34  ;;  %v5565_v46 = vsel %vm783_vm0, %v5525_v22, %v5529_v41  ;;  %v5853_v12 = vsel %vm892_vm1, %v5813_v14, %v5817_v33  ;;  %v5364_v34 = vadd.f32 %v5363_v53, %v5309_v5 }
 0x64b   :  { %v5957_v21 = vsel %vm741_vm2, %v5457_v51, %v5853_v12  ;;  %vm13077_vm2 = vcmp.eq.s32.totalorder %v12880_v26, 0  ;;  %v5765_v12 = vrot.slane %v12068_v2, 1  ;;  %v6509_v18 = vpop.f32.mrf.mxu0 }
 0x64c   :  { %v6029_v16 = vadd.f32 %v5957_v21, %v5741_v37 }
 0x64d   :  { %v5464_v30 = vpop.f32.mrf.mxu3 }
 0x64e   :  { %v5465_v20 = vadd.f32 %v5464_v30, %v11978_v47  ;;  %v6111_v51 = vadd.f32 %v12119_v6, %v6029_v16 }
 0x650   :  { %v5533_v32 = vrot.slane %v5465_v20, 7  ;;  %v5821_v45 = vrot.slane %v5465_v20, 1  ;;  %v5673_v52 = vsel %vm13075_vm13, %v5465_v20, %v5565_v46  ;;  %v6183_v61 = vmax.f32 %v6111_v51, 0.0 }
 0x651   :  { %v5745_v43 = vadd.f32 %v5673_v52, %v5462_v17 }
 0x652   :  { %v5849_v63 = vsel %vm892_vm1, %v5817_v33, %v5821_v45  ;;  %v5561_v4 = vsel %vm783_vm0, %v5529_v41, %v5533_v32 }
 0x653   :  { %v5961_v58 = vsel %vm13076_vm5, %v5460_v55, %v5849_v63 }
 0x654   :  { %v6033_v11 = vadd.f32 %v5961_v58, %v5745_v43 }
 0x655   :  { %v5466_v59 = vpop.f32.mrf.mxu3 }
 0x656   :  { %v5467_v47 = vadd.f32 %v5466_v59, %v11998_v44  ;;  %6651 = vmatmul.bf16.gmra.mxu2 %v12054_v7  ;;  %v6115_v36 = vadd.f32 %v12119_v6, %v6033_v11 }
 0x658   :  { %v5537_v29 = vrot.slane %v5467_v47, 7  ;;  %v5825_v31 = vrot.slane %v5467_v47, 1  ;;  %v6187_v22 = vmax.f32 %v6115_v36, 0.0  ;;  %v5677_v14 = vsel %vm13077_vm2, %v5467_v47, %v5561_v4 }
 0x659   :  { %v5749_v50 = vadd.f32 %v5677_v14, %v5465_v20 }
 0x65a   :  { %v12252_v40 = vpack.c.bf16 %v6187_v22, %v6183_v61  ;;  %v5557_v55 = vsel %vm783_vm0, %v5533_v32, %v5537_v29  ;;  %v5845_v44 = vsel %vm892_vm1, %v5821_v45, %v5825_v31 }
 0x65b   :  { %v5965_v7 = vsel %vm13078_vm6, %v5462_v17, %v5845_v44  ;;  %v6511_v44 = vpop.f32.mrf.mxu0 }
 0x65c   :  { %v6037_v9 = vadd.f32 %v5965_v7, %v5749_v50 }
 0x65d   :  { %v5469_v3 = vpop.f32.mrf.mxu3 }
 0x65e   :  { %v5470_v24 = vadd.f32 %v5469_v3, %v12016_v15  ;;  %v5418_v15 = vadd.f32 %v5417_v42, %v5364_v34  ;;  %v6119_v49 = vadd.f32 %v12119_v6, %v6037_v9 }
 0x660   :  { %v5541_v60 = vrot.slane %v5470_v24, 7  ;;  %v5829_v62 = vrot.slane %v5470_v24, 1  ;;  %v5681_v39 = vsel %vm13079_vm11, %v5470_v24, %v5557_v55  ;;  %v6191_v30 = vmax.f32 %v6119_v49, 0.0 }
 0x661   :  { %v5753_v28 = vadd.f32 %v5681_v39, %v5467_v47 }
 0x662   :  { %v5841_v41 = vsel %vm892_vm1, %v5825_v31, %v5829_v62  ;;  %v5553_v26 = vsel %vm783_vm0, %v5537_v29, %v5541_v60  ;;  %v6067_v29 = vadd.f32 %v12119_v6, %v12103_v13  ;;  %v6563_v13 = vpop.f32.mrf.mxu1 }
 0x663   :  { %v5969_v17 = vsel %vm13080_vm14, %v5465_v20, %v5841_v41  ;;  %v6514_v3 = vpop.f32.mrf.mxu0 }
 0x664   :  { %v6041_v33 = vadd.f32 %v5969_v17, %v5753_v28 }
 0x665   :  { %v5471_v54 = vpop.f32.mrf.mxu3 }
 0x666   :  { %v5472_v37 = vadd.f32 %v5471_v54, %v5418_v15  ;;  %6656 = vmatmul.bf16.gmra.mxu2 %v12075_v8  ;;  %v6123_v46 = vadd.f32 %v12119_v6, %v6041_v33  ;;  %v5901_v8 = vsel %vm892_vm1, %v5765_v12, %v5769_v19 }
 0x668   :  { %v5545_v21 = vrot.slane %v5472_v37, 7  ;;  %v5833_v16 = vrot.slane %v5472_v37, 1  ;;  %v6195_v32 = vmax.f32 %v6123_v46, 0.0  ;;  %v5685_v56 = vsel %vm727_vm15, %v5472_v37, %v5553_v26 }
 0x669   :  { %v5757_v4 = vadd.f32 %v5685_v56, %v5470_v24 }
 0x66a   :  { %v5617_v20 = vsel %vm783_vm0, %v5545_v21, %v5477_v0  ;;  %v6235_v45 = vpack.c.bf16 %v6195_v32, %v6191_v30  ;;  %v5549_v52 = vsel %vm783_vm0, %v5541_v60, %v5545_v21  ;;  %v5837_v0 = vsel %vm892_vm1, %v5829_v62, %v5833_v16  ;;  %v6565_v7 = vpop.f32.mrf.mxu1 }
 0x66b   :  { %v5621_v43 = vsel %vm13081_vm9, %v12079_v27, %v5617_v20  ;;  %v5689_v63 = vsel %vm728_vm3, %v12068_v2, %v5549_v52  ;;  %v5905_v19 = vsel %vm892_vm1, %v5833_v16, %v5765_v12  ;;  %v5973_v11 = vsel %vm745_vm12, %v5467_v47, %v5837_v0  ;;  %v6516_v5 = vpop.f32.mrf.mxu0 }
 0x66c   :  { %v5693_v58 = vadd.f32 %v5621_v43, %v12068_v2  ;;  %v5761_v51 = vadd.f32 %v5689_v63, %v5472_v37  ;;  %vm13082_vm0 = vcmp.eq.s32.totalorder %v12890_v35, 8  ;;  %v5977_v59 = vsel %vm746_vm7, %v5470_v24, %v5905_v19 }
 0x66d   :  { %v5909_v27 = vsel %vm13082_vm0, %v5472_v37, %v5901_v8  ;;  %v6045_v36 = vadd.f32 %v5973_v11, %v5757_v4  ;;  %v6139_v47 = vmax.f32 %v6067_v29, 0.0 }
 0x66e   :  { %v5981_v61 = vadd.f32 %v5909_v27, %v5693_v58  ;;  %v6049_v31 = vadd.f32 %v5977_v59, %v5761_v51 }
 0x66f   :  { %v6127_v2 = vadd.f32 %v12119_v6, %v6045_v36 }
 0x670   :  { %v6063_v1 = vadd.f32 %v12119_v6, %v5981_v61  ;;  %v6131_v22 = vadd.f32 %v12119_v6, %v6049_v31  ;;  %v6617_v6 = vpop.f32.mrf.mxu2 }
 0x671   :  { %v6199_v14 = vmax.f32 %v6127_v2, 0.0 }
 0x672   :  { %v6135_v38 = vmax.f32 %v6063_v1, 0.0  ;;  %v6203_v35 = vmax.f32 %v6131_v22, 0.0  ;;  %v6568_v24 = vpop.f32.mrf.mxu1 }
 0x674   :  { %v6207_v50 = vpack.c.bf16 %v6139_v47, %v6135_v38  ;;  %v6239_v55 = vpack.c.bf16 %v6203_v35, %v6199_v14 }
 0x676   :  { %6670 = vmatmul.bf16.vlgmr.msrb.gmra.mxu3 %v6207_v50 }
 0x678   :  { %v6619_v9 = vpop.f32.mrf.mxu2 }
 0x686   :  { %6675 = vmatmul.bf16.gmra.mxu3 %v12134_v23  ;;  %v6622_v23 = vpop.f32.mrf.mxu2 }
 0x68e   :  { %v6624_v53 = vpop.f32.mrf.mxu2 }
 0x696   :  { %6680 = vmatmul.bf16.gmra.mxu3 %v12158_v10  ;;  %v6570_v10 = vpop.f32.mrf.mxu1  ;;  %v6627_v39 = vpop.f32.mrf.mxu2 }
 0x69e   :  { %v6573_v62 = vpop.f32.mrf.mxu1  ;;  %v6629_v37 = vpop.f32.mrf.mxu2 }
 0x6a6   :  { %6685 = vmatmul.bf16.gmra.mxu3 %v12182_v57  ;;  %v6519_v57 = vpop.f32.mrf.mxu0  ;;  %v6575_v49 = vpop.f32.mrf.mxu1 }
 0x6a7   :  { %v6632_v20 = vpop.f32.mrf.mxu2 }
 0x6ae   :  { %v6521_v34 = vpop.f32.mrf.mxu0  ;;  %v6578_v56 = vpop.f32.mrf.mxu1 }
 0x6af   :  { %v6634_v51 = vpop.f32.mrf.mxu2 }
 0x6b6   :  { %6690 = vmatmul.bf16.gmra.mxu3 %v12206_v25  ;;  %v12316_v25 = vld [vmem:[%s12350_s8] ss:$0 sm:$0xff]  ;;  %v6524_v46 = vpop.f32.mrf.mxu0  ;;  %v6580_v58 = vpop.f32.mrf.mxu1  ;;  %s8461_s8 = smov [#allocation8]  }
 0x6b7   :  { %v6512_v60 = vadd.f32 %v12316_v25, %v6511_v44  ;;  %v6515_v21 = vadd.f32 %v12316_v25, %v6514_v3  ;;  %v6517_v16 = vadd.f32 %v12316_v25, %v6516_v5  ;;  %v6520_v11 = vadd.f32 %v12316_v25, %v6519_v57  ;;  %v6637_v47 = vpop.f32.mrf.mxu2  ;;  %s6756_s14 = sshll.u32 %s8461_s8, 4  ;;  %s6757_s14 = int_to_ptr.vmem [resolvable:$true] %s6756_s14 }
 0x6b8   :  { %v6522_v27 = vadd.f32 %v12316_v25, %v6521_v34 }
 0x6b9   :  { %v6566_v28 = vadd.f32 %v6565_v7, %v6512_v60  ;;  %v6569_v30 = vadd.f32 %v6568_v24, %v6515_v21  ;;  %v6571_v32 = vadd.f32 %v6570_v10, %v6517_v16  ;;  %v6574_v36 = vadd.f32 %v6573_v62, %v6520_v11 }
 0x6ba   :  { %v6576_v61 = vadd.f32 %v6575_v49, %v6522_v27 }
 0x6bb   :  { %v6620_v26 = vadd.f32 %v6619_v9, %v6566_v28  ;;  %v6623_v8 = vadd.f32 %v6622_v23, %v6569_v30  ;;  %v6628_v29 = vadd.f32 %v6627_v39, %v6574_v36 }
 0x6bc   :  { %v6630_v31 = vadd.f32 %v6629_v37, %v6576_v61 }
 0x6be   :  { %v6526_v4 = vpop.f32.mrf.mxu0  ;;  %v6583_v1 = vpop.f32.mrf.mxu1 }
 0x6c6   :  { %6695 = vmatmul.bf16.gmra.mxu3 %v12229_v48  ;;  %v6529_v59 = vpop.f32.mrf.mxu0 }
 0x6c7   :  { %v6530_v60 = vadd.f32 %v12316_v25, %v6529_v59 }
 0x6ce   :  { %v6531_v35 = vpop.f32.mrf.mxu0 }
 0x6cf   :  { %v6532_v62 = vadd.f32 %v12316_v25, %v6531_v35 }
 0x6d6   :  { %6700 = vmatmul.bf16.gmra.mxu3 %v12252_v40  ;;  %v6510_v40 = vadd.f32 %v12316_v25, %v6509_v18  ;;  %v6527_v18 = vadd.f32 %v12316_v25, %v6526_v4  ;;  %v6534_v24 = vpop.f32.mrf.mxu0 }
 0x6d8   :  { %v6564_v42 = vadd.f32 %v6563_v13, %v6510_v40  ;;  %v6585_v13 = vpop.f32.mrf.mxu1  ;;  %v6581_v7 = vadd.f32 %v6580_v58, %v6527_v18 }
 0x6d9   :  { %v6586_v28 = vadd.f32 %v6585_v13, %v6532_v62 }
 0x6da   :  { %v6618_v41 = vadd.f32 %v6617_v6, %v6564_v42  ;;  %v6639_v6 = vpop.f32.mrf.mxu2  ;;  %v6635_v3 = vadd.f32 %v6634_v51, %v6581_v7  ;;  %v6584_v42 = vadd.f32 %v6583_v1, %v6530_v60 }
 0x6de   :  { %v6536_v39 = vpop.f32.mrf.mxu0 }
 0x6df   :  { %v6537_v21 = vadd.f32 %v12316_v25, %v6536_v39 }
 0x6e0   :  { %v6588_v57 = vpop.f32.mrf.mxu1 }
 0x6e6   :  { %6705 = vmatmul.bf16.gmra.mxu3 %v6235_v45  ;;  %v6625_v45 = vadd.f32 %v6624_v53, %v6571_v32  ;;  %v6539_v37 = vpop.f32.mrf.mxu0 }
 0x6e7   :  { %v6540_v11 = vadd.f32 %v12316_v25, %v6539_v37 }
 0x6e8   :  { %v6590_v34 = vpop.f32.mrf.mxu1 }
 0x6f0   :  { %v6593_v16 = vpop.f32.mrf.mxu1 }
 0x6f1   :  { %v6594_v59 = vadd.f32 %v6593_v16, %v6540_v11 }
 0x6f6   :  { %6710 = vmatmul.bf16.gmra.mxu3 %v6239_v55  ;;  %v6525_v55 = vadd.f32 %v12316_v25, %v6524_v46 }
 0x6f8   :  { %v6579_v44 = vadd.f32 %v6578_v56, %v6525_v55  ;;  %v6591_v56 = vadd.f32 %v6590_v34, %v6537_v21  ;;  %v6595_v4 = vpop.f32.mrf.mxu1 }
 0x6f9   :  { %v6671_v48 = vpop.f32.mrf.mxu3 }
 0x6fa   :  { %v6672_v15 = vadd.f32 %v6671_v48, %v6618_v41  ;;  %v6633_v9 = vadd.f32 %v6632_v20, %v6579_v44  ;;  %v6642_v48 = vpop.f32.mrf.mxu2  ;;  %v6638_v41 = vadd.f32 %v6637_v47, %v6584_v42  ;;  %v6541_v20 = vpop.f32.mrf.mxu0 }
 0x6fb   :  { %v6542_v27 = vadd.f32 %v12316_v25, %v6541_v20 }
 0x6fd   :  { %v6596_v36 = vadd.f32 %v6595_v4, %v6542_v27 }
 0x700   :  { %v6598_v61 = vpop.f32.mrf.mxu1 }
 0x701   :  { %v6673_v17 = vpop.f32.mrf.mxu3 }
 0x702   :  { %v6674_v33 = vadd.f32 %v6673_v17, %v6620_v26  ;;  %v6640_v26 = vadd.f32 %v6639_v6, %v6586_v28  ;;  %v6644_v17 = vpop.f32.mrf.mxu2  ;;  %v6544_v51 = vpop.f32.mrf.mxu0 }
 0x703   :  { %v6545_v18 = vadd.f32 %v12316_v25, %v6544_v51 }
 0x704   :  { %v8287_v54 = vpack.c.bf16 %v6674_v33, %v6672_v15 }
 0x705   :  { %v6599_v44 = vadd.f32 %v6598_v61, %v6545_v18 }
 0x706   :  { %8288 = vst [vmem:[#allocation8] sm:$0xff] %v8287_v54  }
 0x708   :  { %v6600_v35 = vpop.f32.mrf.mxu1 }
 0x709   :  { %v6676_v12 = vpop.f32.mrf.mxu3 }
 0x70a   :  { %v6677_v43 = vadd.f32 %v6676_v12, %v6623_v8  ;;  %v6535_v12 = vadd.f32 %v12316_v25, %v6534_v24  ;;  %v6647_v30 = vpop.f32.mrf.mxu2  ;;  %v6546_v47 = vpop.f32.mrf.mxu0 }
 0x70b   :  { %v6547_v13 = vadd.f32 %v12316_v25, %v6546_v47 }
 0x70c   :  { %v6589_v32 = vadd.f32 %v6588_v57, %v6535_v12 }
 0x70d   :  { %v6601_v7 = vadd.f32 %v6600_v35, %v6547_v13 }
 0x70e   :  { %v6643_v8 = vadd.f32 %v6642_v48, %v6589_v32 }
 0x711   :  { %v6678_v52 = vpop.f32.mrf.mxu3 }
 0x712   :  { %v6679_v63 = vadd.f32 %v6678_v52, %v6625_v45  ;;  %v6645_v45 = vadd.f32 %v6644_v17, %v6591_v56  ;;  %v6649_v58 = vpop.f32.mrf.mxu2  ;;  %v6549_v6 = vpop.f32.mrf.mxu0 }
 0x713   :  { %v6550_v60 = vadd.f32 %v12316_v25, %v6549_v6 }
 0x714   :  { %v8292_v0 = vpack.c.bf16 %v6679_v63, %v6677_v43 }
 0x716   :  { %8329 = vst [vmem:[#allocation8 + $0x8] sm:$0xff] %v8292_v0  }
 0x719   :  { %v6681_v19 = vpop.f32.mrf.mxu3 }
 0x71a   :  { %v6682_v22 = vadd.f32 %v6681_v19, %v6628_v29  ;;  %v6652_v29 = vpop.f32.mrf.mxu2  ;;  %v6551_v48 = vpop.f32.mrf.mxu0 }
 0x71b   :  { %v6552_v62 = vadd.f32 %v12316_v25, %v6551_v48 }
 0x721   :  { %v6683_v2 = vpop.f32.mrf.mxu3 }
 0x722   :  { %v6684_v38 = vadd.f32 %v6683_v2, %v6630_v31  ;;  %v6648_v31 = vadd.f32 %v6647_v30, %v6594_v59  ;;  %v6650_v2 = vadd.f32 %v6649_v58, %v6596_v36 }
 0x724   :  { %v8297_v14 = vpack.c.bf16 %v6684_v38, %v6682_v22 }
 0x726   :  { %8330 = vst [vmem:[#allocation8 + $0x10] sm:$0xff] %v8297_v14  }
 0x729   :  { %v6686_v50 = vpop.f32.mrf.mxu3 }
 0x72a   :  { %v6687_v5 = vadd.f32 %v6686_v50, %v6633_v9  ;;  %v6654_v50 = vpop.f32.mrf.mxu2  ;;  %v6653_v9 = vadd.f32 %v6652_v29, %v6599_v44 }
 0x731   :  { %v6688_v23 = vpop.f32.mrf.mxu3 }
 0x732   :  { %v6689_v10 = vadd.f32 %v6688_v23, %v6635_v3  ;;  %v6655_v3 = vadd.f32 %v6654_v50, %v6601_v7 }
 0x734   :  { %v8302_v53 = vpack.c.bf16 %v6689_v10, %v6687_v5  ;;  %v6603_v10 = vpop.f32.mrf.mxu1 }
 0x735   :  { %v6604_v28 = vadd.f32 %v6603_v10, %v6550_v60 }
 0x736   :  { %8331 = vst [vmem:[#allocation8 + $0x18] sm:$0xff] %v8302_v53   ;;  %v6657_v53 = vpop.f32.mrf.mxu2 }
 0x739   :  { %v6691_v40 = vpop.f32.mrf.mxu3 }
 0x73a   :  { %v6692_v33 = vadd.f32 %v6691_v40, %v6638_v41  ;;  %v6658_v41 = vadd.f32 %v6657_v53, %v6604_v28 }
 0x73c   :  { %v6605_v39 = vpop.f32.mrf.mxu1 }
 0x73d   :  { %v6606_v34 = vadd.f32 %v6605_v39, %v6552_v62 }
 0x73e   :  { %v6659_v42 = vpop.f32.mrf.mxu2 }
 0x741   :  { %v6693_v15 = vpop.f32.mrf.mxu3 }
 0x742   :  { %v6694_v49 = vadd.f32 %v6693_v15, %v6640_v26  ;;  %v6660_v26 = vadd.f32 %v6659_v42, %v6606_v34 }
 0x744   :  { %v8307_v54 = vpack.c.bf16 %v6694_v49, %v6692_v33 }
 0x746   :  { %8332 = vst [vmem:[#allocation8 + $0x20] sm:$0xff] %v8307_v54  }
 0x749   :  { %v6696_v46 = vpop.f32.mrf.mxu3 }
 0x74a   :  { %v6697_v43 = vadd.f32 %v6696_v46, %v6643_v8 }
 0x751   :  { %v6698_v52 = vpop.f32.mrf.mxu3 }
 0x752   :  { %v6699_v63 = vadd.f32 %v6698_v52, %v6645_v45 }
 0x754   :  { %v8312_v0 = vpack.c.bf16 %v6699_v63, %v6697_v43 }
 0x756   :  { %8333 = vst [vmem:[#allocation8 + $0x28] sm:$0xff] %v8312_v0  }
 0x759   :  { %v6701_v19 = vpop.f32.mrf.mxu3 }
 0x75a   :  { %v6702_v22 = vadd.f32 %v6701_v19, %v6648_v31 }
 0x761   :  { %v6703_v1 = vpop.f32.mrf.mxu3 }
 0x762   :  { %v6704_v38 = vadd.f32 %v6703_v1, %v6650_v2 }
 0x764   :  { %v8317_v14 = vpack.c.bf16 %v6704_v38, %v6702_v22 }
 0x766   :  { %8334 = vst [vmem:[#allocation8 + $0x30] sm:$0xff] %v8317_v14  }
 0x769   :  { %v6706_v55 = vpop.f32.mrf.mxu3 }
 0x76a   :  { %v6707_v23 = vadd.f32 %v6706_v55, %v6653_v9 }
 0x771   :  { %v6708_v24 = vpop.f32.mrf.mxu3 }
 0x772   :  { %v6709_v5 = vadd.f32 %v6708_v24, %v6655_v3 }
 0x774   :  { %v8322_v57 = vpack.c.bf16 %v6709_v5, %v6707_v23 }
 0x776   :  { %8335 = vst [vmem:[#allocation8 + $0x38] sm:$0xff] %v8322_v57  }
 0x779   :  { %v6711_v40 = vpop.f32.mrf.mxu3 }
 0x77a   :  { %v6712_v15 = vadd.f32 %v6711_v40, %v6658_v41 }
 0x781   :  { %v6713_v17 = vpop.f32.mrf.mxu3 }
 0x782   :  { %v6714_v33 = vadd.f32 %v6713_v17, %v6660_v26 }
 0x784   :  { %v8327_v49 = vpack.c.bf16 %v6714_v33, %v6712_v15 }
 0x786   :  { %8336 = vst [vmem:[#allocation8 + $0x40] sm:$0xff] %v8327_v49  }
 0x787   :  { %6764 = dma.vmem_to_hbm [thread:$0]  %s6757_s14, 1152, %s6759_s16, [#allocation4], %s8458_s25, %s8458_s25, %s8459_s26  }
 0x788   :  { %8451 = dma.done.wait [#allocation4], 1152  }
 0x789   :  { %8452 = vsyncadd [#allocation4], 4294966144 }
 0x78a   :  { %6769 = vsyncpa [#allocation3], 1 }
 0x78b   :  { %6770 = vsyncpa [#allocation6], 1 }
 0x78c   :  { %6771 = vsyncpa [#allocation4], 1 }

</bundles_post_ra>
